<compile_context>
chip_gen: v6e
topology: v6e:2x2x1
jax: 0.10.0
libtpu: 0.0.40
codegen_flags: <defaults>
</compile_context>

<pallas_src>
import math
import functools

import jax
import jax.numpy as jnp
from jax.experimental import pallas as pl
from jax.experimental.pallas import tpu as pltpu


def _attention_kernel(q_ref, k_ref, v_ref,
                      wq_ref, bq_ref, wk_ref, bk_ref, wv_ref, bv_ref,
                      wo_ref, bo_ref, o_ref, hcat_ref, *,
                      num_heads, head_dim, causal_mask, approx_recip):
    # q_ref: (G, Tq, D) compute dtype; k_ref/v_ref: (G, Ts, D); weights (D, D);
    # biases (1, D) f32; o_ref: (G, Tq, D); hcat_ref: (G*Tq, D) VMEM scratch.
    G, Tq, D = q_ref.shape
    Ts = k_ref.shape[1]
    cd = q_ref.dtype

    q2 = q_ref[...].reshape(G * Tq, D)
    k2 = k_ref[...].reshape(G * Ts, D)
    v2 = v_ref[...].reshape(G * Ts, D)

    scale = 1.0 / math.sqrt(head_dim)
    # Fused projections: one (G*T, D) x (D, D) MXU GEMM each (f32 accumulation).
    # Attention scale folded into Q once; cast back to the compute dtype right
    # after the bias add so the f32 copies don't stay live through the head loop.
    Q = ((jnp.dot(q2, wq_ref[...], preferred_element_type=jnp.float32)
          + bq_ref[...]) * scale).astype(cd)
    K = (jnp.dot(k2, wk_ref[...], preferred_element_type=jnp.float32)
         + bk_ref[...]).astype(cd)
    V = (jnp.dot(v2, wv_ref[...], preferred_element_type=jnp.float32)
         + bv_ref[...]).astype(cd)

    Qg = Q.reshape(G, Tq, D)
    Kg = K.reshape(G, Ts, D)
    Vg = V.reshape(G, Ts, D)

    if causal_mask:
        # Hoisted once: identical for every head (JAX does not CSE broadcasts).
        row = jax.lax.broadcasted_iota(jnp.int32, (Tq, Ts), 0)
        col = jax.lax.broadcasted_iota(jnp.int32, (Tq, Ts), 1)
        disallowed = (col > row)[None, :, :]          # (1, Tq, Ts)

    # Per-head attention (batched over the G slices -> single-batch-dim MXU
    # lowering).  Each head's output lands in the VMEM scratch at its lane
    # offset; the output projection is then ONE K=D GEMM instead of H K=head_dim
    # GEMMs.
    for h in range(num_heads):                        # static, fully unrolled
        lo = h * head_dim
        Qh = Qg[:, :, lo:lo + head_dim]               # (G, Tq, hd)
        Kh = Kg[:, :, lo:lo + head_dim]               # (G, Ts, hd)
        Vh = Vg[:, :, lo:lo + head_dim]               # (G, Ts, hd)

        s = jnp.einsum("gqe,gke->gqk", Qh, Kh,
                       preferred_element_type=jnp.float32)   # (G, Tq, Ts)
        if causal_mask:
            s = jnp.where(disallowed, -1e30, s)       # large finite, never NaN

        # numerically-stable softmax over the src (-1) axis, f32 throughout;
        # approx reciprocal (EUP slot) only on the bf16 compute path.
        m = jnp.max(s, axis=-1, keepdims=True)
        e = jnp.exp(s - m)
        p = e * pl.reciprocal(jnp.sum(e, axis=-1, keepdims=True),
                              approx=approx_recip)

        oh = jnp.einsum("gqk,gke->gqe", p.astype(cd), Vh,
                        preferred_element_type=jnp.float32)  # (G, Tq, hd)
        hcat_ref[:, lo:lo + head_dim] = (
            oh.reshape(G * Tq, head_dim).astype(hcat_ref.dtype))

    # Single full-width output projection GEMM + bias.
    out = (jnp.dot(hcat_ref[...], wo_ref[...],
                   preferred_element_type=jnp.float32) + bo_ref[...])
    o_ref[...] = out.reshape(G, Tq, D).astype(o_ref.dtype)


def _tpu_vmem_budget_and_cores():
    """Generation-aware (kernel VMEM budget bytes, TensorCores per chip)."""
    phys = None
    try:
        phys = int(pltpu.get_tpu_info().vmem_capacity_bytes)
    except Exception:
        phys = None
    kind = ""
    try:
        kind = jax.devices()[0].device_kind.lower()
    except Exception:
        pass
    looks_v7 = "v7" in kind
    if phys is None:
        phys = (64 if looks_v7 else 128) * 1024 * 1024
    if looks_v7 or phys <= 64 * 1024 * 1024:
        # v7x-class: 64 MiB physical VMEM per TensorCore, 2 TensorCores per chip.
        return 44 * 1024 * 1024, 2
    # v5e / v6e: 128 MiB physical VMEM, 1 TensorCore.
    return 96 * 1024 * 1024, 1


def _choose_block_g(BS, Tq, Ts, D, cd_bytes, out_bytes, vmem_budget, num_cores,
                    target_rows=512):
    """Pick slices-per-grid-step G: ~target_rows GEMM rows, VMEM-bounded, pad-free."""
    ceil_div = lambda a, b: -(-a // b)
    per_slice = (
        (Tq + 2 * Ts) * D * cd_bytes * 2          # double-buffered q/k/v input blocks
        + Tq * D * out_bytes * 2                  # double-buffered output block
        + (Tq + 2 * Ts) * D * (cd_bytes + 4)      # projected Q/K/V (cd) + transient f32
        + 3 * Tq * Ts * 4                         # one head's scores / exp / probs (f32)
        + Tq * D * (cd_bytes + 4)                 # head-concat scratch (cd) + f32 out
    )
    weights = 4 * D * D * cd_bytes + 4 * D * 4    # single-buffered weights + biases
    g_vmem = max(1, (vmem_budget - weights) // max(per_slice, 1))
    g_rows = max(1, ceil_div(target_rows, Tq))
    G = int(max(1, min(BS, g_vmem, g_rows)))
    # 2-TensorCore chips (v7x): keep at least 2 grid steps so both cores get work
    # under dimension_semantics=("parallel",).  Single-TC chips keep the full G.
    if num_cores >= 2 and BS >= 2 and ceil_div(BS, G) < 2:
        G = ceil_div(BS, 2)
    # Prefer a G that divides BS (avoids the jnp.pad HBM copy) unless that would
    # shrink the block by more than 2x.
    div = max(d for d in range(1, G + 1) if BS % d == 0)
    if 2 * div >= G:
        G = div
    return G


def attention_layer_pallas(query, key, value, params, *, num_heads, mask=False,
                           compute_dtype=jnp.bfloat16, target_rows=512):
    """Pallas implementation of AttentionLayer.forward.

    query: (B, S, Tq, D); key/value: (B, S, Ts, D). Returns (B, S, Tq, D) in
    query.dtype. `compute_dtype` controls the matmul operand precision
    (accumulation is always f32; bf16 halves weight/activation traffic but is an
    approximate path).
    """
    B, S, Tq, D = query.shape
    Ts = key.shape[-2]
    head_dim = D // num_heads
    BS = B * S
    out_dtype = query.dtype
    cdt = jnp.dtype(compute_dtype)
    cd_bytes = cdt.itemsize
    out_bytes = jnp.dtype(out_dtype).itemsize

    vmem_budget, num_cores = _tpu_vmem_budget_and_cores()
    G = _choose_block_g(BS, Tq, Ts, D, cd_bytes, out_bytes, vmem_budget,
                        num_cores, target_rows=target_rows)
    n_blocks = pl.cdiv(BS, G)
    pad = n_blocks * G - BS
    Npad = n_blocks * G

    q = query.reshape(BS, Tq, D).astype(compute_dtype)
    k = key.reshape(BS, Ts, D).astype(compute_dtype)
    v = value.reshape(BS, Ts, D).astype(compute_dtype)
    if pad:
        # Fallback only (G is chosen to divide BS whenever that costs < 2x in size).
        q = jnp.pad(q, ((0, pad), (0, 0), (0, 0)))
        k = jnp.pad(k, ((0, pad), (0, 0), (0, 0)))
        v = jnp.pad(v, ((0, pad), (0, 0), (0, 0)))

    # nn.Linear stores weight as (out, in); pre-transpose so the kernel does x @ W,
    # and pre-cast so bf16 weights halve weight HBM traffic / VMEM residency.
    wq_t = params["wq"].T.astype(compute_dtype)
    wk_t = params["wk"].T.astype(compute_dtype)
    wv_t = params["wv"].T.astype(compute_dtype)
    wo_t = params["wo"].T.astype(compute_dtype)
    bq = params["bq"].reshape(1, D).astype(jnp.float32)
    bk = params["bk"].reshape(1, D).astype(jnp.float32)
    bv = params["bv"].reshape(1, D).astype(jnp.float32)
    bo = params["bo"].reshape(1, D).astype(jnp.float32)

    approx_recip = cdt != jnp.dtype(jnp.float32)
    kernel = functools.partial(_attention_kernel,
                               num_heads=num_heads, head_dim=head_dim,
                               causal_mask=mask, approx_recip=approx_recip)

    cost = pl.CostEstimate(
        flops=int(2 * D * D * BS * (2 * Tq + 2 * Ts) + 4 * BS * Tq * Ts * D),
        transcendentals=int(BS * num_heads * Tq * Ts),
        bytes_accessed=int(BS * (Tq + 2 * Ts) * D * cd_bytes
                           + BS * Tq * D * out_bytes
                           + 4 * D * D * cd_bytes + 4 * D * 4),
    )

    def run(single_buffer_weights):
        qkv_spec = lambda T: pl.BlockSpec((G, T, D), lambda i: (i, 0, 0))
        if single_buffer_weights:
            # Constant block index: never re-DMA'd; single buffering halves their
            # VMEM residency (key enabler on v7x's 64 MiB at large model_dim).
            w_spec = pl.BlockSpec((D, D), lambda i: (0, 0),
                                  pipeline_mode=pl.Buffered(1))
        else:
            w_spec = pl.BlockSpec((D, D), lambda i: (0, 0))
        b_spec = pl.BlockSpec((1, D), lambda i: (0, 0))
        return pl.pallas_call(
            kernel,
            out_shape=jax.ShapeDtypeStruct((Npad, Tq, D), out_dtype),
            grid=(n_blocks,),
            in_specs=[
                qkv_spec(Tq), qkv_spec(Ts), qkv_spec(Ts),
                w_spec, b_spec, w_spec, b_spec, w_spec, b_spec,
                w_spec, b_spec,
            ],
            out_specs=pl.BlockSpec((G, Tq, D), lambda i: (i, 0, 0)),
            scratch_shapes=[pltpu.VMEM((G * Tq, D), compute_dtype)],
            compiler_params=pltpu.CompilerParams(
                dimension_semantics=("parallel",),
                vmem_limit_bytes=int(vmem_budget)),
            cost_estimate=cost,
        )(q, k, v, wq_t, bq, wk_t, bk, wv_t, bv, wo_t, bo)

    try:
        out = run(True)
    except Exception:
        # Installed Pallas rejected pipeline_mode=pl.Buffered(1); use defaults.
        out = run(False)

    return out[:BS].reshape(B, S, Tq, D)


def attention_layer_ref(query, key, value, params, *, num_heads, mask=False):
    """Pure-JAX reference reproducing the exact PyTorch split/cat semantics."""
    D = query.shape[-1]
    head_dim = D // num_heads
    batch_size = query.shape[0]

    Q = query @ params["wq"].T + params["bq"]
    K = key @ params["wk"].T + params["bk"]
    V = value @ params["wv"].T + params["bv"]

    Q = jnp.concatenate(jnp.split(Q, num_heads, axis=-1), axis=0)
    K = jnp.concatenate(jnp.split(K, num_heads, axis=-1), axis=0)
    V = jnp.concatenate(jnp.split(V, num_heads, axis=-1), axis=0)

    scores = Q @ jnp.swapaxes(K, -1, -2) / head_dim ** 0.5
    if mask:
        tq, ts = scores.shape[-2], scores.shape[-1]
        tri = jnp.tril(jnp.ones((tq, ts), dtype=bool))
        scores = jnp.where(tri, scores, -jnp.inf)
    p = jax.nn.softmax(scores, axis=-1)
    out = p @ V
    out = jnp.concatenate(jnp.split(out, out.shape[0] // batch_size, axis=0), axis=-1)
    out = out @ params["wo"].T + params["bo"]
    return out


def init_params(key, model_dim):
    """Deterministic synthetic parameter init (xavier-ish scale)."""
    ks = jax.random.split(key, 4)
    scale = 1.0 / math.sqrt(model_dim)
    mk = lambda k: jax.random.normal(k, (model_dim, model_dim), jnp.float32) * scale
    return {
        "wq": mk(ks[0]), "bq": jnp.linspace(-0.1, 0.1, model_dim, dtype=jnp.float32),
        "wk": mk(ks[1]), "bk": jnp.linspace(0.1, -0.1, model_dim, dtype=jnp.float32),
        "wv": mk(ks[2]), "bv": jnp.zeros((model_dim,), jnp.float32),
        "wo": mk(ks[3]), "bo": jnp.full((model_dim,), 0.05, jnp.float32),
    }


if __name__ == "__main__":
    root = jax.random.PRNGKey(0)
    keys = jax.random.split(root, 8)

    # ---- Config 1: batch=2, in_steps=4, tgt=8, src=16, model_dim=32, heads=8 ----
    B, S, Tq, Ts, D, H = 2, 4, 8, 16, 32, 8
    query = jax.random.normal(keys[0], (B, S, Tq, D), jnp.float32)
    key_in = jax.random.normal(keys[1], (B, S, Ts, D), jnp.float32)
    value_in = jax.random.normal(keys[2], (B, S, Ts, D), jnp.float32)
    params = init_params(keys[3], D)

    ref = attention_layer_ref(query, key_in, value_in, params, num_heads=H, mask=False)

    # 1) f32 compute path, no mask — tight check of exact module semantics.
    out = jax.block_until_ready(attention_layer_pallas(
        query, key_in, value_in, params, num_heads=H, mask=False,
        compute_dtype=jnp.float32))
    assert out.shape == (B, S, Tq, D)
    assert jnp.allclose(out, ref, atol=1e-4, rtol=1e-4), float(jnp.max(jnp.abs(out - ref)))

    # 2) f32 compute path with causal mask (Tq != Ts) — validates mask semantics.
    out_m = jax.block_until_ready(attention_layer_pallas(
        query, key_in, value_in, params, num_heads=H, mask=True,
        compute_dtype=jnp.float32))
    ref_m = attention_layer_ref(query, key_in, value_in, params, num_heads=H, mask=True)
    assert jnp.allclose(out_m, ref_m, atol=1e-4, rtol=1e-4), float(jnp.max(jnp.abs(out_m - ref_m)))

    # 3) Default bf16 matmul path (MXU-friendly) — coarse tolerance vs pure-f32 ref.
    out_bf = jax.block_until_ready(attention_layer_pallas(
        query, key_in, value_in, params, num_heads=H, mask=False))
    assert jnp.allclose(out_bf, ref, atol=1e-1, rtol=1e-1), float(jnp.max(jnp.abs(out_bf - ref)))

    # ---- Config 2: B*S=6 (divisor-based G, no padding), model_dim=64, heads=4 ----
    B2, S2, Tq2, Ts2, D2, H2 = 2, 3, 8, 16, 64, 4
    q2 = jax.random.normal(keys[4], (B2, S2, Tq2, D2), jnp.float32)
    k2 = jax.random.normal(keys[5], (B2, S2, Ts2, D2), jnp.float32)
    v2 = jax.random.normal(keys[6], (B2, S2, Ts2, D2), jnp.float32)
    params2 = init_params(keys[7], D2)
    ref2 = attention_layer_ref(q2, k2, v2, params2, num_heads=H2, mask=True)
    out2 = jax.block_until_ready(attention_layer_pallas(
        q2, k2, v2, params2, num_heads=H2, mask=True, compute_dtype=jnp.float32))
    assert out2.shape == (B2, S2, Tq2, D2)
    assert jnp.allclose(out2, ref2, atol=1e-4, rtol=1e-4), float(jnp.max(jnp.abs(out2 - ref2)))

    print("KERNEL_OK")
</pallas_src>

<mosaic_0001>
module attributes {stable_mosaic.version = 11 : i64} {
  func.func @_attention_kernel(%arg0: i32, %arg1: memref<8x8x32xf32, #tpu.memory_space<vmem>>, %arg2: memref<8x16x32xf32, #tpu.memory_space<vmem>>, %arg3: memref<8x16x32xf32, #tpu.memory_space<vmem>>, %arg4: memref<32x32xf32, #tpu.memory_space<vmem>>, %arg5: memref<1x32xf32, #tpu.memory_space<vmem>>, %arg6: memref<32x32xf32, #tpu.memory_space<vmem>>, %arg7: memref<1x32xf32, #tpu.memory_space<vmem>>, %arg8: memref<32x32xf32, #tpu.memory_space<vmem>>, %arg9: memref<1x32xf32, #tpu.memory_space<vmem>>, %arg10: memref<32x32xf32, #tpu.memory_space<vmem>>, %arg11: memref<1x32xf32, #tpu.memory_space<vmem>>, %arg12: memref<8x8x32xf32, #tpu.memory_space<vmem>>, %arg13: memref<64x32xf32, #tpu.memory_space<vmem>>) attributes {dimension_semantics = [#tpu.dimension_semantics<parallel>], iteration_bounds = array<i64: 1>, scalar_prefetch = 0 : i64, scratch_operands = 1 : i64, tpu.core_type = #tpu.core_type<tc>, window_params = [{transform_indices = @transform_0, window_bounds = array<i64: 8, 8, 32>}, {transform_indices = @transform_1, window_bounds = array<i64: 8, 16, 32>}, {transform_indices = @transform_2, window_bounds = array<i64: 8, 16, 32>}, {pipeline_mode = #tpu.pipeline_mode<synchronous>, transform_indices = @transform_3, window_bounds = array<i64: 32, 32>}, {pipeline_mode = #tpu.pipeline_mode<synchronous>, transform_indices = @transform_4, window_bounds = array<i64: 1, 32>}, {pipeline_mode = #tpu.pipeline_mode<synchronous>, transform_indices = @transform_5, window_bounds = array<i64: 32, 32>}, {pipeline_mode = #tpu.pipeline_mode<synchronous>, transform_indices = @transform_6, window_bounds = array<i64: 1, 32>}, {pipeline_mode = #tpu.pipeline_mode<synchronous>, transform_indices = @transform_7, window_bounds = array<i64: 32, 32>}, {pipeline_mode = #tpu.pipeline_mode<synchronous>, transform_indices = @transform_8, window_bounds = array<i64: 1, 32>}, {pipeline_mode = #tpu.pipeline_mode<synchronous>, transform_indices = @transform_9, window_bounds = array<i64: 32, 32>}, {pipeline_mode = #tpu.pipeline_mode<synchronous>, transform_indices = @transform_10, window_bounds = array<i64: 1, 32>}, {transform_indices = @transform_11, window_bounds = array<i64: 8, 8, 32>}]} {
    %c0 = arith.constant 0 : index
    %c0_0 = arith.constant 0 : index
    %c0_1 = arith.constant 0 : index
    %0 = vector.load %arg1[%c0, %c0_0, %c0_1] : memref<8x8x32xf32, #tpu.memory_space<vmem>>, vector<8x8x32xf32>
    %1 = vector.shape_cast %0 : vector<8x8x32xf32> to vector<64x32xf32>
    %c0_2 = arith.constant 0 : index
    %c0_3 = arith.constant 0 : index
    %c0_4 = arith.constant 0 : index
    %2 = vector.load %arg2[%c0_2, %c0_3, %c0_4] : memref<8x16x32xf32, #tpu.memory_space<vmem>>, vector<8x16x32xf32>
    %3 = vector.shape_cast %2 : vector<8x16x32xf32> to vector<128x32xf32>
    %c0_5 = arith.constant 0 : index
    %c0_6 = arith.constant 0 : index
    %c0_7 = arith.constant 0 : index
    %4 = vector.load %arg3[%c0_5, %c0_6, %c0_7] : memref<8x16x32xf32, #tpu.memory_space<vmem>>, vector<8x16x32xf32>
    %5 = vector.shape_cast %4 : vector<8x16x32xf32> to vector<128x32xf32>
    %c0_8 = arith.constant 0 : index
    %c0_9 = arith.constant 0 : index
    %6 = vector.load %arg4[%c0_8, %c0_9] : memref<32x32xf32, #tpu.memory_space<vmem>>, vector<32x32xf32>
    %cst = arith.constant dense<0.000000e+00> : vector<64x32xf32>
    %7 = tpu.matmul %1, %6, %cst {dimension_numbers = #tpu.dot_dimension_numbers<[1], [0], [0], [1], [0, 0, 1, 1], [], []>} : vector<64x32xf32>, vector<32x32xf32>, vector<64x32xf32> -> vector<64x32xf32>
    %c0_10 = arith.constant 0 : index
    %c0_11 = arith.constant 0 : index
    %8 = vector.load %arg5[%c0_10, %c0_11] : memref<1x32xf32, #tpu.memory_space<vmem>>, vector<1x32xf32>
    %9 = vector.broadcast %8 : vector<1x32xf32> to vector<64x32xf32>
    %10 = arith.addf %7, %9 : vector<64x32xf32>
    %cst_12 = arith.constant 5.000000e-01 : f32
    %11 = vector.broadcast %cst_12 : f32 to vector<64x32xf32>
    %12 = arith.mulf %10, %11 : vector<64x32xf32>
    %c0_13 = arith.constant 0 : index
    %c0_14 = arith.constant 0 : index
    %13 = vector.load %arg6[%c0_13, %c0_14] : memref<32x32xf32, #tpu.memory_space<vmem>>, vector<32x32xf32>
    %cst_15 = arith.constant dense<0.000000e+00> : vector<128x32xf32>
    %14 = tpu.matmul %3, %13, %cst_15 {dimension_numbers = #tpu.dot_dimension_numbers<[1], [0], [0], [1], [0, 0, 1, 1], [], []>} : vector<128x32xf32>, vector<32x32xf32>, vector<128x32xf32> -> vector<128x32xf32>
    %c0_16 = arith.constant 0 : index
    %c0_17 = arith.constant 0 : index
    %15 = vector.load %arg7[%c0_16, %c0_17] : memref<1x32xf32, #tpu.memory_space<vmem>>, vector<1x32xf32>
    %16 = vector.broadcast %15 : vector<1x32xf32> to vector<128x32xf32>
    %17 = arith.addf %14, %16 : vector<128x32xf32>
    %c0_18 = arith.constant 0 : index
    %c0_19 = arith.constant 0 : index
    %18 = vector.load %arg8[%c0_18, %c0_19] : memref<32x32xf32, #tpu.memory_space<vmem>>, vector<32x32xf32>
    %cst_20 = arith.constant dense<0.000000e+00> : vector<128x32xf32>
    %19 = tpu.matmul %5, %18, %cst_20 {dimension_numbers = #tpu.dot_dimension_numbers<[1], [0], [0], [1], [0, 0, 1, 1], [], []>} : vector<128x32xf32>, vector<32x32xf32>, vector<128x32xf32> -> vector<128x32xf32>
    %c0_21 = arith.constant 0 : index
    %c0_22 = arith.constant 0 : index
    %20 = vector.load %arg9[%c0_21, %c0_22] : memref<1x32xf32, #tpu.memory_space<vmem>>, vector<1x32xf32>
    %21 = vector.broadcast %20 : vector<1x32xf32> to vector<128x32xf32>
    %22 = arith.addf %19, %21 : vector<128x32xf32>
    %23 = vector.shape_cast %12 : vector<64x32xf32> to vector<8x8x32xf32>
    %24 = vector.shape_cast %17 : vector<128x32xf32> to vector<8x16x32xf32>
    %25 = vector.shape_cast %22 : vector<128x32xf32> to vector<8x16x32xf32>
    %26 = vector.extract_strided_slice %23 {offsets = [0, 0, 0], sizes = [8, 8, 4], strides = [1, 1, 1]} : vector<8x8x32xf32> to vector<8x8x4xf32>
    %27 = vector.extract_strided_slice %24 {offsets = [0, 0, 0], sizes = [8, 16, 4], strides = [1, 1, 1]} : vector<8x16x32xf32> to vector<8x16x4xf32>
    %28 = vector.extract_strided_slice %25 {offsets = [0, 0, 0], sizes = [8, 16, 4], strides = [1, 1, 1]} : vector<8x16x32xf32> to vector<8x16x4xf32>
    "tpu.trace_start"() <{level = 10 : i32, message = "gqe,gke->gqk"}> : () -> ()
    %cst_23 = arith.constant dense<0.000000e+00> : vector<8x8x16xf32>
    %29 = tpu.matmul %26, %27, %cst_23 {dimension_numbers = #tpu.dot_dimension_numbers<[2], [2], [1], [1], [0, 0, 0, 1, 1, 1], [0], [0]>} : vector<8x8x4xf32>, vector<8x16x4xf32>, vector<8x8x16xf32> -> vector<8x8x16xf32>
    "tpu.trace_stop"() : () -> ()
    %cst_24 = arith.constant dense<0xFF800000> : vector<8x8xf32>
    %30 = vector.multi_reduction <maximumf>, %29, %cst_24 [2] : vector<8x8x16xf32> to vector<8x8xf32>
    %31 = vector.shape_cast %30 : vector<8x8xf32> to vector<8x8x1xf32>
    %32 = vector.broadcast %31 : vector<8x8x1xf32> to vector<8x8x16xf32>
    %33 = arith.subf %29, %32 : vector<8x8x16xf32>
    %34 = math.exp %33 : vector<8x8x16xf32>
    %cst_25 = arith.constant dense<0.000000e+00> : vector<8x8xf32>
    %35 = vector.multi_reduction <add>, %34, %cst_25 [2] : vector<8x8x16xf32> to vector<8x8xf32>
    %36 = vector.shape_cast %35 : vector<8x8xf32> to vector<8x8x1xf32>
    %37 = tpu.reciprocal %36 : vector<8x8x1xf32> -> vector<8x8x1xf32>
    %38 = vector.broadcast %37 : vector<8x8x1xf32> to vector<8x8x16xf32>
    %39 = arith.mulf %34, %38 : vector<8x8x16xf32>
    "tpu.trace_start"() <{level = 10 : i32, message = "gqk,gke->gqe"}> : () -> ()
    %cst_26 = arith.constant dense<0.000000e+00> : vector<8x8x4xf32>
    %40 = tpu.matmul %39, %28, %cst_26 {dimension_numbers = #tpu.dot_dimension_numbers<[2], [1], [1], [2], [0, 0, 0, 1, 1, 2], [0], [0]>} : vector<8x8x16xf32>, vector<8x16x4xf32>, vector<8x8x4xf32> -> vector<8x8x4xf32>
    "tpu.trace_stop"() : () -> ()
    %41 = vector.shape_cast %40 : vector<8x8x4xf32> to vector<64x4xf32>
    %c0_27 = arith.constant 0 : index
    %c0_28 = arith.constant 0 : index
    %42 = vector.load %arg13[%c0_27, %c0_28] : memref<64x32xf32, #tpu.memory_space<vmem>>, vector<64x4xf32>
    tpu.vector_store %arg13[%c0_27, %c0_28], %41 {strides = array<i32>} : memref<64x32xf32, #tpu.memory_space<vmem>>, vector<64x4xf32>,
    %43 = vector.extract_strided_slice %23 {offsets = [0, 0, 4], sizes = [8, 8, 4], strides = [1, 1, 1]} : vector<8x8x32xf32> to vector<8x8x4xf32>
    %44 = vector.extract_strided_slice %24 {offsets = [0, 0, 4], sizes = [8, 16, 4], strides = [1, 1, 1]} : vector<8x16x32xf32> to vector<8x16x4xf32>
    %45 = vector.extract_strided_slice %25 {offsets = [0, 0, 4], sizes = [8, 16, 4], strides = [1, 1, 1]} : vector<8x16x32xf32> to vector<8x16x4xf32>
    "tpu.trace_start"() <{level = 10 : i32, message = "gqe,gke->gqk"}> : () -> ()
    %cst_29 = arith.constant dense<0.000000e+00> : vector<8x8x16xf32>
    %46 = tpu.matmul %43, %44, %cst_29 {dimension_numbers = #tpu.dot_dimension_numbers<[2], [2], [1], [1], [0, 0, 0, 1, 1, 1], [0], [0]>} : vector<8x8x4xf32>, vector<8x16x4xf32>, vector<8x8x16xf32> -> vector<8x8x16xf32>
    "tpu.trace_stop"() : () -> ()
    %cst_30 = arith.constant dense<0xFF800000> : vector<8x8xf32>
    %47 = vector.multi_reduction <maximumf>, %46, %cst_30 [2] : vector<8x8x16xf32> to vector<8x8xf32>
    %48 = vector.shape_cast %47 : vector<8x8xf32> to vector<8x8x1xf32>
    %49 = vector.broadcast %48 : vector<8x8x1xf32> to vector<8x8x16xf32>
    %50 = arith.subf %46, %49 : vector<8x8x16xf32>
    %51 = math.exp %50 : vector<8x8x16xf32>
    %cst_31 = arith.constant dense<0.000000e+00> : vector<8x8xf32>
    %52 = vector.multi_reduction <add>, %51, %cst_31 [2] : vector<8x8x16xf32> to vector<8x8xf32>
    %53 = vector.shape_cast %52 : vector<8x8xf32> to vector<8x8x1xf32>
    %54 = tpu.reciprocal %53 : vector<8x8x1xf32> -> vector<8x8x1xf32>
    %55 = vector.broadcast %54 : vector<8x8x1xf32> to vector<8x8x16xf32>
    %56 = arith.mulf %51, %55 : vector<8x8x16xf32>
    "tpu.trace_start"() <{level = 10 : i32, message = "gqk,gke->gqe"}> : () -> ()
    %cst_32 = arith.constant dense<0.000000e+00> : vector<8x8x4xf32>
    %57 = tpu.matmul %56, %45, %cst_32 {dimension_numbers = #tpu.dot_dimension_numbers<[2], [1], [1], [2], [0, 0, 0, 1, 1, 2], [0], [0]>} : vector<8x8x16xf32>, vector<8x16x4xf32>, vector<8x8x4xf32> -> vector<8x8x4xf32>
    "tpu.trace_stop"() : () -> ()
    %58 = vector.shape_cast %57 : vector<8x8x4xf32> to vector<64x4xf32>
    %c0_33 = arith.constant 0 : index
    %c4 = arith.constant 4 : index
    %59 = vector.load %arg13[%c0_33, %c4] : memref<64x32xf32, #tpu.memory_space<vmem>>, vector<64x4xf32>
    tpu.vector_store %arg13[%c0_33, %c4], %58 {strides = array<i32>} : memref<64x32xf32, #tpu.memory_space<vmem>>, vector<64x4xf32>,
    %60 = vector.extract_strided_slice %23 {offsets = [0, 0, 8], sizes = [8, 8, 4], strides = [1, 1, 1]} : vector<8x8x32xf32> to vector<8x8x4xf32>
    %61 = vector.extract_strided_slice %24 {offsets = [0, 0, 8], sizes = [8, 16, 4], strides = [1, 1, 1]} : vector<8x16x32xf32> to vector<8x16x4xf32>
    %62 = vector.extract_strided_slice %25 {offsets = [0, 0, 8], sizes = [8, 16, 4], strides = [1, 1, 1]} : vector<8x16x32xf32> to vector<8x16x4xf32>
    "tpu.trace_start"() <{level = 10 : i32, message = "gqe,gke->gqk"}> : () -> ()
    %cst_34 = arith.constant dense<0.000000e+00> : vector<8x8x16xf32>
    %63 = tpu.matmul %60, %61, %cst_34 {dimension_numbers = #tpu.dot_dimension_numbers<[2], [2], [1], [1], [0, 0, 0, 1, 1, 1], [0], [0]>} : vector<8x8x4xf32>, vector<8x16x4xf32>, vector<8x8x16xf32> -> vector<8x8x16xf32>
    "tpu.trace_stop"() : () -> ()
    %cst_35 = arith.constant dense<0xFF800000> : vector<8x8xf32>
    %64 = vector.multi_reduction <maximumf>, %63, %cst_35 [2] : vector<8x8x16xf32> to vector<8x8xf32>
    %65 = vector.shape_cast %64 : vector<8x8xf32> to vector<8x8x1xf32>
    %66 = vector.broadcast %65 : vector<8x8x1xf32> to vector<8x8x16xf32>
    %67 = arith.subf %63, %66 : vector<8x8x16xf32>
    %68 = math.exp %67 : vector<8x8x16xf32>
    %cst_36 = arith.constant dense<0.000000e+00> : vector<8x8xf32>
    %69 = vector.multi_reduction <add>, %68, %cst_36 [2] : vector<8x8x16xf32> to vector<8x8xf32>
    %70 = vector.shape_cast %69 : vector<8x8xf32> to vector<8x8x1xf32>
    %71 = tpu.reciprocal %70 : vector<8x8x1xf32> -> vector<8x8x1xf32>
    %72 = vector.broadcast %71 : vector<8x8x1xf32> to vector<8x8x16xf32>
    %73 = arith.mulf %68, %72 : vector<8x8x16xf32>
    "tpu.trace_start"() <{level = 10 : i32, message = "gqk,gke->gqe"}> : () -> ()
    %cst_37 = arith.constant dense<0.000000e+00> : vector<8x8x4xf32>
    %74 = tpu.matmul %73, %62, %cst_37 {dimension_numbers = #tpu.dot_dimension_numbers<[2], [1], [1], [2], [0, 0, 0, 1, 1, 2], [0], [0]>} : vector<8x8x16xf32>, vector<8x16x4xf32>, vector<8x8x4xf32> -> vector<8x8x4xf32>
    "tpu.trace_stop"() : () -> ()
    %75 = vector.shape_cast %74 : vector<8x8x4xf32> to vector<64x4xf32>
    %c0_38 = arith.constant 0 : index
    %c8 = arith.constant 8 : index
    %76 = vector.load %arg13[%c0_38, %c8] : memref<64x32xf32, #tpu.memory_space<vmem>>, vector<64x4xf32>
    tpu.vector_store %arg13[%c0_38, %c8], %75 {strides = array<i32>} : memref<64x32xf32, #tpu.memory_space<vmem>>, vector<64x4xf32>,
    %77 = vector.extract_strided_slice %23 {offsets = [0, 0, 12], sizes = [8, 8, 4], strides = [1, 1, 1]} : vector<8x8x32xf32> to vector<8x8x4xf32>
    %78 = vector.extract_strided_slice %24 {offsets = [0, 0, 12], sizes = [8, 16, 4], strides = [1, 1, 1]} : vector<8x16x32xf32> to vector<8x16x4xf32>
    %79 = vector.extract_strided_slice %25 {offsets = [0, 0, 12], sizes = [8, 16, 4], strides = [1, 1, 1]} : vector<8x16x32xf32> to vector<8x16x4xf32>
    "tpu.trace_start"() <{level = 10 : i32, message = "gqe,gke->gqk"}> : () -> ()
    %cst_39 = arith.constant dense<0.000000e+00> : vector<8x8x16xf32>
    %80 = tpu.matmul %77, %78, %cst_39 {dimension_numbers = #tpu.dot_dimension_numbers<[2], [2], [1], [1], [0, 0, 0, 1, 1, 1], [0], [0]>} : vector<8x8x4xf32>, vector<8x16x4xf32>, vector<8x8x16xf32> -> vector<8x8x16xf32>
    "tpu.trace_stop"() : () -> ()
    %cst_40 = arith.constant dense<0xFF800000> : vector<8x8xf32>
    %81 = vector.multi_reduction <maximumf>, %80, %cst_40 [2] : vector<8x8x16xf32> to vector<8x8xf32>
    %82 = vector.shape_cast %81 : vector<8x8xf32> to vector<8x8x1xf32>
    %83 = vector.broadcast %82 : vector<8x8x1xf32> to vector<8x8x16xf32>
    %84 = arith.subf %80, %83 : vector<8x8x16xf32>
    %85 = math.exp %84 : vector<8x8x16xf32>
    %cst_41 = arith.constant dense<0.000000e+00> : vector<8x8xf32>
    %86 = vector.multi_reduction <add>, %85, %cst_41 [2] : vector<8x8x16xf32> to vector<8x8xf32>
    %87 = vector.shape_cast %86 : vector<8x8xf32> to vector<8x8x1xf32>
    %88 = tpu.reciprocal %87 : vector<8x8x1xf32> -> vector<8x8x1xf32>
    %89 = vector.broadcast %88 : vector<8x8x1xf32> to vector<8x8x16xf32>
    %90 = arith.mulf %85, %89 : vector<8x8x16xf32>
    "tpu.trace_start"() <{level = 10 : i32, message = "gqk,gke->gqe"}> : () -> ()
    %cst_42 = arith.constant dense<0.000000e+00> : vector<8x8x4xf32>
    %91 = tpu.matmul %90, %79, %cst_42 {dimension_numbers = #tpu.dot_dimension_numbers<[2], [1], [1], [2], [0, 0, 0, 1, 1, 2], [0], [0]>} : vector<8x8x16xf32>, vector<8x16x4xf32>, vector<8x8x4xf32> -> vector<8x8x4xf32>
    "tpu.trace_stop"() : () -> ()
    %92 = vector.shape_cast %91 : vector<8x8x4xf32> to vector<64x4xf32>
    %c0_43 = arith.constant 0 : index
    %c12 = arith.constant 12 : index
    %93 = vector.load %arg13[%c0_43, %c12] : memref<64x32xf32, #tpu.memory_space<vmem>>, vector<64x4xf32>
    tpu.vector_store %arg13[%c0_43, %c12], %92 {strides = array<i32>} : memref<64x32xf32, #tpu.memory_space<vmem>>, vector<64x4xf32>,
    %94 = vector.extract_strided_slice %23 {offsets = [0, 0, 16], sizes = [8, 8, 4], strides = [1, 1, 1]} : vector<8x8x32xf32> to vector<8x8x4xf32>
    %95 = vector.extract_strided_slice %24 {offsets = [0, 0, 16], sizes = [8, 16, 4], strides = [1, 1, 1]} : vector<8x16x32xf32> to vector<8x16x4xf32>
    %96 = vector.extract_strided_slice %25 {offsets = [0, 0, 16], sizes = [8, 16, 4], strides = [1, 1, 1]} : vector<8x16x32xf32> to vector<8x16x4xf32>
    "tpu.trace_start"() <{level = 10 : i32, message = "gqe,gke->gqk"}> : () -> ()
    %cst_44 = arith.constant dense<0.000000e+00> : vector<8x8x16xf32>
    %97 = tpu.matmul %94, %95, %cst_44 {dimension_numbers = #tpu.dot_dimension_numbers<[2], [2], [1], [1], [0, 0, 0, 1, 1, 1], [0], [0]>} : vector<8x8x4xf32>, vector<8x16x4xf32>, vector<8x8x16xf32> -> vector<8x8x16xf32>
    "tpu.trace_stop"() : () -> ()
    %cst_45 = arith.constant dense<0xFF800000> : vector<8x8xf32>
    %98 = vector.multi_reduction <maximumf>, %97, %cst_45 [2] : vector<8x8x16xf32> to vector<8x8xf32>
    %99 = vector.shape_cast %98 : vector<8x8xf32> to vector<8x8x1xf32>
    %100 = vector.broadcast %99 : vector<8x8x1xf32> to vector<8x8x16xf32>
    %101 = arith.subf %97, %100 : vector<8x8x16xf32>
    %102 = math.exp %101 : vector<8x8x16xf32>
    %cst_46 = arith.constant dense<0.000000e+00> : vector<8x8xf32>
    %103 = vector.multi_reduction <add>, %102, %cst_46 [2] : vector<8x8x16xf32> to vector<8x8xf32>
    %104 = vector.shape_cast %103 : vector<8x8xf32> to vector<8x8x1xf32>
    %105 = tpu.reciprocal %104 : vector<8x8x1xf32> -> vector<8x8x1xf32>
    %106 = vector.broadcast %105 : vector<8x8x1xf32> to vector<8x8x16xf32>
    %107 = arith.mulf %102, %106 : vector<8x8x16xf32>
    "tpu.trace_start"() <{level = 10 : i32, message = "gqk,gke->gqe"}> : () -> ()
    %cst_47 = arith.constant dense<0.000000e+00> : vector<8x8x4xf32>
    %108 = tpu.matmul %107, %96, %cst_47 {dimension_numbers = #tpu.dot_dimension_numbers<[2], [1], [1], [2], [0, 0, 0, 1, 1, 2], [0], [0]>} : vector<8x8x16xf32>, vector<8x16x4xf32>, vector<8x8x4xf32> -> vector<8x8x4xf32>
    "tpu.trace_stop"() : () -> ()
    %109 = vector.shape_cast %108 : vector<8x8x4xf32> to vector<64x4xf32>
    %c0_48 = arith.constant 0 : index
    %c16 = arith.constant 16 : index
    %110 = vector.load %arg13[%c0_48, %c16] : memref<64x32xf32, #tpu.memory_space<vmem>>, vector<64x4xf32>
    tpu.vector_store %arg13[%c0_48, %c16], %109 {strides = array<i32>} : memref<64x32xf32, #tpu.memory_space<vmem>>, vector<64x4xf32>,
    %111 = vector.extract_strided_slice %23 {offsets = [0, 0, 20], sizes = [8, 8, 4], strides = [1, 1, 1]} : vector<8x8x32xf32> to vector<8x8x4xf32>
    %112 = vector.extract_strided_slice %24 {offsets = [0, 0, 20], sizes = [8, 16, 4], strides = [1, 1, 1]} : vector<8x16x32xf32> to vector<8x16x4xf32>
    %113 = vector.extract_strided_slice %25 {offsets = [0, 0, 20], sizes = [8, 16, 4], strides = [1, 1, 1]} : vector<8x16x32xf32> to vector<8x16x4xf32>
    "tpu.trace_start"() <{level = 10 : i32, message = "gqe,gke->gqk"}> : () -> ()
    %cst_49 = arith.constant dense<0.000000e+00> : vector<8x8x16xf32>
    %114 = tpu.matmul %111, %112, %cst_49 {dimension_numbers = #tpu.dot_dimension_numbers<[2], [2], [1], [1], [0, 0, 0, 1, 1, 1], [0], [0]>} : vector<8x8x4xf32>, vector<8x16x4xf32>, vector<8x8x16xf32> -> vector<8x8x16xf32>
    "tpu.trace_stop"() : () -> ()
    %cst_50 = arith.constant dense<0xFF800000> : vector<8x8xf32>
    %115 = vector.multi_reduction <maximumf>, %114, %cst_50 [2] : vector<8x8x16xf32> to vector<8x8xf32>
    %116 = vector.shape_cast %115 : vector<8x8xf32> to vector<8x8x1xf32>
    %117 = vector.broadcast %116 : vector<8x8x1xf32> to vector<8x8x16xf32>
    %118 = arith.subf %114, %117 : vector<8x8x16xf32>
    %119 = math.exp %118 : vector<8x8x16xf32>
    %cst_51 = arith.constant dense<0.000000e+00> : vector<8x8xf32>
    %120 = vector.multi_reduction <add>, %119, %cst_51 [2] : vector<8x8x16xf32> to vector<8x8xf32>
    %121 = vector.shape_cast %120 : vector<8x8xf32> to vector<8x8x1xf32>
    %122 = tpu.reciprocal %121 : vector<8x8x1xf32> -> vector<8x8x1xf32>
    %123 = vector.broadcast %122 : vector<8x8x1xf32> to vector<8x8x16xf32>
    %124 = arith.mulf %119, %123 : vector<8x8x16xf32>
    "tpu.trace_start"() <{level = 10 : i32, message = "gqk,gke->gqe"}> : () -> ()
    %cst_52 = arith.constant dense<0.000000e+00> : vector<8x8x4xf32>
    %125 = tpu.matmul %124, %113, %cst_52 {dimension_numbers = #tpu.dot_dimension_numbers<[2], [1], [1], [2], [0, 0, 0, 1, 1, 2], [0], [0]>} : vector<8x8x16xf32>, vector<8x16x4xf32>, vector<8x8x4xf32> -> vector<8x8x4xf32>
    "tpu.trace_stop"() : () -> ()
    %126 = vector.shape_cast %125 : vector<8x8x4xf32> to vector<64x4xf32>
    %c0_53 = arith.constant 0 : index
    %c20 = arith.constant 20 : index
    %127 = vector.load %arg13[%c0_53, %c20] : memref<64x32xf32, #tpu.memory_space<vmem>>, vector<64x4xf32>
    tpu.vector_store %arg13[%c0_53, %c20], %126 {strides = array<i32>} : memref<64x32xf32, #tpu.memory_space<vmem>>, vector<64x4xf32>,
    %128 = vector.extract_strided_slice %23 {offsets = [0, 0, 24], sizes = [8, 8, 4], strides = [1, 1, 1]} : vector<8x8x32xf32> to vector<8x8x4xf32>
    %129 = vector.extract_strided_slice %24 {offsets = [0, 0, 24], sizes = [8, 16, 4], strides = [1, 1, 1]} : vector<8x16x32xf32> to vector<8x16x4xf32>
    %130 = vector.extract_strided_slice %25 {offsets = [0, 0, 24], sizes = [8, 16, 4], strides = [1, 1, 1]} : vector<8x16x32xf32> to vector<8x16x4xf32>
    "tpu.trace_start"() <{level = 10 : i32, message = "gqe,gke->gqk"}> : () -> ()
    %cst_54 = arith.constant dense<0.000000e+00> : vector<8x8x16xf32>
    %131 = tpu.matmul %128, %129, %cst_54 {dimension_numbers = #tpu.dot_dimension_numbers<[2], [2], [1], [1], [0, 0, 0, 1, 1, 1], [0], [0]>} : vector<8x8x4xf32>, vector<8x16x4xf32>, vector<8x8x16xf32> -> vector<8x8x16xf32>
    "tpu.trace_stop"() : () -> ()
    %cst_55 = arith.constant dense<0xFF800000> : vector<8x8xf32>
    %132 = vector.multi_reduction <maximumf>, %131, %cst_55 [2] : vector<8x8x16xf32> to vector<8x8xf32>
    %133 = vector.shape_cast %132 : vector<8x8xf32> to vector<8x8x1xf32>
    %134 = vector.broadcast %133 : vector<8x8x1xf32> to vector<8x8x16xf32>
    %135 = arith.subf %131, %134 : vector<8x8x16xf32>
    %136 = math.exp %135 : vector<8x8x16xf32>
    %cst_56 = arith.constant dense<0.000000e+00> : vector<8x8xf32>
    %137 = vector.multi_reduction <add>, %136, %cst_56 [2] : vector<8x8x16xf32> to vector<8x8xf32>
    %138 = vector.shape_cast %137 : vector<8x8xf32> to vector<8x8x1xf32>
    %139 = tpu.reciprocal %138 : vector<8x8x1xf32> -> vector<8x8x1xf32>
    %140 = vector.broadcast %139 : vector<8x8x1xf32> to vector<8x8x16xf32>
    %141 = arith.mulf %136, %140 : vector<8x8x16xf32>
    "tpu.trace_start"() <{level = 10 : i32, message = "gqk,gke->gqe"}> : () -> ()
    %cst_57 = arith.constant dense<0.000000e+00> : vector<8x8x4xf32>
    %142 = tpu.matmul %141, %130, %cst_57 {dimension_numbers = #tpu.dot_dimension_numbers<[2], [1], [1], [2], [0, 0, 0, 1, 1, 2], [0], [0]>} : vector<8x8x16xf32>, vector<8x16x4xf32>, vector<8x8x4xf32> -> vector<8x8x4xf32>
    "tpu.trace_stop"() : () -> ()
    %143 = vector.shape_cast %142 : vector<8x8x4xf32> to vector<64x4xf32>
    %c0_58 = arith.constant 0 : index
    %c24 = arith.constant 24 : index
    %144 = vector.load %arg13[%c0_58, %c24] : memref<64x32xf32, #tpu.memory_space<vmem>>, vector<64x4xf32>
    tpu.vector_store %arg13[%c0_58, %c24], %143 {strides = array<i32>} : memref<64x32xf32, #tpu.memory_space<vmem>>, vector<64x4xf32>,
    %145 = vector.extract_strided_slice %23 {offsets = [0, 0, 28], sizes = [8, 8, 4], strides = [1, 1, 1]} : vector<8x8x32xf32> to vector<8x8x4xf32>
    %146 = vector.extract_strided_slice %24 {offsets = [0, 0, 28], sizes = [8, 16, 4], strides = [1, 1, 1]} : vector<8x16x32xf32> to vector<8x16x4xf32>
    %147 = vector.extract_strided_slice %25 {offsets = [0, 0, 28], sizes = [8, 16, 4], strides = [1, 1, 1]} : vector<8x16x32xf32> to vector<8x16x4xf32>
    "tpu.trace_start"() <{level = 10 : i32, message = "gqe,gke->gqk"}> : () -> ()
    %cst_59 = arith.constant dense<0.000000e+00> : vector<8x8x16xf32>
    %148 = tpu.matmul %145, %146, %cst_59 {dimension_numbers = #tpu.dot_dimension_numbers<[2], [2], [1], [1], [0, 0, 0, 1, 1, 1], [0], [0]>} : vector<8x8x4xf32>, vector<8x16x4xf32>, vector<8x8x16xf32> -> vector<8x8x16xf32>
    "tpu.trace_stop"() : () -> ()
    %cst_60 = arith.constant dense<0xFF800000> : vector<8x8xf32>
    %149 = vector.multi_reduction <maximumf>, %148, %cst_60 [2] : vector<8x8x16xf32> to vector<8x8xf32>
    %150 = vector.shape_cast %149 : vector<8x8xf32> to vector<8x8x1xf32>
    %151 = vector.broadcast %150 : vector<8x8x1xf32> to vector<8x8x16xf32>
    %152 = arith.subf %148, %151 : vector<8x8x16xf32>
    %153 = math.exp %152 : vector<8x8x16xf32>
    %cst_61 = arith.constant dense<0.000000e+00> : vector<8x8xf32>
    %154 = vector.multi_reduction <add>, %153, %cst_61 [2] : vector<8x8x16xf32> to vector<8x8xf32>
    %155 = vector.shape_cast %154 : vector<8x8xf32> to vector<8x8x1xf32>
    %156 = tpu.reciprocal %155 : vector<8x8x1xf32> -> vector<8x8x1xf32>
    %157 = vector.broadcast %156 : vector<8x8x1xf32> to vector<8x8x16xf32>
    %158 = arith.mulf %153, %157 : vector<8x8x16xf32>
    "tpu.trace_start"() <{level = 10 : i32, message = "gqk,gke->gqe"}> : () -> ()
    %cst_62 = arith.constant dense<0.000000e+00> : vector<8x8x4xf32>
    %159 = tpu.matmul %158, %147, %cst_62 {dimension_numbers = #tpu.dot_dimension_numbers<[2], [1], [1], [2], [0, 0, 0, 1, 1, 2], [0], [0]>} : vector<8x8x16xf32>, vector<8x16x4xf32>, vector<8x8x4xf32> -> vector<8x8x4xf32>
    "tpu.trace_stop"() : () -> ()
    %160 = vector.shape_cast %159 : vector<8x8x4xf32> to vector<64x4xf32>
    %c0_63 = arith.constant 0 : index
    %c28 = arith.constant 28 : index
    %161 = vector.load %arg13[%c0_63, %c28] : memref<64x32xf32, #tpu.memory_space<vmem>>, vector<64x4xf32>
    tpu.vector_store %arg13[%c0_63, %c28], %160 {strides = array<i32>} : memref<64x32xf32, #tpu.memory_space<vmem>>, vector<64x4xf32>,
    %c0_64 = arith.constant 0 : index
    %c0_65 = arith.constant 0 : index
    %162 = vector.load %arg13[%c0_64, %c0_65] : memref<64x32xf32, #tpu.memory_space<vmem>>, vector<64x32xf32>
    %c0_66 = arith.constant 0 : index
    %c0_67 = arith.constant 0 : index
    %163 = vector.load %arg10[%c0_66, %c0_67] : memref<32x32xf32, #tpu.memory_space<vmem>>, vector<32x32xf32>
    %cst_68 = arith.constant dense<0.000000e+00> : vector<64x32xf32>
    %164 = tpu.matmul %162, %163, %cst_68 {dimension_numbers = #tpu.dot_dimension_numbers<[1], [0], [0], [1], [0, 0, 1, 1], [], []>} : vector<64x32xf32>, vector<32x32xf32>, vector<64x32xf32> -> vector<64x32xf32>
    %c0_69 = arith.constant 0 : index
    %c0_70 = arith.constant 0 : index
    %165 = vector.load %arg11[%c0_69, %c0_70] : memref<1x32xf32, #tpu.memory_space<vmem>>, vector<1x32xf32>
    %166 = vector.broadcast %165 : vector<1x32xf32> to vector<64x32xf32>
    %167 = arith.addf %164, %166 : vector<64x32xf32>
    %168 = vector.shape_cast %167 : vector<64x32xf32> to vector<8x8x32xf32>
    %c0_71 = arith.constant 0 : index
    %c0_72 = arith.constant 0 : index
    %c0_73 = arith.constant 0 : index
    %169 = vector.load %arg12[%c0_71, %c0_72, %c0_73] : memref<8x8x32xf32, #tpu.memory_space<vmem>>, vector<8x8x32xf32>
    tpu.vector_store %arg12[%c0_71, %c0_72, %c0_73], %168 {strides = array<i32>} : memref<8x8x32xf32, #tpu.memory_space<vmem>>, vector<8x8x32xf32>,
    return
  }
  func.func @transform_0(%arg0: i32) -> (i32, i32, i32) {
    %c0_i32 = arith.constant 0 : i32
    %c0_i32_0 = arith.constant 0 : i32
    %c0_i32_1 = arith.constant 0 : i32
    return %arg0, %c0_i32, %c0_i32_0 : i32, i32, i32
  }
  func.func @transform_1(%arg0: i32) -> (i32, i32, i32) {
    %c0_i32 = arith.constant 0 : i32
    %c0_i32_0 = arith.constant 0 : i32
    %c0_i32_1 = arith.constant 0 : i32
    return %arg0, %c0_i32, %c0_i32_0 : i32, i32, i32
  }
  func.func @transform_2(%arg0: i32) -> (i32, i32, i32) {
    %c0_i32 = arith.constant 0 : i32
    %c0_i32_0 = arith.constant 0 : i32
    %c0_i32_1 = arith.constant 0 : i32
    return %arg0, %c0_i32, %c0_i32_0 : i32, i32, i32
  }
  func.func @transform_3(%arg0: i32) -> (i32, i32) {
    %c0_i32 = arith.constant 0 : i32
    %c0_i32_0 = arith.constant 0 : i32
    %c0_i32_1 = arith.constant 0 : i32
    return %c0_i32, %c0_i32_0 : i32, i32
  }
  func.func @transform_4(%arg0: i32) -> (i32, i32) {
    %c0_i32 = arith.constant 0 : i32
    %c0_i32_0 = arith.constant 0 : i32
    %c0_i32_1 = arith.constant 0 : i32
    return %c0_i32, %c0_i32_0 : i32, i32
  }
  func.func @transform_5(%arg0: i32) -> (i32, i32) {
    %c0_i32 = arith.constant 0 : i32
    %c0_i32_0 = arith.constant 0 : i32
    %c0_i32_1 = arith.constant 0 : i32
    return %c0_i32, %c0_i32_0 : i32, i32
  }
  func.func @transform_6(%arg0: i32) -> (i32, i32) {
    %c0_i32 = arith.constant 0 : i32
    %c0_i32_0 = arith.constant 0 : i32
    %c0_i32_1 = arith.constant 0 : i32
    return %c0_i32, %c0_i32_0 : i32, i32
  }
  func.func @transform_7(%arg0: i32) -> (i32, i32) {
    %c0_i32 = arith.constant 0 : i32
    %c0_i32_0 = arith.constant 0 : i32
    %c0_i32_1 = arith.constant 0 : i32
    return %c0_i32, %c0_i32_0 : i32, i32
  }
  func.func @transform_8(%arg0: i32) -> (i32, i32) {
    %c0_i32 = arith.constant 0 : i32
    %c0_i32_0 = arith.constant 0 : i32
    %c0_i32_1 = arith.constant 0 : i32
    return %c0_i32, %c0_i32_0 : i32, i32
  }
  func.func @transform_9(%arg0: i32) -> (i32, i32) {
    %c0_i32 = arith.constant 0 : i32
    %c0_i32_0 = arith.constant 0 : i32
    %c0_i32_1 = arith.constant 0 : i32
    return %c0_i32, %c0_i32_0 : i32, i32
  }
  func.func @transform_10(%arg0: i32) -> (i32, i32) {
    %c0_i32 = arith.constant 0 : i32
    %c0_i32_0 = arith.constant 0 : i32
    %c0_i32_1 = arith.constant 0 : i32
    return %c0_i32, %c0_i32_0 : i32, i32
  }
  func.func @transform_11(%arg0: i32) -> (i32, i32, i32) {
    %c0_i32 = arith.constant 0 : i32
    %c0_i32_0 = arith.constant 0 : i32
    %c0_i32_1 = arith.constant 0 : i32
    return %arg0, %c0_i32, %c0_i32_0 : i32, i32, i32
  }
}

module attributes {stable_mosaic.version = 11 : i64} {
  func.func @_attention_kernel(%arg0: i32, %arg1: memref<8x8x32xf32, #tpu.memory_space<vmem>>, %arg2: memref<8x16x32xf32, #tpu.memory_space<vmem>>, %arg3: memref<8x16x32xf32, #tpu.memory_space<vmem>>, %arg4: memref<32x32xf32, #tpu.memory_space<vmem>>, %arg5: memref<1x32xf32, #tpu.memory_space<vmem>>, %arg6: memref<32x32xf32, #tpu.memory_space<vmem>>, %arg7: memref<1x32xf32, #tpu.memory_space<vmem>>, %arg8: memref<32x32xf32, #tpu.memory_space<vmem>>, %arg9: memref<1x32xf32, #tpu.memory_space<vmem>>, %arg10: memref<32x32xf32, #tpu.memory_space<vmem>>, %arg11: memref<1x32xf32, #tpu.memory_space<vmem>>, %arg12: memref<8x8x32xf32, #tpu.memory_space<vmem>>, %arg13: memref<64x32xf32, #tpu.memory_space<vmem>>) attributes {dimension_semantics = [#tpu.dimension_semantics<parallel>], iteration_bounds = array<i64: 1>, scalar_prefetch = 0 : i64, scratch_operands = 1 : i64, tpu.core_type = #tpu.core_type<tc>, window_params = [{transform_indices = @transform_0, window_bounds = array<i64: 8, 8, 32>}, {transform_indices = @transform_1, window_bounds = array<i64: 8, 16, 32>}, {transform_indices = @transform_2, window_bounds = array<i64: 8, 16, 32>}, {pipeline_mode = #tpu.pipeline_mode<synchronous>, transform_indices = @transform_3, window_bounds = array<i64: 32, 32>}, {pipeline_mode = #tpu.pipeline_mode<synchronous>, transform_indices = @transform_4, window_bounds = array<i64: 1, 32>}, {pipeline_mode = #tpu.pipeline_mode<synchronous>, transform_indices = @transform_5, window_bounds = array<i64: 32, 32>}, {pipeline_mode = #tpu.pipeline_mode<synchronous>, transform_indices = @transform_6, window_bounds = array<i64: 1, 32>}, {pipeline_mode = #tpu.pipeline_mode<synchronous>, transform_indices = @transform_7, window_bounds = array<i64: 32, 32>}, {pipeline_mode = #tpu.pipeline_mode<synchronous>, transform_indices = @transform_8, window_bounds = array<i64: 1, 32>}, {pipeline_mode = #tpu.pipeline_mode<synchronous>, transform_indices = @transform_9, window_bounds = array<i64: 32, 32>}, {pipeline_mode = #tpu.pipeline_mode<synchronous>, transform_indices = @transform_10, window_bounds = array<i64: 1, 32>}, {transform_indices = @transform_11, window_bounds = array<i64: 8, 8, 32>}]} {
    %c0 = arith.constant 0 : index
    %c0_0 = arith.constant 0 : index
    %c0_1 = arith.constant 0 : index
    %0 = vector.load %arg1[%c0, %c0_0, %c0_1] : memref<8x8x32xf32, #tpu.memory_space<vmem>>, vector<8x8x32xf32>
    %1 = vector.shape_cast %0 : vector<8x8x32xf32> to vector<64x32xf32>
    %c0_2 = arith.constant 0 : index
    %c0_3 = arith.constant 0 : index
    %c0_4 = arith.constant 0 : index
    %2 = vector.load %arg2[%c0_2, %c0_3, %c0_4] : memref<8x16x32xf32, #tpu.memory_space<vmem>>, vector<8x16x32xf32>
    %3 = vector.shape_cast %2 : vector<8x16x32xf32> to vector<128x32xf32>
    %c0_5 = arith.constant 0 : index
    %c0_6 = arith.constant 0 : index
    %c0_7 = arith.constant 0 : index
    %4 = vector.load %arg3[%c0_5, %c0_6, %c0_7] : memref<8x16x32xf32, #tpu.memory_space<vmem>>, vector<8x16x32xf32>
    %5 = vector.shape_cast %4 : vector<8x16x32xf32> to vector<128x32xf32>
    %c0_8 = arith.constant 0 : index
    %c0_9 = arith.constant 0 : index
    %6 = vector.load %arg4[%c0_8, %c0_9] : memref<32x32xf32, #tpu.memory_space<vmem>>, vector<32x32xf32>
    %cst = arith.constant dense<0.000000e+00> : vector<64x32xf32>
    %7 = tpu.matmul %1, %6, %cst {dimension_numbers = #tpu.dot_dimension_numbers<[1], [0], [0], [1], [0, 0, 1, 1], [], []>} : vector<64x32xf32>, vector<32x32xf32>, vector<64x32xf32> -> vector<64x32xf32>
    %c0_10 = arith.constant 0 : index
    %c0_11 = arith.constant 0 : index
    %8 = vector.load %arg5[%c0_10, %c0_11] : memref<1x32xf32, #tpu.memory_space<vmem>>, vector<1x32xf32>
    %9 = vector.broadcast %8 : vector<1x32xf32> to vector<64x32xf32>
    %10 = arith.addf %7, %9 : vector<64x32xf32>
    %cst_12 = arith.constant 5.000000e-01 : f32
    %11 = vector.broadcast %cst_12 : f32 to vector<64x32xf32>
    %12 = arith.mulf %10, %11 : vector<64x32xf32>
    %c0_13 = arith.constant 0 : index
    %c0_14 = arith.constant 0 : index
    %13 = vector.load %arg6[%c0_13, %c0_14] : memref<32x32xf32, #tpu.memory_space<vmem>>, vector<32x32xf32>
    %cst_15 = arith.constant dense<0.000000e+00> : vector<128x32xf32>
    %14 = tpu.matmul %3, %13, %cst_15 {dimension_numbers = #tpu.dot_dimension_numbers<[1], [0], [0], [1], [0, 0, 1, 1], [], []>} : vector<128x32xf32>, vector<32x32xf32>, vector<128x32xf32> -> vector<128x32xf32>
    %c0_16 = arith.constant 0 : index
    %c0_17 = arith.constant 0 : index
    %15 = vector.load %arg7[%c0_16, %c0_17] : memref<1x32xf32, #tpu.memory_space<vmem>>, vector<1x32xf32>
    %16 = vector.broadcast %15 : vector<1x32xf32> to vector<128x32xf32>
    %17 = arith.addf %14, %16 : vector<128x32xf32>
    %c0_18 = arith.constant 0 : index
    %c0_19 = arith.constant 0 : index
    %18 = vector.load %arg8[%c0_18, %c0_19] : memref<32x32xf32, #tpu.memory_space<vmem>>, vector<32x32xf32>
    %cst_20 = arith.constant dense<0.000000e+00> : vector<128x32xf32>
    %19 = tpu.matmul %5, %18, %cst_20 {dimension_numbers = #tpu.dot_dimension_numbers<[1], [0], [0], [1], [0, 0, 1, 1], [], []>} : vector<128x32xf32>, vector<32x32xf32>, vector<128x32xf32> -> vector<128x32xf32>
    %c0_21 = arith.constant 0 : index
    %c0_22 = arith.constant 0 : index
    %20 = vector.load %arg9[%c0_21, %c0_22] : memref<1x32xf32, #tpu.memory_space<vmem>>, vector<1x32xf32>
    %21 = vector.broadcast %20 : vector<1x32xf32> to vector<128x32xf32>
    %22 = arith.addf %19, %21 : vector<128x32xf32>
    %23 = vector.shape_cast %12 : vector<64x32xf32> to vector<8x8x32xf32>
    %24 = vector.shape_cast %17 : vector<128x32xf32> to vector<8x16x32xf32>
    %25 = vector.shape_cast %22 : vector<128x32xf32> to vector<8x16x32xf32>
    %26 = vector.extract_strided_slice %23 {offsets = [0, 0, 0], sizes = [8, 8, 4], strides = [1, 1, 1]} : vector<8x8x32xf32> to vector<8x8x4xf32>
    %27 = vector.extract_strided_slice %24 {offsets = [0, 0, 0], sizes = [8, 16, 4], strides = [1, 1, 1]} : vector<8x16x32xf32> to vector<8x16x4xf32>
    %28 = vector.extract_strided_slice %25 {offsets = [0, 0, 0], sizes = [8, 16, 4], strides = [1, 1, 1]} : vector<8x16x32xf32> to vector<8x16x4xf32>
    "tpu.trace_start"() <{level = 10 : i32, message = "gqe,gke->gqk"}> : () -> ()
    %cst_23 = arith.constant dense<0.000000e+00> : vector<8x8x16xf32>
    %29 = tpu.matmul %26, %27, %cst_23 {dimension_numbers = #tpu.dot_dimension_numbers<[2], [2], [1], [1], [0, 0, 0, 1, 1, 1], [0], [0]>} : vector<8x8x4xf32>, vector<8x16x4xf32>, vector<8x8x16xf32> -> vector<8x8x16xf32>
    "tpu.trace_stop"() : () -> ()
    %cst_24 = arith.constant dense<0xFF800000> : vector<8x8xf32>
    %30 = vector.multi_reduction <maximumf>, %29, %cst_24 [2] : vector<8x8x16xf32> to vector<8x8xf32>
    %31 = vector.shape_cast %30 : vector<8x8xf32> to vector<8x8x1xf32>
    %32 = vector.broadcast %31 : vector<8x8x1xf32> to vector<8x8x16xf32>
    %33 = arith.subf %29, %32 : vector<8x8x16xf32>
    %34 = math.exp %33 : vector<8x8x16xf32>
    %cst_25 = arith.constant dense<0.000000e+00> : vector<8x8xf32>
    %35 = vector.multi_reduction <add>, %34, %cst_25 [2] : vector<8x8x16xf32> to vector<8x8xf32>
    %36 = vector.shape_cast %35 : vector<8x8xf32> to vector<8x8x1xf32>
    %37 = tpu.reciprocal %36 : vector<8x8x1xf32> -> vector<8x8x1xf32>
    %38 = vector.broadcast %37 : vector<8x8x1xf32> to vector<8x8x16xf32>
    %39 = arith.mulf %34, %38 : vector<8x8x16xf32>
    "tpu.trace_start"() <{level = 10 : i32, message = "gqk,gke->gqe"}> : () -> ()
    %cst_26 = arith.constant dense<0.000000e+00> : vector<8x8x4xf32>
    %40 = tpu.matmul %39, %28, %cst_26 {dimension_numbers = #tpu.dot_dimension_numbers<[2], [1], [1], [2], [0, 0, 0, 1, 1, 2], [0], [0]>} : vector<8x8x16xf32>, vector<8x16x4xf32>, vector<8x8x4xf32> -> vector<8x8x4xf32>
    "tpu.trace_stop"() : () -> ()
    %41 = vector.shape_cast %40 : vector<8x8x4xf32> to vector<64x4xf32>
    %c0_27 = arith.constant 0 : index
    %c0_28 = arith.constant 0 : index
    %42 = vector.load %arg13[%c0_27, %c0_28] : memref<64x32xf32, #tpu.memory_space<vmem>>, vector<64x4xf32>
    tpu.vector_store %arg13[%c0_27, %c0_28], %41 {strides = array<i32>} : memref<64x32xf32, #tpu.memory_space<vmem>>, vector<64x4xf32>,
    %43 = vector.extract_strided_slice %23 {offsets = [0, 0, 4], sizes = [8, 8, 4], strides = [1, 1, 1]} : vector<8x8x32xf32> to vector<8x8x4xf32>
    %44 = vector.extract_strided_slice %24 {offsets = [0, 0, 4], sizes = [8, 16, 4], strides = [1, 1, 1]} : vector<8x16x32xf32> to vector<8x16x4xf32>
    %45 = vector.extract_strided_slice %25 {offsets = [0, 0, 4], sizes = [8, 16, 4], strides = [1, 1, 1]} : vector<8x16x32xf32> to vector<8x16x4xf32>
    "tpu.trace_start"() <{level = 10 : i32, message = "gqe,gke->gqk"}> : () -> ()
    %cst_29 = arith.constant dense<0.000000e+00> : vector<8x8x16xf32>
    %46 = tpu.matmul %43, %44, %cst_29 {dimension_numbers = #tpu.dot_dimension_numbers<[2], [2], [1], [1], [0, 0, 0, 1, 1, 1], [0], [0]>} : vector<8x8x4xf32>, vector<8x16x4xf32>, vector<8x8x16xf32> -> vector<8x8x16xf32>
    "tpu.trace_stop"() : () -> ()
    %cst_30 = arith.constant dense<0xFF800000> : vector<8x8xf32>
    %47 = vector.multi_reduction <maximumf>, %46, %cst_30 [2] : vector<8x8x16xf32> to vector<8x8xf32>
    %48 = vector.shape_cast %47 : vector<8x8xf32> to vector<8x8x1xf32>
    %49 = vector.broadcast %48 : vector<8x8x1xf32> to vector<8x8x16xf32>
    %50 = arith.subf %46, %49 : vector<8x8x16xf32>
    %51 = math.exp %50 : vector<8x8x16xf32>
    %cst_31 = arith.constant dense<0.000000e+00> : vector<8x8xf32>
    %52 = vector.multi_reduction <add>, %51, %cst_31 [2] : vector<8x8x16xf32> to vector<8x8xf32>
    %53 = vector.shape_cast %52 : vector<8x8xf32> to vector<8x8x1xf32>
    %54 = tpu.reciprocal %53 : vector<8x8x1xf32> -> vector<8x8x1xf32>
    %55 = vector.broadcast %54 : vector<8x8x1xf32> to vector<8x8x16xf32>
    %56 = arith.mulf %51, %55 : vector<8x8x16xf32>
    "tpu.trace_start"() <{level = 10 : i32, message = "gqk,gke->gqe"}> : () -> ()
    %cst_32 = arith.constant dense<0.000000e+00> : vector<8x8x4xf32>
    %57 = tpu.matmul %56, %45, %cst_32 {dimension_numbers = #tpu.dot_dimension_numbers<[2], [1], [1], [2], [0, 0, 0, 1, 1, 2], [0], [0]>} : vector<8x8x16xf32>, vector<8x16x4xf32>, vector<8x8x4xf32> -> vector<8x8x4xf32>
    "tpu.trace_stop"() : () -> ()
    %58 = vector.shape_cast %57 : vector<8x8x4xf32> to vector<64x4xf32>
    %c0_33 = arith.constant 0 : index
    %c4 = arith.constant 4 : index
    %59 = vector.load %arg13[%c0_33, %c4] : memref<64x32xf32, #tpu.memory_space<vmem>>, vector<64x4xf32>
    tpu.vector_store %arg13[%c0_33, %c4], %58 {strides = array<i32>} : memref<64x32xf32, #tpu.memory_space<vmem>>, vector<64x4xf32>,
    %60 = vector.extract_strided_slice %23 {offsets = [0, 0, 8], sizes = [8, 8, 4], strides = [1, 1, 1]} : vector<8x8x32xf32> to vector<8x8x4xf32>
    %61 = vector.extract_strided_slice %24 {offsets = [0, 0, 8], sizes = [8, 16, 4], strides = [1, 1, 1]} : vector<8x16x32xf32> to vector<8x16x4xf32>
    %62 = vector.extract_strided_slice %25 {offsets = [0, 0, 8], sizes = [8, 16, 4], strides = [1, 1, 1]} : vector<8x16x32xf32> to vector<8x16x4xf32>
    "tpu.trace_start"() <{level = 10 : i32, message = "gqe,gke->gqk"}> : () -> ()
    %cst_34 = arith.constant dense<0.000000e+00> : vector<8x8x16xf32>
    %63 = tpu.matmul %60, %61, %cst_34 {dimension_numbers = #tpu.dot_dimension_numbers<[2], [2], [1], [1], [0, 0, 0, 1, 1, 1], [0], [0]>} : vector<8x8x4xf32>, vector<8x16x4xf32>, vector<8x8x16xf32> -> vector<8x8x16xf32>
    "tpu.trace_stop"() : () -> ()
    %cst_35 = arith.constant dense<0xFF800000> : vector<8x8xf32>
    %64 = vector.multi_reduction <maximumf>, %63, %cst_35 [2] : vector<8x8x16xf32> to vector<8x8xf32>
    %65 = vector.shape_cast %64 : vector<8x8xf32> to vector<8x8x1xf32>
    %66 = vector.broadcast %65 : vector<8x8x1xf32> to vector<8x8x16xf32>
    %67 = arith.subf %63, %66 : vector<8x8x16xf32>
    %68 = math.exp %67 : vector<8x8x16xf32>
    %cst_36 = arith.constant dense<0.000000e+00> : vector<8x8xf32>
    %69 = vector.multi_reduction <add>, %68, %cst_36 [2] : vector<8x8x16xf32> to vector<8x8xf32>
    %70 = vector.shape_cast %69 : vector<8x8xf32> to vector<8x8x1xf32>
    %71 = tpu.reciprocal %70 : vector<8x8x1xf32> -> vector<8x8x1xf32>
    %72 = vector.broadcast %71 : vector<8x8x1xf32> to vector<8x8x16xf32>
    %73 = arith.mulf %68, %72 : vector<8x8x16xf32>
    "tpu.trace_start"() <{level = 10 : i32, message = "gqk,gke->gqe"}> : () -> ()
    %cst_37 = arith.constant dense<0.000000e+00> : vector<8x8x4xf32>
    %74 = tpu.matmul %73, %62, %cst_37 {dimension_numbers = #tpu.dot_dimension_numbers<[2], [1], [1], [2], [0, 0, 0, 1, 1, 2], [0], [0]>} : vector<8x8x16xf32>, vector<8x16x4xf32>, vector<8x8x4xf32> -> vector<8x8x4xf32>
    "tpu.trace_stop"() : () -> ()
    %75 = vector.shape_cast %74 : vector<8x8x4xf32> to vector<64x4xf32>
    %c0_38 = arith.constant 0 : index
    %c8 = arith.constant 8 : index
    %76 = vector.load %arg13[%c0_38, %c8] : memref<64x32xf32, #tpu.memory_space<vmem>>, vector<64x4xf32>
    tpu.vector_store %arg13[%c0_38, %c8], %75 {strides = array<i32>} : memref<64x32xf32, #tpu.memory_space<vmem>>, vector<64x4xf32>,
    %77 = vector.extract_strided_slice %23 {offsets = [0, 0, 12], sizes = [8, 8, 4], strides = [1, 1, 1]} : vector<8x8x32xf32> to vector<8x8x4xf32>
    %78 = vector.extract_strided_slice %24 {offsets = [0, 0, 12], sizes = [8, 16, 4], strides = [1, 1, 1]} : vector<8x16x32xf32> to vector<8x16x4xf32>
    %79 = vector.extract_strided_slice %25 {offsets = [0, 0, 12], sizes = [8, 16, 4], strides = [1, 1, 1]} : vector<8x16x32xf32> to vector<8x16x4xf32>
    "tpu.trace_start"() <{level = 10 : i32, message = "gqe,gke->gqk"}> : () -> ()
    %cst_39 = arith.constant dense<0.000000e+00> : vector<8x8x16xf32>
    %80 = tpu.matmul %77, %78, %cst_39 {dimension_numbers = #tpu.dot_dimension_numbers<[2], [2], [1], [1], [0, 0, 0, 1, 1, 1], [0], [0]>} : vector<8x8x4xf32>, vector<8x16x4xf32>, vector<8x8x16xf32> -> vector<8x8x16xf32>
    "tpu.trace_stop"() : () -> ()
    %cst_40 = arith.constant dense<0xFF800000> : vector<8x8xf32>
    %81 = vector.multi_reduction <maximumf>, %80, %cst_40 [2] : vector<8x8x16xf32> to vector<8x8xf32>
    %82 = vector.shape_cast %81 : vector<8x8xf32> to vector<8x8x1xf32>
    %83 = vector.broadcast %82 : vector<8x8x1xf32> to vector<8x8x16xf32>
    %84 = arith.subf %80, %83 : vector<8x8x16xf32>
    %85 = math.exp %84 : vector<8x8x16xf32>
    %cst_41 = arith.constant dense<0.000000e+00> : vector<8x8xf32>
    %86 = vector.multi_reduction <add>, %85, %cst_41 [2] : vector<8x8x16xf32> to vector<8x8xf32>
    %87 = vector.shape_cast %86 : vector<8x8xf32> to vector<8x8x1xf32>
    %88 = tpu.reciprocal %87 : vector<8x8x1xf32> -> vector<8x8x1xf32>
    %89 = vector.broadcast %88 : vector<8x8x1xf32> to vector<8x8x16xf32>
    %90 = arith.mulf %85, %89 : vector<8x8x16xf32>
    "tpu.trace_start"() <{level = 10 : i32, message = "gqk,gke->gqe"}> : () -> ()
    %cst_42 = arith.constant dense<0.000000e+00> : vector<8x8x4xf32>
    %91 = tpu.matmul %90, %79, %cst_42 {dimension_numbers = #tpu.dot_dimension_numbers<[2], [1], [1], [2], [0, 0, 0, 1, 1, 2], [0], [0]>} : vector<8x8x16xf32>, vector<8x16x4xf32>, vector<8x8x4xf32> -> vector<8x8x4xf32>
    "tpu.trace_stop"() : () -> ()
    %92 = vector.shape_cast %91 : vector<8x8x4xf32> to vector<64x4xf32>
    %c0_43 = arith.constant 0 : index
    %c12 = arith.constant 12 : index
    %93 = vector.load %arg13[%c0_43, %c12] : memref<64x32xf32, #tpu.memory_space<vmem>>, vector<64x4xf32>
    tpu.vector_store %arg13[%c0_43, %c12], %92 {strides = array<i32>} : memref<64x32xf32, #tpu.memory_space<vmem>>, vector<64x4xf32>,
    %94 = vector.extract_strided_slice %23 {offsets = [0, 0, 16], sizes = [8, 8, 4], strides = [1, 1, 1]} : vector<8x8x32xf32> to vector<8x8x4xf32>
    %95 = vector.extract_strided_slice %24 {offsets = [0, 0, 16], sizes = [8, 16, 4], strides = [1, 1, 1]} : vector<8x16x32xf32> to vector<8x16x4xf32>
    %96 = vector.extract_strided_slice %25 {offsets = [0, 0, 16], sizes = [8, 16, 4], strides = [1, 1, 1]} : vector<8x16x32xf32> to vector<8x16x4xf32>
    "tpu.trace_start"() <{level = 10 : i32, message = "gqe,gke->gqk"}> : () -> ()
    %cst_44 = arith.constant dense<0.000000e+00> : vector<8x8x16xf32>
    %97 = tpu.matmul %94, %95, %cst_44 {dimension_numbers = #tpu.dot_dimension_numbers<[2], [2], [1], [1], [0, 0, 0, 1, 1, 1], [0], [0]>} : vector<8x8x4xf32>, vector<8x16x4xf32>, vector<8x8x16xf32> -> vector<8x8x16xf32>
    "tpu.trace_stop"() : () -> ()
    %cst_45 = arith.constant dense<0xFF800000> : vector<8x8xf32>
    %98 = vector.multi_reduction <maximumf>, %97, %cst_45 [2] : vector<8x8x16xf32> to vector<8x8xf32>
    %99 = vector.shape_cast %98 : vector<8x8xf32> to vector<8x8x1xf32>
    %100 = vector.broadcast %99 : vector<8x8x1xf32> to vector<8x8x16xf32>
    %101 = arith.subf %97, %100 : vector<8x8x16xf32>
    %102 = math.exp %101 : vector<8x8x16xf32>
    %cst_46 = arith.constant dense<0.000000e+00> : vector<8x8xf32>
    %103 = vector.multi_reduction <add>, %102, %cst_46 [2] : vector<8x8x16xf32> to vector<8x8xf32>
    %104 = vector.shape_cast %103 : vector<8x8xf32> to vector<8x8x1xf32>
    %105 = tpu.reciprocal %104 : vector<8x8x1xf32> -> vector<8x8x1xf32>
    %106 = vector.broadcast %105 : vector<8x8x1xf32> to vector<8x8x16xf32>
    %107 = arith.mulf %102, %106 : vector<8x8x16xf32>
    "tpu.trace_start"() <{level = 10 : i32, message = "gqk,gke->gqe"}> : () -> ()
    %cst_47 = arith.constant dense<0.000000e+00> : vector<8x8x4xf32>
    %108 = tpu.matmul %107, %96, %cst_47 {dimension_numbers = #tpu.dot_dimension_numbers<[2], [1], [1], [2], [0, 0, 0, 1, 1, 2], [0], [0]>} : vector<8x8x16xf32>, vector<8x16x4xf32>, vector<8x8x4xf32> -> vector<8x8x4xf32>
    "tpu.trace_stop"() : () -> ()
    %109 = vector.shape_cast %108 : vector<8x8x4xf32> to vector<64x4xf32>
    %c0_48 = arith.constant 0 : index
    %c16 = arith.constant 16 : index
    %110 = vector.load %arg13[%c0_48, %c16] : memref<64x32xf32, #tpu.memory_space<vmem>>, vector<64x4xf32>
    tpu.vector_store %arg13[%c0_48, %c16], %109 {strides = array<i32>} : memref<64x32xf32, #tpu.memory_space<vmem>>, vector<64x4xf32>,
    %111 = vector.extract_strided_slice %23 {offsets = [0, 0, 20], sizes = [8, 8, 4], strides = [1, 1, 1]} : vector<8x8x32xf32> to vector<8x8x4xf32>
    %112 = vector.extract_strided_slice %24 {offsets = [0, 0, 20], sizes = [8, 16, 4], strides = [1, 1, 1]} : vector<8x16x32xf32> to vector<8x16x4xf32>
    %113 = vector.extract_strided_slice %25 {offsets = [0, 0, 20], sizes = [8, 16, 4], strides = [1, 1, 1]} : vector<8x16x32xf32> to vector<8x16x4xf32>
    "tpu.trace_start"() <{level = 10 : i32, message = "gqe,gke->gqk"}> : () -> ()
    %cst_49 = arith.constant dense<0.000000e+00> : vector<8x8x16xf32>
    %114 = tpu.matmul %111, %112, %cst_49 {dimension_numbers = #tpu.dot_dimension_numbers<[2], [2], [1], [1], [0, 0, 0, 1, 1, 1], [0], [0]>} : vector<8x8x4xf32>, vector<8x16x4xf32>, vector<8x8x16xf32> -> vector<8x8x16xf32>
    "tpu.trace_stop"() : () -> ()
    %cst_50 = arith.constant dense<0xFF800000> : vector<8x8xf32>
    %115 = vector.multi_reduction <maximumf>, %114, %cst_50 [2] : vector<8x8x16xf32> to vector<8x8xf32>
    %116 = vector.shape_cast %115 : vector<8x8xf32> to vector<8x8x1xf32>
    %117 = vector.broadcast %116 : vector<8x8x1xf32> to vector<8x8x16xf32>
    %118 = arith.subf %114, %117 : vector<8x8x16xf32>
    %119 = math.exp %118 : vector<8x8x16xf32>
    %cst_51 = arith.constant dense<0.000000e+00> : vector<8x8xf32>
    %120 = vector.multi_reduction <add>, %119, %cst_51 [2] : vector<8x8x16xf32> to vector<8x8xf32>
    %121 = vector.shape_cast %120 : vector<8x8xf32> to vector<8x8x1xf32>
    %122 = tpu.reciprocal %121 : vector<8x8x1xf32> -> vector<8x8x1xf32>
    %123 = vector.broadcast %122 : vector<8x8x1xf32> to vector<8x8x16xf32>
    %124 = arith.mulf %119, %123 : vector<8x8x16xf32>
    "tpu.trace_start"() <{level = 10 : i32, message = "gqk,gke->gqe"}> : () -> ()
    %cst_52 = arith.constant dense<0.000000e+00> : vector<8x8x4xf32>
    %125 = tpu.matmul %124, %113, %cst_52 {dimension_numbers = #tpu.dot_dimension_numbers<[2], [1], [1], [2], [0, 0, 0, 1, 1, 2], [0], [0]>} : vector<8x8x16xf32>, vector<8x16x4xf32>, vector<8x8x4xf32> -> vector<8x8x4xf32>
    "tpu.trace_stop"() : () -> ()
    %126 = vector.shape_cast %125 : vector<8x8x4xf32> to vector<64x4xf32>
    %c0_53 = arith.constant 0 : index
    %c20 = arith.constant 20 : index
    %127 = vector.load %arg13[%c0_53, %c20] : memref<64x32xf32, #tpu.memory_space<vmem>>, vector<64x4xf32>
    tpu.vector_store %arg13[%c0_53, %c20], %126 {strides = array<i32>} : memref<64x32xf32, #tpu.memory_space<vmem>>, vector<64x4xf32>,
    %128 = vector.extract_strided_slice %23 {offsets = [0, 0, 24], sizes = [8, 8, 4], strides = [1, 1, 1]} : vector<8x8x32xf32> to vector<8x8x4xf32>
    %129 = vector.extract_strided_slice %24 {offsets = [0, 0, 24], sizes = [8, 16, 4], strides = [1, 1, 1]} : vector<8x16x32xf32> to vector<8x16x4xf32>
    %130 = vector.extract_strided_slice %25 {offsets = [0, 0, 24], sizes = [8, 16, 4], strides = [1, 1, 1]} : vector<8x16x32xf32> to vector<8x16x4xf32>
    "tpu.trace_start"() <{level = 10 : i32, message = "gqe,gke->gqk"}> : () -> ()
    %cst_54 = arith.constant dense<0.000000e+00> : vector<8x8x16xf32>
    %131 = tpu.matmul %128, %129, %cst_54 {dimension_numbers = #tpu.dot_dimension_numbers<[2], [2], [1], [1], [0, 0, 0, 1, 1, 1], [0], [0]>} : vector<8x8x4xf32>, vector<8x16x4xf32>, vector<8x8x16xf32> -> vector<8x8x16xf32>
    "tpu.trace_stop"() : () -> ()
    %cst_55 = arith.constant dense<0xFF800000> : vector<8x8xf32>
    %132 = vector.multi_reduction <maximumf>, %131, %cst_55 [2] : vector<8x8x16xf32> to vector<8x8xf32>
    %133 = vector.shape_cast %132 : vector<8x8xf32> to vector<8x8x1xf32>
    %134 = vector.broadcast %133 : vector<8x8x1xf32> to vector<8x8x16xf32>
    %135 = arith.subf %131, %134 : vector<8x8x16xf32>
    %136 = math.exp %135 : vector<8x8x16xf32>
    %cst_56 = arith.constant dense<0.000000e+00> : vector<8x8xf32>
    %137 = vector.multi_reduction <add>, %136, %cst_56 [2] : vector<8x8x16xf32> to vector<8x8xf32>
    %138 = vector.shape_cast %137 : vector<8x8xf32> to vector<8x8x1xf32>
    %139 = tpu.reciprocal %138 : vector<8x8x1xf32> -> vector<8x8x1xf32>
    %140 = vector.broadcast %139 : vector<8x8x1xf32> to vector<8x8x16xf32>
    %141 = arith.mulf %136, %140 : vector<8x8x16xf32>
    "tpu.trace_start"() <{level = 10 : i32, message = "gqk,gke->gqe"}> : () -> ()
    %cst_57 = arith.constant dense<0.000000e+00> : vector<8x8x4xf32>
    %142 = tpu.matmul %141, %130, %cst_57 {dimension_numbers = #tpu.dot_dimension_numbers<[2], [1], [1], [2], [0, 0, 0, 1, 1, 2], [0], [0]>} : vector<8x8x16xf32>, vector<8x16x4xf32>, vector<8x8x4xf32> -> vector<8x8x4xf32>
    "tpu.trace_stop"() : () -> ()
    %143 = vector.shape_cast %142 : vector<8x8x4xf32> to vector<64x4xf32>
    %c0_58 = arith.constant 0 : index
    %c24 = arith.constant 24 : index
    %144 = vector.load %arg13[%c0_58, %c24] : memref<64x32xf32, #tpu.memory_space<vmem>>, vector<64x4xf32>
    tpu.vector_store %arg13[%c0_58, %c24], %143 {strides = array<i32>} : memref<64x32xf32, #tpu.memory_space<vmem>>, vector<64x4xf32>,
    %145 = vector.extract_strided_slice %23 {offsets = [0, 0, 28], sizes = [8, 8, 4], strides = [1, 1, 1]} : vector<8x8x32xf32> to vector<8x8x4xf32>
    %146 = vector.extract_strided_slice %24 {offsets = [0, 0, 28], sizes = [8, 16, 4], strides = [1, 1, 1]} : vector<8x16x32xf32> to vector<8x16x4xf32>
    %147 = vector.extract_strided_slice %25 {offsets = [0, 0, 28], sizes = [8, 16, 4], strides = [1, 1, 1]} : vector<8x16x32xf32> to vector<8x16x4xf32>
    "tpu.trace_start"() <{level = 10 : i32, message = "gqe,gke->gqk"}> : () -> ()
    %cst_59 = arith.constant dense<0.000000e+00> : vector<8x8x16xf32>
    %148 = tpu.matmul %145, %146, %cst_59 {dimension_numbers = #tpu.dot_dimension_numbers<[2], [2], [1], [1], [0, 0, 0, 1, 1, 1], [0], [0]>} : vector<8x8x4xf32>, vector<8x16x4xf32>, vector<8x8x16xf32> -> vector<8x8x16xf32>
    "tpu.trace_stop"() : () -> ()
    %cst_60 = arith.constant dense<0xFF800000> : vector<8x8xf32>
    %149 = vector.multi_reduction <maximumf>, %148, %cst_60 [2] : vector<8x8x16xf32> to vector<8x8xf32>
    %150 = vector.shape_cast %149 : vector<8x8xf32> to vector<8x8x1xf32>
    %151 = vector.broadcast %150 : vector<8x8x1xf32> to vector<8x8x16xf32>
    %152 = arith.subf %148, %151 : vector<8x8x16xf32>
    %153 = math.exp %152 : vector<8x8x16xf32>
    %cst_61 = arith.constant dense<0.000000e+00> : vector<8x8xf32>
    %154 = vector.multi_reduction <add>, %153, %cst_61 [2] : vector<8x8x16xf32> to vector<8x8xf32>
    %155 = vector.shape_cast %154 : vector<8x8xf32> to vector<8x8x1xf32>
    %156 = tpu.reciprocal %155 : vector<8x8x1xf32> -> vector<8x8x1xf32>
    %157 = vector.broadcast %156 : vector<8x8x1xf32> to vector<8x8x16xf32>
    %158 = arith.mulf %153, %157 : vector<8x8x16xf32>
    "tpu.trace_start"() <{level = 10 : i32, message = "gqk,gke->gqe"}> : () -> ()
    %cst_62 = arith.constant dense<0.000000e+00> : vector<8x8x4xf32>
    %159 = tpu.matmul %158, %147, %cst_62 {dimension_numbers = #tpu.dot_dimension_numbers<[2], [1], [1], [2], [0, 0, 0, 1, 1, 2], [0], [0]>} : vector<8x8x16xf32>, vector<8x16x4xf32>, vector<8x8x4xf32> -> vector<8x8x4xf32>
    "tpu.trace_stop"() : () -> ()
    %160 = vector.shape_cast %159 : vector<8x8x4xf32> to vector<64x4xf32>
    %c0_63 = arith.constant 0 : index
    %c28 = arith.constant 28 : index
    %161 = vector.load %arg13[%c0_63, %c28] : memref<64x32xf32, #tpu.memory_space<vmem>>, vector<64x4xf32>
    tpu.vector_store %arg13[%c0_63, %c28], %160 {strides = array<i32>} : memref<64x32xf32, #tpu.memory_space<vmem>>, vector<64x4xf32>,
    %c0_64 = arith.constant 0 : index
    %c0_65 = arith.constant 0 : index
    %162 = vector.load %arg13[%c0_64, %c0_65] : memref<64x32xf32, #tpu.memory_space<vmem>>, vector<64x32xf32>
    %c0_66 = arith.constant 0 : index
    %c0_67 = arith.constant 0 : index
    %163 = vector.load %arg10[%c0_66, %c0_67] : memref<32x32xf32, #tpu.memory_space<vmem>>, vector<32x32xf32>
    %cst_68 = arith.constant dense<0.000000e+00> : vector<64x32xf32>
    %164 = tpu.matmul %162, %163, %cst_68 {dimension_numbers = #tpu.dot_dimension_numbers<[1], [0], [0], [1], [0, 0, 1, 1], [], []>} : vector<64x32xf32>, vector<32x32xf32>, vector<64x32xf32> -> vector<64x32xf32>
    %c0_69 = arith.constant 0 : index
    %c0_70 = arith.constant 0 : index
    %165 = vector.load %arg11[%c0_69, %c0_70] : memref<1x32xf32, #tpu.memory_space<vmem>>, vector<1x32xf32>
    %166 = vector.broadcast %165 : vector<1x32xf32> to vector<64x32xf32>
    %167 = arith.addf %164, %166 : vector<64x32xf32>
    %168 = vector.shape_cast %167 : vector<64x32xf32> to vector<8x8x32xf32>
    %c0_71 = arith.constant 0 : index
    %c0_72 = arith.constant 0 : index
    %c0_73 = arith.constant 0 : index
    %169 = vector.load %arg12[%c0_71, %c0_72, %c0_73] : memref<8x8x32xf32, #tpu.memory_space<vmem>>, vector<8x8x32xf32>
    tpu.vector_store %arg12[%c0_71, %c0_72, %c0_73], %168 {strides = array<i32>} : memref<8x8x32xf32, #tpu.memory_space<vmem>>, vector<8x8x32xf32>,
    return
  }
  func.func @transform_0(%arg0: i32) -> (i32, i32, i32) {
    %c0_i32 = arith.constant 0 : i32
    %c0_i32_0 = arith.constant 0 : i32
    %c0_i32_1 = arith.constant 0 : i32
    return %arg0, %c0_i32, %c0_i32_0 : i32, i32, i32
  }
  func.func @transform_1(%arg0: i32) -> (i32, i32, i32) {
    %c0_i32 = arith.constant 0 : i32
    %c0_i32_0 = arith.constant 0 : i32
    %c0_i32_1 = arith.constant 0 : i32
    return %arg0, %c0_i32, %c0_i32_0 : i32, i32, i32
  }
  func.func @transform_2(%arg0: i32) -> (i32, i32, i32) {
    %c0_i32 = arith.constant 0 : i32
    %c0_i32_0 = arith.constant 0 : i32
    %c0_i32_1 = arith.constant 0 : i32
    return %arg0, %c0_i32, %c0_i32_0 : i32, i32, i32
  }
  func.func @transform_3(%arg0: i32) -> (i32, i32) {
    %c0_i32 = arith.constant 0 : i32
    %c0_i32_0 = arith.constant 0 : i32
    %c0_i32_1 = arith.constant 0 : i32
    return %c0_i32, %c0_i32_0 : i32, i32
  }
  func.func @transform_4(%arg0: i32) -> (i32, i32) {
    %c0_i32 = arith.constant 0 : i32
    %c0_i32_0 = arith.constant 0 : i32
    %c0_i32_1 = arith.constant 0 : i32
    return %c0_i32, %c0_i32_0 : i32, i32
  }
  func.func @transform_5(%arg0: i32) -> (i32, i32) {
    %c0_i32 = arith.constant 0 : i32
    %c0_i32_0 = arith.constant 0 : i32
    %c0_i32_1 = arith.constant 0 : i32
    return %c0_i32, %c0_i32_0 : i32, i32
  }
  func.func @transform_6(%arg0: i32) -> (i32, i32) {
    %c0_i32 = arith.constant 0 : i32
    %c0_i32_0 = arith.constant 0 : i32
    %c0_i32_1 = arith.constant 0 : i32
    return %c0_i32, %c0_i32_0 : i32, i32
  }
  func.func @transform_7(%arg0: i32) -> (i32, i32) {
    %c0_i32 = arith.constant 0 : i32
    %c0_i32_0 = arith.constant 0 : i32
    %c0_i32_1 = arith.constant 0 : i32
    return %c0_i32, %c0_i32_0 : i32, i32
  }
  func.func @transform_8(%arg0: i32) -> (i32, i32) {
    %c0_i32 = arith.constant 0 : i32
    %c0_i32_0 = arith.constant 0 : i32
    %c0_i32_1 = arith.constant 0 : i32
    return %c0_i32, %c0_i32_0 : i32, i32
  }
  func.func @transform_9(%arg0: i32) -> (i32, i32) {
    %c0_i32 = arith.constant 0 : i32
    %c0_i32_0 = arith.constant 0 : i32
    %c0_i32_1 = arith.constant 0 : i32
    return %c0_i32, %c0_i32_0 : i32, i32
  }
  func.func @transform_10(%arg0: i32) -> (i32, i32) {
    %c0_i32 = arith.constant 0 : i32
    %c0_i32_0 = arith.constant 0 : i32
    %c0_i32_1 = arith.constant 0 : i32
    return %c0_i32, %c0_i32_0 : i32, i32
  }
  func.func @transform_11(%arg0: i32) -> (i32, i32, i32) {
    %c0_i32 = arith.constant 0 : i32
    %c0_i32_0 = arith.constant 0 : i32
    %c0_i32_1 = arith.constant 0 : i32
    return %arg0, %c0_i32, %c0_i32_0 : i32, i32, i32
  }
}

</mosaic_0001>

<bundles_post_ra>
// kernel: tpu_custom_call.1
= control target key start
LH: loop header
LB: loop body
LE: loop exit
PB: predicated region body
PF: predicated region fallthrough
CT: control target
= control target key end

     0   :  { %16 = vsyncpa [#allocation4], 0  ;;  %s17240_s0 = inlined_call_operand.hbm [shape: f32[8,8,32], index: 0, kind: input, shape index: {}]   ;;  %s17241_s1 = inlined_call_operand.hbm [shape: f32[8,16,32], index: 1, kind: input, shape index: {}]   ;;  %s17242_s2 = inlined_call_operand.hbm [shape: f32[8,16,32], index: 2, kind: input, shape index: {}]   ;;  %s17243_s3 = inlined_call_operand.hbm [shape: f32[32,32], index: 3, kind: input, shape index: {}]   ;;  %s17244_s4 = inlined_call_operand.vmem [shape: f32[1,32], index: 4, kind: input, shape index: {}]   ;;  %s17245_s5 = inlined_call_operand.hbm [shape: f32[32,32], index: 5, kind: input, shape index: {}]   ;;  %s17246_s6 = inlined_call_operand.vmem [shape: f32[1,32], index: 6, kind: input, shape index: {}]   ;;  %s17247_s7 = inlined_call_operand.hbm [shape: f32[32,32], index: 7, kind: input, shape index: {}]   ;;  %s17248_s8 = inlined_call_operand.vmem [shape: f32[1,32], index: 8, kind: input, shape index: {}]   ;;  %s17249_s9 = inlined_call_operand.hbm [shape: f32[32,32], index: 9, kind: input, shape index: {}]   ;;  %s17250_s10 = inlined_call_operand.vmem [shape: f32[1,32], index: 10, kind: input, shape index: {}]   ;;  %s17251_s11 = inlined_call_operand.hbm [shape: f32[8,8,32], index: 11, kind: output, shape index: {}]  }
   0x1   :  { %17 = vsyncpa [#allocation7], 0 }
   0x2   :  { %18 = vsyncpa [#allocation10], 0 }
   0x3   :  { %19 = vsyncpa [#allocation13], 0 }
   0x4   :  { %20 = vsyncpa [#allocation5], 0  ;;  %s14371_s17 = smov [#allocation6]   ;;  %s14372_s19 = smov [#allocation9]  }
   0x5   :  { %s38_s18 = sshll.u32 %s14371_s17, 4  ;;  %s62_s20 = sshll.u32 %s14372_s19, 4  ;;  %s39_s18 = int_to_ptr.vmem [resolvable:$true] %s38_s18  ;;  %s63_s20 = int_to_ptr.vmem [resolvable:$true] %s62_s20 }
   0x6   :  { %s14209_s21 = scalar_lea.vmem %s39_s18, 2048  ;;  %p14214_p1 = scmp.lt.s32.totalorder %s39_s18, %s39_s18 }
   0x7   :  { %p14210_p0 = scmp.ne.s32.totalorder %s39_s18, %s14209_s21  ;;  %p14215_p2 = scmp.lt.s32.totalorder %s14209_s21, %s14209_s21 }
   0x9   :  { %p14216_p3 = por %p14215_p2, %p14214_p1 }
   0xb   :  { %p14217_p4 = pnand %p14216_p3, %p14210_p0 }
   0xd   :  { %14220 = shalt.err (!%p14217_p4)
}
   0xe   :  { %s14373_s22 = smov 128   ;;  %s14374_s23 = smov 8  }
   0xf   :  { %44 = dma.hbm_to_vmem [thread:$0]  %s17241_s1, 2048, %s39_s18, [#allocation7], %s14373_s22, %s14373_s22, %s14374_s23  }
  0x10   :  { %s14229_s26 = scalar_lea.vmem %s63_s20, 512  ;;  %p14234_p6 = scmp.lt.s32.totalorder %s63_s20, %s63_s20 }
  0x11   :  { %p14230_p5 = scmp.ne.s32.totalorder %s63_s20, %s14229_s26  ;;  %p14235_p7 = scmp.lt.s32.totalorder %s14229_s26, %s14229_s26 }
  0x13   :  { %p14236_p8 = por %p14235_p7, %p14234_p6 }
  0x15   :  { %p14237_p9 = pnand %p14236_p8, %p14230_p5 }
  0x17   :  { %14240 = shalt.err (!%p14237_p9)
}
  0x18   :  { %68 = dma.hbm_to_vmem [thread:$0]  %s17243_s3, 512, %s63_s20, [#allocation10], %s14373_s22, %s14373_s22, %s14374_s23  }
  0x19   :  { %s14375_s29 = smov [#allocation12]   ;;  %s14376_s12 = smov [#allocation3]  }
  0x1a   :  { %s90_s30 = sshll.u32 %s14375_s29, 4  ;;  %s26_s13 = sshll.u32 %s14376_s12, 4  ;;  %s91_s30 = int_to_ptr.vmem [resolvable:$true] %s90_s30  ;;  %s27_s13 = int_to_ptr.vmem [resolvable:$true] %s26_s13 }
  0x1b   :  { %s14249_s1 = scalar_lea.vmem %s91_s30, 512  ;;  %p14254_p11 = scmp.lt.s32.totalorder %s91_s30, %s91_s30 }
  0x1c   :  { %p14250_p10 = scmp.ne.s32.totalorder %s91_s30, %s14249_s1  ;;  %p14255_p12 = scmp.lt.s32.totalorder %s14249_s1, %s14249_s1 }
  0x1e   :  { %p14256_p13 = por %p14255_p12, %p14254_p11 }
  0x20   :  { %p14257_p0 = pnand %p14256_p13, %p14250_p10 }
  0x22   :  { %14260 = shalt.err (!%p14257_p0)
}
  0x23   :  { %96 = dma.hbm_to_vmem [thread:$0]  %s17247_s7, 512, %s91_s30, [#allocation13], %s14373_s22, %s14373_s22, %s14374_s23  }
  0x24   :  { %s14269_s3 = scalar_lea.vmem %s27_s13, 1024  ;;  %p14274_p2 = scmp.lt.s32.totalorder %s27_s13, %s27_s13 }
  0x25   :  { %p14270_p1 = scmp.ne.s32.totalorder %s27_s13, %s14269_s3  ;;  %p14275_p3 = scmp.lt.s32.totalorder %s14269_s3, %s14269_s3 }
  0x27   :  { %p14276_p4 = por %p14275_p3, %p14274_p2 }
  0x29   :  { %p14277_p5 = pnand %p14276_p4, %p14270_p1 }
  0x2b   :  { %14280 = shalt.err (!%p14277_p5)
}
  0x2c   :  { %32 = dma.hbm_to_vmem [thread:$0]  %s17240_s0, 1024, %s27_s13, [#allocation4], %s14373_s22, %s14373_s22, %s14374_s23  }
  0x2d   :  { %s14377_s18 = smov [#allocation8]   ;;  %s14378_s20 = smov [#allocation11]  }
  0x2e   :  { %s50_s19 = sshll.u32 %s14377_s18, 4  ;;  %s76_s21 = sshll.u32 %s14378_s20, 4  ;;  %s51_s19 = int_to_ptr.vmem [resolvable:$true] %s50_s19  ;;  %s77_s21 = int_to_ptr.vmem [resolvable:$true] %s76_s21 }
  0x2f   :  { %s14289_s7 = scalar_lea.vmem %s51_s19, 2048  ;;  %p14294_p7 = scmp.lt.s32.totalorder %s51_s19, %s51_s19 }
  0x30   :  { %p14290_p6 = scmp.ne.s32.totalorder %s51_s19, %s14289_s7  ;;  %p14295_p8 = scmp.lt.s32.totalorder %s14289_s7, %s14289_s7 }
  0x32   :  { %p14296_p9 = por %p14295_p8, %p14294_p7 }
  0x34   :  { %p14297_p10 = pnand %p14296_p9, %p14290_p6 }
  0x36   :  { %14300 = shalt.err (!%p14297_p10)
}
  0x37   :  { %56 = dma.hbm_to_vmem [thread:$0]  %s17242_s2, 2048, %s51_s19, [#allocation7], %s14373_s22, %s14373_s22, %s14374_s23  }
  0x38   :  { %s14309_s0 = scalar_lea.vmem %s77_s21, 512  ;;  %p14314_p12 = scmp.lt.s32.totalorder %s77_s21, %s77_s21 }
  0x39   :  { %p14310_p11 = scmp.ne.s32.totalorder %s77_s21, %s14309_s0  ;;  %p14315_p13 = scmp.lt.s32.totalorder %s14309_s0, %s14309_s0 }
  0x3b   :  { %p14316_p0 = por %p14315_p13, %p14314_p12 }
  0x3d   :  { %p14317_p1 = pnand %p14316_p0, %p14310_p11 }
  0x3f   :  { %14320 = shalt.err (!%p14317_p1)
}
  0x40   :  { %82 = dma.hbm_to_vmem [thread:$0]  %s17245_s5, 512, %s77_s21, [#allocation10], %s14373_s22, %s14373_s22, %s14374_s23  }
  0x41   :  { %s14379_s28 = smov [#allocation14]  }
  0x42   :  { %s104_s29 = sshll.u32 %s14379_s28, 4  ;;  %s105_s29 = int_to_ptr.vmem [resolvable:$true] %s104_s29 }
  0x43   :  { %s14329_s30 = scalar_lea.vmem %s105_s29, 512  ;;  %p14334_p3 = scmp.lt.s32.totalorder %s105_s29, %s105_s29 }
  0x44   :  { %p14330_p2 = scmp.ne.s32.totalorder %s105_s29, %s14329_s30  ;;  %p14335_p4 = scmp.lt.s32.totalorder %s14329_s30, %s14329_s30 }
  0x46   :  { %p14336_p5 = por %p14335_p4, %p14334_p3 }
  0x48   :  { %p14337_p6 = pnand %p14336_p5, %p14330_p2 }
  0x4a   :  { %14340 = shalt.err (!%p14337_p6)
}
  0x4b   :  { %110 = dma.hbm_to_vmem [thread:$0]  %s17249_s9, 512, %s105_s29, [#allocation13], %s14373_s22, %s14373_s22, %s14374_s23  }
  0x4c   :  { %14361 = dma.done.wait [#allocation4], 1024  }
  0x4d   :  { %14362 = vsyncadd [#allocation4], 4294966272 }
  0x4e   :  { %14363 = dma.done.wait [#allocation7], 4096  }
  0x4f   :  { %14364 = vsyncadd [#allocation7], 4294963200 }
  0x50   :  { %14365 = dma.done.wait [#allocation10], 1024  }
  0x51   :  { %14366 = vsyncadd [#allocation10], 4294966272 }
  0x52   :  { %14367 = dma.done.wait [#allocation13], 1024  }
  0x53   :  { %14368 = vsyncadd [#allocation13], 4294966272  ;;  %vm185_vm0 = vcmask 261120   ;;  %v177_v0 = vld [vmem:[#allocation9 + $0x18] sm:$0xff]  ;;  %v176_v1 = vld [vmem:[#allocation9 + $0x10] sm:$0xff]  ;;  %v17252_v46 = vmov 0.0  }
  0x54   :  { %13912 = vmatprep.subr.mxu1 %v177_v0  ;;  %v138_v2 = vld [vmem:[#allocation3 + $0x20] sm:$0xff]  ;;  %12912 = vmatprep.subr.mxu0 %v177_v0  ;;  %v175_v3 = vld [vmem:[#allocation9 + $0x8] sm:$0xff]  ;;  %v326_v6 = vld [vmem:[#allocation11 + $0x18] sm:$0xff]  ;;  %vm14381_vm1 = vmmov 0   ;;  %vm731_vm2 = vcmask 31744   ;;  %vm1364_vm3 = vcmask 130048  }
  0x55   :  { %13916 = vmatpush3.msra.mxu1 %v177_v0  ;;  %12926 = vmatprep.mubr.msk.f32.mxu1 %vm185_vm0, %v138_v2  ;;  %v174_v4 = vld [vmem:[#allocation9] sm:$0xff]  ;;  %v139_v5 = vld [vmem:[#allocation3 + $0x28] sm:$0xff]  ;;  %v140_v7 = vld [vmem:[#allocation3 + $0x30] sm:$0xff]  ;;  %s14383_s14 = smov 120   ;;  %s14384_s15 = smov 116   ;;  %vm3469_vm4 = vcmask 64544  }
  0x56   :  { %13913 = vmatprep.subr.mxu1 %v176_v1  ;;  %12913 = vmatpush3.msra.mxu0 %v177_v0  ;;  %v325_v8 = vld [vmem:[#allocation11 + $0x10] sm:$0xff]  ;;  %v134_v9 = vld [vmem:[#allocation3] sm:$0xff]  ;;  %v141_v10 = vld [vmem:[#allocation3 + $0x38] sm:$0xff]  ;;  %s14385_s3 = smov 112   ;;  %s14386_s16 = smov 108   ;;  %vm4886_vm5 = vcmask 97344  }
  0x57   :  { %13917 = vmatpush3.msra.mxu1 %v176_v1  ;;  %12914 = vmatprep.subr.mxu0 %v176_v1  ;;  %v324_v11 = vld [vmem:[#allocation11 + $0x8] sm:$0xff]  ;;  %v142_v12 = vld [vmem:[#allocation6] sm:$0xff]  ;;  %v136_v15 = vld [vmem:[#allocation3 + $0x10] sm:$0xff]  ;;  %s14387_s17 = smov 104   ;;  %s14388_s18 = smov 100   ;;  %vm6303_vm6 = vcmask 130144  }
  0x58   :  { %13914 = vmatprep.subr.mxu1 %v175_v3  ;;  %12915 = vmatpush3.msra.mxu0 %v176_v1  ;;  %v323_v13 = vld [vmem:[#allocation11] sm:$0xff]  ;;  %v135_v14 = vld [vmem:[#allocation3 + $0x8] sm:$0xff]  ;;  %v530_v17 = vld [vmem:[#allocation12 + $0x18] sm:$0xff]  ;;  %s14389_s19 = smov 4   ;;  %s14390_s20 = smov 12   ;;  %vm7720_vm7 = vcmask 162944  }
  0x59   :  { %13918 = vmatpush3.msra.mxu1 %v175_v3  ;;  %12916 = vmatprep.subr.mxu0 %v175_v3  ;;  %v143_v16 = vld [vmem:[#allocation6 + $0x8] sm:$0xff]  ;;  %v144_v18 = vld [vmem:[#allocation6 + $0x10] sm:$0xff]  ;;  %v137_v19 = vld [vmem:[#allocation3 + $0x18] sm:$0xff]  ;;  %s14391_s21 = smov 16   ;;  %s14392_s7 = smov 20   ;;  %vm9137_vm8 = vcmask 195744  }
  0x5a   :  { %13915 = vmatprep.subr.mxu1 %v174_v4  ;;  %12917 = vmatpush3.msra.mxu0 %v175_v3  ;;  %v529_v20 = vld [vmem:[#allocation12 + $0x10] sm:$0xff]  ;;  %v158_v21 = vld [vmem:[#allocation8] sm:$0xff]  ;;  %v145_v22 = vld [vmem:[#allocation6 + $0x18] sm:$0xff]  ;;  %s14393_s24 = smov 24   ;;  %vm10554_vm9 = vcmask 228544   ;;  %s14394_s25 = smov 28  }
  0x5b   :  { %13919 = vmatpush3.msra.mxu1 %v174_v4  ;;  %12918 = vmatprep.subr.mxu0 %v174_v4  ;;  %v528_v23 = vld [vmem:[#allocation12 + $0x8] sm:$0xff]  ;;  %v146_v24 = vld [vmem:[#allocation6 + $0x20] sm:$0xff]  ;;  %v148_v28 = vld [vmem:[#allocation6 + $0x30] sm:$0xff]  ;;  %vm11971_vm10 = vcmask 261344  }
  0x5c   :  { %12927 = vmatmul.mubr.msk.f32.vlgmr.msra.gmra.mxu1 %vm185_vm0, %v139_v5  ;;  %12932 = vmatprep.subr.mxu1 %v326_v6  ;;  %v527_v25 = vld [vmem:[#allocation12] sm:$0xff]  ;;  %v147_v26 = vld [vmem:[#allocation6 + $0x28] sm:$0xff]  ;;  %v160_v29 = vld [vmem:[#allocation8 + $0x10] sm:$0xff] }
  0x5d   :  { %12933 = vmatpush3.msra.mxu1 %v326_v6  ;;  %12929 = vmatprep.mubr.msk.f32.mxu1 %vm185_vm0, %v140_v7  ;;  %v159_v27 = vld [vmem:[#allocation8 + $0x8] sm:$0xff]  ;;  %v149_v30 = vld [vmem:[#allocation6 + $0x38] sm:$0xff]  ;;  %v150_v32 = vld [vmem:[#allocation6 + $0x40] sm:$0xff] }
  0x5e   :  { %12934 = vmatprep.subr.mxu1 %v325_v8  ;;  %12919 = vmatpush3.msra.mxu0 %v174_v4  ;;  %v161_v31 = vld [vmem:[#allocation8 + $0x18] sm:$0xff]  ;;  %v151_v33 = vld [vmem:[#allocation6 + $0x48] sm:$0xff]  ;;  %v152_v34 = vld [vmem:[#allocation6 + $0x50] sm:$0xff] }
  0x5f   :  { %12935 = vmatpush3.msra.mxu1 %v325_v8  ;;  %12920 = vmatprep.mubr.msk.f32.mxu0 %vm185_vm0, %v134_v9  ;;  %v153_v35 = vld [vmem:[#allocation6 + $0x58] sm:$0xff]  ;;  %v154_v36 = vld [vmem:[#allocation6 + $0x60] sm:$0xff]  ;;  %v155_v37 = vld [vmem:[#allocation6 + $0x68] sm:$0xff] }
  0x60   :  { %12930 = vmatmul.mubr.msk.f32.gmra.mxu1 %vm185_vm0, %v141_v10  ;;  %12936 = vmatprep.subr.mxu1 %v324_v11  ;;  %v156_v38 = vld [vmem:[#allocation6 + $0x70] sm:$0xff]  ;;  %v157_v39 = vld [vmem:[#allocation6 + $0x78] sm:$0xff]  ;;  %v162_v40 = vld [vmem:[#allocation8 + $0x20] sm:$0xff] }
  0x61   :  { %12937 = vmatpush3.msra.mxu1 %v324_v11  ;;  %12940 = vmatprep.mubr.msk.f32.mxu1 %vm185_vm0, %v142_v12  ;;  %v163_v41 = vld [vmem:[#allocation8 + $0x28] sm:$0xff]  ;;  %v164_v42 = vld [vmem:[#allocation8 + $0x30] sm:$0xff]  ;;  %v165_v43 = vld [vmem:[#allocation8 + $0x38] sm:$0xff] }
  0x62   :  { %12938 = vmatprep.subr.mxu1 %v323_v13  ;;  %12921 = vmatmul.mubr.msk.f32.vlgmr.msra.gmra.mxu0 %vm185_vm0, %v135_v14  ;;  %v166_v44 = vld [vmem:[#allocation8 + $0x40] sm:$0xff]  ;;  %v167_v45 = vld [vmem:[#allocation8 + $0x48] sm:$0xff]  ;;  %v168_v47 = vld [vmem:[#allocation8 + $0x50] sm:$0xff] }
  0x63   :  { %12939 = vmatpush3.msra.mxu1 %v323_v13  ;;  %12923 = vmatprep.mubr.msk.f32.mxu0 %vm185_vm0, %v136_v15  ;;  %v169_v48 = vld [vmem:[#allocation8 + $0x58] sm:$0xff]  ;;  %v170_v49 = vld [vmem:[#allocation8 + $0x60] sm:$0xff]  ;;  %v171_v50 = vld [vmem:[#allocation8 + $0x68] sm:$0xff] }
  0x64   :  { %12941 = vmatmul.mubr.msk.f32.vlgmr.msra.gmra.mxu1 %vm185_vm0, %v143_v16  ;;  %12964 = vmatprep.subr.mxu0 %v530_v17  ;;  %v172_v51 = vld [vmem:[#allocation8 + $0x70] sm:$0xff]  ;;  %v173_v52 = vld [vmem:[#allocation8 + $0x78] sm:$0xff]  ;;  %v14553_v57 = vld [vmem:[%s17246_s6] ss:$0 sm:$0xff] }
  0x65   :  { %12943 = vmatprep.mubr.msk.f32.mxu1 %vm185_vm0, %v144_v18  ;;  %12965 = vmatpush3.msra.mxu0 %v530_v17  ;;  %v14558_v61 = vld [vmem:[%s17244_s4] ss:$0 sm:$0xff] }
  0x66   :  { %12924 = vmatmul.mubr.msk.f32.gmra.mxu0 %vm185_vm0, %v137_v19  ;;  %12966 = vmatprep.subr.mxu0 %v529_v20 }
  0x67   :  { %12967 = vmatpush3.msra.mxu0 %v529_v20  ;;  %12972 = vmatprep.mubr.msk.f32.mxu0 %vm185_vm0, %v158_v21 }
  0x68   :  { %12944 = vmatmul.mubr.msk.f32.gmra.mxu1 %vm185_vm0, %v145_v22  ;;  %12968 = vmatprep.subr.mxu0 %v528_v23 }
  0x69   :  { %12946 = vmatprep.mubr.msk.f32.mxu1 %vm185_vm0, %v146_v24  ;;  %12969 = vmatpush3.msra.mxu0 %v528_v23 }
  0x6a   :  { %12970 = vmatprep.subr.mxu0 %v527_v25  ;;  %12996 = vmatprep.subr.mxu1 %v17252_v46 }
  0x6b   :  { %12971 = vmatpush3.msra.mxu0 %v527_v25 }
  0x6c   :  { %12947 = vmatmul.mubr.msk.f32.gmra.mxu1 %vm185_vm0, %v147_v26  ;;  %12973 = vmatmul.mubr.msk.f32.vlgmr.msra.gmra.mxu0 %vm185_vm0, %v159_v27 }
  0x6d   :  { %12949 = vmatprep.mubr.msk.f32.mxu1 %vm185_vm0, %v148_v28  ;;  %12975 = vmatprep.mubr.msk.f32.mxu0 %vm185_vm0, %v160_v29 }
  0x6e   :  { %13010 = vmatprep.subr.mxu0 %v17252_v46 }
  0x70   :  { %12950 = vmatmul.mubr.msk.f32.gmra.mxu1 %vm185_vm0, %v149_v30  ;;  %12976 = vmatmul.mubr.msk.f32.gmra.mxu0 %vm185_vm0, %v161_v31 }
  0x71   :  { %12952 = vmatprep.mubr.msk.f32.mxu1 %vm185_vm0, %v150_v32  ;;  %12978 = vmatprep.mubr.msk.f32.mxu0 %vm185_vm0, %v162_v40 }
  0x74   :  { %12953 = vmatmul.mubr.msk.f32.gmra.mxu1 %vm185_vm0, %v151_v33  ;;  %12979 = vmatmul.mubr.msk.f32.gmra.mxu0 %vm185_vm0, %v163_v41  ;;  %v14680_v41 = vld [vmem:[%s17248_s8] ss:$0 sm:$0xff]  ;;  %s14382_s8 = smov 124  }
  0x75   :  { %12955 = vmatprep.mubr.msk.f32.mxu1 %vm185_vm0, %v152_v34  ;;  %12981 = vmatprep.mubr.msk.f32.mxu0 %vm185_vm0, %v164_v42 }
  0x78   :  { %12956 = vmatmul.mubr.msk.f32.gmra.mxu1 %vm185_vm0, %v153_v35  ;;  %12982 = vmatmul.mubr.msk.f32.gmra.mxu0 %vm185_vm0, %v165_v43 }
  0x79   :  { %12958 = vmatprep.mubr.msk.f32.mxu1 %vm185_vm0, %v154_v36  ;;  %12984 = vmatprep.mubr.msk.f32.mxu0 %vm185_vm0, %v166_v44 }
  0x7c   :  { %12959 = vmatmul.mubr.msk.f32.gmra.mxu1 %vm185_vm0, %v155_v37  ;;  %12985 = vmatmul.mubr.msk.f32.gmra.mxu0 %vm185_vm0, %v167_v45 }
  0x7d   :  { %12961 = vmatprep.mubr.msk.f32.mxu1 %vm185_vm0, %v156_v38  ;;  %12987 = vmatprep.mubr.msk.f32.mxu0 %vm185_vm0, %v168_v47 }
  0x80   :  { %12962 = vmatmul.mubr.msk.f32.gmra.mxu1 %vm185_vm0, %v157_v39  ;;  %12988 = vmatmul.mubr.msk.f32.gmra.mxu0 %vm185_vm0, %v169_v48 }
  0x81   :  { %12990 = vmatprep.mubr.msk.f32.mxu0 %vm185_vm0, %v170_v49  ;;  %13000 = vmatprep.mubr.msk.f32.mxu1 %vm14381_vm1, %v17252_v46 }
  0x84   :  { %12991 = vmatmul.mubr.msk.f32.gmra.mxu0 %vm185_vm0, %v171_v50 }
  0x85   :  { %12993 = vmatprep.mubr.msk.f32.mxu0 %vm185_vm0, %v172_v51 }
  0x88   :  { %12994 = vmatmul.mubr.msk.f32.gmra.mxu0 %vm185_vm0, %v173_v52 }
  0x89   :  { %13014 = vmatprep.mubr.msk.f32.mxu0 %vm14381_vm1, %v17252_v46 }
 0x11c   :  { %v14544_v53 = vpop.f32.mrf.mxu1 }
 0x11d   :  { %v302_v36 = vadd.f32 %v14544_v53, %v14558_v61 }
 0x11e   :  { %v296_v54 = vpop.f32.mrf.mxu1 }
 0x11f   :  { %v297_v24 = vadd.f32 %v14558_v61, %v296_v54  ;;  %v14689_v43 = vmul.f32 0.5, %v302_v36 }
 0x120   :  { %v14546_v55 = vpop.f32.mrf.mxu1 }
 0x121   :  { %v14644_v30 = vmul.f32 0.5, %v297_v24  ;;  %17294 = vst [vmem:[#allocation33_spill] sm:$0xff] %v14689_v43  ;;  %v312_v51 = vadd.f32 %v14546_v55, %v14558_v61 }
 0x122   :  { %v14548_v56 = vpop.f32.mrf.mxu1  ;;  %v12922_v58 = vpop.f32.mrf.mxu0 }
 0x123   :  { %v282_v13 = vadd.f32 %v12922_v58, %v14558_v61  ;;  %17291 = vst [vmem:[#allocation30_spill] sm:$0xff] %v14644_v30  ;;  %v307_v37 = vadd.f32 %v14558_v61, %v14548_v56  ;;  %v14726_v54 = vmul.f32 0.5, %v312_v51 }
 0x124   :  { %v12942_v59 = vpop.f32.mrf.mxu1  ;;  %v276_v60 = vpop.f32.mrf.mxu0 }
 0x125   :  { %v14561_v62 = vadd.f32 %v12942_v59, %v14553_v57  ;;  %v277_v0 = vadd.f32 %v14558_v61, %v276_v60  ;;  %v14608_v19 = vmul.f32 0.5, %v282_v13  ;;  %v14691_v44 = vmul.f32 0.5, %v307_v37 }
 0x126   :  { %v448_v63 = vpop.f32.mrf.mxu1  ;;  %v12925_v1 = vpop.f32.mrf.mxu0 }
 0x127   :  { %12997 = vmatpush3.xpose.msk.msra.mxu1 %vm731_vm2, %v14561_v62  ;;  %v14568_v3 = vadd.f32 %v14553_v57, %v448_v63  ;;  %v14570_v4 = vmul.f32 0.5, %v277_v0  ;;  %17288 = vst [vmem:[#allocation27_spill] sm:$0xff] %v14608_v19  ;;  %v292_v25 = vadd.f32 %v12925_v1, %v14558_v61  ;;  %17295 = vst [vmem:[#allocation34_spill] sm:$0xff] %v14691_v44 }
 0x128   :  { %v12945_v2 = vpop.f32.mrf.mxu1  ;;  %12998 = vmatprep.subr.mxu1 %v17252_v46  ;;  %v286_v7 = vpop.f32.mrf.mxu0 }
 0x129   :  { %17282 = vst [vmem:[#allocation21_spill] sm:$0xff] %v14568_v3  ;;  %17283 = vst [vmem:[#allocation22_spill] sm:$0xff] %v14570_v4  ;;  %v14573_v6 = vadd.f32 %v12945_v2, %v14553_v57  ;;  %v287_v11 = vadd.f32 %v14558_v61, %v286_v7  ;;  %v14646_v31 = vmul.f32 0.5, %v292_v25 }
 0x12a   :  { %v458_v5 = vpop.f32.mrf.mxu1 }
 0x12b   :  { %12999 = vmatpush3.xpose.msk.msra.mxu1 %vm731_vm2, %v14568_v3  ;;  %v14595_v15 = vadd.f32 %v14553_v57, %v458_v5  ;;  %v14599_v16 = vmul.f32 0.5, %v287_v11  ;;  %17292 = vst [vmem:[#allocation31_spill] sm:$0xff] %v14646_v31 }
 0x12c   :  { %v12948_v8 = vpop.f32.mrf.mxu1  ;;  %13003 = vmatprep.subr.mxu1 %v17252_v46  ;;  %v12974_v39 = vpop.f32.mrf.mxu0 }
 0x12d   :  { %v14579_v9 = vadd.f32 %v12948_v8, %v14553_v57  ;;  %17286 = vst [vmem:[#allocation25_spill] sm:$0xff] %v14599_v16  ;;  %v14695_v47 = vadd.f32 %v12974_v39, %v14680_v41 }
 0x12e   :  { %v468_v10 = vpop.f32.mrf.mxu1  ;;  %13001 = vmatmul.mubr.msk.f32.vlgmr.msra.gmra.mxu1 %vm731_vm2, %v14570_v4  ;;  %v652_v48 = vpop.f32.mrf.mxu0 }
 0x12f   :  { %17284 = vst [vmem:[#allocation23_spill] sm:$0xff] %v14579_v9  ;;  %v14585_v12 = vadd.f32 %v14553_v57, %v468_v10  ;;  %13004 = vmatpush3.xpose.msk.msra.mxu1 %vm731_vm2, %v14573_v6  ;;  %13011 = vmatpush3.xpose.msk.msra.mxu0 %vm731_vm2, %v14579_v9  ;;  %v14703_v49 = vadd.f32 %v14680_v41, %v652_v48 }
 0x130   :  { %v12951_v14 = vpop.f32.mrf.mxu1  ;;  %13005 = vmatprep.subr.mxu1 %v17252_v46  ;;  %13012 = vmatprep.subr.mxu0 %v17252_v46  ;;  %v12977_v52 = vpop.f32.mrf.mxu0 }
 0x131   :  { %17285 = vst [vmem:[#allocation24_spill] sm:$0xff] %v14585_v12  ;;  %13007 = vmatprep.mubr.msk.f32.mxu1 %vm14381_vm1, %v17252_v46  ;;  %v14602_v18 = vadd.f32 %v12951_v14, %v14553_v57  ;;  %v14723_v53 = vadd.f32 %v12977_v52, %v14680_v41 }
 0x132   :  { %v478_v17 = vpop.f32.mrf.mxu1  ;;  %v662_v55 = vpop.f32.mrf.mxu0 }
 0x133   :  { %17287 = vst [vmem:[#allocation26_spill] sm:$0xff] %v14602_v18  ;;  %13006 = vmatpush3.xpose.msk.msra.mxu1 %vm731_vm2, %v14595_v15  ;;  %13013 = vmatpush3.xpose.msk.msra.mxu0 %vm731_vm2, %v14585_v12  ;;  %v14631_v27 = vadd.f32 %v14553_v57, %v478_v17  ;;  %v14730_v56 = vadd.f32 %v14680_v41, %v662_v55 }
 0x134   :  { %v12954_v20 = vpop.f32.mrf.mxu1  ;;  %13017 = vmatprep.subr.mxu1 %v17252_v46  ;;  %13024 = vmatprep.subr.mxu0 %v17252_v46 }
 0x135   :  { %v14613_v21 = vadd.f32 %v12954_v20, %v14553_v57  ;;  %17290 = vst [vmem:[#allocation29_spill] sm:$0xff] %v14631_v27 }
 0x136   :  { %v488_v22 = vpop.f32.mrf.mxu1  ;;  %13008 = vmatmul.mubr.msk.f32.vlgmr.msra.gmra.mxu1 %vm731_vm2, %v14608_v19  ;;  %13015 = vmatmul.mubr.msk.f32.vlgmr.msra.gmra.mxu0 %vm731_vm2, %v14599_v16 }
 0x137   :  { %v14620_v23 = vadd.f32 %v14553_v57, %v488_v22  ;;  %13018 = vmatpush3.xpose.msk.msra.mxu1 %vm731_vm2, %v14602_v18  ;;  %13025 = vmatpush3.xpose.msk.msra.mxu0 %vm731_vm2, %v14613_v21 }
 0x138   :  { %v12957_v26 = vpop.f32.mrf.mxu1  ;;  %13019 = vmatprep.subr.mxu1 %v17252_v46  ;;  %13026 = vmatprep.subr.mxu0 %v17252_v46 }
 0x139   :  { %17289 = vst [vmem:[#allocation28_spill] sm:$0xff] %v14620_v23  ;;  %13021 = vmatprep.mubr.msk.f32.mxu1 %vm14381_vm1, %v17252_v46  ;;  %13028 = vmatprep.mubr.msk.f32.mxu0 %vm14381_vm1, %v17252_v46  ;;  %v14638_v29 = vadd.f32 %v12957_v26, %v14553_v57 }
 0x13a   :  { %v498_v28 = vpop.f32.mrf.mxu1 }
 0x13b   :  { %13020 = vmatpush3.xpose.msk.msra.mxu1 %vm731_vm2, %v14631_v27  ;;  %13027 = vmatpush3.xpose.msk.msra.mxu0 %vm731_vm2, %v14620_v23  ;;  %v14671_v40 = vadd.f32 %v14553_v57, %v498_v28 }
 0x13c   :  { %v12960_v32 = vpop.f32.mrf.mxu1  ;;  %13031 = vmatprep.subr.mxu1 %v17252_v46  ;;  %13038 = vmatprep.subr.mxu0 %v17252_v46 }
 0x13d   :  { %v14651_v33 = vadd.f32 %v12960_v32, %v14553_v57 }
 0x13e   :  { %13022 = vmatmul.mubr.msk.f32.vlgmr.msra.gmra.mxu1 %vm731_vm2, %v14646_v31  ;;  %13029 = vmatmul.mubr.msk.f32.vlgmr.msra.gmra.mxu0 %vm731_vm2, %v14644_v30  ;;  %v508_v34 = vpop.f32.mrf.mxu1 }
 0x13f   :  { %13032 = vmatpush3.xpose.msk.msra.mxu1 %vm731_vm2, %v14638_v29  ;;  %13039 = vmatpush3.xpose.msk.msra.mxu0 %vm731_vm2, %v14651_v33  ;;  %v14662_v35 = vadd.f32 %v14553_v57, %v508_v34 }
 0x140   :  { %13033 = vmatprep.subr.mxu1 %v17252_v46  ;;  %13040 = vmatprep.subr.mxu0 %v17252_v46  ;;  %v12963_v38 = vpop.f32.mrf.mxu1 }
 0x141   :  { %17293 = vst [vmem:[#allocation32_spill] sm:$0xff] %v14662_v35  ;;  %13035 = vmatprep.mubr.msk.f32.mxu1 %vm14381_vm1, %v17252_v46  ;;  %13042 = vmatprep.mubr.msk.f32.mxu0 %vm14381_vm1, %v17252_v46  ;;  %v14687_v42 = vadd.f32 %v12963_v38, %v14553_v57 }
 0x142   :  { %v518_v45 = vpop.f32.mrf.mxu1 }
 0x143   :  { %13034 = vmatpush3.xpose.msk.msra.mxu1 %vm731_vm2, %v14671_v40  ;;  %13041 = vmatpush3.xpose.msk.msra.mxu0 %vm731_vm2, %v14662_v35  ;;  %v14708_v50 = vadd.f32 %v14553_v57, %v518_v45  ;;  %v14740_v57 = vpop.f32.mrf.mxu0 }
 0x144   :  { %13045 = vmatprep.subr.mxu1 %v17252_v46  ;;  %13052 = vmatprep.subr.mxu0 %v17252_v46 }
 0x145   :  { %v14742_v58 = vpop.f32.mrf.mxu0 }
 0x146   :  { %13036 = vmatmul.mubr.msk.f32.vlgmr.msra.gmra.mxu1 %vm731_vm2, %v14689_v43  ;;  %13043 = vmatmul.mubr.msk.f32.vlgmr.msra.gmra.mxu0 %vm731_vm2, %v14691_v44 }
 0x147   :  { %13046 = vmatpush3.xpose.msk.msra.mxu1 %vm731_vm2, %v14687_v42  ;;  %13049 = vmatprep.mubr.msk.f32.mxu1 %vm14381_vm1, %v17252_v46  ;;  %v14744_v59 = vpop.f32.mrf.mxu0 }
 0x148   :  { %13047 = vmatprep.subr.mxu1 %v17252_v46  ;;  %13053 = vmatpush3.msra.mxu0 %v14695_v47 }
 0x149   :  { %13054 = vmatprep.subr.mxu0 %v17252_v46  ;;  %13056 = vmatprep.mubr.msk.f32.mxu0 %vm14381_vm1, %v17252_v46  ;;  %v14746_v60 = vpop.f32.mrf.mxu0 }
 0x14a   :  { %13055 = vmatpush3.msra.mxu0 %v14703_v49 }
 0x14b   :  { %13048 = vmatpush3.xpose.msk.msra.mxu1 %vm731_vm2, %v14708_v50  ;;  %13066 = vmatprep.subr.mxu0 %v17252_v46  ;;  %v14748_v61 = vpop.f32.mrf.mxu0 }
 0x14c   :  { %13059 = vmatprep.subr.mxu1 %v17252_v46 }
 0x14d   :  { %v14750_v63 = vpop.f32.mrf.mxu0 }
 0x14e   :  { %13050 = vmatmul.mubr.msk.f32.vlgmr.msra.gmra.mxu1 %vm731_vm2, %v14726_v54 }
 0x14f   :  { %13060 = vmatpush3.msra.mxu1 %v14723_v53  ;;  %13063 = vmatprep.mubr.msk.f32.mxu1 %vm14381_vm1, %v17252_v46  ;;  %v14752_v0 = vpop.f32.mrf.mxu0 }
 0x150   :  { %13061 = vmatprep.subr.mxu1 %v17252_v46 }
 0x151   :  { %13062 = vmatpush3.msra.mxu1 %v14730_v56  ;;  %v14754_v1 = vpop.f32.mrf.mxu0 }
 0x152   :  { %13073 = vmatprep.subr.mxu1 %v17252_v46 }
 0x153   :  { %v14756_v2 = vpop.f32.mrf.mxu0 }
 0x155   :  { %v14758_v5 = vpop.f32.mrf.mxu0 }
 0x157   :  { %v14760_v8 = vpop.f32.mrf.mxu0 }
 0x159   :  { %v14763_v13 = vpop.f32.mrf.mxu0 }
 0x1ee   :  { %v807_v7 = vpop.f32.mrf.mxu1 }
 0x1ef   :  { %v1365_v10 = vsel %vm1364_vm3, %v807_v7, -inf }
 0x1f0   :  { %1366 = vmax.xlane.f32.xlu0 %v1365_v10  ;;  %v13002_v11 = vpop.f32.mrf.mxu1 }
 0x1f6   :  { %v886_v14 = vpop.f32.mrf.mxu1  ;;  %v965_v17 = vpop.f32.mrf.mxu0 }
 0x1f7   :  { %v1371_v20 = vsel %vm1364_vm3, %v965_v17, -inf  ;;  %v1368_v22 = vsel %vm1364_vm3, %v886_v14, -inf }
 0x1f8   :  { %1372 = vmax.xlane.f32.xlu1 %v1371_v20  ;;  %1369 = vmax.xlane.f32.xlu0 %v1368_v22  ;;  %v13009_v24 = vpop.f32.mrf.mxu1  ;;  %v13016_v25 = vpop.f32.mrf.mxu0 }
 0x1fe   :  { %v1044_v26 = vpop.f32.mrf.mxu1  ;;  %v1123_v28 = vpop.f32.mrf.mxu0 }
 0x1ff   :  { %v1377_v32 = vsel %vm1364_vm3, %v1123_v28, -inf  ;;  %v1374_v34 = vsel %vm1364_vm3, %v1044_v26, -inf }
 0x200   :  { %v13030_v36 = vpop.f32.mrf.mxu0  ;;  %1378 = vmax.xlane.f32.xlu0 %v1377_v32  ;;  %1375 = vmax.xlane.f32.xlu1 %v1374_v34  ;;  %v13023_v37 = vpop.f32.mrf.mxu1 }
 0x206   :  { %v1202_v38 = vpop.f32.mrf.mxu1  ;;  %v1281_v39 = vpop.f32.mrf.mxu0 }
 0x207   :  { %v1383_v45 = vsel %vm1364_vm3, %v1281_v39, -inf  ;;  %v1380_v48 = vsel %vm1364_vm3, %v1202_v38, -inf }
 0x208   :  { %v13044_v51 = vpop.f32.mrf.mxu0  ;;  %1384 = vmax.xlane.f32.xlu0 %v1383_v45  ;;  %1381 = vmax.xlane.f32.xlu1 %v1380_v48  ;;  %v13037_v52 = vpop.f32.mrf.mxu1 }
 0x20e   :  { %v14771_v55 = vpop.f32.mrf.mxu1 }
 0x20f   :  { %v1386_v11 = vsel %vm1364_vm3, %v14771_v55, -inf }
 0x210   :  { %v13051_v10 = vpop.f32.mrf.mxu1 }
 0x219   :  { %2131 = vrot.lane.b32.xlu1 %v14573_v6, %s14382_s8 }
 0x21d   :  { %2047 = vrot.lane.b32.xlu1 %v14568_v3, %s14382_s8 }
 0x21e   :  { %2049 = vrot.lane.b32.xlu0 %v14561_v62, %s14382_s8 }
 0x221   :  { %2129 = vrot.lane.b32.xlu1 %v14595_v15, %s14382_s8 }
 0x222   :  { %2045 = vrot.lane.b32.xlu0 %v14570_v4, %s14382_s8 }
 0x225   :  { %2213 = vrot.lane.b32.xlu1 %v14579_v9, %s14382_s8 }
 0x226   :  { %2127 = vrot.lane.b32.xlu0 %v14608_v19, %s14382_s8 }
 0x249   :  { %1387 = vmax.xlane.f32.xlu1 %v1386_v11 }
 0x25a   :  { %2295 = vrot.lane.b32.xlu1 %v14602_v18, %s14382_s8 }
 0x279   :  { %v1367_v20 = vpop.xlane.xlu0 %1366 }
 0x27a   :  { %v1389_v22 = vsub.f32 %v807_v7, %v1367_v20 }
 0x27c   :  { %v1397_v24 = vmul.f32 1.442695, %v1389_v22 }
 0x27e   :  { %13945 = vpow2.f32 %v1397_v24 }
 0x281   :  { %v1373_v25 = vpop.xlane.xlu1 %1372  ;;  %v1370_v32 = vpop.xlane.xlu0 %1369 }
 0x282   :  { %v1391_v34 = vsub.f32 %v965_v17, %v1373_v25  ;;  %v1390_v36 = vsub.f32 %v886_v14, %v1370_v32 }
 0x284   :  { %v1401_v37 = vmul.f32 1.442695, %v1391_v34  ;;  %v1399_v45 = vmul.f32 1.442695, %v1390_v36 }
 0x286   :  { %13947 = vpow2.f32 %v1401_v37 }
 0x287   :  { %13949 = vpow2.f32 %v1399_v45 }
 0x289   :  { %v1379_v48 = vpop.xlane.xlu0 %1378  ;;  %v1376_v51 = vpop.xlane.xlu1 %1375 }
 0x28a   :  { %v1393_v52 = vsub.f32 %v1123_v28, %v1379_v48  ;;  %v1392_v10 = vsub.f32 %v1044_v26, %v1376_v51 }
 0x28b   :  { %v14791_v11 = vpop.eup %13945 }
 0x28c   :  { %v1405_v46 = vmul.f32 1.442695, %v1393_v52  ;;  %v1403_v18 = vmul.f32 1.442695, %v1392_v10  ;;  %v1413_v7 = vsel %vm1364_vm3, %v14791_v11, 0.0 }
 0x28d   :  { %1414 = vadd.xlane.f32.xlu0 %v1413_v7 }
 0x28e   :  { %13951 = vpow2.f32 %v1405_v46 }
 0x28f   :  { %13953 = vpow2.f32 %v1403_v18 }
 0x291   :  { %v1385_v17 = vpop.xlane.xlu0 %1384  ;;  %v1382_v14 = vpop.xlane.xlu1 %1381 }
 0x292   :  { %v1395_v20 = vsub.f32 %v1281_v39, %v1385_v17  ;;  %v1394_v22 = vsub.f32 %v1202_v38, %v1382_v14 }
 0x293   :  { %v14795_v24 = vpop.eup %13947 }
 0x294   :  { %v14797_v25 = vpop.eup %13949  ;;  %v1409_v28 = vmul.f32 1.442695, %v1395_v20  ;;  %v1407_v26 = vmul.f32 1.442695, %v1394_v22  ;;  %v1419_v32 = vsel %vm1364_vm3, %v14795_v24, 0.0  ;;  %v14850_v22 = vadd.f32 %v14740_v57, %v14680_v41 }
 0x295   :  { %1420 = vadd.xlane.f32.xlu0 %v1419_v32  ;;  %v1416_v34 = vsel %vm1364_vm3, %v14797_v25, 0.0  ;;  %v14823_v51 = vpop.permute.xlu1 %2131 }
 0x296   :  { %13955 = vpow2.f32 %v1409_v28  ;;  %1417 = vadd.xlane.f32.xlu1 %v1416_v34 }
 0x297   :  { %13957 = vpow2.f32 %v1407_v26  ;;  %v14864_v26 = vadd.f32 %v14748_v61, %v14680_v41 }
 0x299   :  { %v14827_v52 = vpop.permute.xlu1 %2047 }
 0x29b   :  { %v14803_v46 = vpop.eup %13951 }
 0x29c   :  { %v14805_v18 = vpop.eup %13953  ;;  %v1425_v38 = vsel %vm1364_vm3, %v14803_v46, 0.0 }
 0x29d   :  { %1426 = vadd.xlane.f32.xlu0 %v1425_v38  ;;  %v1422_v39 = vsel %vm1364_vm3, %v14805_v18, 0.0  ;;  %v14833_v10 = vpop.permute.xlu1 %2129 }
 0x29e   :  { %1423 = vadd.xlane.f32.xlu1 %v1422_v39  ;;  %v14900_v39 = vadd.f32 %v14744_v59, %v14680_v41 }
 0x2a1   :  { %v14837_v7 = vpop.permute.xlu1 %2213 }
 0x2a3   :  { %v14811_v36 = vpop.eup %13955 }
 0x2a4   :  { %v14813_v37 = vpop.eup %13957  ;;  %v1431_v45 = vsel %vm1364_vm3, %v14811_v36, 0.0 }
 0x2a5   :  { %1432 = vadd.xlane.f32.xlu0 %v1431_v45  ;;  %v1428_v48 = vsel %vm1364_vm3, %v14813_v37, 0.0 }
 0x2a6   :  { %1429 = vadd.xlane.f32.xlu1 %v1428_v48 }
 0x2b7   :  { %2293 = vrot.lane.b32.xlu1 %v14631_v27, %s14382_s8 }
 0x2bb   :  { %2211 = vrot.lane.b32.xlu0 %v14585_v12, %s14382_s8 }
 0x2bf   :  { %2209 = vrot.lane.b32.xlu0 %v14599_v16, %s14382_s8 }
 0x2c3   :  { %2291 = vrot.lane.b32.xlu0 %v14646_v31, %s14382_s8 }
 0x2c7   :  { %2375 = vrot.lane.b32.xlu0 %v14620_v23, %s14382_s8 }
 0x2cb   :  { %2373 = vrot.lane.b32.xlu0 %v14644_v30, %s14382_s8 }
 0x2cf   :  { %2455 = vrot.lane.b32.xlu0 %v14689_v43, %s14382_s8 }
 0x2d2   :  { %v1388_v17 = vpop.xlane.xlu1 %1387 }
 0x2d3   :  { %v1396_v14 = vsub.f32 %v14771_v55, %v1388_v17  ;;  %2539 = vrot.lane.b32.xlu0 %v14662_v35, %s14382_s8  ;;  %v14856_v55 = vadd.f32 %v14680_v41, %v14742_v58  ;;  %v14878_v58 = vpop.permute.xlu0 %2049  ;;  %v14906_v17 = vadd.f32 %v14680_v41, %v14746_v60  ;;  %v17296_v60 = vmov 0.0  }
 0x2d5   :  { %v1411_v20 = vmul.f32 1.442695, %v1396_v14 }
 0x2d6   :  { %v14894_v38 = vpop.permute.xlu1 %2295 }
 0x2d7   :  { %13959 = vpow2.f32 %v1411_v20  ;;  %2537 = vrot.lane.b32.xlu0 %v14691_v44, %s14382_s8  ;;  %v14884_v61 = vpop.permute.xlu0 %2045  ;;  %v14912_v20 = vadd.f32 %v14752_v0, %v14680_v41 }
 0x2db   :  { %2793 = vrot.lane.b32.xlu0 %v14695_v47, %s14382_s8  ;;  %v14888_v32 = vpop.permute.xlu0 %2127 }
 0x2df   :  { %2955 = vrot.lane.b32.xlu0 %v14850_v22, %s14382_s8 }
 0x2e3   :  { %2953 = vrot.lane.b32.xlu0 %v14856_v55, %s14382_s8 }
 0x2e4   :  { %v14860_v28 = vpop.eup %13959 }
 0x2e5   :  { %v1434_v57 = vsel %vm1364_vm3, %v14860_v28, 0.0 }
 0x2e6   :  { %1435 = vadd.xlane.f32.xlu1 %v1434_v57 }
 0x2e7   :  { %3117 = vrot.lane.b32.xlu0 %v14864_v26, %s14382_s8 }
 0x2f7   :  { %2377 = vrot.lane.b32.xlu1 %v14613_v21, %s14382_s8 }
 0x2fb   :  { %2459 = vrot.lane.b32.xlu1 %v14638_v29, %s14382_s8 }
 0x2ff   :  { %2457 = vrot.lane.b32.xlu1 %v14671_v40, %s14382_s8 }
 0x303   :  { %2541 = vrot.lane.b32.xlu1 %v14651_v33, %s14382_s8 }
 0x307   :  { %2623 = vrot.lane.b32.xlu1 %v14687_v42, %s14382_s8 }
 0x30b   :  { %2621 = vrot.lane.b32.xlu1 %v14708_v50, %s14382_s8 }
 0x30f   :  { %2619 = vrot.lane.b32.xlu1 %v14726_v54, %s14382_s8 }
 0x313   :  { %2874 = vrot.lane.b32.xlu1 %v14723_v53, %s14382_s8 }
 0x316   :  { %v1415_v34 = vpop.xlane.xlu0 %1414 }
 0x317   :  { %13961 = vrcp.f32 %v1415_v34  ;;  %2791 = vrot.lane.b32.xlu1 %v14703_v49, %s14382_s8 }
 0x31b   :  { %2872 = vrot.lane.b32.xlu1 %v14730_v56, %s14382_s8 }
 0x31e   :  { %v1421_v45 = vpop.xlane.xlu0 %1420 }
 0x31f   :  { %13963 = vrcp.f32 %v1421_v45  ;;  %v1418_v48 = vpop.xlane.xlu1 %1417  ;;  %3036 = vrot.lane.b32.xlu1 %v14900_v39, %s14382_s8 }
 0x320   :  { %13965 = vrcp.f32 %v1418_v48 }
 0x323   :  { %3034 = vrot.lane.b32.xlu1 %v14906_v17, %s14382_s8 }
 0x324   :  { %v13962_v14 = vpop.eup %13961 }
 0x325   :  { %v1445_v59 = vmul.f32 %v13962_v14, %v14791_v11 }
 0x326   :  { %v1427_v57 = vpop.xlane.xlu0 %1426 }
 0x327   :  { %13967 = vrcp.f32 %v1427_v57  ;;  %v1424_v34 = vpop.xlane.xlu1 %1423  ;;  %13057 = vmatmul.mubr.msk.f32.vlgmr.msra.gmra.mxu0 %vm1364_vm3, %v1445_v59  ;;  %3198 = vrot.lane.b32.xlu1 %v14912_v20, %s14382_s8  ;;  %v14929_v57 = vadd.f32 %v14680_v41, %v14750_v63 }
 0x328   :  { %13969 = vrcp.f32 %v1424_v34  ;;  %13067 = vmatpush3.msra.mxu0 %v14850_v22  ;;  %13070 = vmatprep.mubr.msk.f32.mxu0 %vm14381_vm1, %v17296_v60  ;;  %v14947_v34 = vadd.f32 %v14756_v2, %v14680_v41 }
 0x329   :  { %13068 = vmatprep.subr.mxu0 %v17296_v60 }
 0x32a   :  { %13069 = vmatpush3.msra.mxu0 %v14856_v55 }
 0x32b   :  { %13080 = vmatprep.subr.mxu0 %v17296_v60 }
 0x32c   :  { %v13964_v0 = vpop.eup %13963 }
 0x32d   :  { %v13966_v11 = vpop.eup %13965  ;;  %v1447_v45 = vmul.f32 %v13964_v0, %v14795_v24 }
 0x32e   :  { %v1433_v48 = vpop.xlane.xlu0 %1432  ;;  %v1446_v14 = vmul.f32 %v13966_v11, %v14797_v25  ;;  %v14953_v11 = vadd.f32 %v14680_v41, %v14758_v5 }
 0x32f   :  { %13971 = vrcp.f32 %v1433_v48  ;;  %v1430_v59 = vpop.xlane.xlu1 %1429  ;;  %13071 = vmatmul.mubr.msk.f32.vlgmr.msra.gmra.mxu0 %vm1364_vm3, %v1447_v45  ;;  %v14959_v45 = vadd.f32 %v14680_v41, %v14754_v1  ;;  %v14984_v48 = vadd.f32 %v14680_v41, %v14763_v13 }
 0x330   :  { %13973 = vrcp.f32 %v1430_v59  ;;  %13064 = vmatmul.mubr.msk.f32.vlgmr.msra.gmra.mxu1 %vm1364_vm3, %v1446_v14  ;;  %13081 = vmatpush3.msra.mxu0 %v14864_v26 }
 0x331   :  { %13074 = vmatpush3.msra.mxu1 %v14900_v39  ;;  %13082 = vmatprep.subr.mxu0 %v17296_v60 }
 0x332   :  { %13075 = vmatprep.subr.mxu1 %v17296_v60  ;;  %13083 = vmatpush3.msra.mxu0 %v14929_v57 }
 0x333   :  { %13076 = vmatpush3.msra.mxu1 %v14906_v17  ;;  %13084 = vmatprep.mubr.msk.f32.mxu0 %vm14381_vm1, %v17296_v60 }
 0x334   :  { %v13968_v63 = vpop.eup %13967  ;;  %13094 = vmatprep.subr.mxu0 %v17296_v60  ;;  %13077 = vmatprep.mubr.msk.f32.mxu1 %vm14381_vm1, %v17296_v60 }
 0x335   :  { %v13970_v24 = vpop.eup %13969  ;;  %13087 = vmatprep.subr.mxu1 %v17296_v60  ;;  %v1449_v25 = vmul.f32 %v13968_v63, %v14803_v46 }
 0x336   :  { %v1448_v0 = vmul.f32 %v13970_v24, %v14805_v18  ;;  %v14976_v18 = vadd.f32 %v14760_v8, %v14680_v41  ;;  %v2212_v41 = vpop.permute.xlu0 %2211 }
 0x337   :  { %13085 = vmatmul.mubr.msk.f32.vlgmr.msra.gmra.mxu0 %vm1364_vm3, %v1449_v25 }
 0x338   :  { %13078 = vmatmul.mubr.msk.f32.vlgmr.msra.gmra.mxu1 %vm1364_vm3, %v1448_v0  ;;  %13095 = vmatpush3.msra.mxu0 %v14947_v34 }
 0x339   :  { %13088 = vmatpush3.msra.mxu1 %v14912_v20  ;;  %13096 = vmatprep.subr.mxu0 %v17296_v60 }
 0x33a   :  { %13089 = vmatprep.subr.mxu1 %v17296_v60  ;;  %13097 = vmatpush3.msra.mxu0 %v14953_v11  ;;  %v2210_v8 = vpop.permute.xlu0 %2209 }
 0x33b   :  { %13090 = vmatpush3.msra.mxu1 %v14959_v45  ;;  %13098 = vmatprep.mubr.msk.f32.mxu0 %vm14381_vm1, %v17296_v60 }
 0x33c   :  { %v13972_v2 = vpop.eup %13971  ;;  %13108 = vmatprep.subr.mxu0 %v17296_v60  ;;  %13091 = vmatprep.mubr.msk.f32.mxu1 %vm14381_vm1, %v17296_v60 }
 0x33d   :  { %v13974_v1 = vpop.eup %13973  ;;  %13101 = vmatprep.subr.mxu1 %v17296_v60  ;;  %v1451_v5 = vmul.f32 %v13972_v2, %v14811_v36 }
 0x33e   :  { %v1450_v46 = vmul.f32 %v13974_v1, %v14813_v37  ;;  %v2292_v13 = vpop.permute.xlu0 %2291  ;;  %v2294_v37 = vpop.permute.xlu1 %2293 }
 0x33f   :  { %13099 = vmatmul.mubr.msk.f32.vlgmr.msra.gmra.mxu0 %vm1364_vm3, %v1451_v5 }
 0x340   :  { %13092 = vmatmul.mubr.msk.f32.vlgmr.msra.gmra.mxu1 %vm1364_vm3, %v1450_v46  ;;  %13109 = vmatpush3.xpose.msk.msra.mxu0 %vm731_vm2, %v14878_v58 }
 0x341   :  { %13102 = vmatpush3.msra.mxu1 %v14976_v18  ;;  %13110 = vmatprep.subr.mxu0 %v17296_v60 }
 0x342   :  { %13103 = vmatprep.subr.mxu1 %v17296_v60  ;;  %13112 = vmatprep.mubr.msk.f32.mxu0 %vm14381_vm1, %v17296_v60  ;;  %v2376_v36 = vpop.permute.xlu0 %2375 }
 0x343   :  { %13104 = vmatpush3.msra.mxu1 %v14984_v48  ;;  %13105 = vmatprep.mubr.msk.f32.mxu1 %vm14381_vm1, %v17296_v60 }
 0x344   :  { %13111 = vmatpush3.xpose.msk.msra.mxu0 %vm731_vm2, %v14827_v52  ;;  %13115 = vmatprep.subr.mxu1 %v17296_v60 }
 0x345   :  { %13122 = vmatprep.subr.mxu0 %v17296_v60 }
 0x346   :  { %v2374_v52 = vpop.permute.xlu0 %2373 }
 0x347   :  { %13113 = vmatmul.mubr.msk.f32.vlgmr.msra.gmra.mxu0 %vm731_vm2, %v14884_v61 }
 0x348   :  { %13123 = vmatpush3.xpose.msk.msra.mxu0 %vm731_vm2, %v14837_v7  ;;  %13126 = vmatprep.mubr.msk.f32.mxu0 %vm14381_vm1, %v17296_v60 }
 0x349   :  { %13124 = vmatprep.subr.mxu0 %v17296_v60 }
 0x34a   :  { %v2456_v61 = vpop.permute.xlu0 %2455 }
 0x34c   :  { %13125 = vmatpush3.xpose.msk.msra.mxu0 %vm731_vm2, %v2212_v41 }
 0x34d   :  { %13136 = vmatprep.subr.mxu0 %v17296_v60 }
 0x34e   :  { %v2540_v59 = vpop.permute.xlu0 %2539 }
 0x34f   :  { %13127 = vmatmul.mubr.msk.f32.vlgmr.msra.gmra.mxu0 %vm731_vm2, %v2210_v8 }
 0x350   :  { %13140 = vmatprep.mubr.msk.f32.mxu0 %vm14381_vm1, %v17296_v60 }
 0x352   :  { %v2538_v2 = vpop.permute.xlu0 %2537 }
 0x36f   :  { %v1436_v7 = vpop.xlane.xlu1 %1435 }
 0x370   :  { %13975 = vrcp.f32 %v1436_v7 }
 0x373   :  { %v2378_v58 = vpop.permute.xlu1 %2377 }
 0x374   :  { %13137 = vmatpush3.xpose.msk.msra.mxu0 %vm731_vm2, %v2378_v58 }
 0x375   :  { %13138 = vmatprep.subr.mxu0 %v17296_v60 }
 0x377   :  { %v2460_v14 = vpop.permute.xlu1 %2459 }
 0x378   :  { %13139 = vmatpush3.xpose.msk.msra.mxu0 %vm731_vm2, %v2376_v36 }
 0x379   :  { %13150 = vmatprep.subr.mxu0 %v17296_v60 }
 0x37b   :  { %13141 = vmatmul.mubr.msk.f32.vlgmr.msra.gmra.mxu0 %vm731_vm2, %v2374_v52  ;;  %v2458_v63 = vpop.permute.xlu1 %2457 }
 0x37c   :  { %13154 = vmatprep.mubr.msk.f32.mxu0 %vm14381_vm1, %v17296_v60 }
 0x37d   :  { %v13976_v24 = vpop.eup %13975 }
 0x37e   :  { %v1452_v25 = vmul.f32 %v13976_v24, %v14860_v28  ;;  %v2794_v28 = vpop.permute.xlu0 %2793 }
 0x37f   :  { %v2542_v0 = vpop.permute.xlu1 %2541 }
 0x380   :  { %13106 = vmatmul.mubr.msk.f32.vlgmr.msra.gmra.mxu1 %vm1364_vm3, %v1452_v25  ;;  %13151 = vmatpush3.xpose.msk.msra.mxu0 %vm731_vm2, %v2542_v0 }
 0x381   :  { %13116 = vmatpush3.xpose.msk.msra.mxu1 %vm731_vm2, %v14823_v51  ;;  %13152 = vmatprep.subr.mxu0 %v17296_v60 }
 0x382   :  { %13117 = vmatprep.subr.mxu1 %v17296_v60  ;;  %13119 = vmatprep.mubr.msk.f32.mxu1 %vm14381_vm1, %v17296_v60 }
 0x383   :  { %v2624_v1 = vpop.permute.xlu1 %2623 }
 0x384   :  { %13153 = vmatpush3.xpose.msk.msra.mxu0 %vm731_vm2, %v2540_v59 }
 0x385   :  { %13118 = vmatpush3.xpose.msk.msra.mxu1 %vm731_vm2, %v14833_v10  ;;  %13164 = vmatprep.subr.mxu0 %v17296_v60 }
 0x386   :  { %13129 = vmatprep.subr.mxu1 %v17296_v60 }
 0x387   :  { %13155 = vmatmul.mubr.msk.f32.vlgmr.msra.gmra.mxu0 %vm731_vm2, %v2538_v2  ;;  %v2622_v51 = vpop.permute.xlu1 %2621 }
 0x388   :  { %13120 = vmatmul.mubr.msk.f32.vlgmr.msra.gmra.mxu1 %vm731_vm2, %v14888_v32  ;;  %13165 = vmatpush3.msra.mxu0 %v2794_v28 }
 0x389   :  { %13130 = vmatpush3.xpose.msk.msra.mxu1 %vm731_vm2, %v14894_v38  ;;  %13133 = vmatprep.mubr.msk.f32.mxu1 %vm14381_vm1, %v17296_v60 }
 0x38a   :  { %13131 = vmatprep.subr.mxu1 %v17296_v60  ;;  %13166 = vmatprep.subr.mxu0 %v17296_v60 }
 0x38b   :  { %v2620_v10 = vpop.permute.xlu1 %2619  ;;  %13168 = vmatprep.mubr.msk.f32.mxu0 %vm14381_vm1, %v17296_v60 }
 0x38d   :  { %13132 = vmatpush3.xpose.msk.msra.mxu1 %vm731_vm2, %v2294_v37 }
 0x38e   :  { %13143 = vmatprep.subr.mxu1 %v17296_v60 }
 0x38f   :  { %v2875_v32 = vpop.permute.xlu1 %2874 }
 0x390   :  { %13134 = vmatmul.mubr.msk.f32.vlgmr.msra.gmra.mxu1 %vm731_vm2, %v2292_v13 }
 0x391   :  { %13144 = vmatpush3.xpose.msk.msra.mxu1 %vm731_vm2, %v2460_v14  ;;  %13147 = vmatprep.mubr.msk.f32.mxu1 %vm14381_vm1, %v17296_v60 }
 0x392   :  { %13145 = vmatprep.subr.mxu1 %v17296_v60 }
 0x393   :  { %v2792_v38 = vpop.permute.xlu1 %2791 }
 0x394   :  { %13167 = vmatpush3.msra.mxu0 %v2792_v38 }
 0x395   :  { %13146 = vmatpush3.xpose.msk.msra.mxu1 %vm731_vm2, %v2458_v63  ;;  %13178 = vmatprep.subr.mxu0 %v17296_v60 }
 0x396   :  { %13157 = vmatprep.subr.mxu1 %v17296_v60 }
 0x397   :  { %v2873_v5 = vpop.permute.xlu1 %2872 }
 0x398   :  { %13148 = vmatmul.mubr.msk.f32.vlgmr.msra.gmra.mxu1 %vm731_vm2, %v2456_v61 }
 0x399   :  { %13158 = vmatpush3.xpose.msk.msra.mxu1 %vm731_vm2, %v2624_v1  ;;  %13161 = vmatprep.mubr.msk.f32.mxu1 %vm14381_vm1, %v17296_v60 }
 0x39a   :  { %13159 = vmatprep.subr.mxu1 %v17296_v60 }
 0x39d   :  { %13160 = vmatpush3.xpose.msk.msra.mxu1 %vm731_vm2, %v2622_v51 }
 0x39e   :  { %13171 = vmatprep.subr.mxu1 %v17296_v60 }
 0x3a0   :  { %13162 = vmatmul.mubr.msk.f32.vlgmr.msra.gmra.mxu1 %vm731_vm2, %v2620_v10 }
 0x3a1   :  { %13172 = vmatpush3.msra.mxu1 %v2875_v32  ;;  %13175 = vmatprep.mubr.msk.f32.mxu1 %vm14381_vm1, %v17296_v60 }
 0x3a2   :  { %13173 = vmatprep.subr.mxu1 %v17296_v60 }
 0x3a3   :  { %13174 = vmatpush3.msra.mxu1 %v2873_v5 }
 0x3a4   :  { %13185 = vmatprep.subr.mxu1 %v17296_v60 }
 0x3e7   :  { %v1522_v46 = vpop.f32.mrf.mxu0 }
 0x3e8   :  { %2037 = vst.msk [vmem:[#allocation2] sm:$0xff] %vm731_vm2, %v1522_v46 }
 0x3e9   :  { %v13058_v41 = vpop.f32.mrf.mxu0 }
 0x3ef   :  { %v1668_v8 = vpop.f32.mrf.mxu0 }
 0x3f0   :  { %v1595_v13 = vpop.f32.mrf.mxu1  ;;  %2039 = vst.msk [vmem:[#allocation2 + $0x10] sm:$0xff] %vm731_vm2, %v1668_v8 }
 0x3f1   :  { %2038 = vst.msk [vmem:[#allocation2 + $0x8] sm:$0xff] %vm731_vm2, %v1595_v13  ;;  %v13072_v36 = vpop.f32.mrf.mxu0 }
 0x3f2   :  { %v13065_v37 = vpop.f32.mrf.mxu1 }
 0x3f7   :  { %v1814_v52 = vpop.f32.mrf.mxu0 }
 0x3f8   :  { %v1741_v7 = vpop.f32.mrf.mxu1  ;;  %2041 = vst.msk [vmem:[#allocation2 + $0x20] sm:$0xff] %vm731_vm2, %v1814_v52 }
 0x3f9   :  { %2040 = vst.msk [vmem:[#allocation2 + $0x18] sm:$0xff] %vm731_vm2, %v1741_v7  ;;  %v13086_v58 = vpop.f32.mrf.mxu0 }
 0x3fa   :  { %v13079_v61 = vpop.f32.mrf.mxu1 }
 0x3ff   :  { %v1960_v14 = vpop.f32.mrf.mxu0 }
 0x400   :  { %v1887_v59 = vpop.f32.mrf.mxu1  ;;  %2043 = vst.msk [vmem:[#allocation2 + $0x30] sm:$0xff] %vm731_vm2, %v1960_v14 }
 0x401   :  { %2042 = vst.msk [vmem:[#allocation2 + $0x28] sm:$0xff] %vm731_vm2, %v1887_v59  ;;  %v13100_v63 = vpop.f32.mrf.mxu0 }
 0x402   :  { %v13093_v24 = vpop.f32.mrf.mxu1 }
 0x407   :  { %v2123_v25 = vpop.f32.mrf.mxu0 }
 0x408   :  { %v2701_v0 = vsel %vm1364_vm3, %v2123_v25, -inf }
 0x409   :  { %2702 = vmax.xlane.f32.xlu0 %v2701_v0  ;;  %v13114_v2 = vpop.f32.mrf.mxu0 }
 0x40a   :  { %v15112_v2 = vpop.permute.xlu0 %2955 }
 0x40f   :  { %v2287_v1 = vpop.f32.mrf.mxu0 }
 0x410   :  { %v2707_v28 = vsel %vm1364_vm3, %v2287_v1, -inf }
 0x411   :  { %2708 = vmax.xlane.f32.xlu0 %v2707_v28  ;;  %v13128_v51 = vpop.f32.mrf.mxu0  ;;  %v15116_v28 = vpop.permute.xlu0 %2953 }
 0x415   :  { %v15120_v51 = vpop.permute.xlu0 %3117 }
 0x43b   :  { %v15073_v10 = vpop.f32.mrf.mxu0 }
 0x43c   :  { %v2713_v58 = vsel %vm1364_vm3, %v15073_v10, -inf }
 0x43d   :  { %v13142_v32 = vpop.f32.mrf.mxu0 }
 0x440   :  { %v2033_v38 = vpop.f32.mrf.mxu1 }
 0x441   :  { %2044 = vst.msk [vmem:[#allocation2 + $0x38] sm:$0xff] %vm731_vm2, %v2033_v38 }
 0x442   :  { %v13107_v5 = vpop.f32.mrf.mxu1 }
 0x447   :  { %v15076_v46 = vpop.f32.mrf.mxu0 }
 0x448   :  { %v2205_v41 = vpop.f32.mrf.mxu1  ;;  %v2719_v14 = vsel %vm1364_vm3, %v15076_v46, -inf }
 0x449   :  { %v13156_v8 = vpop.f32.mrf.mxu0  ;;  %v2704_v13 = vsel %vm1364_vm3, %v2205_v41, -inf }
 0x44a   :  { %2705 = vmax.xlane.f32.xlu1 %v2704_v13  ;;  %v13121_v36 = vpop.f32.mrf.mxu1 }
 0x450   :  { %v2369_v37 = vpop.f32.mrf.mxu1 }
 0x451   :  { %v2710_v52 = vsel %vm1364_vm3, %v2369_v37, -inf }
 0x452   :  { %2711 = vmax.xlane.f32.xlu0 %v2710_v52  ;;  %v13135_v7 = vpop.f32.mrf.mxu1 }
 0x456   :  { %2714 = vmax.xlane.f32.xlu0 %v2713_v58 }
 0x458   :  { %v15082_v61 = vpop.f32.mrf.mxu1 }
 0x459   :  { %v2716_v59 = vsel %vm1364_vm3, %v15082_v61, -inf }
 0x45a   :  { %2720 = vmax.xlane.f32.xlu0 %v2719_v14  ;;  %2717 = vmax.xlane.f32.xlu1 %v2716_v59  ;;  %v13149_v63 = vpop.f32.mrf.mxu1  ;;  %v15134_v59 = vpop.permute.xlu1 %3036 }
 0x45e   :  { %v15136_v63 = vpop.permute.xlu1 %3034 }
 0x460   :  { %v15088_v24 = vpop.f32.mrf.mxu1 }
 0x461   :  { %v2722_v52 = vsel %vm1364_vm3, %v15088_v24, -inf }
 0x462   :  { %v13163_v0 = vpop.f32.mrf.mxu1 }
 0x463   :  { %v15138_v0 = vpop.permute.xlu1 %3198 }
 0x46b   :  { %3196 = vrot.lane.b32.xlu1 %v14959_v45, %s14382_s8 }
 0x46f   :  { %3360 = vrot.lane.b32.xlu1 %v14976_v18, %s14382_s8 }
 0x470   :  { %3115 = vrot.lane.b32.xlu0 %v14929_v57, %s14382_s8 }
 0x473   :  { %3358 = vrot.lane.b32.xlu1 %v14984_v48, %s14382_s8 }
 0x474   :  { %3279 = vrot.lane.b32.xlu0 %v14947_v34, %s14382_s8 }
 0x477   :  { %3564 = vrot.lane.b32.xlu1 %v14573_v6, %s14383_s14 }
 0x478   :  { %3277 = vrot.lane.b32.xlu0 %v14953_v11, %s14382_s8 }
 0x47b   :  { %3562 = vrot.lane.b32.xlu1 %v14595_v15, %s14383_s14 }
 0x47c   :  { %3482 = vrot.lane.b32.xlu0 %v14561_v62, %s14383_s14 }
 0x47f   :  { %3646 = vrot.lane.b32.xlu1 %v14579_v9, %s14383_s14 }
 0x480   :  { %3480 = vrot.lane.b32.xlu0 %v14568_v3, %s14383_s14 }
 0x484   :  { %3478 = vrot.lane.b32.xlu0 %v14570_v4, %s14383_s14 }
 0x488   :  { %3560 = vrot.lane.b32.xlu0 %v14608_v19, %s14383_s14 }
 0x492   :  { %v2703_v32 = vpop.xlane.xlu0 %2702 }
 0x493   :  { %v2725_v38 = vsub.f32 %v2123_v25, %v2703_v32 }
 0x495   :  { %v2733_v5 = vmul.f32 1.442695, %v2725_v38 }
 0x497   :  { %13977 = vpow2.f32 %v2733_v5 }
 0x49a   :  { %v2709_v8 = vpop.xlane.xlu0 %2708 }
 0x49b   :  { %v2727_v13 = vsub.f32 %v2287_v1, %v2709_v8  ;;  %v17297_v1 = vld [vmem:[#allocation26_spill] sm:$0xff] }
 0x49d   :  { %v2737_v36 = vmul.f32 1.442695, %v2727_v13 }
 0x49f   :  { %13979 = vpow2.f32 %v2737_v36 }
 0x4a3   :  { %2723 = vmax.xlane.f32.xlu1 %v2722_v52 }
 0x4a4   :  { %v15124_v7 = vpop.eup %13977 }
 0x4a5   :  { %v2749_v58 = vsel %vm1364_vm3, %v15124_v7, 0.0 }
 0x4a7   :  { %2750 = vadd.xlane.f32.xlu0 %v2749_v58 }
 0x4ac   :  { %v15128_v14 = vpop.eup %13979 }
 0x4ad   :  { %v2755_v25 = vsel %vm1364_vm3, %v15128_v14, 0.0 }
 0x4ae   :  { %2756 = vadd.xlane.f32.xlu0 %v2755_v25 }
 0x4b4   :  { %3728 = vrot.lane.b32.xlu1 %v17297_v1, %s14383_s14 }
 0x4d3   :  { %v2706_v32 = vpop.xlane.xlu1 %2705 }
 0x4d4   :  { %v2726_v38 = vsub.f32 %v2205_v41, %v2706_v32 }
 0x4d6   :  { %v2735_v5 = vmul.f32 1.442695, %v2726_v38 }
 0x4d8   :  { %13981 = vpow2.f32 %v2735_v5 }
 0x4db   :  { %v2712_v8 = vpop.xlane.xlu0 %2711 }
 0x4dc   :  { %v2728_v13 = vsub.f32 %v2369_v37, %v2712_v8 }
 0x4de   :  { %v2739_v36 = vmul.f32 1.442695, %v2728_v13 }
 0x4df   :  { %v2715_v52 = vpop.xlane.xlu0 %2714 }
 0x4e0   :  { %13983 = vpow2.f32 %v2739_v36  ;;  %v2729_v58 = vsub.f32 %v15073_v10, %v2715_v52 }
 0x4e2   :  { %v2741_v25 = vmul.f32 1.442695, %v2729_v58 }
 0x4e3   :  { %v2721_v19 = vpop.xlane.xlu0 %2720  ;;  %v2718_v1 = vpop.xlane.xlu1 %2717 }
 0x4e4   :  { %13985 = vpow2.f32 %v2741_v25  ;;  %v2731_v4 = vsub.f32 %v15076_v46, %v2721_v19  ;;  %v2730_v3 = vsub.f32 %v15082_v61, %v2718_v1 }
 0x4e5   :  { %v15143_v9 = vpop.eup %13981 }
 0x4e6   :  { %v2745_v41 = vmul.f32 1.442695, %v2731_v4  ;;  %v2743_v32 = vmul.f32 1.442695, %v2730_v3  ;;  %v2752_v37 = vsel %vm1364_vm3, %v15143_v9, 0.0 }
 0x4e7   :  { %2753 = vadd.xlane.f32.xlu1 %v2752_v37  ;;  %v3116_v1 = vpop.permute.xlu0 %3115  ;;  %v15165_v8 = vpop.permute.xlu1 %3196 }
 0x4e8   :  { %13987 = vpow2.f32 %v2745_v41 }
 0x4e9   :  { %13989 = vpow2.f32 %v2743_v32 }
 0x4eb   :  { %v15169_v13 = vpop.permute.xlu0 %3279  ;;  %v15171_v36 = vpop.permute.xlu1 %3360 }
 0x4ed   :  { %v15147_v38 = vpop.eup %13983 }
 0x4ee   :  { %v2758_v10 = vsel %vm1364_vm3, %v15147_v38, 0.0 }
 0x4ef   :  { %2759 = vadd.xlane.f32.xlu1 %v2758_v10  ;;  %v15175_v52 = vpop.permute.xlu0 %3277  ;;  %v15179_v58 = vpop.permute.xlu1 %3358 }
 0x4f1   :  { %v15151_v5 = vpop.eup %13985 }
 0x4f2   :  { %v2761_v19 = vsel %vm1364_vm3, %v15151_v5, 0.0 }
 0x4f3   :  { %2762 = vadd.xlane.f32.xlu0 %v2761_v19  ;;  %v15183_v25 = vpop.permute.xlu0 %3482  ;;  %v15185_v41 = vpop.permute.xlu1 %3564 }
 0x4f5   :  { %v15155_v4 = vpop.eup %13987 }
 0x4f6   :  { %v15157_v3 = vpop.eup %13989  ;;  %v2767_v46 = vsel %vm1364_vm3, %v15155_v4, 0.0 }
 0x4f7   :  { %2768 = vadd.xlane.f32.xlu0 %v2767_v46  ;;  %v2764_v61 = vsel %vm1364_vm3, %v15157_v3, 0.0  ;;  %v15189_v32 = vpop.permute.xlu0 %3480  ;;  %v15193_v37 = vpop.permute.xlu1 %3562 }
 0x4f8   :  { %2765 = vadd.xlane.f32.xlu1 %v2764_v61 }
 0x4fb   :  { %v15197_v10 = vpop.permute.xlu0 %3478  ;;  %v15199_v19 = vpop.permute.xlu1 %3646 }
 0x4ff   :  { %v15203_v46 = vpop.permute.xlu0 %3560 }
 0x509   :  { %3726 = vrot.lane.b32.xlu1 %v14631_v27, %s14383_s14 }
 0x50d   :  { %3644 = vrot.lane.b32.xlu0 %v14585_v12, %s14383_s14 }
 0x511   :  { %3642 = vrot.lane.b32.xlu0 %v14599_v16, %s14383_s14 }
 0x515   :  { %3724 = vrot.lane.b32.xlu0 %v14646_v31, %s14383_s14 }
 0x519   :  { %3808 = vrot.lane.b32.xlu0 %v14620_v23, %s14383_s14 }
 0x51d   :  { %3806 = vrot.lane.b32.xlu0 %v14644_v30, %s14383_s14 }
 0x521   :  { %3888 = vrot.lane.b32.xlu0 %v14689_v43, %s14383_s14 }
 0x525   :  { %3972 = vrot.lane.b32.xlu0 %v14662_v35, %s14383_s14 }
 0x529   :  { %3970 = vrot.lane.b32.xlu0 %v14691_v44, %s14383_s14 }
 0x52c   :  { %v2724_v61 = vpop.xlane.xlu1 %2723 }
 0x52d   :  { %v2732_v30 = vsub.f32 %v15088_v24, %v2724_v61  ;;  %4224 = vrot.lane.b32.xlu0 %v14695_v47, %s14383_s14 }
 0x52f   :  { %v2747_v43 = vmul.f32 1.442695, %v2732_v30 }
 0x530   :  { %v2751_v23 = vpop.xlane.xlu0 %2750 }
 0x531   :  { %13991 = vpow2.f32 %v2747_v43  ;;  %4382 = vrot.lane.b32.xlu0 %v14850_v22, %s14383_s14 }
 0x532   :  { %13993 = vrcp.f32 %v2751_v23 }
 0x535   :  { %4380 = vrot.lane.b32.xlu0 %v14856_v55, %s14383_s14 }
 0x537   :  { %v2757_v35 = vpop.xlane.xlu0 %2756 }
 0x538   :  { %13995 = vrcp.f32 %v2757_v35 }
 0x539   :  { %4540 = vrot.lane.b32.xlu0 %v14864_v26, %s14383_s14 }
 0x53e   :  { %v15214_v44 = vpop.eup %13991 }
 0x53f   :  { %v13994_v24 = vpop.eup %13993  ;;  %v2770_v30 = vsel %vm1364_vm3, %v15214_v44, 0.0 }
 0x540   :  { %2771 = vadd.xlane.f32.xlu1 %v2770_v30  ;;  %v2781_v43 = vmul.f32 %v13994_v24, %v15124_v7 }
 0x542   :  { %13169 = vmatmul.mubr.msk.f32.vlgmr.msra.gmra.mxu0 %vm1364_vm3, %v2781_v43 }
 0x543   :  { %13179 = vmatpush3.msra.mxu0 %v15112_v2  ;;  %13182 = vmatprep.mubr.msk.f32.mxu0 %vm14381_vm1, %v17296_v60  ;;  %v15247_v2 = vpop.permute.xlu1 %3728 }
 0x544   :  { %13180 = vmatprep.subr.mxu0 %v17296_v60 }
 0x545   :  { %v13996_v23 = vpop.eup %13995  ;;  %13181 = vmatpush3.msra.mxu0 %v15116_v28 }
 0x546   :  { %13192 = vmatprep.subr.mxu0 %v17296_v60  ;;  %v2783_v35 = vmul.f32 %v13996_v23, %v15128_v14 }
 0x548   :  { %13183 = vmatmul.mubr.msk.f32.vlgmr.msra.gmra.mxu0 %vm1364_vm3, %v2783_v35 }
 0x549   :  { %13193 = vmatpush3.msra.mxu0 %v15120_v51  ;;  %13196 = vmatprep.mubr.msk.f32.mxu0 %vm14381_vm1, %v17296_v60 }
 0x54a   :  { %13194 = vmatprep.subr.mxu0 %v17296_v60 }
 0x54b   :  { %13195 = vmatpush3.msra.mxu0 %v3116_v1 }
 0x54c   :  { %13206 = vmatprep.subr.mxu0 %v17296_v60 }
 0x551   :  { %3810 = vrot.lane.b32.xlu1 %v14613_v21, %s14383_s14 }
 0x555   :  { %3892 = vrot.lane.b32.xlu1 %v14638_v29, %s14383_s14 }
 0x559   :  { %3890 = vrot.lane.b32.xlu1 %v14671_v40, %s14383_s14 }
 0x55d   :  { %3974 = vrot.lane.b32.xlu1 %v14651_v33, %s14383_s14 }
 0x561   :  { %4056 = vrot.lane.b32.xlu1 %v14687_v42, %s14383_s14 }
 0x565   :  { %4054 = vrot.lane.b32.xlu1 %v14708_v50, %s14383_s14 }
 0x569   :  { %4052 = vrot.lane.b32.xlu1 %v14726_v54, %s14383_s14 }
 0x56d   :  { %4303 = vrot.lane.b32.xlu1 %v14723_v53, %s14383_s14 }
 0x570   :  { %v2754_v28 = vpop.xlane.xlu1 %2753 }
 0x571   :  { %13997 = vrcp.f32 %v2754_v28  ;;  %4222 = vrot.lane.b32.xlu1 %v14703_v49, %s14383_s14 }
 0x575   :  { %4301 = vrot.lane.b32.xlu1 %v14730_v56, %s14383_s14 }
 0x578   :  { %v2760_v51 = vpop.xlane.xlu1 %2759 }
 0x579   :  { %13999 = vrcp.f32 %v2760_v51  ;;  %4461 = vrot.lane.b32.xlu1 %v14900_v39, %s14383_s14 }
 0x57c   :  { %v2763_v7 = vpop.xlane.xlu0 %2762 }
 0x57d   :  { %14001 = vrcp.f32 %v2763_v7  ;;  %4459 = vrot.lane.b32.xlu1 %v14906_v17, %s14383_s14 }
 0x57e   :  { %v13998_v14 = vpop.eup %13997 }
 0x57f   :  { %v2782_v1 = vmul.f32 %v13998_v14, %v15143_v9 }
 0x580   :  { %v2769_v61 = vpop.xlane.xlu0 %2768 }
 0x581   :  { %14003 = vrcp.f32 %v2769_v61  ;;  %v2766_v24 = vpop.xlane.xlu1 %2765  ;;  %4619 = vrot.lane.b32.xlu1 %v14912_v20, %s14383_s14  ;;  %13176 = vmatmul.mubr.msk.f32.vlgmr.msra.gmra.mxu1 %vm1364_vm3, %v2782_v1 }
 0x582   :  { %14005 = vrcp.f32 %v2766_v24  ;;  %13186 = vmatpush3.msra.mxu1 %v15134_v59  ;;  %13189 = vmatprep.mubr.msk.f32.mxu1 %vm14381_vm1, %v17296_v60 }
 0x583   :  { %13187 = vmatprep.subr.mxu1 %v17296_v60 }
 0x584   :  { %13188 = vmatpush3.msra.mxu1 %v15136_v63 }
 0x585   :  { %13199 = vmatprep.subr.mxu1 %v17296_v60 }
 0x586   :  { %v14000_v9 = vpop.eup %13999 }
 0x587   :  { %v2784_v30 = vmul.f32 %v14000_v9, %v15147_v38 }
 0x589   :  { %13190 = vmatmul.mubr.msk.f32.vlgmr.msra.gmra.mxu1 %vm1364_vm3, %v2784_v30 }
 0x58a   :  { %v14002_v43 = vpop.eup %14001  ;;  %13200 = vmatpush3.msra.mxu1 %v15138_v0  ;;  %13203 = vmatprep.mubr.msk.f32.mxu1 %vm14381_vm1, %v17296_v60 }
 0x58b   :  { %13201 = vmatprep.subr.mxu1 %v17296_v60  ;;  %v2785_v59 = vmul.f32 %v14002_v43, %v15151_v5 }
 0x58c   :  { %13202 = vmatpush3.msra.mxu1 %v15165_v8 }
 0x58d   :  { %13197 = vmatmul.mubr.msk.f32.vlgmr.msra.gmra.mxu0 %vm1364_vm3, %v2785_v59  ;;  %13213 = vmatprep.subr.mxu1 %v17296_v60 }
 0x58e   :  { %v14004_v63 = vpop.eup %14003  ;;  %13207 = vmatpush3.msra.mxu0 %v15169_v13  ;;  %13210 = vmatprep.mubr.msk.f32.mxu0 %vm14381_vm1, %v17296_v60 }
 0x58f   :  { %v14006_v0 = vpop.eup %14005  ;;  %13208 = vmatprep.subr.mxu0 %v17296_v60  ;;  %v2787_v38 = vmul.f32 %v14004_v63, %v15155_v4  ;;  %v3645_v4 = vpop.permute.xlu0 %3644 }
 0x590   :  { %13209 = vmatpush3.msra.mxu0 %v15175_v52  ;;  %v2786_v5 = vmul.f32 %v14006_v0, %v15157_v3 }
 0x591   :  { %13220 = vmatprep.subr.mxu0 %v17296_v60  ;;  %13211 = vmatmul.mubr.msk.f32.vlgmr.msra.gmra.mxu0 %vm1364_vm3, %v2787_v38 }
 0x592   :  { %13204 = vmatmul.mubr.msk.f32.vlgmr.msra.gmra.mxu1 %vm1364_vm3, %v2786_v5  ;;  %13221 = vmatpush3.xpose.msk.msra.mxu0 %vm731_vm2, %v15183_v25 }
 0x593   :  { %13214 = vmatpush3.msra.mxu1 %v15171_v36  ;;  %13222 = vmatprep.subr.mxu0 %v17296_v60  ;;  %v3643_v3 = vpop.permute.xlu0 %3642  ;;  %v3727_v36 = vpop.permute.xlu1 %3726 }
 0x594   :  { %13215 = vmatprep.subr.mxu1 %v17296_v60  ;;  %13224 = vmatprep.mubr.msk.f32.mxu0 %vm14381_vm1, %v17296_v60 }
 0x595   :  { %13216 = vmatpush3.msra.mxu1 %v15179_v58  ;;  %13217 = vmatprep.mubr.msk.f32.mxu1 %vm14381_vm1, %v17296_v60 }
 0x596   :  { %13223 = vmatpush3.xpose.msk.msra.mxu0 %vm731_vm2, %v15189_v32  ;;  %13227 = vmatprep.subr.mxu1 %v17296_v60 }
 0x597   :  { %13234 = vmatprep.subr.mxu0 %v17296_v60  ;;  %v3725_v8 = vpop.permute.xlu0 %3724 }
 0x599   :  { %13225 = vmatmul.mubr.msk.f32.vlgmr.msra.gmra.mxu0 %vm731_vm2, %v15197_v10 }
 0x59a   :  { %13235 = vmatpush3.xpose.msk.msra.mxu0 %vm731_vm2, %v15199_v19  ;;  %13238 = vmatprep.mubr.msk.f32.mxu0 %vm14381_vm1, %v17296_v60 }
 0x59b   :  { %13236 = vmatprep.subr.mxu0 %v17296_v60  ;;  %v3809_v13 = vpop.permute.xlu0 %3808 }
 0x59e   :  { %13237 = vmatpush3.xpose.msk.msra.mxu0 %vm731_vm2, %v3645_v4 }
 0x59f   :  { %13248 = vmatprep.subr.mxu0 %v17296_v60  ;;  %v3807_v52 = vpop.permute.xlu0 %3806 }
 0x5a1   :  { %13239 = vmatmul.mubr.msk.f32.vlgmr.msra.gmra.mxu0 %vm731_vm2, %v3643_v3 }
 0x5a2   :  { %13252 = vmatprep.mubr.msk.f32.mxu0 %vm14381_vm1, %v17296_v60 }
 0x5a3   :  { %v3889_v32 = vpop.permute.xlu0 %3888 }
 0x5a7   :  { %v3973_v19 = vpop.permute.xlu0 %3972 }
 0x5ab   :  { %v3971_v7 = vpop.permute.xlu0 %3970 }
 0x5c9   :  { %v2772_v58 = vpop.xlane.xlu1 %2771 }
 0x5ca   :  { %14007 = vrcp.f32 %v2772_v58 }
 0x5cd   :  { %v3811_v25 = vpop.permute.xlu1 %3810 }
 0x5ce   :  { %13249 = vmatpush3.xpose.msk.msra.mxu0 %vm731_vm2, %v3811_v25 }
 0x5cf   :  { %13250 = vmatprep.subr.mxu0 %v17296_v60 }
 0x5d1   :  { %v3893_v10 = vpop.permute.xlu1 %3892 }
 0x5d2   :  { %13251 = vmatpush3.xpose.msk.msra.mxu0 %vm731_vm2, %v3809_v13 }
 0x5d3   :  { %13262 = vmatprep.subr.mxu0 %v17296_v60 }
 0x5d5   :  { %13253 = vmatmul.mubr.msk.f32.vlgmr.msra.gmra.mxu0 %vm731_vm2, %v3807_v52  ;;  %v3891_v23 = vpop.permute.xlu1 %3890 }
 0x5d6   :  { %13266 = vmatprep.mubr.msk.f32.mxu0 %vm14381_vm1, %v17296_v60 }
 0x5d7   :  { %v14008_v35 = vpop.eup %14007 }
 0x5d8   :  { %v2788_v28 = vmul.f32 %v14008_v35, %v15214_v44  ;;  %v4225_v44 = vpop.permute.xlu0 %4224 }
 0x5d9   :  { %v3975_v51 = vpop.permute.xlu1 %3974 }
 0x5da   :  { %13218 = vmatmul.mubr.msk.f32.vlgmr.msra.gmra.mxu1 %vm1364_vm3, %v2788_v28  ;;  %13263 = vmatpush3.xpose.msk.msra.mxu0 %vm731_vm2, %v3975_v51 }
 0x5db   :  { %13228 = vmatpush3.xpose.msk.msra.mxu1 %vm731_vm2, %v15185_v41  ;;  %13264 = vmatprep.subr.mxu0 %v17296_v60 }
 0x5dc   :  { %13229 = vmatprep.subr.mxu1 %v17296_v60  ;;  %13231 = vmatprep.mubr.msk.f32.mxu1 %vm14381_vm1, %v17296_v60 }
 0x5dd   :  { %v4057_v14 = vpop.permute.xlu1 %4056 }
 0x5de   :  { %13265 = vmatpush3.xpose.msk.msra.mxu0 %vm731_vm2, %v3973_v19 }
 0x5df   :  { %13230 = vmatpush3.xpose.msk.msra.mxu1 %vm731_vm2, %v15193_v37  ;;  %13276 = vmatprep.subr.mxu0 %v17296_v60 }
 0x5e0   :  { %13241 = vmatprep.subr.mxu1 %v17296_v60 }
 0x5e1   :  { %13267 = vmatmul.mubr.msk.f32.vlgmr.msra.gmra.mxu0 %vm731_vm2, %v3971_v7  ;;  %v4055_v41 = vpop.permute.xlu1 %4054 }
 0x5e2   :  { %13232 = vmatmul.mubr.msk.f32.vlgmr.msra.gmra.mxu1 %vm731_vm2, %v15203_v46  ;;  %13277 = vmatpush3.msra.mxu0 %v4225_v44 }
 0x5e3   :  { %13242 = vmatpush3.xpose.msk.msra.mxu1 %vm731_vm2, %v15247_v2  ;;  %13245 = vmatprep.mubr.msk.f32.mxu1 %vm14381_vm1, %v17296_v60 }
 0x5e4   :  { %13243 = vmatprep.subr.mxu1 %v17296_v60  ;;  %13278 = vmatprep.subr.mxu0 %v17296_v60 }
 0x5e5   :  { %v4053_v37 = vpop.permute.xlu1 %4052  ;;  %13280 = vmatprep.mubr.msk.f32.mxu0 %vm14381_vm1, %v17296_v60 }
 0x5e7   :  { %13244 = vmatpush3.xpose.msk.msra.mxu1 %vm731_vm2, %v3727_v36 }
 0x5e8   :  { %13255 = vmatprep.subr.mxu1 %v17296_v60 }
 0x5e9   :  { %v4304_v46 = vpop.permute.xlu1 %4303 }
 0x5ea   :  { %13246 = vmatmul.mubr.msk.f32.vlgmr.msra.gmra.mxu1 %vm731_vm2, %v3725_v8 }
 0x5eb   :  { %13256 = vmatpush3.xpose.msk.msra.mxu1 %vm731_vm2, %v3893_v10  ;;  %13259 = vmatprep.mubr.msk.f32.mxu1 %vm14381_vm1, %v17296_v60 }
 0x5ec   :  { %13257 = vmatprep.subr.mxu1 %v17296_v60 }
 0x5ed   :  { %v4223_v2 = vpop.permute.xlu1 %4222 }
 0x5ee   :  { %13279 = vmatpush3.msra.mxu0 %v4223_v2 }
 0x5ef   :  { %13258 = vmatpush3.xpose.msk.msra.mxu1 %vm731_vm2, %v3891_v23  ;;  %13290 = vmatprep.subr.mxu0 %v17296_v60 }
 0x5f0   :  { %13269 = vmatprep.subr.mxu1 %v17296_v60 }
 0x5f1   :  { %v4302_v1 = vpop.permute.xlu1 %4301 }
 0x5f2   :  { %13260 = vmatmul.mubr.msk.f32.vlgmr.msra.gmra.mxu1 %vm731_vm2, %v3889_v32 }
 0x5f3   :  { %13270 = vmatpush3.xpose.msk.msra.mxu1 %vm731_vm2, %v4057_v14  ;;  %13273 = vmatprep.mubr.msk.f32.mxu1 %vm14381_vm1, %v17296_v60 }
 0x5f4   :  { %13271 = vmatprep.subr.mxu1 %v17296_v60 }
 0x5f7   :  { %13272 = vmatpush3.xpose.msk.msra.mxu1 %vm731_vm2, %v4055_v41 }
 0x5f8   :  { %13283 = vmatprep.subr.mxu1 %v17296_v60 }
 0x5fa   :  { %13274 = vmatmul.mubr.msk.f32.vlgmr.msra.gmra.mxu1 %vm731_vm2, %v4053_v37 }
 0x5fb   :  { %13284 = vmatpush3.msra.mxu1 %v4304_v46  ;;  %13287 = vmatprep.mubr.msk.f32.mxu1 %vm14381_vm1, %v17296_v60 }
 0x5fc   :  { %13285 = vmatprep.subr.mxu1 %v17296_v60 }
 0x5fd   :  { %13286 = vmatpush3.msra.mxu1 %v4302_v1 }
 0x5fe   :  { %13297 = vmatprep.subr.mxu1 %v17296_v60 }
 0x602   :  { %v15369_v61 = vpop.f32.mrf.mxu0 }
 0x603   :  { %17298 = vst [vmem:[#allocation35_spill] sm:$0xff] %v15369_v61 }
 0x604   :  { %v13170_v24 = vpop.f32.mrf.mxu0 }
 0x608   :  { %v15371_v9 = vpop.f32.mrf.mxu0 }
 0x609   :  { %17299 = vst [vmem:[#allocation36_spill] sm:$0xff] %v15371_v9 }
 0x60a   :  { %v13184_v30 = vpop.f32.mrf.mxu0 }
 0x641   :  { %v15373_v43 = vpop.f32.mrf.mxu1 }
 0x642   :  { %17300 = vst [vmem:[#allocation37_spill] sm:$0xff] %v15373_v43 }
 0x643   :  { %v13177_v59 = vpop.f32.mrf.mxu1 }
 0x649   :  { %v15375_v63 = vpop.f32.mrf.mxu1 }
 0x64a   :  { %17301 = vst [vmem:[#allocation38_spill] sm:$0xff] %v15375_v63 }
 0x64b   :  { %v13191_v0 = vpop.f32.mrf.mxu1 }
 0x64d   :  { %v15377_v38 = vpop.f32.mrf.mxu0 }
 0x64e   :  { %17302 = vst [vmem:[#allocation39_spill] sm:$0xff] %v15377_v38 }
 0x64f   :  { %v13198_v5 = vpop.f32.mrf.mxu0 }
 0x651   :  { %v15379_v4 = vpop.f32.mrf.mxu0 }
 0x652   :  { %17303 = vst [vmem:[#allocation40_spill] sm:$0xff] %v15379_v4  ;;  %v15381_v3 = vpop.f32.mrf.mxu1 }
 0x653   :  { %17304 = vst [vmem:[#allocation41_spill] sm:$0xff] %v15381_v3  ;;  %v13212_v8 = vpop.f32.mrf.mxu0 }
 0x654   :  { %v13205_v13 = vpop.f32.mrf.mxu1 }
 0x655   :  { %v15417_v13 = vpop.permute.xlu0 %4382 }
 0x659   :  { %v3556_v36 = vpop.f32.mrf.mxu0 }
 0x65a   :  { %v4134_v52 = vsel %vm1364_vm3, %v3556_v36, -inf }
 0x65b   :  { %4135 = vmax.xlane.f32.xlu0 %v4134_v52  ;;  %v13226_v58 = vpop.f32.mrf.mxu0  ;;  %v17306_v52 = vld [vmem:[#allocation23_spill] sm:$0xff] }
 0x65c   :  { %v17307_v58 = vld [vmem:[#allocation21_spill] sm:$0xff] }
 0x661   :  { %v3720_v25 = vpop.f32.mrf.mxu0 }
 0x662   :  { %v4140_v32 = vsel %vm1364_vm3, %v3720_v25, -inf }
 0x663   :  { %4141 = vmax.xlane.f32.xlu0 %v4140_v32  ;;  %v13240_v10 = vpop.f32.mrf.mxu0  ;;  %v15427_v32 = vpop.permute.xlu0 %4380 }
 0x664   :  { %v17308_v10 = vld [vmem:[#allocation22_spill] sm:$0xff] }
 0x695   :  { %v15385_v19 = vpop.f32.mrf.mxu0 }
 0x696   :  { %v4146_v1 = vsel %vm1364_vm3, %v15385_v19, -inf }
 0x697   :  { %v13254_v23 = vpop.f32.mrf.mxu0 }
 0x698   :  { %v15431_v23 = vpop.permute.xlu0 %4540 }
 0x69a   :  { %v15387_v35 = vpop.f32.mrf.mxu1 }
 0x69b   :  { %17305 = vst [vmem:[#allocation42_spill] sm:$0xff] %v15387_v35 }
 0x69c   :  { %v13219_v28 = vpop.f32.mrf.mxu1 }
 0x69d   :  { %v17309_v28 = vld [vmem:[#allocation27_spill] sm:$0xff] }
 0x6a1   :  { %v15389_v51 = vpop.f32.mrf.mxu0 }
 0x6a2   :  { %v3638_v7 = vpop.f32.mrf.mxu1  ;;  %v4152_v30 = vsel %vm1364_vm3, %v15389_v51, -inf }
 0x6a3   :  { %v13268_v14 = vpop.f32.mrf.mxu0  ;;  %v4137_v44 = vsel %vm1364_vm3, %v3638_v7, -inf }
 0x6a4   :  { %4138 = vmax.xlane.f32.xlu1 %v4137_v44  ;;  %v13233_v41 = vpop.f32.mrf.mxu1 }
 0x6aa   :  { %v3802_v37 = vpop.f32.mrf.mxu1 }
 0x6ab   :  { %v4143_v46 = vsel %vm1364_vm3, %v3802_v37, -inf }
 0x6ac   :  { %4144 = vmax.xlane.f32.xlu0 %v4143_v46  ;;  %v13247_v2 = vpop.f32.mrf.mxu1 }
 0x6b0   :  { %4147 = vmax.xlane.f32.xlu0 %v4146_v1 }
 0x6b2   :  { %v15395_v24 = vpop.f32.mrf.mxu1 }
 0x6b3   :  { %v4149_v59 = vsel %vm1364_vm3, %v15395_v24, -inf }
 0x6b4   :  { %4153 = vmax.xlane.f32.xlu0 %v4152_v30  ;;  %4150 = vmax.xlane.f32.xlu1 %v4149_v59  ;;  %v13261_v0 = vpop.f32.mrf.mxu1 }
 0x6ba   :  { %v15401_v5 = vpop.f32.mrf.mxu1 }
 0x6bb   :  { %v4155_v30 = vsel %vm1364_vm3, %v15401_v5, -inf }
 0x6bc   :  { %v13275_v8 = vpop.f32.mrf.mxu1 }
 0x6c5   :  { %4617 = vrot.lane.b32.xlu1 %v14959_v45, %s14383_s14 }
 0x6c9   :  { %4777 = vrot.lane.b32.xlu1 %v14976_v18, %s14383_s14 }
 0x6ca   :  { %4538 = vrot.lane.b32.xlu0 %v14929_v57, %s14383_s14 }
 0x6cd   :  { %4775 = vrot.lane.b32.xlu1 %v14984_v48, %s14383_s14 }
 0x6ce   :  { %4698 = vrot.lane.b32.xlu0 %v14947_v34, %s14383_s14 }
 0x6d1   :  { %4981 = vrot.lane.b32.xlu1 %v14573_v6, %s14384_s15 }
 0x6d2   :  { %4696 = vrot.lane.b32.xlu0 %v14953_v11, %s14383_s14 }
 0x6d5   :  { %4979 = vrot.lane.b32.xlu1 %v14595_v15, %s14384_s15 }
 0x6d6   :  { %4899 = vrot.lane.b32.xlu0 %v14561_v62, %s14384_s15 }
 0x6d9   :  { %5063 = vrot.lane.b32.xlu1 %v17306_v52, %s14384_s15 }
 0x6da   :  { %4897 = vrot.lane.b32.xlu0 %v17307_v58, %s14384_s15 }
 0x6de   :  { %4895 = vrot.lane.b32.xlu0 %v17308_v10, %s14384_s15 }
 0x6e2   :  { %4977 = vrot.lane.b32.xlu0 %v17309_v28, %s14384_s15 }
 0x6e4   :  { %v4136_v14 = vpop.xlane.xlu0 %4135 }
 0x6e5   :  { %v4158_v44 = vsub.f32 %v3556_v36, %v4136_v14  ;;  %v15447_v14 = vpop.permute.xlu1 %4461 }
 0x6e7   :  { %v4166_v41 = vmul.f32 1.442695, %v4158_v44 }
 0x6e9   :  { %14009 = vpow2.f32 %v4166_v41  ;;  %v15449_v44 = vpop.permute.xlu1 %4459 }
 0x6ec   :  { %v4142_v46 = vpop.xlane.xlu0 %4141 }
 0x6ed   :  { %v4160_v2 = vsub.f32 %v3720_v25, %v4142_v46  ;;  %v17310_v25 = vld [vmem:[#allocation26_spill] sm:$0xff]  ;;  %v15451_v41 = vpop.permute.xlu1 %4619 }
 0x6ef   :  { %v4170_v1 = vmul.f32 1.442695, %v4160_v2 }
 0x6f1   :  { %14011 = vpow2.f32 %v4170_v1 }
 0x6f6   :  { %v15437_v59 = vpop.eup %14009 }
 0x6f7   :  { %v4182_v0 = vsel %vm1364_vm3, %v15437_v59, 0.0 }
 0x6fd   :  { %4156 = vmax.xlane.f32.xlu1 %v4155_v30 }
 0x6fe   :  { %v15441_v8 = vpop.eup %14011 }
 0x6ff   :  { %v4188_v36 = vsel %vm1364_vm3, %v15441_v8, 0.0 }
 0x701   :  { %4183 = vadd.xlane.f32.xlu0 %v4182_v0 }
 0x705   :  { %4189 = vadd.xlane.f32.xlu0 %v4188_v36 }
 0x70e   :  { %5145 = vrot.lane.b32.xlu1 %v17310_v25, %s14384_s15 }
 0x72d   :  { %v4139_v46 = vpop.xlane.xlu1 %4138 }
 0x72e   :  { %v4159_v2 = vsub.f32 %v3638_v7, %v4139_v46 }
 0x730   :  { %v4168_v1 = vmul.f32 1.442695, %v4159_v2 }
 0x732   :  { %14013 = vpow2.f32 %v4168_v1 }
 0x735   :  { %v4145_v30 = vpop.xlane.xlu0 %4144 }
 0x736   :  { %v4161_v4 = vsub.f32 %v3802_v37, %v4145_v30 }
 0x738   :  { %v4172_v0 = vmul.f32 1.442695, %v4161_v4 }
 0x739   :  { %v4148_v38 = vpop.xlane.xlu0 %4147 }
 0x73a   :  { %14015 = vpow2.f32 %v4172_v0  ;;  %v4162_v36 = vsub.f32 %v15385_v19, %v4148_v38 }
 0x73c   :  { %v4174_v9 = vmul.f32 1.442695, %v4162_v36  ;;  %v17311_v36 = vld [vmem:[#allocation28_spill] sm:$0xff] }
 0x73d   :  { %v4154_v35 = vpop.xlane.xlu0 %4153  ;;  %v4151_v43 = vpop.xlane.xlu1 %4150 }
 0x73e   :  { %14017 = vpow2.f32 %v4174_v9  ;;  %v4164_v3 = vsub.f32 %v15389_v51, %v4154_v35  ;;  %v4163_v63 = vsub.f32 %v15395_v24, %v4151_v43 }
 0x73f   :  { %v15456_v61 = vpop.eup %14013 }
 0x740   :  { %v4178_v7 = vmul.f32 1.442695, %v4164_v3  ;;  %v4176_v46 = vmul.f32 1.442695, %v4163_v63  ;;  %v4185_v37 = vsel %vm1364_vm3, %v15456_v61, 0.0 }
 0x741   :  { %4186 = vadd.xlane.f32.xlu1 %v4185_v37  ;;  %v4539_v51 = vpop.permute.xlu0 %4538  ;;  %v15478_v24 = vpop.permute.xlu1 %4617  ;;  %v17312_v37 = vld [vmem:[#allocation30_spill] sm:$0xff] }
 0x742   :  { %14019 = vpow2.f32 %v4178_v7 }
 0x743   :  { %14021 = vpow2.f32 %v4176_v46 }
 0x745   :  { %v15482_v2 = vpop.permute.xlu0 %4698  ;;  %v15484_v1 = vpop.permute.xlu1 %4777 }
 0x747   :  { %v15460_v4 = vpop.eup %14015 }
 0x748   :  { %v4191_v38 = vsel %vm1364_vm3, %v15460_v4, 0.0 }
 0x749   :  { %4192 = vadd.xlane.f32.xlu1 %v4191_v38  ;;  %v15488_v30 = vpop.permute.xlu0 %4696  ;;  %v15492_v0 = vpop.permute.xlu1 %4775 }
 0x74b   :  { %v15464_v9 = vpop.eup %14017 }
 0x74c   :  { %v4194_v43 = vsel %vm1364_vm3, %v15464_v9, 0.0 }
 0x74d   :  { %4195 = vadd.xlane.f32.xlu0 %v4194_v43  ;;  %v15496_v7 = vpop.permute.xlu0 %4899  ;;  %v15498_v46 = vpop.permute.xlu1 %4981  ;;  %v17313_v43 = vld [vmem:[#allocation33_spill] sm:$0xff] }
 0x74f   :  { %v15468_v3 = vpop.eup %14019 }
 0x750   :  { %v15470_v63 = vpop.eup %14021  ;;  %v4200_v19 = vsel %vm1364_vm3, %v15468_v3, 0.0 }
 0x751   :  { %4201 = vadd.xlane.f32.xlu0 %v4200_v19  ;;  %v4197_v35 = vsel %vm1364_vm3, %v15470_v63, 0.0  ;;  %v15502_v38 = vpop.permute.xlu0 %4897  ;;  %v15506_v19 = vpop.permute.xlu1 %4979 }
 0x752   :  { %4198 = vadd.xlane.f32.xlu1 %v4197_v35  ;;  %v17314_v35 = vld [vmem:[#allocation32_spill] sm:$0xff] }
 0x763   :  { %5143 = vrot.lane.b32.xlu1 %v14631_v27, %s14384_s15 }
 0x767   :  { %5061 = vrot.lane.b32.xlu0 %v14585_v12, %s14384_s15 }
 0x76b   :  { %5059 = vrot.lane.b32.xlu0 %v14599_v16, %s14384_s15  ;;  %v17315_v16 = vld [vmem:[#allocation34_spill] sm:$0xff] }
 0x76f   :  { %5141 = vrot.lane.b32.xlu0 %v14646_v31, %s14384_s15  ;;  %v15510_v31 = vpop.permute.xlu0 %4895 }
 0x773   :  { %5225 = vrot.lane.b32.xlu0 %v17311_v36, %s14384_s15  ;;  %v15512_v36 = vpop.permute.xlu1 %5063  ;;  %v15516_v12 = vpop.permute.xlu0 %4977 }
 0x777   :  { %5223 = vrot.lane.b32.xlu0 %v17312_v37, %s14384_s15 }
 0x77b   :  { %5305 = vrot.lane.b32.xlu0 %v17313_v43, %s14384_s15 }
 0x77f   :  { %5389 = vrot.lane.b32.xlu0 %v17314_v35, %s14384_s15 }
 0x783   :  { %5387 = vrot.lane.b32.xlu0 %v17315_v16, %s14384_s15 }
 0x786   :  { %v4157_v37 = vpop.xlane.xlu1 %4156 }
 0x787   :  { %v4165_v27 = vsub.f32 %v15401_v5, %v4157_v37  ;;  %5641 = vrot.lane.b32.xlu0 %v14695_v47, %s14384_s15 }
 0x789   :  { %v4180_v43 = vmul.f32 1.442695, %v4165_v27 }
 0x78a   :  { %v4184_v25 = vpop.xlane.xlu0 %4183 }
 0x78b   :  { %14023 = vpow2.f32 %v4180_v43  ;;  %5799 = vrot.lane.b32.xlu0 %v14850_v22, %s14384_s15 }
 0x78c   :  { %14025 = vrcp.f32 %v4184_v25 }
 0x78e   :  { %v4190_v35 = vpop.xlane.xlu0 %4189 }
 0x78f   :  { %14027 = vrcp.f32 %v4190_v35  ;;  %5797 = vrot.lane.b32.xlu0 %v14856_v55, %s14384_s15 }
 0x793   :  { %5957 = vrot.lane.b32.xlu0 %v14864_v26, %s14384_s15 }
 0x798   :  { %v15527_v16 = vpop.eup %14023 }
 0x799   :  { %v14026_v5 = vpop.eup %14025  ;;  %v4203_v27 = vsel %vm1364_vm3, %v15527_v16, 0.0 }
 0x79a   :  { %4204 = vadd.xlane.f32.xlu1 %v4203_v27  ;;  %v4214_v37 = vmul.f32 %v14026_v5, %v15437_v59 }
 0x79c   :  { %v14028_v43 = vpop.eup %14027  ;;  %13281 = vmatmul.mubr.msk.f32.vlgmr.msra.gmra.mxu0 %vm1364_vm3, %v4214_v37 }
 0x79d   :  { %13291 = vmatpush3.msra.mxu0 %v15417_v13  ;;  %13294 = vmatprep.mubr.msk.f32.mxu0 %vm14381_vm1, %v17296_v60  ;;  %v4216_v25 = vmul.f32 %v14028_v43, %v15441_v8  ;;  %v15560_v13 = vpop.permute.xlu1 %5145 }
 0x79e   :  { %13292 = vmatprep.subr.mxu0 %v17296_v60 }
 0x79f   :  { %13293 = vmatpush3.msra.mxu0 %v15427_v32 }
 0x7a0   :  { %13304 = vmatprep.subr.mxu0 %v17296_v60  ;;  %13295 = vmatmul.mubr.msk.f32.vlgmr.msra.gmra.mxu0 %vm1364_vm3, %v4216_v25 }
 0x7a1   :  { %13305 = vmatpush3.msra.mxu0 %v15431_v23  ;;  %13308 = vmatprep.mubr.msk.f32.mxu0 %vm14381_vm1, %v17296_v60 }
 0x7a2   :  { %13306 = vmatprep.subr.mxu0 %v17296_v60 }
 0x7a3   :  { %13307 = vmatpush3.msra.mxu0 %v4539_v51 }
 0x7a4   :  { %13318 = vmatprep.subr.mxu0 %v17296_v60 }
 0x7ab   :  { %5227 = vrot.lane.b32.xlu1 %v14613_v21, %s14384_s15 }
 0x7af   :  { %5309 = vrot.lane.b32.xlu1 %v14638_v29, %s14384_s15 }
 0x7b3   :  { %5307 = vrot.lane.b32.xlu1 %v14671_v40, %s14384_s15 }
 0x7b7   :  { %5391 = vrot.lane.b32.xlu1 %v14651_v33, %s14384_s15 }
 0x7bb   :  { %5473 = vrot.lane.b32.xlu1 %v14687_v42, %s14384_s15 }
 0x7bf   :  { %5471 = vrot.lane.b32.xlu1 %v14708_v50, %s14384_s15 }
 0x7c3   :  { %5469 = vrot.lane.b32.xlu1 %v14726_v54, %s14384_s15 }
 0x7c7   :  { %5720 = vrot.lane.b32.xlu1 %v14723_v53, %s14384_s15 }
 0x7ca   :  { %v4187_v32 = vpop.xlane.xlu1 %4186 }
 0x7cb   :  { %14029 = vrcp.f32 %v4187_v32  ;;  %5639 = vrot.lane.b32.xlu1 %v14703_v49, %s14384_s15 }
 0x7cf   :  { %5718 = vrot.lane.b32.xlu1 %v14730_v56, %s14384_s15 }
 0x7d2   :  { %v4193_v23 = vpop.xlane.xlu1 %4192 }
 0x7d3   :  { %14031 = vrcp.f32 %v4193_v23  ;;  %5878 = vrot.lane.b32.xlu1 %v14900_v39, %s14384_s15 }
 0x7d6   :  { %v4196_v59 = vpop.xlane.xlu0 %4195 }
 0x7d7   :  { %14033 = vrcp.f32 %v4196_v59  ;;  %5876 = vrot.lane.b32.xlu1 %v14906_v17, %s14384_s15 }
 0x7d8   :  { %v14030_v8 = vpop.eup %14029 }
 0x7d9   :  { %v4215_v51 = vmul.f32 %v14030_v8, %v15456_v61 }
 0x7da   :  { %v4202_v35 = vpop.xlane.xlu0 %4201 }
 0x7db   :  { %14035 = vrcp.f32 %v4202_v35  ;;  %v4199_v5 = vpop.xlane.xlu1 %4198  ;;  %6036 = vrot.lane.b32.xlu1 %v14912_v20, %s14384_s15  ;;  %13288 = vmatmul.mubr.msk.f32.vlgmr.msra.gmra.mxu1 %vm1364_vm3, %v4215_v51 }
 0x7dc   :  { %14037 = vrcp.f32 %v4199_v5  ;;  %13298 = vmatpush3.msra.mxu1 %v15447_v14  ;;  %13301 = vmatprep.mubr.msk.f32.mxu1 %vm14381_vm1, %v17296_v60 }
 0x7dd   :  { %13299 = vmatprep.subr.mxu1 %v17296_v60 }
 0x7de   :  { %13300 = vmatpush3.msra.mxu1 %v15449_v44 }
 0x7df   :  { %13311 = vmatprep.subr.mxu1 %v17296_v60 }
 0x7e0   :  { %v14032_v61 = vpop.eup %14031 }
 0x7e1   :  { %v4217_v27 = vmul.f32 %v14032_v61, %v15460_v4 }
 0x7e3   :  { %13302 = vmatmul.mubr.msk.f32.vlgmr.msra.gmra.mxu1 %vm1364_vm3, %v4217_v27 }
 0x7e4   :  { %v14034_v37 = vpop.eup %14033  ;;  %13312 = vmatpush3.msra.mxu1 %v15451_v41  ;;  %13315 = vmatprep.mubr.msk.f32.mxu1 %vm14381_vm1, %v17296_v60 }
 0x7e5   :  { %13313 = vmatprep.subr.mxu1 %v17296_v60  ;;  %v4218_v14 = vmul.f32 %v14034_v37, %v15464_v9 }
 0x7e6   :  { %13314 = vmatpush3.msra.mxu1 %v15478_v24 }
 0x7e7   :  { %13309 = vmatmul.mubr.msk.f32.vlgmr.msra.gmra.mxu0 %vm1364_vm3, %v4218_v14  ;;  %13325 = vmatprep.subr.mxu1 %v17296_v60 }
 0x7e8   :  { %v14036_v44 = vpop.eup %14035  ;;  %13319 = vmatpush3.msra.mxu0 %v15482_v2  ;;  %13322 = vmatprep.mubr.msk.f32.mxu0 %vm14381_vm1, %v17296_v60  ;;  %v5144_v2 = vpop.permute.xlu1 %5143 }
 0x7e9   :  { %v14038_v41 = vpop.eup %14037  ;;  %13320 = vmatprep.subr.mxu0 %v17296_v60  ;;  %v4220_v4 = vmul.f32 %v14036_v44, %v15468_v3  ;;  %v5062_v3 = vpop.permute.xlu0 %5061 }
 0x7ea   :  { %13321 = vmatpush3.msra.mxu0 %v15488_v30  ;;  %v4219_v9 = vmul.f32 %v14038_v41, %v15470_v63 }
 0x7eb   :  { %13332 = vmatprep.subr.mxu0 %v17296_v60  ;;  %13323 = vmatmul.mubr.msk.f32.vlgmr.msra.gmra.mxu0 %vm1364_vm3, %v4220_v4 }
 0x7ec   :  { %13316 = vmatmul.mubr.msk.f32.vlgmr.msra.gmra.mxu1 %vm1364_vm3, %v4219_v9  ;;  %13333 = vmatpush3.xpose.msk.msra.mxu0 %vm731_vm2, %v15496_v7 }
 0x7ed   :  { %13326 = vmatpush3.msra.mxu1 %v15484_v1  ;;  %13334 = vmatprep.subr.mxu0 %v17296_v60  ;;  %v5060_v63 = vpop.permute.xlu0 %5059 }
 0x7ee   :  { %13327 = vmatprep.subr.mxu1 %v17296_v60  ;;  %13336 = vmatprep.mubr.msk.f32.mxu0 %vm14381_vm1, %v17296_v60 }
 0x7ef   :  { %13328 = vmatpush3.msra.mxu1 %v15492_v0  ;;  %13329 = vmatprep.mubr.msk.f32.mxu1 %vm14381_vm1, %v17296_v60 }
 0x7f0   :  { %13335 = vmatpush3.xpose.msk.msra.mxu0 %vm731_vm2, %v15502_v38  ;;  %13339 = vmatprep.subr.mxu1 %v17296_v60 }
 0x7f1   :  { %13346 = vmatprep.subr.mxu0 %v17296_v60 }
 0x7f3   :  { %13337 = vmatmul.mubr.msk.f32.vlgmr.msra.gmra.mxu0 %vm731_vm2, %v15510_v31  ;;  %v5142_v31 = vpop.permute.xlu0 %5141 }
 0x7f4   :  { %13347 = vmatpush3.xpose.msk.msra.mxu0 %vm731_vm2, %v15512_v36  ;;  %13350 = vmatprep.mubr.msk.f32.mxu0 %vm14381_vm1, %v17296_v60 }
 0x7f5   :  { %13348 = vmatprep.subr.mxu0 %v17296_v60 }
 0x7f7   :  { %v5226_v24 = vpop.permute.xlu0 %5225 }
 0x7f8   :  { %13349 = vmatpush3.xpose.msk.msra.mxu0 %vm731_vm2, %v5062_v3 }
 0x7f9   :  { %13360 = vmatprep.subr.mxu0 %v17296_v60 }
 0x7fb   :  { %13351 = vmatmul.mubr.msk.f32.vlgmr.msra.gmra.mxu0 %vm731_vm2, %v5060_v63  ;;  %v5224_v1 = vpop.permute.xlu0 %5223 }
 0x7fc   :  { %13364 = vmatprep.mubr.msk.f32.mxu0 %vm14381_vm1, %v17296_v60 }
 0x7ff   :  { %v5306_v36 = vpop.permute.xlu0 %5305 }
 0x803   :  { %v5390_v38 = vpop.permute.xlu0 %5389 }
 0x807   :  { %v5388_v59 = vpop.permute.xlu0 %5387 }
 0x823   :  { %v4205_v30 = vpop.xlane.xlu1 %4204 }
 0x824   :  { %14039 = vrcp.f32 %v4205_v30 }
 0x827   :  { %v5228_v0 = vpop.permute.xlu1 %5227 }
 0x828   :  { %13361 = vmatpush3.xpose.msk.msra.mxu0 %vm731_vm2, %v5228_v0 }
 0x829   :  { %13362 = vmatprep.subr.mxu0 %v17296_v60 }
 0x82b   :  { %v5310_v7 = vpop.permute.xlu1 %5309 }
 0x82c   :  { %13363 = vmatpush3.xpose.msk.msra.mxu0 %vm731_vm2, %v5226_v24 }
 0x82d   :  { %13374 = vmatprep.subr.mxu0 %v17296_v60 }
 0x82f   :  { %13365 = vmatmul.mubr.msk.f32.vlgmr.msra.gmra.mxu0 %vm731_vm2, %v5224_v1  ;;  %v5308_v43 = vpop.permute.xlu1 %5307 }
 0x830   :  { %13378 = vmatprep.mubr.msk.f32.mxu0 %vm14381_vm1, %v17296_v60 }
 0x831   :  { %v14040_v25 = vpop.eup %14039 }
 0x832   :  { %v4221_v32 = vmul.f32 %v14040_v25, %v15527_v16  ;;  %v5642_v16 = vpop.permute.xlu0 %5641 }
 0x833   :  { %v5392_v23 = vpop.permute.xlu1 %5391 }
 0x834   :  { %13330 = vmatmul.mubr.msk.f32.vlgmr.msra.gmra.mxu1 %vm1364_vm3, %v4221_v32  ;;  %13375 = vmatpush3.xpose.msk.msra.mxu0 %vm731_vm2, %v5392_v23 }
 0x835   :  { %13340 = vmatpush3.xpose.msk.msra.mxu1 %vm731_vm2, %v15498_v46  ;;  %13376 = vmatprep.subr.mxu0 %v17296_v60 }
 0x836   :  { %13341 = vmatprep.subr.mxu1 %v17296_v60  ;;  %13343 = vmatprep.mubr.msk.f32.mxu1 %vm14381_vm1, %v17296_v60 }
 0x837   :  { %v5474_v8 = vpop.permute.xlu1 %5473 }
 0x838   :  { %13377 = vmatpush3.xpose.msk.msra.mxu0 %vm731_vm2, %v5390_v38 }
 0x839   :  { %13342 = vmatpush3.xpose.msk.msra.mxu1 %vm731_vm2, %v15506_v19  ;;  %13388 = vmatprep.subr.mxu0 %v17296_v60 }
 0x83a   :  { %13353 = vmatprep.subr.mxu1 %v17296_v60 }
 0x83b   :  { %13379 = vmatmul.mubr.msk.f32.vlgmr.msra.gmra.mxu0 %vm731_vm2, %v5388_v59  ;;  %v5472_v46 = vpop.permute.xlu1 %5471 }
 0x83c   :  { %13344 = vmatmul.mubr.msk.f32.vlgmr.msra.gmra.mxu1 %vm731_vm2, %v15516_v12  ;;  %13389 = vmatpush3.msra.mxu0 %v5642_v16 }
 0x83d   :  { %13354 = vmatpush3.xpose.msk.msra.mxu1 %vm731_vm2, %v15560_v13  ;;  %13357 = vmatprep.mubr.msk.f32.mxu1 %vm14381_vm1, %v17296_v60 }
 0x83e   :  { %13355 = vmatprep.subr.mxu1 %v17296_v60  ;;  %13390 = vmatprep.subr.mxu0 %v17296_v60 }
 0x83f   :  { %v5470_v19 = vpop.permute.xlu1 %5469  ;;  %13392 = vmatprep.mubr.msk.f32.mxu0 %vm14381_vm1, %v17296_v60 }
 0x841   :  { %13356 = vmatpush3.xpose.msk.msra.mxu1 %vm731_vm2, %v5144_v2 }
 0x842   :  { %13367 = vmatprep.subr.mxu1 %v17296_v60 }
 0x843   :  { %v5721_v12 = vpop.permute.xlu1 %5720 }
 0x844   :  { %13358 = vmatmul.mubr.msk.f32.vlgmr.msra.gmra.mxu1 %vm731_vm2, %v5142_v31 }
 0x845   :  { %13368 = vmatpush3.xpose.msk.msra.mxu1 %vm731_vm2, %v5310_v7  ;;  %13371 = vmatprep.mubr.msk.f32.mxu1 %vm14381_vm1, %v17296_v60 }
 0x846   :  { %13369 = vmatprep.subr.mxu1 %v17296_v60 }
 0x847   :  { %v5640_v13 = vpop.permute.xlu1 %5639 }
 0x848   :  { %13391 = vmatpush3.msra.mxu0 %v5640_v13 }
 0x849   :  { %13370 = vmatpush3.xpose.msk.msra.mxu1 %vm731_vm2, %v5308_v43  ;;  %13402 = vmatprep.subr.mxu0 %v17296_v60 }
 0x84a   :  { %13381 = vmatprep.subr.mxu1 %v17296_v60 }
 0x84b   :  { %v5719_v51 = vpop.permute.xlu1 %5718 }
 0x84c   :  { %13372 = vmatmul.mubr.msk.f32.vlgmr.msra.gmra.mxu1 %vm731_vm2, %v5306_v36 }
 0x84d   :  { %13382 = vmatpush3.xpose.msk.msra.mxu1 %vm731_vm2, %v5474_v8  ;;  %13385 = vmatprep.mubr.msk.f32.mxu1 %vm14381_vm1, %v17296_v60 }
 0x84e   :  { %13383 = vmatprep.subr.mxu1 %v17296_v60 }
 0x851   :  { %13384 = vmatpush3.xpose.msk.msra.mxu1 %vm731_vm2, %v5472_v46 }
 0x852   :  { %13395 = vmatprep.subr.mxu1 %v17296_v60 }
 0x854   :  { %13386 = vmatmul.mubr.msk.f32.vlgmr.msra.gmra.mxu1 %vm731_vm2, %v5470_v19 }
 0x855   :  { %13396 = vmatpush3.msra.mxu1 %v5721_v12  ;;  %13399 = vmatprep.mubr.msk.f32.mxu1 %vm14381_vm1, %v17296_v60 }
 0x856   :  { %13397 = vmatprep.subr.mxu1 %v17296_v60 }
 0x857   :  { %13398 = vmatpush3.msra.mxu1 %v5719_v51 }
 0x858   :  { %13409 = vmatprep.subr.mxu1 %v17296_v60 }
 0x85c   :  { %v15682_v35 = vpop.f32.mrf.mxu0 }
 0x85d   :  { %17316 = vst [vmem:[#allocation23_spill] sm:$0xff] %v15682_v35  ;;  %v17332_v35 = vld [vmem:[#allocation32_spill] sm:$0xff] }
 0x85e   :  { %v13282_v5 = vpop.f32.mrf.mxu0 }
 0x860   :  { %v15684_v61 = vpop.f32.mrf.mxu0 }
 0x861   :  { %17317 = vst [vmem:[#allocation21_spill] sm:$0xff] %v15684_v61 }
 0x862   :  { %v13296_v27 = vpop.f32.mrf.mxu0 }
 0x89b   :  { %v15686_v37 = vpop.f32.mrf.mxu1 }
 0x89c   :  { %17318 = vst [vmem:[#allocation22_spill] sm:$0xff] %v15686_v37 }
 0x89d   :  { %v13289_v14 = vpop.f32.mrf.mxu1 }
 0x8a3   :  { %v15688_v44 = vpop.f32.mrf.mxu1 }
 0x8a4   :  { %17319 = vst [vmem:[#allocation27_spill] sm:$0xff] %v15688_v44 }
 0x8a5   :  { %v13303_v41 = vpop.f32.mrf.mxu1 }
 0x8a7   :  { %v15690_v4 = vpop.f32.mrf.mxu0 }
 0x8a8   :  { %17320 = vst [vmem:[#allocation43_spill] sm:$0xff] %v15690_v4 }
 0x8a9   :  { %v13310_v9 = vpop.f32.mrf.mxu0 }
 0x8ab   :  { %v15692_v3 = vpop.f32.mrf.mxu0 }
 0x8ac   :  { %17321 = vst [vmem:[#allocation44_spill] sm:$0xff] %v15692_v3  ;;  %v15694_v63 = vpop.f32.mrf.mxu1 }
 0x8ad   :  { %17322 = vst [vmem:[#allocation45_spill] sm:$0xff] %v15694_v63  ;;  %v13324_v31 = vpop.f32.mrf.mxu0  ;;  %v17331_v63 = vld [vmem:[#allocation33_spill] sm:$0xff] }
 0x8ae   :  { %v13317_v24 = vpop.f32.mrf.mxu1 }
 0x8af   :  { %v15730_v24 = vpop.permute.xlu0 %5799 }
 0x8b3   :  { %v4973_v2 = vpop.f32.mrf.mxu0 }
 0x8b4   :  { %v5551_v1 = vsel %vm1364_vm3, %v4973_v2, -inf }
 0x8b5   :  { %5552 = vmax.xlane.f32.xlu0 %v5551_v1  ;;  %v13338_v30 = vpop.f32.mrf.mxu0  ;;  %v15740_v1 = vpop.permute.xlu0 %5797 }
 0x8b9   :  { %v15744_v30 = vpop.permute.xlu0 %5957 }
 0x8bb   :  { %v5137_v0 = vpop.f32.mrf.mxu0 }
 0x8bc   :  { %v5557_v36 = vsel %vm1364_vm3, %v5137_v0, -inf }
 0x8bd   :  { %5558 = vmax.xlane.f32.xlu0 %v5557_v36  ;;  %v13352_v7 = vpop.f32.mrf.mxu0 }
 0x8ef   :  { %v15698_v38 = vpop.f32.mrf.mxu0 }
 0x8f0   :  { %v5563_v51 = vsel %vm1364_vm3, %v15698_v38, -inf }
 0x8f1   :  { %v13366_v43 = vpop.f32.mrf.mxu0 }
 0x8f4   :  { %v15700_v25 = vpop.f32.mrf.mxu1 }
 0x8f5   :  { %17323 = vst [vmem:[#allocation46_spill] sm:$0xff] %v15700_v25 }
 0x8f6   :  { %v13331_v32 = vpop.f32.mrf.mxu1 }
 0x8fb   :  { %v15702_v23 = vpop.f32.mrf.mxu0 }
 0x8fc   :  { %v5055_v59 = vpop.f32.mrf.mxu1  ;;  %v5569_v27 = vsel %vm1364_vm3, %v15702_v23, -inf }
 0x8fd   :  { %v13380_v8 = vpop.f32.mrf.mxu0  ;;  %v5554_v16 = vsel %vm1364_vm3, %v5055_v59, -inf }
 0x8fe   :  { %5555 = vmax.xlane.f32.xlu1 %v5554_v16  ;;  %v13345_v46 = vpop.f32.mrf.mxu1 }
 0x904   :  { %v5219_v19 = vpop.f32.mrf.mxu1 }
 0x905   :  { %v5560_v12 = vsel %vm1364_vm3, %v5219_v19, -inf }
 0x906   :  { %5561 = vmax.xlane.f32.xlu0 %v5560_v12  ;;  %v13359_v13 = vpop.f32.mrf.mxu1 }
 0x90a   :  { %5564 = vmax.xlane.f32.xlu0 %v5563_v51 }
 0x90c   :  { %v15708_v5 = vpop.f32.mrf.mxu1 }
 0x90d   :  { %v5566_v14 = vsel %vm1364_vm3, %v15708_v5, -inf }
 0x90e   :  { %5570 = vmax.xlane.f32.xlu0 %v5569_v27  ;;  %5567 = vmax.xlane.f32.xlu1 %v5566_v14  ;;  %v13373_v41 = vpop.f32.mrf.mxu1  ;;  %v15760_v27 = vpop.permute.xlu1 %5878 }
 0x912   :  { %v15762_v14 = vpop.permute.xlu1 %5876 }
 0x914   :  { %v15714_v9 = vpop.f32.mrf.mxu1 }
 0x915   :  { %v5572_v46 = vsel %vm1364_vm3, %v15714_v9, -inf }
 0x916   :  { %v13387_v31 = vpop.f32.mrf.mxu1  ;;  %v15764_v41 = vpop.permute.xlu1 %6036 }
 0x91f   :  { %6034 = vrot.lane.b32.xlu1 %v14959_v45, %s14384_s15 }
 0x923   :  { %6194 = vrot.lane.b32.xlu1 %v14976_v18, %s14384_s15 }
 0x924   :  { %5955 = vrot.lane.b32.xlu0 %v14929_v57, %s14384_s15 }
 0x927   :  { %6192 = vrot.lane.b32.xlu1 %v14984_v48, %s14384_s15 }
 0x928   :  { %6115 = vrot.lane.b32.xlu0 %v14947_v34, %s14384_s15 }
 0x92b   :  { %6398 = vrot.lane.b32.xlu1 %v14573_v6, %s14385_s3 }
 0x92c   :  { %6113 = vrot.lane.b32.xlu0 %v14953_v11, %s14384_s15 }
 0x92f   :  { %6396 = vrot.lane.b32.xlu1 %v14595_v15, %s14385_s3 }
 0x930   :  { %6316 = vrot.lane.b32.xlu0 %v14561_v62, %s14385_s3 }
 0x933   :  { %6480 = vrot.lane.b32.xlu1 %v17306_v52, %s14385_s3 }
 0x934   :  { %6314 = vrot.lane.b32.xlu0 %v17307_v58, %s14385_s3 }
 0x938   :  { %6312 = vrot.lane.b32.xlu0 %v17308_v10, %s14385_s3 }
 0x93c   :  { %6394 = vrot.lane.b32.xlu0 %v17309_v28, %s14385_s3 }
 0x93e   :  { %v5553_v36 = vpop.xlane.xlu0 %5552 }
 0x93f   :  { %v5575_v7 = vsub.f32 %v4973_v2, %v5553_v36 }
 0x941   :  { %v5583_v43 = vmul.f32 1.442695, %v5575_v7 }
 0x943   :  { %14041 = vpow2.f32 %v5583_v43 }
 0x946   :  { %v5559_v32 = vpop.xlane.xlu0 %5558 }
 0x947   :  { %v5577_v8 = vsub.f32 %v5137_v0, %v5559_v32  ;;  %v17324_v0 = vld [vmem:[#allocation26_spill] sm:$0xff] }
 0x949   :  { %v5587_v16 = vmul.f32 1.442695, %v5577_v8 }
 0x94b   :  { %14043 = vpow2.f32 %v5587_v16 }
 0x950   :  { %v15750_v12 = vpop.eup %14041 }
 0x951   :  { %v5599_v13 = vsel %vm1364_vm3, %v15750_v12, 0.0 }
 0x957   :  { %5573 = vmax.xlane.f32.xlu1 %v5572_v46 }
 0x958   :  { %v15754_v51 = vpop.eup %14043 }
 0x959   :  { %v5605_v2 = vsel %vm1364_vm3, %v15754_v51, 0.0 }
 0x95b   :  { %5600 = vadd.xlane.f32.xlu0 %v5599_v13 }
 0x95f   :  { %5606 = vadd.xlane.f32.xlu0 %v5605_v2 }
 0x968   :  { %6562 = vrot.lane.b32.xlu1 %v17324_v0, %s14385_s3 }
 0x987   :  { %v5556_v31 = vpop.xlane.xlu1 %5555 }
 0x988   :  { %v5576_v36 = vsub.f32 %v5055_v59, %v5556_v31 }
 0x98a   :  { %v5585_v7 = vmul.f32 1.442695, %v5576_v36 }
 0x98c   :  { %14045 = vpow2.f32 %v5585_v7 }
 0x98f   :  { %v5562_v43 = vpop.xlane.xlu0 %5561 }
 0x990   :  { %v5578_v32 = vsub.f32 %v5219_v19, %v5562_v43 }
 0x992   :  { %v5589_v8 = vmul.f32 1.442695, %v5578_v32  ;;  %v17325_v32 = vld [vmem:[#allocation29_spill] sm:$0xff] }
 0x993   :  { %v5565_v16 = vpop.xlane.xlu0 %5564 }
 0x994   :  { %14047 = vpow2.f32 %v5589_v8  ;;  %v5579_v46 = vsub.f32 %v15698_v38, %v5565_v16  ;;  %v17326_v16 = vld [vmem:[#allocation24_spill] sm:$0xff] }
 0x996   :  { %v5591_v13 = vmul.f32 1.442695, %v5579_v46 }
 0x997   :  { %v5571_v2 = vpop.xlane.xlu0 %5570  ;;  %v5568_v3 = vpop.xlane.xlu1 %5567 }
 0x998   :  { %14049 = vpow2.f32 %v5591_v13  ;;  %v5581_v4 = vsub.f32 %v15702_v23, %v5571_v2  ;;  %v5580_v61 = vsub.f32 %v15708_v5, %v5568_v3  ;;  %v17327_v2 = vld [vmem:[#allocation25_spill] sm:$0xff] }
 0x999   :  { %v15769_v25 = vpop.eup %14045 }
 0x99a   :  { %v5595_v59 = vmul.f32 1.442695, %v5581_v4  ;;  %v5593_v31 = vmul.f32 1.442695, %v5580_v61  ;;  %v5602_v19 = vsel %vm1364_vm3, %v15769_v25, 0.0 }
 0x99b   :  { %5603 = vadd.xlane.f32.xlu1 %v5602_v19  ;;  %v5956_v43 = vpop.permute.xlu0 %5955  ;;  %v15791_v8 = vpop.permute.xlu1 %6034 }
 0x99c   :  { %14051 = vpow2.f32 %v5595_v59 }
 0x99d   :  { %14053 = vpow2.f32 %v5593_v31  ;;  %v17328_v31 = vld [vmem:[#allocation31_spill] sm:$0xff] }
 0x99f   :  { %v15795_v46 = vpop.permute.xlu0 %6115  ;;  %v15797_v13 = vpop.permute.xlu1 %6194 }
 0x9a1   :  { %v15773_v36 = vpop.eup %14047 }
 0x9a2   :  { %v5608_v38 = vsel %vm1364_vm3, %v15773_v36, 0.0 }
 0x9a3   :  { %5609 = vadd.xlane.f32.xlu1 %v5608_v38  ;;  %v15801_v59 = vpop.permute.xlu0 %6113  ;;  %v15805_v19 = vpop.permute.xlu1 %6192  ;;  %v17329_v38 = vld [vmem:[#allocation28_spill] sm:$0xff] }
 0x9a5   :  { %v15777_v7 = vpop.eup %14049 }
 0x9a6   :  { %v5611_v3 = vsel %vm1364_vm3, %v15777_v7, 0.0 }
 0x9a7   :  { %5612 = vadd.xlane.f32.xlu0 %v5611_v3  ;;  %v15809_v3 = vpop.permute.xlu0 %6316 }
 0x9a9   :  { %v15781_v4 = vpop.eup %14051 }
 0x9aa   :  { %v15783_v61 = vpop.eup %14053  ;;  %v5617_v23 = vsel %vm1364_vm3, %v15781_v4, 0.0 }
 0x9ab   :  { %5618 = vadd.xlane.f32.xlu0 %v5617_v23  ;;  %v5614_v5 = vsel %vm1364_vm3, %v15783_v61, 0.0  ;;  %v15811_v23 = vpop.permute.xlu1 %6398  ;;  %v15815_v37 = vpop.permute.xlu0 %6314 }
 0x9ac   :  { %5615 = vadd.xlane.f32.xlu1 %v5614_v5  ;;  %v17330_v5 = vld [vmem:[#allocation30_spill] sm:$0xff] }
 0x9af   :  { %v15819_v44 = vpop.permute.xlu1 %6396 }
 0x9bd   :  { %6560 = vrot.lane.b32.xlu1 %v17325_v32, %s14385_s3 }
 0x9c1   :  { %6478 = vrot.lane.b32.xlu0 %v17326_v16, %s14385_s3 }
 0x9c5   :  { %6476 = vrot.lane.b32.xlu0 %v17327_v2, %s14385_s3  ;;  %v17333_v2 = vld [vmem:[#allocation34_spill] sm:$0xff] }
 0x9c9   :  { %6558 = vrot.lane.b32.xlu0 %v17328_v31, %s14385_s3  ;;  %v15823_v31 = vpop.permute.xlu0 %6312 }
 0x9cd   :  { %6642 = vrot.lane.b32.xlu0 %v17329_v38, %s14385_s3  ;;  %v15825_v38 = vpop.permute.xlu1 %6480  ;;  %v15829_v16 = vpop.permute.xlu0 %6394 }
 0x9d1   :  { %6640 = vrot.lane.b32.xlu0 %v17330_v5, %s14385_s3 }
 0x9d5   :  { %6722 = vrot.lane.b32.xlu0 %v17331_v63, %s14385_s3 }
 0x9d9   :  { %6806 = vrot.lane.b32.xlu0 %v17332_v35, %s14385_s3 }
 0x9dd   :  { %6804 = vrot.lane.b32.xlu0 %v17333_v2, %s14385_s3 }
 0x9e0   :  { %v5574_v5 = vpop.xlane.xlu1 %5573 }
 0x9e1   :  { %v5582_v32 = vsub.f32 %v15714_v9, %v5574_v5  ;;  %7058 = vrot.lane.b32.xlu0 %v14695_v47, %s14385_s3 }
 0x9e3   :  { %v5597_v63 = vmul.f32 1.442695, %v5582_v32 }
 0x9e4   :  { %v5601_v0 = vpop.xlane.xlu0 %5600 }
 0x9e5   :  { %14055 = vpow2.f32 %v5597_v63  ;;  %7216 = vrot.lane.b32.xlu0 %v14850_v22, %s14385_s3 }
 0x9e6   :  { %14057 = vrcp.f32 %v5601_v0 }
 0x9e8   :  { %v5607_v35 = vpop.xlane.xlu0 %5606 }
 0x9e9   :  { %14059 = vrcp.f32 %v5607_v35  ;;  %7214 = vrot.lane.b32.xlu0 %v14856_v55, %s14385_s3 }
 0x9ed   :  { %7374 = vrot.lane.b32.xlu0 %v14864_v26, %s14385_s3 }
 0x9f2   :  { %v15840_v2 = vpop.eup %14055 }
 0x9f3   :  { %v14058_v9 = vpop.eup %14057  ;;  %v5620_v32 = vsel %vm1364_vm3, %v15840_v2, 0.0 }
 0x9f4   :  { %5621 = vadd.xlane.f32.xlu1 %v5620_v32  ;;  %v5631_v63 = vmul.f32 %v14058_v9, %v15750_v12 }
 0x9f6   :  { %v14060_v5 = vpop.eup %14059  ;;  %13393 = vmatmul.mubr.msk.f32.vlgmr.msra.gmra.mxu0 %vm1364_vm3, %v5631_v63 }
 0x9f7   :  { %13403 = vmatpush3.msra.mxu0 %v15730_v24  ;;  %13406 = vmatprep.mubr.msk.f32.mxu0 %vm14381_vm1, %v17296_v60  ;;  %v5633_v35 = vmul.f32 %v14060_v5, %v15754_v51  ;;  %v15873_v24 = vpop.permute.xlu1 %6562 }
 0x9f8   :  { %13404 = vmatprep.subr.mxu0 %v17296_v60 }
 0x9f9   :  { %13405 = vmatpush3.msra.mxu0 %v15740_v1 }
 0x9fa   :  { %13416 = vmatprep.subr.mxu0 %v17296_v60  ;;  %13407 = vmatmul.mubr.msk.f32.vlgmr.msra.gmra.mxu0 %vm1364_vm3, %v5633_v35 }
 0x9fb   :  { %13417 = vmatpush3.msra.mxu0 %v15744_v30  ;;  %13420 = vmatprep.mubr.msk.f32.mxu0 %vm14381_vm1, %v17296_v60 }
 0x9fc   :  { %13418 = vmatprep.subr.mxu0 %v17296_v60 }
 0x9fd   :  { %13419 = vmatpush3.msra.mxu0 %v5956_v43 }
 0x9fe   :  { %13430 = vmatprep.subr.mxu0 %v17296_v60 }
 0xa05   :  { %6644 = vrot.lane.b32.xlu1 %v14613_v21, %s14385_s3 }
 0xa09   :  { %6726 = vrot.lane.b32.xlu1 %v14638_v29, %s14385_s3 }
 0xa0d   :  { %6724 = vrot.lane.b32.xlu1 %v14671_v40, %s14385_s3 }
 0xa11   :  { %6808 = vrot.lane.b32.xlu1 %v14651_v33, %s14385_s3 }
 0xa15   :  { %6890 = vrot.lane.b32.xlu1 %v14687_v42, %s14385_s3 }
 0xa19   :  { %6888 = vrot.lane.b32.xlu1 %v14708_v50, %s14385_s3 }
 0xa1d   :  { %6886 = vrot.lane.b32.xlu1 %v14726_v54, %s14385_s3 }
 0xa21   :  { %7137 = vrot.lane.b32.xlu1 %v14723_v53, %s14385_s3 }
 0xa24   :  { %v5604_v1 = vpop.xlane.xlu1 %5603 }
 0xa25   :  { %14061 = vrcp.f32 %v5604_v1  ;;  %7056 = vrot.lane.b32.xlu1 %v14703_v49, %s14385_s3 }
 0xa29   :  { %7135 = vrot.lane.b32.xlu1 %v14730_v56, %s14385_s3 }
 0xa2c   :  { %v5610_v30 = vpop.xlane.xlu1 %5609 }
 0xa2d   :  { %14063 = vrcp.f32 %v5610_v30  ;;  %7295 = vrot.lane.b32.xlu1 %v14900_v39, %s14385_s3 }
 0xa30   :  { %v5613_v12 = vpop.xlane.xlu0 %5612 }
 0xa31   :  { %14065 = vrcp.f32 %v5613_v12  ;;  %7293 = vrot.lane.b32.xlu1 %v14906_v17, %s14385_s3 }
 0xa32   :  { %v14062_v51 = vpop.eup %14061 }
 0xa33   :  { %v5632_v0 = vmul.f32 %v14062_v51, %v15769_v25 }
 0xa34   :  { %v5619_v43 = vpop.xlane.xlu0 %5618 }
 0xa35   :  { %14067 = vrcp.f32 %v5619_v43  ;;  %v5616_v9 = vpop.xlane.xlu1 %5615  ;;  %7453 = vrot.lane.b32.xlu1 %v14912_v20, %s14385_s3  ;;  %13400 = vmatmul.mubr.msk.f32.vlgmr.msra.gmra.mxu1 %vm1364_vm3, %v5632_v0 }
 0xa36   :  { %14069 = vrcp.f32 %v5616_v9  ;;  %13410 = vmatpush3.msra.mxu1 %v15760_v27  ;;  %13413 = vmatprep.mubr.msk.f32.mxu1 %vm14381_vm1, %v17296_v60 }
 0xa37   :  { %13411 = vmatprep.subr.mxu1 %v17296_v60 }
 0xa38   :  { %13412 = vmatpush3.msra.mxu1 %v15762_v14 }
 0xa39   :  { %13423 = vmatprep.subr.mxu1 %v17296_v60 }
 0xa3a   :  { %v14064_v25 = vpop.eup %14063 }
 0xa3b   :  { %v5634_v32 = vmul.f32 %v14064_v25, %v15773_v36 }
 0xa3d   :  { %13414 = vmatmul.mubr.msk.f32.vlgmr.msra.gmra.mxu1 %vm1364_vm3, %v5634_v32 }
 0xa3e   :  { %v14066_v63 = vpop.eup %14065  ;;  %13424 = vmatpush3.msra.mxu1 %v15764_v41  ;;  %13427 = vmatprep.mubr.msk.f32.mxu1 %vm14381_vm1, %v17296_v60 }
 0xa3f   :  { %13425 = vmatprep.subr.mxu1 %v17296_v60  ;;  %v5635_v27 = vmul.f32 %v14066_v63, %v15777_v7 }
 0xa40   :  { %13426 = vmatpush3.msra.mxu1 %v15791_v8 }
 0xa41   :  { %13421 = vmatmul.mubr.msk.f32.vlgmr.msra.gmra.mxu0 %vm1364_vm3, %v5635_v27  ;;  %13437 = vmatprep.subr.mxu1 %v17296_v60 }
 0xa42   :  { %v14068_v14 = vpop.eup %14067  ;;  %13431 = vmatpush3.msra.mxu0 %v15795_v46  ;;  %13434 = vmatprep.mubr.msk.f32.mxu0 %vm14381_vm1, %v17296_v60  ;;  %v6561_v46 = vpop.permute.xlu1 %6560 }
 0xa43   :  { %v14070_v41 = vpop.eup %14069  ;;  %13432 = vmatprep.subr.mxu0 %v17296_v60  ;;  %v5637_v36 = vmul.f32 %v14068_v14, %v15781_v4  ;;  %v6479_v4 = vpop.permute.xlu0 %6478 }
 0xa44   :  { %13433 = vmatpush3.msra.mxu0 %v15801_v59  ;;  %v5636_v7 = vmul.f32 %v14070_v41, %v15783_v61 }
 0xa45   :  { %13444 = vmatprep.subr.mxu0 %v17296_v60  ;;  %13435 = vmatmul.mubr.msk.f32.vlgmr.msra.gmra.mxu0 %vm1364_vm3, %v5637_v36 }
 0xa46   :  { %13428 = vmatmul.mubr.msk.f32.vlgmr.msra.gmra.mxu1 %vm1364_vm3, %v5636_v7  ;;  %13445 = vmatpush3.xpose.msk.msra.mxu0 %vm731_vm2, %v15809_v3 }
 0xa47   :  { %13438 = vmatpush3.msra.mxu1 %v15797_v13  ;;  %13446 = vmatprep.subr.mxu0 %v17296_v60 }
 0xa48   :  { %13439 = vmatprep.subr.mxu1 %v17296_v60  ;;  %13448 = vmatprep.mubr.msk.f32.mxu0 %vm14381_vm1, %v17296_v60 }
 0xa49   :  { %13440 = vmatpush3.msra.mxu1 %v15805_v19  ;;  %13441 = vmatprep.mubr.msk.f32.mxu1 %vm14381_vm1, %v17296_v60 }
 0xa4a   :  { %13447 = vmatpush3.xpose.msk.msra.mxu0 %vm731_vm2, %v15815_v37  ;;  %13451 = vmatprep.subr.mxu1 %v17296_v60  ;;  %v6477_v37 = vpop.permute.xlu0 %6476 }
 0xa4b   :  { %13458 = vmatprep.subr.mxu0 %v17296_v60 }
 0xa4d   :  { %13449 = vmatmul.mubr.msk.f32.vlgmr.msra.gmra.mxu0 %vm731_vm2, %v15823_v31 }
 0xa4e   :  { %13459 = vmatpush3.xpose.msk.msra.mxu0 %vm731_vm2, %v15825_v38  ;;  %13462 = vmatprep.mubr.msk.f32.mxu0 %vm14381_vm1, %v17296_v60  ;;  %v6559_v61 = vpop.permute.xlu0 %6558 }
 0xa4f   :  { %13460 = vmatprep.subr.mxu0 %v17296_v60 }
 0xa52   :  { %13461 = vmatpush3.xpose.msk.msra.mxu0 %vm731_vm2, %v6479_v4  ;;  %v6643_v8 = vpop.permute.xlu0 %6642 }
 0xa53   :  { %13472 = vmatprep.subr.mxu0 %v17296_v60 }
 0xa55   :  { %13463 = vmatmul.mubr.msk.f32.vlgmr.msra.gmra.mxu0 %vm731_vm2, %v6477_v37 }
 0xa56   :  { %13476 = vmatprep.mubr.msk.f32.mxu0 %vm14381_vm1, %v17296_v60  ;;  %v6641_v13 = vpop.permute.xlu0 %6640 }
 0xa5a   :  { %v6723_v19 = vpop.permute.xlu0 %6722 }
 0xa5e   :  { %v6807_v3 = vpop.permute.xlu0 %6806 }
 0xa62   :  { %v6805_v12 = vpop.permute.xlu0 %6804 }
 0xa7d   :  { %v5622_v59 = vpop.xlane.xlu1 %5621 }
 0xa7e   :  { %14071 = vrcp.f32 %v5622_v59 }
 0xa81   :  { %v6645_v31 = vpop.permute.xlu1 %6644 }
 0xa82   :  { %13473 = vmatpush3.xpose.msk.msra.mxu0 %vm731_vm2, %v6645_v31 }
 0xa83   :  { %13474 = vmatprep.subr.mxu0 %v17296_v60 }
 0xa85   :  { %v6727_v38 = vpop.permute.xlu1 %6726 }
 0xa86   :  { %13475 = vmatpush3.xpose.msk.msra.mxu0 %vm731_vm2, %v6643_v8 }
 0xa87   :  { %13486 = vmatprep.subr.mxu0 %v17296_v60 }
 0xa89   :  { %13477 = vmatmul.mubr.msk.f32.vlgmr.msra.gmra.mxu0 %vm731_vm2, %v6641_v13  ;;  %v6725_v5 = vpop.permute.xlu1 %6724 }
 0xa8a   :  { %13490 = vmatprep.mubr.msk.f32.mxu0 %vm14381_vm1, %v17296_v60 }
 0xa8b   :  { %v14072_v35 = vpop.eup %14071 }
 0xa8c   :  { %v5638_v1 = vmul.f32 %v14072_v35, %v15840_v2  ;;  %v7059_v2 = vpop.permute.xlu0 %7058 }
 0xa8d   :  { %v6809_v30 = vpop.permute.xlu1 %6808 }
 0xa8e   :  { %13442 = vmatmul.mubr.msk.f32.vlgmr.msra.gmra.mxu1 %vm1364_vm3, %v5638_v1  ;;  %13487 = vmatpush3.xpose.msk.msra.mxu0 %vm731_vm2, %v6809_v30 }
 0xa8f   :  { %13452 = vmatpush3.xpose.msk.msra.mxu1 %vm731_vm2, %v15811_v23  ;;  %13488 = vmatprep.subr.mxu0 %v17296_v60 }
 0xa90   :  { %13453 = vmatprep.subr.mxu1 %v17296_v60  ;;  %13455 = vmatprep.mubr.msk.f32.mxu1 %vm14381_vm1, %v17296_v60 }
 0xa91   :  { %v6891_v51 = vpop.permute.xlu1 %6890 }
 0xa92   :  { %13489 = vmatpush3.xpose.msk.msra.mxu0 %vm731_vm2, %v6807_v3 }
 0xa93   :  { %13454 = vmatpush3.xpose.msk.msra.mxu1 %vm731_vm2, %v15819_v44  ;;  %13500 = vmatprep.subr.mxu0 %v17296_v60 }
 0xa94   :  { %13465 = vmatprep.subr.mxu1 %v17296_v60 }
 0xa95   :  { %13491 = vmatmul.mubr.msk.f32.vlgmr.msra.gmra.mxu0 %vm731_vm2, %v6805_v12  ;;  %v6889_v23 = vpop.permute.xlu1 %6888 }
 0xa96   :  { %13456 = vmatmul.mubr.msk.f32.vlgmr.msra.gmra.mxu1 %vm731_vm2, %v15829_v16  ;;  %13501 = vmatpush3.msra.mxu0 %v7059_v2 }
 0xa97   :  { %13466 = vmatpush3.xpose.msk.msra.mxu1 %vm731_vm2, %v15873_v24  ;;  %13469 = vmatprep.mubr.msk.f32.mxu1 %vm14381_vm1, %v17296_v60 }
 0xa98   :  { %13467 = vmatprep.subr.mxu1 %v17296_v60  ;;  %13502 = vmatprep.subr.mxu0 %v17296_v60 }
 0xa99   :  { %v6887_v44 = vpop.permute.xlu1 %6886  ;;  %13504 = vmatprep.mubr.msk.f32.mxu0 %vm14381_vm1, %v17296_v60 }
 0xa9b   :  { %13468 = vmatpush3.xpose.msk.msra.mxu1 %vm731_vm2, %v6561_v46 }
 0xa9c   :  { %13479 = vmatprep.subr.mxu1 %v17296_v60 }
 0xa9d   :  { %v7138_v16 = vpop.permute.xlu1 %7137 }
 0xa9e   :  { %13470 = vmatmul.mubr.msk.f32.vlgmr.msra.gmra.mxu1 %vm731_vm2, %v6559_v61 }
 0xa9f   :  { %13480 = vmatpush3.xpose.msk.msra.mxu1 %vm731_vm2, %v6727_v38  ;;  %13483 = vmatprep.mubr.msk.f32.mxu1 %vm14381_vm1, %v17296_v60 }
 0xaa0   :  { %13481 = vmatprep.subr.mxu1 %v17296_v60 }
 0xaa1   :  { %v7057_v24 = vpop.permute.xlu1 %7056 }
 0xaa2   :  { %13503 = vmatpush3.msra.mxu0 %v7057_v24 }
 0xaa3   :  { %13482 = vmatpush3.xpose.msk.msra.mxu1 %vm731_vm2, %v6725_v5  ;;  %13514 = vmatprep.subr.mxu0 %v17296_v60 }
 0xaa4   :  { %13493 = vmatprep.subr.mxu1 %v17296_v60 }
 0xaa5   :  { %v7136_v0 = vpop.permute.xlu1 %7135 }
 0xaa6   :  { %13484 = vmatmul.mubr.msk.f32.vlgmr.msra.gmra.mxu1 %vm731_vm2, %v6723_v19 }
 0xaa7   :  { %13494 = vmatpush3.xpose.msk.msra.mxu1 %vm731_vm2, %v6891_v51  ;;  %13497 = vmatprep.mubr.msk.f32.mxu1 %vm14381_vm1, %v17296_v60 }
 0xaa8   :  { %13495 = vmatprep.subr.mxu1 %v17296_v60 }
 0xaab   :  { %13496 = vmatpush3.xpose.msk.msra.mxu1 %vm731_vm2, %v6889_v23 }
 0xaac   :  { %13507 = vmatprep.subr.mxu1 %v17296_v60 }
 0xaae   :  { %13498 = vmatmul.mubr.msk.f32.vlgmr.msra.gmra.mxu1 %vm731_vm2, %v6887_v44 }
 0xaaf   :  { %13508 = vmatpush3.msra.mxu1 %v7138_v16  ;;  %13511 = vmatprep.mubr.msk.f32.mxu1 %vm14381_vm1, %v17296_v60 }
 0xab0   :  { %13509 = vmatprep.subr.mxu1 %v17296_v60 }
 0xab1   :  { %13510 = vmatpush3.msra.mxu1 %v7136_v0 }
 0xab2   :  { %13521 = vmatprep.subr.mxu1 %v17296_v60 }
 0xab6   :  { %v15995_v43 = vpop.f32.mrf.mxu0 }
 0xab7   :  { %17334 = vst [vmem:[#allocation47_spill] sm:$0xff] %v15995_v43  ;;  %v17350_v43 = vld [vmem:[#allocation32_spill] sm:$0xff] }
 0xab8   :  { %v13394_v9 = vpop.f32.mrf.mxu0 }
 0xaba   :  { %v15997_v25 = vpop.f32.mrf.mxu0 }
 0xabb   :  { %17335 = vst [vmem:[#allocation48_spill] sm:$0xff] %v15997_v25 }
 0xabc   :  { %v13408_v32 = vpop.f32.mrf.mxu0 }
 0xaf5   :  { %v15999_v63 = vpop.f32.mrf.mxu1 }
 0xaf6   :  { %17336 = vst [vmem:[#allocation49_spill] sm:$0xff] %v15999_v63 }
 0xaf7   :  { %v13401_v27 = vpop.f32.mrf.mxu1 }
 0xafd   :  { %v16001_v14 = vpop.f32.mrf.mxu1 }
 0xafe   :  { %17337 = vst [vmem:[#allocation50_spill] sm:$0xff] %v16001_v14 }
 0xaff   :  { %v13415_v41 = vpop.f32.mrf.mxu1 }
 0xb01   :  { %v16003_v36 = vpop.f32.mrf.mxu0 }
 0xb02   :  { %17338 = vst [vmem:[#allocation51_spill] sm:$0xff] %v16003_v36 }
 0xb03   :  { %v13422_v7 = vpop.f32.mrf.mxu0 }
 0xb05   :  { %v16005_v4 = vpop.f32.mrf.mxu0 }
 0xb06   :  { %17339 = vst [vmem:[#allocation52_spill] sm:$0xff] %v16005_v4  ;;  %v16007_v37 = vpop.f32.mrf.mxu1 }
 0xb07   :  { %17340 = vst [vmem:[#allocation53_spill] sm:$0xff] %v16007_v37  ;;  %v13436_v61 = vpop.f32.mrf.mxu0  ;;  %v17349_v37 = vld [vmem:[#allocation33_spill] sm:$0xff] }
 0xb08   :  { %v13429_v8 = vpop.f32.mrf.mxu1 }
 0xb09   :  { %v16043_v8 = vpop.permute.xlu0 %7216 }
 0xb0d   :  { %v6390_v46 = vpop.f32.mrf.mxu0 }
 0xb0e   :  { %v6968_v13 = vsel %vm1364_vm3, %v6390_v46, -inf }
 0xb0f   :  { %6969 = vmax.xlane.f32.xlu0 %v6968_v13  ;;  %v13450_v59 = vpop.f32.mrf.mxu0  ;;  %v16053_v13 = vpop.permute.xlu0 %7214 }
 0xb13   :  { %v16057_v59 = vpop.permute.xlu0 %7374 }
 0xb15   :  { %v6554_v31 = vpop.f32.mrf.mxu0 }
 0xb16   :  { %v6974_v19 = vsel %vm1364_vm3, %v6554_v31, -inf }
 0xb17   :  { %6975 = vmax.xlane.f32.xlu0 %v6974_v19  ;;  %v13464_v38 = vpop.f32.mrf.mxu0 }
 0xb49   :  { %v16011_v3 = vpop.f32.mrf.mxu0 }
 0xb4a   :  { %v6980_v0 = vsel %vm1364_vm3, %v16011_v3, -inf }
 0xb4b   :  { %v13478_v5 = vpop.f32.mrf.mxu0 }
 0xb4e   :  { %v16013_v35 = vpop.f32.mrf.mxu1 }
 0xb4f   :  { %17341 = vst [vmem:[#allocation54_spill] sm:$0xff] %v16013_v35 }
 0xb50   :  { %v13443_v1 = vpop.f32.mrf.mxu1 }
 0xb55   :  { %v16015_v30 = vpop.f32.mrf.mxu0 }
 0xb56   :  { %v6472_v12 = vpop.f32.mrf.mxu1  ;;  %v6986_v32 = vsel %vm1364_vm3, %v16015_v30, -inf }
 0xb57   :  { %v13492_v51 = vpop.f32.mrf.mxu0  ;;  %v6971_v2 = vsel %vm1364_vm3, %v6472_v12, -inf }
 0xb58   :  { %6972 = vmax.xlane.f32.xlu1 %v6971_v2  ;;  %v13457_v23 = vpop.f32.mrf.mxu1 }
 0xb5e   :  { %v6636_v44 = vpop.f32.mrf.mxu1 }
 0xb5f   :  { %v6977_v16 = vsel %vm1364_vm3, %v6636_v44, -inf }
 0xb60   :  { %6978 = vmax.xlane.f32.xlu0 %v6977_v16  ;;  %v13471_v24 = vpop.f32.mrf.mxu1 }
 0xb64   :  { %6981 = vmax.xlane.f32.xlu0 %v6980_v0 }
 0xb66   :  { %v16021_v9 = vpop.f32.mrf.mxu1 }
 0xb67   :  { %v6983_v27 = vsel %vm1364_vm3, %v16021_v9, -inf }
 0xb68   :  { %6987 = vmax.xlane.f32.xlu0 %v6986_v32  ;;  %6984 = vmax.xlane.f32.xlu1 %v6983_v27  ;;  %v13485_v41 = vpop.f32.mrf.mxu1  ;;  %v16073_v32 = vpop.permute.xlu1 %7295 }
 0xb6c   :  { %v16075_v27 = vpop.permute.xlu1 %7293 }
 0xb6e   :  { %v16027_v7 = vpop.f32.mrf.mxu1 }
 0xb6f   :  { %v6989_v23 = vsel %vm1364_vm3, %v16027_v7, -inf }
 0xb70   :  { %v13499_v61 = vpop.f32.mrf.mxu1  ;;  %v16077_v41 = vpop.permute.xlu1 %7453 }
 0xb79   :  { %7451 = vrot.lane.b32.xlu1 %v14959_v45, %s14385_s3 }
 0xb7d   :  { %7611 = vrot.lane.b32.xlu1 %v14976_v18, %s14385_s3 }
 0xb7e   :  { %7372 = vrot.lane.b32.xlu0 %v14929_v57, %s14385_s3 }
 0xb81   :  { %7609 = vrot.lane.b32.xlu1 %v14984_v48, %s14385_s3 }
 0xb82   :  { %7532 = vrot.lane.b32.xlu0 %v14947_v34, %s14385_s3 }
 0xb85   :  { %7815 = vrot.lane.b32.xlu1 %v14573_v6, %s14386_s16 }
 0xb86   :  { %7530 = vrot.lane.b32.xlu0 %v14953_v11, %s14385_s3 }
 0xb89   :  { %7813 = vrot.lane.b32.xlu1 %v14595_v15, %s14386_s16 }
 0xb8a   :  { %7733 = vrot.lane.b32.xlu0 %v14561_v62, %s14386_s16 }
 0xb8d   :  { %7897 = vrot.lane.b32.xlu1 %v17306_v52, %s14386_s16 }
 0xb8e   :  { %7731 = vrot.lane.b32.xlu0 %v17307_v58, %s14386_s16 }
 0xb92   :  { %7729 = vrot.lane.b32.xlu0 %v17308_v10, %s14386_s16 }
 0xb96   :  { %7811 = vrot.lane.b32.xlu0 %v17309_v28, %s14386_s16 }
 0xb98   :  { %v6970_v19 = vpop.xlane.xlu0 %6969 }
 0xb99   :  { %v6992_v38 = vsub.f32 %v6390_v46, %v6970_v19 }
 0xb9b   :  { %v7000_v5 = vmul.f32 1.442695, %v6992_v38 }
 0xb9d   :  { %14073 = vpow2.f32 %v7000_v5 }
 0xba0   :  { %v6976_v1 = vpop.xlane.xlu0 %6975 }
 0xba1   :  { %v6994_v51 = vsub.f32 %v6554_v31, %v6976_v1  ;;  %v17342_v31 = vld [vmem:[#allocation26_spill] sm:$0xff] }
 0xba3   :  { %v7004_v2 = vmul.f32 1.442695, %v6994_v51 }
 0xba5   :  { %14075 = vpow2.f32 %v7004_v2 }
 0xbaa   :  { %v16063_v16 = vpop.eup %14073 }
 0xbab   :  { %v7016_v24 = vsel %vm1364_vm3, %v16063_v16, 0.0 }
 0xbb1   :  { %6990 = vmax.xlane.f32.xlu1 %v6989_v23 }
 0xbb2   :  { %v16067_v0 = vpop.eup %14075 }
 0xbb3   :  { %v7022_v46 = vsel %vm1364_vm3, %v16067_v0, 0.0 }
 0xbb5   :  { %7017 = vadd.xlane.f32.xlu0 %v7016_v24 }
 0xbb9   :  { %7023 = vadd.xlane.f32.xlu0 %v7022_v46 }
 0xbc2   :  { %7979 = vrot.lane.b32.xlu1 %v17342_v31, %s14386_s16 }
 0xbe1   :  { %v6973_v61 = vpop.xlane.xlu1 %6972 }
 0xbe2   :  { %v6993_v19 = vsub.f32 %v6472_v12, %v6973_v61 }
 0xbe4   :  { %v7002_v38 = vmul.f32 1.442695, %v6993_v19 }
 0xbe6   :  { %14077 = vpow2.f32 %v7002_v38 }
 0xbe9   :  { %v6979_v5 = vpop.xlane.xlu0 %6978 }
 0xbea   :  { %v6995_v1 = vsub.f32 %v6636_v44, %v6979_v5 }
 0xbec   :  { %v7006_v51 = vmul.f32 1.442695, %v6995_v1  ;;  %v17343_v1 = vld [vmem:[#allocation29_spill] sm:$0xff] }
 0xbed   :  { %v6982_v2 = vpop.xlane.xlu0 %6981 }
 0xbee   :  { %14079 = vpow2.f32 %v7006_v51  ;;  %v6996_v23 = vsub.f32 %v16011_v3, %v6982_v2  ;;  %v17344_v2 = vld [vmem:[#allocation24_spill] sm:$0xff] }
 0xbf0   :  { %v7008_v24 = vmul.f32 1.442695, %v6996_v23 }
 0xbf1   :  { %v6988_v46 = vpop.xlane.xlu0 %6987  ;;  %v6985_v4 = vpop.xlane.xlu1 %6984 }
 0xbf2   :  { %14081 = vpow2.f32 %v7008_v24  ;;  %v6998_v36 = vsub.f32 %v16015_v30, %v6988_v46  ;;  %v6997_v25 = vsub.f32 %v16021_v9, %v6985_v4  ;;  %v17345_v46 = vld [vmem:[#allocation25_spill] sm:$0xff] }
 0xbf3   :  { %v16082_v35 = vpop.eup %14077 }
 0xbf4   :  { %v7012_v12 = vmul.f32 1.442695, %v6998_v36  ;;  %v7010_v61 = vmul.f32 1.442695, %v6997_v25  ;;  %v7019_v44 = vsel %vm1364_vm3, %v16082_v35, 0.0 }
 0xbf5   :  { %7020 = vadd.xlane.f32.xlu1 %v7019_v44  ;;  %v7373_v5 = vpop.permute.xlu0 %7372  ;;  %v16104_v51 = vpop.permute.xlu1 %7451 }
 0xbf6   :  { %14083 = vpow2.f32 %v7012_v12 }
 0xbf7   :  { %14085 = vpow2.f32 %v7010_v61  ;;  %v17346_v61 = vld [vmem:[#allocation31_spill] sm:$0xff] }
 0xbf9   :  { %v16108_v23 = vpop.permute.xlu0 %7532  ;;  %v16110_v24 = vpop.permute.xlu1 %7611 }
 0xbfb   :  { %v16086_v19 = vpop.eup %14079 }
 0xbfc   :  { %v7025_v3 = vsel %vm1364_vm3, %v16086_v19, 0.0 }
 0xbfd   :  { %7026 = vadd.xlane.f32.xlu1 %v7025_v3  ;;  %v16114_v12 = vpop.permute.xlu0 %7530  ;;  %v16118_v44 = vpop.permute.xlu1 %7609  ;;  %v17347_v3 = vld [vmem:[#allocation28_spill] sm:$0xff] }
 0xbff   :  { %v16090_v38 = vpop.eup %14081 }
 0xc00   :  { %v7028_v4 = vsel %vm1364_vm3, %v16090_v38, 0.0 }
 0xc01   :  { %7029 = vadd.xlane.f32.xlu0 %v7028_v4  ;;  %v16122_v4 = vpop.permute.xlu0 %7733 }
 0xc03   :  { %v16094_v36 = vpop.eup %14083 }
 0xc04   :  { %v16096_v25 = vpop.eup %14085  ;;  %v7034_v30 = vsel %vm1364_vm3, %v16094_v36, 0.0 }
 0xc05   :  { %7035 = vadd.xlane.f32.xlu0 %v7034_v30  ;;  %v7031_v9 = vsel %vm1364_vm3, %v16096_v25, 0.0  ;;  %v16124_v30 = vpop.permute.xlu1 %7815  ;;  %v16128_v63 = vpop.permute.xlu0 %7731 }
 0xc06   :  { %7032 = vadd.xlane.f32.xlu1 %v7031_v9  ;;  %v17348_v9 = vld [vmem:[#allocation30_spill] sm:$0xff] }
 0xc09   :  { %v16132_v14 = vpop.permute.xlu1 %7813 }
 0xc17   :  { %7977 = vrot.lane.b32.xlu1 %v17343_v1, %s14386_s16 }
 0xc1b   :  { %7895 = vrot.lane.b32.xlu0 %v17344_v2, %s14386_s16 }
 0xc1f   :  { %7893 = vrot.lane.b32.xlu0 %v17345_v46, %s14386_s16  ;;  %v17351_v46 = vld [vmem:[#allocation34_spill] sm:$0xff] }
 0xc23   :  { %7975 = vrot.lane.b32.xlu0 %v17346_v61, %s14386_s16  ;;  %v16136_v61 = vpop.permute.xlu0 %7729 }
 0xc27   :  { %8059 = vrot.lane.b32.xlu0 %v17347_v3, %s14386_s16  ;;  %v16138_v3 = vpop.permute.xlu1 %7897  ;;  %v16142_v2 = vpop.permute.xlu0 %7811 }
 0xc2b   :  { %8057 = vrot.lane.b32.xlu0 %v17348_v9, %s14386_s16 }
 0xc2f   :  { %8139 = vrot.lane.b32.xlu0 %v17349_v37, %s14386_s16 }
 0xc33   :  { %8223 = vrot.lane.b32.xlu0 %v17350_v43, %s14386_s16 }
 0xc37   :  { %8221 = vrot.lane.b32.xlu0 %v17351_v46, %s14386_s16 }
 0xc3a   :  { %v6991_v9 = vpop.xlane.xlu1 %6990 }
 0xc3b   :  { %v6999_v1 = vsub.f32 %v16027_v7, %v6991_v9  ;;  %8475 = vrot.lane.b32.xlu0 %v14695_v47, %s14386_s16 }
 0xc3d   :  { %v7014_v37 = vmul.f32 1.442695, %v6999_v1 }
 0xc3e   :  { %v7018_v31 = vpop.xlane.xlu0 %7017 }
 0xc3f   :  { %14087 = vpow2.f32 %v7014_v37  ;;  %8633 = vrot.lane.b32.xlu0 %v14850_v22, %s14386_s16 }
 0xc40   :  { %14089 = vrcp.f32 %v7018_v31 }
 0xc42   :  { %v7024_v43 = vpop.xlane.xlu0 %7023 }
 0xc43   :  { %14091 = vrcp.f32 %v7024_v43  ;;  %8631 = vrot.lane.b32.xlu0 %v14856_v55, %s14386_s16 }
 0xc47   :  { %8791 = vrot.lane.b32.xlu0 %v14864_v26, %s14386_s16 }
 0xc4c   :  { %v16153_v46 = vpop.eup %14087 }
 0xc4d   :  { %v14090_v7 = vpop.eup %14089  ;;  %v7037_v1 = vsel %vm1364_vm3, %v16153_v46, 0.0 }
 0xc4e   :  { %7038 = vadd.xlane.f32.xlu1 %v7037_v1  ;;  %v7048_v37 = vmul.f32 %v14090_v7, %v16063_v16 }
 0xc50   :  { %v14092_v9 = vpop.eup %14091  ;;  %13505 = vmatmul.mubr.msk.f32.vlgmr.msra.gmra.mxu0 %vm1364_vm3, %v7048_v37 }
 0xc51   :  { %13515 = vmatpush3.msra.mxu0 %v16043_v8  ;;  %13518 = vmatprep.mubr.msk.f32.mxu0 %vm14381_vm1, %v17296_v60  ;;  %v7050_v43 = vmul.f32 %v14092_v9, %v16067_v0  ;;  %v16186_v8 = vpop.permute.xlu1 %7979 }
 0xc52   :  { %13516 = vmatprep.subr.mxu0 %v17296_v60 }
 0xc53   :  { %13517 = vmatpush3.msra.mxu0 %v16053_v13 }
 0xc54   :  { %13528 = vmatprep.subr.mxu0 %v17296_v60  ;;  %13519 = vmatmul.mubr.msk.f32.vlgmr.msra.gmra.mxu0 %vm1364_vm3, %v7050_v43 }
 0xc55   :  { %13529 = vmatpush3.msra.mxu0 %v16057_v59  ;;  %13532 = vmatprep.mubr.msk.f32.mxu0 %vm14381_vm1, %v17296_v60 }
 0xc56   :  { %13530 = vmatprep.subr.mxu0 %v17296_v60 }
 0xc57   :  { %13531 = vmatpush3.msra.mxu0 %v7373_v5 }
 0xc58   :  { %13542 = vmatprep.subr.mxu0 %v17296_v60 }
 0xc5f   :  { %8061 = vrot.lane.b32.xlu1 %v14613_v21, %s14386_s16 }
 0xc63   :  { %8143 = vrot.lane.b32.xlu1 %v14638_v29, %s14386_s16 }
 0xc67   :  { %8141 = vrot.lane.b32.xlu1 %v14671_v40, %s14386_s16 }
 0xc6b   :  { %8225 = vrot.lane.b32.xlu1 %v14651_v33, %s14386_s16 }
 0xc6f   :  { %8307 = vrot.lane.b32.xlu1 %v14687_v42, %s14386_s16 }
 0xc73   :  { %8305 = vrot.lane.b32.xlu1 %v14708_v50, %s14386_s16 }
 0xc77   :  { %8303 = vrot.lane.b32.xlu1 %v14726_v54, %s14386_s16 }
 0xc7b   :  { %8554 = vrot.lane.b32.xlu1 %v14723_v53, %s14386_s16 }
 0xc7e   :  { %v7021_v13 = vpop.xlane.xlu1 %7020 }
 0xc7f   :  { %14093 = vrcp.f32 %v7021_v13  ;;  %8473 = vrot.lane.b32.xlu1 %v14703_v49, %s14386_s16 }
 0xc83   :  { %8552 = vrot.lane.b32.xlu1 %v14730_v56, %s14386_s16 }
 0xc86   :  { %v7027_v59 = vpop.xlane.xlu1 %7026 }
 0xc87   :  { %14095 = vrcp.f32 %v7027_v59  ;;  %8712 = vrot.lane.b32.xlu1 %v14900_v39, %s14386_s16 }
 0xc8a   :  { %v7030_v16 = vpop.xlane.xlu0 %7029 }
 0xc8b   :  { %14097 = vrcp.f32 %v7030_v16  ;;  %8710 = vrot.lane.b32.xlu1 %v14906_v17, %s14386_s16 }
 0xc8c   :  { %v14094_v0 = vpop.eup %14093 }
 0xc8d   :  { %v7049_v31 = vmul.f32 %v14094_v0, %v16082_v35 }
 0xc8e   :  { %v7036_v5 = vpop.xlane.xlu0 %7035 }
 0xc8f   :  { %14099 = vrcp.f32 %v7036_v5  ;;  %v7033_v7 = vpop.xlane.xlu1 %7032  ;;  %8870 = vrot.lane.b32.xlu1 %v14912_v20, %s14386_s16  ;;  %13512 = vmatmul.mubr.msk.f32.vlgmr.msra.gmra.mxu1 %vm1364_vm3, %v7049_v31 }
 0xc90   :  { %14101 = vrcp.f32 %v7033_v7  ;;  %13522 = vmatpush3.msra.mxu1 %v16073_v32  ;;  %13525 = vmatprep.mubr.msk.f32.mxu1 %vm14381_vm1, %v17296_v60 }
 0xc91   :  { %13523 = vmatprep.subr.mxu1 %v17296_v60 }
 0xc92   :  { %13524 = vmatpush3.msra.mxu1 %v16075_v27 }
 0xc93   :  { %13535 = vmatprep.subr.mxu1 %v17296_v60 }
 0xc94   :  { %v14096_v35 = vpop.eup %14095 }
 0xc95   :  { %v7051_v1 = vmul.f32 %v14096_v35, %v16086_v19 }
 0xc97   :  { %13526 = vmatmul.mubr.msk.f32.vlgmr.msra.gmra.mxu1 %vm1364_vm3, %v7051_v1 }
 0xc98   :  { %v14098_v37 = vpop.eup %14097  ;;  %13536 = vmatpush3.msra.mxu1 %v16077_v41  ;;  %13539 = vmatprep.mubr.msk.f32.mxu1 %vm14381_vm1, %v17296_v60 }
 0xc99   :  { %13537 = vmatprep.subr.mxu1 %v17296_v60  ;;  %v7052_v32 = vmul.f32 %v14098_v37, %v16090_v38 }
 0xc9a   :  { %13538 = vmatpush3.msra.mxu1 %v16104_v51 }
 0xc9b   :  { %13533 = vmatmul.mubr.msk.f32.vlgmr.msra.gmra.mxu0 %vm1364_vm3, %v7052_v32  ;;  %13549 = vmatprep.subr.mxu1 %v17296_v60 }
 0xc9c   :  { %v14100_v27 = vpop.eup %14099  ;;  %13543 = vmatpush3.msra.mxu0 %v16108_v23  ;;  %13546 = vmatprep.mubr.msk.f32.mxu0 %vm14381_vm1, %v17296_v60  ;;  %v7978_v23 = vpop.permute.xlu1 %7977 }
 0xc9d   :  { %v14102_v41 = vpop.eup %14101  ;;  %13544 = vmatprep.subr.mxu0 %v17296_v60  ;;  %v7054_v19 = vmul.f32 %v14100_v27, %v16094_v36  ;;  %v7896_v36 = vpop.permute.xlu0 %7895 }
 0xc9e   :  { %13545 = vmatpush3.msra.mxu0 %v16114_v12  ;;  %v7053_v38 = vmul.f32 %v14102_v41, %v16096_v25 }
 0xc9f   :  { %13556 = vmatprep.subr.mxu0 %v17296_v60  ;;  %13547 = vmatmul.mubr.msk.f32.vlgmr.msra.gmra.mxu0 %vm1364_vm3, %v7054_v19 }
 0xca0   :  { %13540 = vmatmul.mubr.msk.f32.vlgmr.msra.gmra.mxu1 %vm1364_vm3, %v7053_v38  ;;  %13557 = vmatpush3.xpose.msk.msra.mxu0 %vm731_vm2, %v16122_v4 }
 0xca1   :  { %13550 = vmatpush3.msra.mxu1 %v16110_v24  ;;  %13558 = vmatprep.subr.mxu0 %v17296_v60 }
 0xca2   :  { %13551 = vmatprep.subr.mxu1 %v17296_v60  ;;  %13560 = vmatprep.mubr.msk.f32.mxu0 %vm14381_vm1, %v17296_v60 }
 0xca3   :  { %13552 = vmatpush3.msra.mxu1 %v16118_v44  ;;  %13553 = vmatprep.mubr.msk.f32.mxu1 %vm14381_vm1, %v17296_v60 }
 0xca4   :  { %13559 = vmatpush3.xpose.msk.msra.mxu0 %vm731_vm2, %v16128_v63  ;;  %13563 = vmatprep.subr.mxu1 %v17296_v60  ;;  %v7894_v63 = vpop.permute.xlu0 %7893 }
 0xca5   :  { %13570 = vmatprep.subr.mxu0 %v17296_v60 }
 0xca7   :  { %13561 = vmatmul.mubr.msk.f32.vlgmr.msra.gmra.mxu0 %vm731_vm2, %v16136_v61 }
 0xca8   :  { %13571 = vmatpush3.xpose.msk.msra.mxu0 %vm731_vm2, %v16138_v3  ;;  %13574 = vmatprep.mubr.msk.f32.mxu0 %vm14381_vm1, %v17296_v60  ;;  %v7976_v25 = vpop.permute.xlu0 %7975 }
 0xca9   :  { %13572 = vmatprep.subr.mxu0 %v17296_v60 }
 0xcac   :  { %13573 = vmatpush3.xpose.msk.msra.mxu0 %vm731_vm2, %v7896_v36  ;;  %v8060_v51 = vpop.permute.xlu0 %8059 }
 0xcad   :  { %13584 = vmatprep.subr.mxu0 %v17296_v60 }
 0xcaf   :  { %13575 = vmatmul.mubr.msk.f32.vlgmr.msra.gmra.mxu0 %vm731_vm2, %v7894_v63 }
 0xcb0   :  { %13588 = vmatprep.mubr.msk.f32.mxu0 %vm14381_vm1, %v17296_v60  ;;  %v8058_v24 = vpop.permute.xlu0 %8057 }
 0xcb4   :  { %v8140_v44 = vpop.permute.xlu0 %8139 }
 0xcb8   :  { %v8224_v4 = vpop.permute.xlu0 %8223 }
 0xcbc   :  { %v8222_v16 = vpop.permute.xlu0 %8221 }
 0xcd7   :  { %v7039_v12 = vpop.xlane.xlu1 %7038 }
 0xcd8   :  { %14103 = vrcp.f32 %v7039_v12 }
 0xcdb   :  { %v8062_v61 = vpop.permute.xlu1 %8061 }
 0xcdc   :  { %13585 = vmatpush3.xpose.msk.msra.mxu0 %vm731_vm2, %v8062_v61 }
 0xcdd   :  { %13586 = vmatprep.subr.mxu0 %v17296_v60 }
 0xcdf   :  { %v8144_v3 = vpop.permute.xlu1 %8143 }
 0xce0   :  { %13587 = vmatpush3.xpose.msk.msra.mxu0 %vm731_vm2, %v8060_v51 }
 0xce1   :  { %13598 = vmatprep.subr.mxu0 %v17296_v60 }
 0xce3   :  { %13589 = vmatmul.mubr.msk.f32.vlgmr.msra.gmra.mxu0 %vm731_vm2, %v8058_v24  ;;  %v8142_v9 = vpop.permute.xlu1 %8141 }
 0xce4   :  { %13602 = vmatprep.mubr.msk.f32.mxu0 %vm14381_vm1, %v17296_v60 }
 0xce5   :  { %v14104_v43 = vpop.eup %14103 }
 0xce6   :  { %v7055_v13 = vmul.f32 %v14104_v43, %v16153_v46  ;;  %v8476_v46 = vpop.permute.xlu0 %8475 }
 0xce7   :  { %v8226_v59 = vpop.permute.xlu1 %8225 }
 0xce8   :  { %13554 = vmatmul.mubr.msk.f32.vlgmr.msra.gmra.mxu1 %vm1364_vm3, %v7055_v13  ;;  %13599 = vmatpush3.xpose.msk.msra.mxu0 %vm731_vm2, %v8226_v59 }
 0xce9   :  { %13564 = vmatpush3.xpose.msk.msra.mxu1 %vm731_vm2, %v16124_v30  ;;  %13600 = vmatprep.subr.mxu0 %v17296_v60 }
 0xcea   :  { %13565 = vmatprep.subr.mxu1 %v17296_v60  ;;  %13567 = vmatprep.mubr.msk.f32.mxu1 %vm14381_vm1, %v17296_v60 }
 0xceb   :  { %v8308_v0 = vpop.permute.xlu1 %8307 }
 0xcec   :  { %13601 = vmatpush3.xpose.msk.msra.mxu0 %vm731_vm2, %v8224_v4 }
 0xced   :  { %13566 = vmatpush3.xpose.msk.msra.mxu1 %vm731_vm2, %v16132_v14  ;;  %13612 = vmatprep.subr.mxu0 %v17296_v60 }
 0xcee   :  { %13577 = vmatprep.subr.mxu1 %v17296_v60 }
 0xcef   :  { %13603 = vmatmul.mubr.msk.f32.vlgmr.msra.gmra.mxu0 %vm731_vm2, %v8222_v16  ;;  %v8306_v30 = vpop.permute.xlu1 %8305 }
 0xcf0   :  { %13568 = vmatmul.mubr.msk.f32.vlgmr.msra.gmra.mxu1 %vm731_vm2, %v16142_v2  ;;  %13613 = vmatpush3.msra.mxu0 %v8476_v46 }
 0xcf1   :  { %13578 = vmatpush3.xpose.msk.msra.mxu1 %vm731_vm2, %v16186_v8  ;;  %13581 = vmatprep.mubr.msk.f32.mxu1 %vm14381_vm1, %v17296_v60 }
 0xcf2   :  { %13579 = vmatprep.subr.mxu1 %v17296_v60  ;;  %13614 = vmatprep.subr.mxu0 %v17296_v60 }
 0xcf3   :  { %v8304_v14 = vpop.permute.xlu1 %8303  ;;  %13616 = vmatprep.mubr.msk.f32.mxu0 %vm14381_vm1, %v17296_v60 }
 0xcf5   :  { %13580 = vmatpush3.xpose.msk.msra.mxu1 %vm731_vm2, %v7978_v23 }
 0xcf6   :  { %13591 = vmatprep.subr.mxu1 %v17296_v60 }
 0xcf7   :  { %v8555_v2 = vpop.permute.xlu1 %8554 }
 0xcf8   :  { %13582 = vmatmul.mubr.msk.f32.vlgmr.msra.gmra.mxu1 %vm731_vm2, %v7976_v25 }
 0xcf9   :  { %13592 = vmatpush3.xpose.msk.msra.mxu1 %vm731_vm2, %v8144_v3  ;;  %13595 = vmatprep.mubr.msk.f32.mxu1 %vm14381_vm1, %v17296_v60 }
 0xcfa   :  { %13593 = vmatprep.subr.mxu1 %v17296_v60 }
 0xcfb   :  { %v8474_v8 = vpop.permute.xlu1 %8473 }
 0xcfc   :  { %13615 = vmatpush3.msra.mxu0 %v8474_v8 }
 0xcfd   :  { %13594 = vmatpush3.xpose.msk.msra.mxu1 %vm731_vm2, %v8142_v9  ;;  %13626 = vmatprep.subr.mxu0 %v17296_v60 }
 0xcfe   :  { %13605 = vmatprep.subr.mxu1 %v17296_v60 }
 0xcff   :  { %v8553_v31 = vpop.permute.xlu1 %8552 }
 0xd00   :  { %13596 = vmatmul.mubr.msk.f32.vlgmr.msra.gmra.mxu1 %vm731_vm2, %v8140_v44 }
 0xd01   :  { %13606 = vmatpush3.xpose.msk.msra.mxu1 %vm731_vm2, %v8308_v0  ;;  %13609 = vmatprep.mubr.msk.f32.mxu1 %vm14381_vm1, %v17296_v60 }
 0xd02   :  { %13607 = vmatprep.subr.mxu1 %v17296_v60 }
 0xd05   :  { %13608 = vmatpush3.xpose.msk.msra.mxu1 %vm731_vm2, %v8306_v30 }
 0xd06   :  { %13619 = vmatprep.subr.mxu1 %v17296_v60 }
 0xd08   :  { %13610 = vmatmul.mubr.msk.f32.vlgmr.msra.gmra.mxu1 %vm731_vm2, %v8304_v14 }
 0xd09   :  { %13620 = vmatpush3.msra.mxu1 %v8555_v2  ;;  %13623 = vmatprep.mubr.msk.f32.mxu1 %vm14381_vm1, %v17296_v60 }
 0xd0a   :  { %13621 = vmatprep.subr.mxu1 %v17296_v60 }
 0xd0b   :  { %13622 = vmatpush3.msra.mxu1 %v8553_v31 }
 0xd0c   :  { %13633 = vmatprep.subr.mxu1 %v17296_v60 }
 0xd10   :  { %v16308_v5 = vpop.f32.mrf.mxu0 }
 0xd11   :  { %17352 = vst [vmem:[#allocation55_spill] sm:$0xff] %v16308_v5  ;;  %v17368_v5 = vld [vmem:[#allocation32_spill] sm:$0xff] }
 0xd12   :  { %v13506_v7 = vpop.f32.mrf.mxu0 }
 0xd14   :  { %v16310_v35 = vpop.f32.mrf.mxu0 }
 0xd15   :  { %17353 = vst [vmem:[#allocation56_spill] sm:$0xff] %v16310_v35 }
 0xd16   :  { %v13520_v1 = vpop.f32.mrf.mxu0 }
 0xd4f   :  { %v16312_v37 = vpop.f32.mrf.mxu1 }
 0xd50   :  { %17354 = vst [vmem:[#allocation57_spill] sm:$0xff] %v16312_v37 }
 0xd51   :  { %v13513_v32 = vpop.f32.mrf.mxu1 }
 0xd57   :  { %v16314_v27 = vpop.f32.mrf.mxu1 }
 0xd58   :  { %17355 = vst [vmem:[#allocation58_spill] sm:$0xff] %v16314_v27  ;;  %v17367_v27 = vld [vmem:[#allocation33_spill] sm:$0xff] }
 0xd59   :  { %v13527_v41 = vpop.f32.mrf.mxu1 }
 0xd5b   :  { %v16316_v19 = vpop.f32.mrf.mxu0 }
 0xd5c   :  { %17356 = vst [vmem:[#allocation59_spill] sm:$0xff] %v16316_v19 }
 0xd5d   :  { %v13534_v38 = vpop.f32.mrf.mxu0 }
 0xd5f   :  { %v16318_v36 = vpop.f32.mrf.mxu0 }
 0xd60   :  { %17357 = vst [vmem:[#allocation60_spill] sm:$0xff] %v16318_v36  ;;  %v16320_v63 = vpop.f32.mrf.mxu1 }
 0xd61   :  { %17358 = vst [vmem:[#allocation61_spill] sm:$0xff] %v16320_v63  ;;  %v13548_v25 = vpop.f32.mrf.mxu0 }
 0xd62   :  { %v13541_v51 = vpop.f32.mrf.mxu1 }
 0xd63   :  { %v16356_v51 = vpop.permute.xlu0 %8633 }
 0xd67   :  { %v7807_v23 = vpop.f32.mrf.mxu0 }
 0xd68   :  { %v8385_v24 = vsel %vm1364_vm3, %v7807_v23, -inf }
 0xd69   :  { %8386 = vmax.xlane.f32.xlu0 %v8385_v24  ;;  %v13562_v12 = vpop.f32.mrf.mxu0  ;;  %v16366_v24 = vpop.permute.xlu0 %8631 }
 0xd6d   :  { %v16370_v12 = vpop.permute.xlu0 %8791 }
 0xd6f   :  { %v7971_v61 = vpop.f32.mrf.mxu0 }
 0xd70   :  { %v8391_v44 = vsel %vm1364_vm3, %v7971_v61, -inf }
 0xd71   :  { %8392 = vmax.xlane.f32.xlu0 %v8391_v44  ;;  %v13576_v3 = vpop.f32.mrf.mxu0 }
 0xda3   :  { %v16324_v4 = vpop.f32.mrf.mxu0 }
 0xda4   :  { %v8397_v31 = vsel %vm1364_vm3, %v16324_v4, -inf }
 0xda5   :  { %v13590_v9 = vpop.f32.mrf.mxu0 }
 0xda8   :  { %v16326_v43 = vpop.f32.mrf.mxu1 }
 0xda9   :  { %17359 = vst [vmem:[#allocation62_spill] sm:$0xff] %v16326_v43 }
 0xdaa   :  { %v13555_v13 = vpop.f32.mrf.mxu1 }
 0xdaf   :  { %v16328_v59 = vpop.f32.mrf.mxu0 }
 0xdb0   :  { %v7889_v16 = vpop.f32.mrf.mxu1  ;;  %v8403_v1 = vsel %vm1364_vm3, %v16328_v59, -inf }
 0xdb1   :  { %v13604_v0 = vpop.f32.mrf.mxu0  ;;  %v8388_v46 = vsel %vm1364_vm3, %v7889_v16, -inf }
 0xdb2   :  { %8389 = vmax.xlane.f32.xlu1 %v8388_v46  ;;  %v13569_v30 = vpop.f32.mrf.mxu1 }
 0xdb8   :  { %v8053_v14 = vpop.f32.mrf.mxu1 }
 0xdb9   :  { %v8394_v2 = vsel %vm1364_vm3, %v8053_v14, -inf }
 0xdba   :  { %8395 = vmax.xlane.f32.xlu0 %v8394_v2  ;;  %v13583_v8 = vpop.f32.mrf.mxu1 }
 0xdbe   :  { %8398 = vmax.xlane.f32.xlu0 %v8397_v31 }
 0xdc0   :  { %v16334_v7 = vpop.f32.mrf.mxu1 }
 0xdc1   :  { %v8400_v32 = vsel %vm1364_vm3, %v16334_v7, -inf }
 0xdc2   :  { %8404 = vmax.xlane.f32.xlu0 %v8403_v1  ;;  %8401 = vmax.xlane.f32.xlu1 %v8400_v32  ;;  %v13597_v41 = vpop.f32.mrf.mxu1  ;;  %v16386_v1 = vpop.permute.xlu1 %8712 }
 0xdc6   :  { %v16388_v32 = vpop.permute.xlu1 %8710 }
 0xdc8   :  { %v16340_v38 = vpop.f32.mrf.mxu1 }
 0xdc9   :  { %v8406_v30 = vsel %vm1364_vm3, %v16340_v38, -inf }
 0xdca   :  { %v13611_v25 = vpop.f32.mrf.mxu1  ;;  %v16390_v41 = vpop.permute.xlu1 %8870 }
 0xdd3   :  { %8868 = vrot.lane.b32.xlu1 %v14959_v45, %s14386_s16 }
 0xdd7   :  { %9028 = vrot.lane.b32.xlu1 %v14976_v18, %s14386_s16 }
 0xdd8   :  { %8789 = vrot.lane.b32.xlu0 %v14929_v57, %s14386_s16 }
 0xddb   :  { %9026 = vrot.lane.b32.xlu1 %v14984_v48, %s14386_s16 }
 0xddc   :  { %8949 = vrot.lane.b32.xlu0 %v14947_v34, %s14386_s16 }
 0xddf   :  { %9232 = vrot.lane.b32.xlu1 %v14573_v6, %s14387_s17 }
 0xde0   :  { %8947 = vrot.lane.b32.xlu0 %v14953_v11, %s14386_s16 }
 0xde3   :  { %9230 = vrot.lane.b32.xlu1 %v14595_v15, %s14387_s17 }
 0xde4   :  { %9150 = vrot.lane.b32.xlu0 %v14561_v62, %s14387_s17 }
 0xde7   :  { %9314 = vrot.lane.b32.xlu1 %v17306_v52, %s14387_s17 }
 0xde8   :  { %9148 = vrot.lane.b32.xlu0 %v17307_v58, %s14387_s17 }
 0xdec   :  { %9146 = vrot.lane.b32.xlu0 %v17308_v10, %s14387_s17 }
 0xdf0   :  { %9228 = vrot.lane.b32.xlu0 %v17309_v28, %s14387_s17 }
 0xdf2   :  { %v8387_v44 = vpop.xlane.xlu0 %8386 }
 0xdf3   :  { %v8409_v3 = vsub.f32 %v7807_v23, %v8387_v44 }
 0xdf5   :  { %v8417_v9 = vmul.f32 1.442695, %v8409_v3 }
 0xdf7   :  { %14105 = vpow2.f32 %v8417_v9 }
 0xdfa   :  { %v8393_v13 = vpop.xlane.xlu0 %8392 }
 0xdfb   :  { %v8411_v0 = vsub.f32 %v7971_v61, %v8393_v13  ;;  %v17360_v61 = vld [vmem:[#allocation26_spill] sm:$0xff] }
 0xdfd   :  { %v8421_v46 = vmul.f32 1.442695, %v8411_v0 }
 0xdff   :  { %14107 = vpow2.f32 %v8421_v46 }
 0xe04   :  { %v16376_v2 = vpop.eup %14105 }
 0xe05   :  { %v8433_v8 = vsel %vm1364_vm3, %v16376_v2, 0.0 }
 0xe0b   :  { %8407 = vmax.xlane.f32.xlu1 %v8406_v30 }
 0xe0c   :  { %v16380_v31 = vpop.eup %14107 }
 0xe0d   :  { %v8439_v23 = vsel %vm1364_vm3, %v16380_v31, 0.0 }
 0xe0f   :  { %8434 = vadd.xlane.f32.xlu0 %v8433_v8 }
 0xe13   :  { %8440 = vadd.xlane.f32.xlu0 %v8439_v23 }
 0xe1c   :  { %9396 = vrot.lane.b32.xlu1 %v17360_v61, %s14387_s17 }
 0xe3b   :  { %v8390_v25 = vpop.xlane.xlu1 %8389 }
 0xe3c   :  { %v8410_v44 = vsub.f32 %v7889_v16, %v8390_v25 }
 0xe3e   :  { %v8419_v3 = vmul.f32 1.442695, %v8410_v44 }
 0xe40   :  { %14109 = vpow2.f32 %v8419_v3 }
 0xe43   :  { %v8396_v9 = vpop.xlane.xlu0 %8395 }
 0xe44   :  { %v8412_v13 = vsub.f32 %v8053_v14, %v8396_v9 }
 0xe46   :  { %v8423_v0 = vmul.f32 1.442695, %v8412_v13  ;;  %v17361_v13 = vld [vmem:[#allocation29_spill] sm:$0xff] }
 0xe47   :  { %v8399_v46 = vpop.xlane.xlu0 %8398 }
 0xe48   :  { %14111 = vpow2.f32 %v8423_v0  ;;  %v8413_v30 = vsub.f32 %v16324_v4, %v8399_v46  ;;  %v17362_v46 = vld [vmem:[#allocation24_spill] sm:$0xff] }
 0xe4a   :  { %v8425_v8 = vmul.f32 1.442695, %v8413_v30 }
 0xe4b   :  { %v8405_v23 = vpop.xlane.xlu0 %8404  ;;  %v8402_v43 = vpop.xlane.xlu1 %8401 }
 0xe4c   :  { %14113 = vpow2.f32 %v8425_v8  ;;  %v8415_v36 = vsub.f32 %v16328_v59, %v8405_v23  ;;  %v8414_v19 = vsub.f32 %v16334_v7, %v8402_v43  ;;  %v17363_v23 = vld [vmem:[#allocation25_spill] sm:$0xff] }
 0xe4d   :  { %v16395_v35 = vpop.eup %14109 }
 0xe4e   :  { %v8429_v16 = vmul.f32 1.442695, %v8415_v36  ;;  %v8427_v25 = vmul.f32 1.442695, %v8414_v19  ;;  %v8436_v14 = vsel %vm1364_vm3, %v16395_v35, 0.0 }
 0xe4f   :  { %8437 = vadd.xlane.f32.xlu1 %v8436_v14  ;;  %v8790_v9 = vpop.permute.xlu0 %8789  ;;  %v16417_v0 = vpop.permute.xlu1 %8868 }
 0xe50   :  { %14115 = vpow2.f32 %v8429_v16 }
 0xe51   :  { %14117 = vpow2.f32 %v8427_v25  ;;  %v17364_v25 = vld [vmem:[#allocation31_spill] sm:$0xff] }
 0xe53   :  { %v16421_v30 = vpop.permute.xlu0 %8949  ;;  %v16423_v8 = vpop.permute.xlu1 %9028 }
 0xe55   :  { %v16399_v44 = vpop.eup %14111 }
 0xe56   :  { %v8442_v4 = vsel %vm1364_vm3, %v16399_v44, 0.0 }
 0xe57   :  { %8443 = vadd.xlane.f32.xlu1 %v8442_v4  ;;  %v16427_v16 = vpop.permute.xlu0 %8947  ;;  %v16431_v14 = vpop.permute.xlu1 %9026  ;;  %v17365_v4 = vld [vmem:[#allocation28_spill] sm:$0xff] }
 0xe59   :  { %v16403_v3 = vpop.eup %14113 }
 0xe5a   :  { %v8445_v43 = vsel %vm1364_vm3, %v16403_v3, 0.0 }
 0xe5b   :  { %8446 = vadd.xlane.f32.xlu0 %v8445_v43  ;;  %v16435_v43 = vpop.permute.xlu0 %9150 }
 0xe5d   :  { %v16407_v36 = vpop.eup %14115 }
 0xe5e   :  { %v16409_v19 = vpop.eup %14117  ;;  %v8451_v59 = vsel %vm1364_vm3, %v16407_v36, 0.0 }
 0xe5f   :  { %8452 = vadd.xlane.f32.xlu0 %v8451_v59  ;;  %v8448_v7 = vsel %vm1364_vm3, %v16409_v19, 0.0  ;;  %v16437_v59 = vpop.permute.xlu1 %9232  ;;  %v16441_v63 = vpop.permute.xlu0 %9148 }
 0xe60   :  { %8449 = vadd.xlane.f32.xlu1 %v8448_v7  ;;  %v17366_v7 = vld [vmem:[#allocation30_spill] sm:$0xff] }
 0xe63   :  { %v16445_v37 = vpop.permute.xlu1 %9230 }
 0xe71   :  { %9394 = vrot.lane.b32.xlu1 %v17361_v13, %s14387_s17 }
 0xe75   :  { %9312 = vrot.lane.b32.xlu0 %v17362_v46, %s14387_s17 }
 0xe79   :  { %9310 = vrot.lane.b32.xlu0 %v17363_v23, %s14387_s17  ;;  %v17369_v23 = vld [vmem:[#allocation34_spill] sm:$0xff] }
 0xe7d   :  { %9392 = vrot.lane.b32.xlu0 %v17364_v25, %s14387_s17  ;;  %v16449_v25 = vpop.permute.xlu0 %9146 }
 0xe81   :  { %9476 = vrot.lane.b32.xlu0 %v17365_v4, %s14387_s17  ;;  %v16451_v4 = vpop.permute.xlu1 %9314  ;;  %v16455_v46 = vpop.permute.xlu0 %9228 }
 0xe85   :  { %9474 = vrot.lane.b32.xlu0 %v17366_v7, %s14387_s17 }
 0xe89   :  { %9556 = vrot.lane.b32.xlu0 %v17367_v27, %s14387_s17 }
 0xe8d   :  { %9640 = vrot.lane.b32.xlu0 %v17368_v5, %s14387_s17 }
 0xe91   :  { %9638 = vrot.lane.b32.xlu0 %v17369_v23, %s14387_s17 }
 0xe94   :  { %v8408_v7 = vpop.xlane.xlu1 %8407 }
 0xe95   :  { %v8416_v13 = vsub.f32 %v16340_v38, %v8408_v7  ;;  %9892 = vrot.lane.b32.xlu0 %v14695_v47, %s14387_s17 }
 0xe97   :  { %v8431_v27 = vmul.f32 1.442695, %v8416_v13 }
 0xe98   :  { %v8435_v61 = vpop.xlane.xlu0 %8434 }
 0xe99   :  { %14119 = vpow2.f32 %v8431_v27  ;;  %10050 = vrot.lane.b32.xlu0 %v14850_v22, %s14387_s17 }
 0xe9a   :  { %14121 = vrcp.f32 %v8435_v61 }
 0xe9c   :  { %v8441_v5 = vpop.xlane.xlu0 %8440 }
 0xe9d   :  { %14123 = vrcp.f32 %v8441_v5  ;;  %10048 = vrot.lane.b32.xlu0 %v14856_v55, %s14387_s17 }
 0xea1   :  { %10208 = vrot.lane.b32.xlu0 %v14864_v26, %s14387_s17 }
 0xea6   :  { %v16466_v23 = vpop.eup %14119 }
 0xea7   :  { %v14122_v38 = vpop.eup %14121  ;;  %v8454_v13 = vsel %vm1364_vm3, %v16466_v23, 0.0 }
 0xea8   :  { %8455 = vadd.xlane.f32.xlu1 %v8454_v13  ;;  %v8465_v27 = vmul.f32 %v14122_v38, %v16376_v2 }
 0xeaa   :  { %v14124_v7 = vpop.eup %14123  ;;  %13617 = vmatmul.mubr.msk.f32.vlgmr.msra.gmra.mxu0 %vm1364_vm3, %v8465_v27 }
 0xeab   :  { %13627 = vmatpush3.msra.mxu0 %v16356_v51  ;;  %13630 = vmatprep.mubr.msk.f32.mxu0 %vm14381_vm1, %v17296_v60  ;;  %v8467_v5 = vmul.f32 %v14124_v7, %v16380_v31  ;;  %v16499_v51 = vpop.permute.xlu1 %9396 }
 0xeac   :  { %13628 = vmatprep.subr.mxu0 %v17296_v60 }
 0xead   :  { %13629 = vmatpush3.msra.mxu0 %v16366_v24 }
 0xeae   :  { %13640 = vmatprep.subr.mxu0 %v17296_v60  ;;  %13631 = vmatmul.mubr.msk.f32.vlgmr.msra.gmra.mxu0 %vm1364_vm3, %v8467_v5 }
 0xeaf   :  { %13641 = vmatpush3.msra.mxu0 %v16370_v12  ;;  %13644 = vmatprep.mubr.msk.f32.mxu0 %vm14381_vm1, %v17296_v60 }
 0xeb0   :  { %13642 = vmatprep.subr.mxu0 %v17296_v60 }
 0xeb1   :  { %13643 = vmatpush3.msra.mxu0 %v8790_v9 }
 0xeb2   :  { %13654 = vmatprep.subr.mxu0 %v17296_v60 }
 0xeb9   :  { %9478 = vrot.lane.b32.xlu1 %v14613_v21, %s14387_s17 }
 0xebd   :  { %9560 = vrot.lane.b32.xlu1 %v14638_v29, %s14387_s17 }
 0xec1   :  { %9558 = vrot.lane.b32.xlu1 %v14671_v40, %s14387_s17 }
 0xec5   :  { %9642 = vrot.lane.b32.xlu1 %v14651_v33, %s14387_s17 }
 0xec9   :  { %9724 = vrot.lane.b32.xlu1 %v14687_v42, %s14387_s17 }
 0xecd   :  { %9722 = vrot.lane.b32.xlu1 %v14708_v50, %s14387_s17 }
 0xed1   :  { %9720 = vrot.lane.b32.xlu1 %v14726_v54, %s14387_s17 }
 0xed5   :  { %9971 = vrot.lane.b32.xlu1 %v14723_v53, %s14387_s17 }
 0xed8   :  { %v8438_v24 = vpop.xlane.xlu1 %8437 }
 0xed9   :  { %14125 = vrcp.f32 %v8438_v24  ;;  %9890 = vrot.lane.b32.xlu1 %v14703_v49, %s14387_s17 }
 0xedd   :  { %9969 = vrot.lane.b32.xlu1 %v14730_v56, %s14387_s17 }
 0xee0   :  { %v8444_v12 = vpop.xlane.xlu1 %8443 }
 0xee1   :  { %14127 = vrcp.f32 %v8444_v12  ;;  %10129 = vrot.lane.b32.xlu1 %v14900_v39, %s14387_s17 }
 0xee4   :  { %v8447_v2 = vpop.xlane.xlu0 %8446 }
 0xee5   :  { %14129 = vrcp.f32 %v8447_v2  ;;  %10127 = vrot.lane.b32.xlu1 %v14906_v17, %s14387_s17 }
 0xee6   :  { %v14126_v31 = vpop.eup %14125 }
 0xee7   :  { %v8466_v61 = vmul.f32 %v14126_v31, %v16395_v35 }
 0xee8   :  { %v8453_v9 = vpop.xlane.xlu0 %8452 }
 0xee9   :  { %14131 = vrcp.f32 %v8453_v9  ;;  %v8450_v38 = vpop.xlane.xlu1 %8449  ;;  %10287 = vrot.lane.b32.xlu1 %v14912_v20, %s14387_s17  ;;  %13624 = vmatmul.mubr.msk.f32.vlgmr.msra.gmra.mxu1 %vm1364_vm3, %v8466_v61 }
 0xeea   :  { %14133 = vrcp.f32 %v8450_v38  ;;  %13634 = vmatpush3.msra.mxu1 %v16386_v1  ;;  %13637 = vmatprep.mubr.msk.f32.mxu1 %vm14381_vm1, %v17296_v60 }
 0xeeb   :  { %13635 = vmatprep.subr.mxu1 %v17296_v60 }
 0xeec   :  { %13636 = vmatpush3.msra.mxu1 %v16388_v32 }
 0xeed   :  { %13647 = vmatprep.subr.mxu1 %v17296_v60 }
 0xeee   :  { %v14128_v35 = vpop.eup %14127 }
 0xeef   :  { %v8468_v13 = vmul.f32 %v14128_v35, %v16399_v44 }
 0xef1   :  { %13638 = vmatmul.mubr.msk.f32.vlgmr.msra.gmra.mxu1 %vm1364_vm3, %v8468_v13 }
 0xef2   :  { %v14130_v27 = vpop.eup %14129  ;;  %13648 = vmatpush3.msra.mxu1 %v16390_v41  ;;  %13651 = vmatprep.mubr.msk.f32.mxu1 %vm14381_vm1, %v17296_v60 }
 0xef3   :  { %13649 = vmatprep.subr.mxu1 %v17296_v60  ;;  %v8469_v1 = vmul.f32 %v14130_v27, %v16403_v3  ;;  %v9313_v3 = vpop.permute.xlu0 %9312 }
 0xef4   :  { %13650 = vmatpush3.msra.mxu1 %v16417_v0  ;;  %v9395_v0 = vpop.permute.xlu1 %9394 }
 0xef5   :  { %13645 = vmatmul.mubr.msk.f32.vlgmr.msra.gmra.mxu0 %vm1364_vm3, %v8469_v1  ;;  %13661 = vmatprep.subr.mxu1 %v17296_v60 }
 0xef6   :  { %v14132_v32 = vpop.eup %14131  ;;  %13655 = vmatpush3.msra.mxu0 %v16421_v30  ;;  %13658 = vmatprep.mubr.msk.f32.mxu0 %vm14381_vm1, %v17296_v60 }
 0xef7   :  { %v14134_v41 = vpop.eup %14133  ;;  %v8471_v44 = vmul.f32 %v14132_v32, %v16407_v36  ;;  %13656 = vmatprep.subr.mxu0 %v17296_v60 }
 0xef8   :  { %v8470_v7 = vmul.f32 %v14134_v41, %v16409_v19  ;;  %13657 = vmatpush3.msra.mxu0 %v16427_v16 }
 0xef9   :  { %13668 = vmatprep.subr.mxu0 %v17296_v60  ;;  %13659 = vmatmul.mubr.msk.f32.vlgmr.msra.gmra.mxu0 %vm1364_vm3, %v8471_v44 }
 0xefa   :  { %13652 = vmatmul.mubr.msk.f32.vlgmr.msra.gmra.mxu1 %vm1364_vm3, %v8470_v7  ;;  %13669 = vmatpush3.xpose.msk.msra.mxu0 %vm731_vm2, %v16435_v43 }
 0xefb   :  { %13662 = vmatpush3.msra.mxu1 %v16423_v8  ;;  %13670 = vmatprep.subr.mxu0 %v17296_v60 }
 0xefc   :  { %13663 = vmatprep.subr.mxu1 %v17296_v60  ;;  %13672 = vmatprep.mubr.msk.f32.mxu0 %vm14381_vm1, %v17296_v60 }
 0xefd   :  { %13664 = vmatpush3.msra.mxu1 %v16431_v14  ;;  %13665 = vmatprep.mubr.msk.f32.mxu1 %vm14381_vm1, %v17296_v60 }
 0xefe   :  { %13671 = vmatpush3.xpose.msk.msra.mxu0 %vm731_vm2, %v16441_v63  ;;  %13675 = vmatprep.subr.mxu1 %v17296_v60  ;;  %v9311_v63 = vpop.permute.xlu0 %9310 }
 0xeff   :  { %13682 = vmatprep.subr.mxu0 %v17296_v60 }
 0xf01   :  { %13673 = vmatmul.mubr.msk.f32.vlgmr.msra.gmra.mxu0 %vm731_vm2, %v16449_v25 }
 0xf02   :  { %13683 = vmatpush3.xpose.msk.msra.mxu0 %vm731_vm2, %v16451_v4  ;;  %13686 = vmatprep.mubr.msk.f32.mxu0 %vm14381_vm1, %v17296_v60  ;;  %v9393_v36 = vpop.permute.xlu0 %9392 }
 0xf03   :  { %13684 = vmatprep.subr.mxu0 %v17296_v60 }
 0xf06   :  { %13685 = vmatpush3.xpose.msk.msra.mxu0 %vm731_vm2, %v9313_v3  ;;  %v9477_v19 = vpop.permute.xlu0 %9476 }
 0xf07   :  { %13696 = vmatprep.subr.mxu0 %v17296_v60 }
 0xf09   :  { %13687 = vmatmul.mubr.msk.f32.vlgmr.msra.gmra.mxu0 %vm731_vm2, %v9311_v63 }
 0xf0a   :  { %13700 = vmatprep.mubr.msk.f32.mxu0 %vm14381_vm1, %v17296_v60  ;;  %v9475_v30 = vpop.permute.xlu0 %9474 }
 0xf0e   :  { %v9557_v25 = vpop.permute.xlu0 %9556 }
 0xf12   :  { %v9641_v4 = vpop.permute.xlu0 %9640 }
 0xf16   :  { %v9639_v2 = vpop.permute.xlu0 %9638 }
 0xf31   :  { %v8456_v8 = vpop.xlane.xlu1 %8455 }
 0xf32   :  { %14135 = vrcp.f32 %v8456_v8 }
 0xf35   :  { %v9479_v16 = vpop.permute.xlu1 %9478 }
 0xf36   :  { %13697 = vmatpush3.xpose.msk.msra.mxu0 %vm731_vm2, %v9479_v16 }
 0xf37   :  { %13698 = vmatprep.subr.mxu0 %v17296_v60 }
 0xf39   :  { %v9561_v14 = vpop.permute.xlu1 %9560 }
 0xf3a   :  { %13699 = vmatpush3.xpose.msk.msra.mxu0 %vm731_vm2, %v9477_v19 }
 0xf3b   :  { %13710 = vmatprep.subr.mxu0 %v17296_v60 }
 0xf3d   :  { %13701 = vmatmul.mubr.msk.f32.vlgmr.msra.gmra.mxu0 %vm731_vm2, %v9475_v30  ;;  %v9559_v43 = vpop.permute.xlu1 %9558 }
 0xf3e   :  { %13714 = vmatprep.mubr.msk.f32.mxu0 %vm14381_vm1, %v17296_v60 }
 0xf3f   :  { %v14136_v5 = vpop.eup %14135 }
 0xf40   :  { %v8472_v24 = vmul.f32 %v14136_v5, %v16466_v23  ;;  %v9893_v23 = vpop.permute.xlu0 %9892 }
 0xf41   :  { %v9643_v12 = vpop.permute.xlu1 %9642 }
 0xf42   :  { %13666 = vmatmul.mubr.msk.f32.vlgmr.msra.gmra.mxu1 %vm1364_vm3, %v8472_v24  ;;  %13711 = vmatpush3.xpose.msk.msra.mxu0 %vm731_vm2, %v9643_v12 }
 0xf43   :  { %13676 = vmatpush3.xpose.msk.msra.mxu1 %vm731_vm2, %v16437_v59  ;;  %13712 = vmatprep.subr.mxu0 %v17296_v60 }
 0xf44   :  { %13677 = vmatprep.subr.mxu1 %v17296_v60  ;;  %13679 = vmatprep.mubr.msk.f32.mxu1 %vm14381_vm1, %v17296_v60 }
 0xf45   :  { %v9725_v31 = vpop.permute.xlu1 %9724 }
 0xf46   :  { %13713 = vmatpush3.xpose.msk.msra.mxu0 %vm731_vm2, %v9641_v4 }
 0xf47   :  { %13678 = vmatpush3.xpose.msk.msra.mxu1 %vm731_vm2, %v16445_v37  ;;  %13724 = vmatprep.subr.mxu0 %v17296_v60 }
 0xf48   :  { %13689 = vmatprep.subr.mxu1 %v17296_v60 }
 0xf49   :  { %13715 = vmatmul.mubr.msk.f32.vlgmr.msra.gmra.mxu0 %vm731_vm2, %v9639_v2  ;;  %v9723_v59 = vpop.permute.xlu1 %9722 }
 0xf4a   :  { %13680 = vmatmul.mubr.msk.f32.vlgmr.msra.gmra.mxu1 %vm731_vm2, %v16455_v46  ;;  %13725 = vmatpush3.msra.mxu0 %v9893_v23 }
 0xf4b   :  { %13690 = vmatpush3.xpose.msk.msra.mxu1 %vm731_vm2, %v16499_v51  ;;  %13693 = vmatprep.mubr.msk.f32.mxu1 %vm14381_vm1, %v17296_v60 }
 0xf4c   :  { %13691 = vmatprep.subr.mxu1 %v17296_v60  ;;  %13726 = vmatprep.subr.mxu0 %v17296_v60 }
 0xf4d   :  { %v9721_v37 = vpop.permute.xlu1 %9720  ;;  %13728 = vmatprep.mubr.msk.f32.mxu0 %vm14381_vm1, %v17296_v60 }
 0xf4f   :  { %13692 = vmatpush3.xpose.msk.msra.mxu1 %vm731_vm2, %v9395_v0 }
 0xf50   :  { %13703 = vmatprep.subr.mxu1 %v17296_v60 }
 0xf51   :  { %v9972_v46 = vpop.permute.xlu1 %9971 }
 0xf52   :  { %13694 = vmatmul.mubr.msk.f32.vlgmr.msra.gmra.mxu1 %vm731_vm2, %v9393_v36 }
 0xf53   :  { %13704 = vmatpush3.xpose.msk.msra.mxu1 %vm731_vm2, %v9561_v14  ;;  %13707 = vmatprep.mubr.msk.f32.mxu1 %vm14381_vm1, %v17296_v60 }
 0xf54   :  { %13705 = vmatprep.subr.mxu1 %v17296_v60 }
 0xf55   :  { %v9891_v51 = vpop.permute.xlu1 %9890 }
 0xf56   :  { %13727 = vmatpush3.msra.mxu0 %v9891_v51 }
 0xf57   :  { %13706 = vmatpush3.xpose.msk.msra.mxu1 %vm731_vm2, %v9559_v43  ;;  %13738 = vmatprep.subr.mxu0 %v17296_v60 }
 0xf58   :  { %13717 = vmatprep.subr.mxu1 %v17296_v60 }
 0xf59   :  { %v9970_v61 = vpop.permute.xlu1 %9969 }
 0xf5a   :  { %13708 = vmatmul.mubr.msk.f32.vlgmr.msra.gmra.mxu1 %vm731_vm2, %v9557_v25 }
 0xf5b   :  { %13718 = vmatpush3.xpose.msk.msra.mxu1 %vm731_vm2, %v9725_v31  ;;  %13721 = vmatprep.mubr.msk.f32.mxu1 %vm14381_vm1, %v17296_v60 }
 0xf5c   :  { %13719 = vmatprep.subr.mxu1 %v17296_v60 }
 0xf5f   :  { %13720 = vmatpush3.xpose.msk.msra.mxu1 %vm731_vm2, %v9723_v59 }
 0xf60   :  { %13731 = vmatprep.subr.mxu1 %v17296_v60 }
 0xf62   :  { %13722 = vmatmul.mubr.msk.f32.vlgmr.msra.gmra.mxu1 %vm731_vm2, %v9721_v37 }
 0xf63   :  { %13732 = vmatpush3.msra.mxu1 %v9972_v46  ;;  %13735 = vmatprep.mubr.msk.f32.mxu1 %vm14381_vm1, %v17296_v60 }
 0xf64   :  { %13733 = vmatprep.subr.mxu1 %v17296_v60 }
 0xf65   :  { %13734 = vmatpush3.msra.mxu1 %v9970_v61 }
 0xf66   :  { %13745 = vmatprep.subr.mxu1 %v17296_v60 }
 0xf6a   :  { %v16621_v9 = vpop.f32.mrf.mxu0 }
 0xf6b   :  { %17370 = vst [vmem:[#allocation63_spill] sm:$0xff] %v16621_v9 }
 0xf6c   :  { %v13618_v38 = vpop.f32.mrf.mxu0 }
 0xf6e   :  { %v16623_v35 = vpop.f32.mrf.mxu0 }
 0xf6f   :  { %17371 = vst [vmem:[#allocation64_spill] sm:$0xff] %v16623_v35 }
 0xf70   :  { %v13632_v13 = vpop.f32.mrf.mxu0 }
 0xfa9   :  { %v16625_v27 = vpop.f32.mrf.mxu1 }
 0xfab   :  { %v13625_v1 = vpop.f32.mrf.mxu1 }
 0xfb1   :  { %v16627_v32 = vpop.f32.mrf.mxu1 }
 0xfb3   :  { %v13639_v41 = vpop.f32.mrf.mxu1 }
 0xfb5   :  { %v16629_v44 = vpop.f32.mrf.mxu0 }
 0xfb6   :  { %17372 = vst [vmem:[#allocation65_spill] sm:$0xff] %v16629_v44 }
 0xfb7   :  { %v13646_v7 = vpop.f32.mrf.mxu0 }
 0xfb9   :  { %v16631_v3 = vpop.f32.mrf.mxu0 }
 0xfba   :  { %17373 = vst [vmem:[#allocation66_spill] sm:$0xff] %v16631_v3  ;;  %v16633_v63 = vpop.f32.mrf.mxu1 }
 0xfbb   :  { %v13660_v36 = vpop.f32.mrf.mxu0 }
 0xfbc   :  { %v13653_v19 = vpop.f32.mrf.mxu1 }
 0xfbd   :  { %v16669_v19 = vpop.permute.xlu0 %10050 }
 0xfc1   :  { %v9224_v0 = vpop.f32.mrf.mxu0 }
 0xfc2   :  { %v9802_v30 = vsel %vm1364_vm3, %v9224_v0, -inf }
 0xfc3   :  { %9803 = vmax.xlane.f32.xlu0 %v9802_v30  ;;  %v13674_v8 = vpop.f32.mrf.mxu0  ;;  %v16679_v30 = vpop.permute.xlu0 %10048 }
 0xfc9   :  { %v9388_v16 = vpop.f32.mrf.mxu0 }
 0xfca   :  { %v9808_v25 = vsel %vm1364_vm3, %v9388_v16, -inf }
 0xfcb   :  { %9809 = vmax.xlane.f32.xlu0 %v9808_v25  ;;  %v13688_v14 = vpop.f32.mrf.mxu0 }
 0xffd   :  { %v16637_v4 = vpop.f32.mrf.mxu0 }
 0xffe   :  { %v9814_v61 = vsel %vm1364_vm3, %v16637_v4, -inf }
 0xfff   :  { %v13702_v43 = vpop.f32.mrf.mxu0 }
0x1002   :  { %v16639_v5 = vpop.f32.mrf.mxu1 }
0x1003   :  { %17374 = vst [vmem:[#allocation67_spill] sm:$0xff] %v16639_v5 }
0x1004   :  { %v13667_v24 = vpop.f32.mrf.mxu1 }
0x1009   :  { %v16641_v12 = vpop.f32.mrf.mxu0 }
0x100a   :  { %v9306_v2 = vpop.f32.mrf.mxu1  ;;  %v9820_v13 = vsel %vm1364_vm3, %v16641_v12, -inf }
0x100b   :  { %v13716_v31 = vpop.f32.mrf.mxu0  ;;  %v9805_v23 = vsel %vm1364_vm3, %v9306_v2, -inf }
0x100c   :  { %9806 = vmax.xlane.f32.xlu1 %v9805_v23  ;;  %v13681_v59 = vpop.f32.mrf.mxu1 }
0x1012   :  { %v9470_v37 = vpop.f32.mrf.mxu1 }
0x1013   :  { %v9811_v46 = vsel %vm1364_vm3, %v9470_v37, -inf }
0x1014   :  { %9812 = vmax.xlane.f32.xlu0 %v9811_v46  ;;  %v13695_v51 = vpop.f32.mrf.mxu1 }
0x1018   :  { %9815 = vmax.xlane.f32.xlu0 %v9814_v61 }
0x101a   :  { %v16647_v38 = vpop.f32.mrf.mxu1 }
0x101b   :  { %v9817_v1 = vsel %vm1364_vm3, %v16647_v38, -inf }
0x101c   :  { %9821 = vmax.xlane.f32.xlu0 %v9820_v13  ;;  %9818 = vmax.xlane.f32.xlu1 %v9817_v1  ;;  %v13709_v41 = vpop.f32.mrf.mxu1 }
0x1022   :  { %v16653_v7 = vpop.f32.mrf.mxu1 }
0x1024   :  { %v13723_v36 = vpop.f32.mrf.mxu1 }
0x102d   :  { %10285 = vrot.lane.b32.xlu1 %v14959_v45, %s14387_s17 }
0x1031   :  { %10445 = vrot.lane.b32.xlu1 %v14976_v18, %s14387_s17 }
0x1032   :  { %10206 = vrot.lane.b32.xlu0 %v14929_v57, %s14387_s17 }
0x1035   :  { %10443 = vrot.lane.b32.xlu1 %v14984_v48, %s14387_s17 }
0x1036   :  { %10366 = vrot.lane.b32.xlu0 %v14947_v34, %s14387_s17 }
0x1039   :  { %10649 = vrot.lane.b32.xlu1 %v14573_v6, %s14388_s18  ;;  %v16683_v6 = vpop.permute.xlu0 %10208 }
0x103a   :  { %10364 = vrot.lane.b32.xlu0 %v14953_v11, %s14387_s17 }
0x103d   :  { %10647 = vrot.lane.b32.xlu1 %v14595_v15, %s14388_s18 }
0x103e   :  { %10567 = vrot.lane.b32.xlu0 %v14561_v62, %s14388_s18 }
0x1041   :  { %10731 = vrot.lane.b32.xlu1 %v17306_v52, %s14388_s18 }
0x1042   :  { %10565 = vrot.lane.b32.xlu0 %v17307_v58, %s14388_s18  ;;  %v9823_v58 = vsel %vm1364_vm3, %v16653_v7, -inf }
0x1046   :  { %10563 = vrot.lane.b32.xlu0 %v17308_v10, %s14388_s18 }
0x104a   :  { %10645 = vrot.lane.b32.xlu0 %v17309_v28, %s14388_s18 }
0x104c   :  { %v9804_v15 = vpop.xlane.xlu0 %9803 }
0x104d   :  { %v9826_v8 = vsub.f32 %v9224_v0, %v9804_v15  ;;  %v17375_v0 = vld [vmem:[#allocation26_spill] sm:$0xff] }
0x104f   :  { %v9834_v25 = vmul.f32 1.442695, %v9826_v8 }
0x1051   :  { %14137 = vpow2.f32 %v9834_v25 }
0x1054   :  { %v9810_v62 = vpop.xlane.xlu0 %9809 }
0x1055   :  { %v9828_v14 = vsub.f32 %v9388_v16, %v9810_v62  ;;  %v16699_v16 = vpop.permute.xlu1 %10129 }
0x1057   :  { %v9838_v52 = vmul.f32 1.442695, %v9828_v14 }
0x1059   :  { %14139 = vpow2.f32 %v9838_v52  ;;  %v16701_v31 = vpop.permute.xlu1 %10127 }
0x105d   :  { %v16703_v23 = vpop.permute.xlu1 %10287 }
0x105e   :  { %v16689_v43 = vpop.eup %14137 }
0x105f   :  { %v9850_v10 = vsel %vm1364_vm3, %v16689_v43, 0.0 }
0x1065   :  { %9824 = vmax.xlane.f32.xlu1 %v9823_v58 }
0x1066   :  { %v16693_v24 = vpop.eup %14139 }
0x1067   :  { %v9856_v28 = vsel %vm1364_vm3, %v16693_v24, 0.0 }
0x1069   :  { %9851 = vadd.xlane.f32.xlu0 %v9850_v10 }
0x106d   :  { %9857 = vadd.xlane.f32.xlu0 %v9856_v28 }
0x1076   :  { %10813 = vrot.lane.b32.xlu1 %v17375_v0, %s14388_s18 }
0x1095   :  { %v9807_v59 = vpop.xlane.xlu1 %9806 }
0x1096   :  { %v9827_v46 = vsub.f32 %v9306_v2, %v9807_v59 }
0x1098   :  { %v9836_v51 = vmul.f32 1.442695, %v9827_v46 }
0x109a   :  { %14141 = vpow2.f32 %v9836_v51 }
0x109d   :  { %v9813_v61 = vpop.xlane.xlu0 %9812 }
0x109e   :  { %v9829_v13 = vsub.f32 %v9470_v37, %v9813_v61  ;;  %v17376_v61 = vld [vmem:[#allocation29_spill] sm:$0xff] }
0x10a0   :  { %v9840_v1 = vmul.f32 1.442695, %v9829_v13 }
0x10a1   :  { %v9816_v41 = vpop.xlane.xlu0 %9815 }
0x10a2   :  { %14143 = vpow2.f32 %v9840_v1  ;;  %v9830_v36 = vsub.f32 %v16637_v4, %v9816_v41  ;;  %v17377_v1 = vld [vmem:[#allocation24_spill] sm:$0xff] }
0x10a4   :  { %v9842_v15 = vmul.f32 1.442695, %v9830_v36 }
0x10a5   :  { %v9822_v8 = vpop.xlane.xlu0 %9821  ;;  %v9819_v25 = vpop.xlane.xlu1 %9818 }
0x10a6   :  { %14145 = vpow2.f32 %v9842_v15  ;;  %v9832_v62 = vsub.f32 %v16641_v12, %v9822_v8  ;;  %v9831_v14 = vsub.f32 %v16647_v38, %v9819_v25  ;;  %v17378_v15 = vld [vmem:[#allocation25_spill] sm:$0xff]  ;;  %v17379_v25 = vld [vmem:[#allocation31_spill] sm:$0xff] }
0x10a7   :  { %v16708_v52 = vpop.eup %14141 }
0x10a8   :  { %v9846_v2 = vmul.f32 1.442695, %v9832_v62  ;;  %v9844_v58 = vmul.f32 1.442695, %v9831_v14  ;;  %v9853_v37 = vsel %vm1364_vm3, %v16708_v52, 0.0  ;;  %v17380_v14 = vld [vmem:[#allocation28_spill] sm:$0xff] }
0x10a9   :  { %9854 = vadd.xlane.f32.xlu1 %v9853_v37  ;;  %v10207_v51 = vpop.permute.xlu0 %10206  ;;  %v16730_v13 = vpop.permute.xlu1 %10285  ;;  %v17381_v37 = vld [vmem:[#allocation30_spill] sm:$0xff] }
0x10aa   :  { %14147 = vpow2.f32 %v9846_v2 }
0x10ab   :  { %14149 = vpow2.f32 %v9844_v58 }
0x10ad   :  { %v16734_v41 = vpop.permute.xlu0 %10366  ;;  %v16736_v36 = vpop.permute.xlu1 %10445 }
0x10af   :  { %v16712_v10 = vpop.eup %14143 }
0x10b0   :  { %v9859_v4 = vsel %vm1364_vm3, %v16712_v10, 0.0 }
0x10b1   :  { %9860 = vadd.xlane.f32.xlu1 %v9859_v4  ;;  %v16740_v8 = vpop.permute.xlu0 %10364  ;;  %v16744_v62 = vpop.permute.xlu1 %10443 }
0x10b3   :  { %v16716_v28 = vpop.eup %14145 }
0x10b4   :  { %v9862_v12 = vsel %vm1364_vm3, %v16716_v28, 0.0 }
0x10b5   :  { %9863 = vadd.xlane.f32.xlu0 %v9862_v12  ;;  %v16748_v2 = vpop.permute.xlu0 %10567  ;;  %v16750_v58 = vpop.permute.xlu1 %10649  ;;  %v17382_v12 = vld [vmem:[#allocation33_spill] sm:$0xff] }
0x10b7   :  { %v16720_v38 = vpop.eup %14147 }
0x10b8   :  { %v16722_v0 = vpop.eup %14149  ;;  %v9868_v59 = vsel %vm1364_vm3, %v16720_v38, 0.0 }
0x10b9   :  { %9869 = vadd.xlane.f32.xlu0 %v9868_v59  ;;  %v9865_v46 = vsel %vm1364_vm3, %v16722_v0, 0.0  ;;  %v16754_v4 = vpop.permute.xlu0 %10565  ;;  %v16758_v59 = vpop.permute.xlu1 %10647 }
0x10ba   :  { %9866 = vadd.xlane.f32.xlu1 %v9865_v46  ;;  %v17383_v46 = vld [vmem:[#allocation32_spill] sm:$0xff] }
0x10cb   :  { %10811 = vrot.lane.b32.xlu1 %v17376_v61, %s14388_s18  ;;  %v16762_v61 = vpop.permute.xlu0 %10563 }
0x10cf   :  { %10729 = vrot.lane.b32.xlu0 %v17377_v1, %s14388_s18  ;;  %v16764_v1 = vpop.permute.xlu1 %10731 }
0x10d3   :  { %10727 = vrot.lane.b32.xlu0 %v17378_v15, %s14388_s18  ;;  %v17384_v15 = vld [vmem:[#allocation34_spill] sm:$0xff] }
0x10d7   :  { %10809 = vrot.lane.b32.xlu0 %v17379_v25, %s14388_s18  ;;  %v16768_v25 = vpop.permute.xlu0 %10645 }
0x10db   :  { %10893 = vrot.lane.b32.xlu0 %v17380_v14, %s14388_s18 }
0x10df   :  { %10891 = vrot.lane.b32.xlu0 %v17381_v37, %s14388_s18 }
0x10e3   :  { %10973 = vrot.lane.b32.xlu0 %v17382_v12, %s14388_s18 }
0x10e7   :  { %11057 = vrot.lane.b32.xlu0 %v17383_v46, %s14388_s18 }
0x10eb   :  { %11055 = vrot.lane.b32.xlu0 %v17384_v15, %s14388_s18 }
0x10ee   :  { %v9825_v14 = vpop.xlane.xlu1 %9824 }
0x10ef   :  { %v9833_v37 = vsub.f32 %v16653_v7, %v9825_v14 }
0x10f1   :  { %v9848_v5 = vmul.f32 1.442695, %v9833_v37 }
0x10f2   :  { %v9852_v44 = vpop.xlane.xlu0 %9851 }
0x10f3   :  { %14151 = vpow2.f32 %v9848_v5 }
0x10f4   :  { %14153 = vrcp.f32 %v9852_v44 }
0x10f6   :  { %v9858_v12 = vpop.xlane.xlu0 %9857 }
0x10f7   :  { %14155 = vrcp.f32 %v9858_v12 }
0x1100   :  { %v16771_v35 = vpop.eup %14151 }
0x1101   :  { %v14154_v46 = vpop.eup %14153  ;;  %v9871_v3 = vsel %vm1364_vm3, %v16771_v35, 0.0 }
0x1102   :  { %v9882_v9 = vmul.f32 %v14154_v46, %v16689_v43  ;;  %9872 = vadd.xlane.f32.xlu1 %v9871_v3 }
0x1104   :  { %v14156_v15 = vpop.eup %14155  ;;  %13729 = vmatmul.mubr.msk.f32.vlgmr.msra.gmra.mxu0 %vm1364_vm3, %v9882_v9  ;;  %v16804_v9 = vpop.permute.xlu1 %10813 }
0x1105   :  { %v9884_v7 = vmul.f32 %v14156_v15, %v16693_v24  ;;  %13739 = vmatpush3.msra.mxu0 %v16669_v19  ;;  %13742 = vmatprep.mubr.msk.f32.mxu0 %vm14381_vm1, %v17296_v60 }
0x1106   :  { %13740 = vmatprep.subr.mxu0 %v17296_v60 }
0x1107   :  { %13741 = vmatpush3.msra.mxu0 %v16679_v30 }
0x1108   :  { %13752 = vmatprep.subr.mxu0 %v17296_v60  ;;  %13743 = vmatmul.mubr.msk.f32.vlgmr.msra.gmra.mxu0 %vm1364_vm3, %v9884_v7 }
0x1109   :  { %13753 = vmatpush3.msra.mxu0 %v16683_v6  ;;  %13756 = vmatprep.mubr.msk.f32.mxu0 %vm14381_vm1, %v17296_v60 }
0x110a   :  { %13754 = vmatprep.subr.mxu0 %v17296_v60 }
0x110b   :  { %13755 = vmatpush3.msra.mxu0 %v10207_v51 }
0x110c   :  { %13766 = vmatprep.subr.mxu0 %v17296_v60 }
0x1113   :  { %10895 = vrot.lane.b32.xlu1 %v14613_v21, %s14388_s18 }
0x1117   :  { %10977 = vrot.lane.b32.xlu1 %v14638_v29, %s14388_s18 }
0x111b   :  { %10975 = vrot.lane.b32.xlu1 %v14671_v40, %s14388_s18 }
0x111f   :  { %11059 = vrot.lane.b32.xlu1 %v14651_v33, %s14388_s18 }
0x1123   :  { %11141 = vrot.lane.b32.xlu1 %v14687_v42, %s14388_s18 }
0x1127   :  { %11139 = vrot.lane.b32.xlu1 %v14708_v50, %s14388_s18 }
0x112b   :  { %11137 = vrot.lane.b32.xlu1 %v14726_v54, %s14388_s18 }
0x1132   :  { %v9855_v21 = vpop.xlane.xlu1 %9854 }
0x1133   :  { %14157 = vrcp.f32 %v9855_v21 }
0x113a   :  { %v9861_v29 = vpop.xlane.xlu1 %9860 }
0x113b   :  { %14159 = vrcp.f32 %v9861_v29 }
0x113e   :  { %v9864_v44 = vpop.xlane.xlu0 %9863 }
0x113f   :  { %14161 = vrcp.f32 %v9864_v44 }
0x1140   :  { %v14158_v40 = vpop.eup %14157 }
0x1141   :  { %v9883_v33 = vmul.f32 %v14158_v40, %v16708_v52 }
0x1142   :  { %v9870_v3 = vpop.xlane.xlu0 %9869 }
0x1143   :  { %14163 = vrcp.f32 %v9870_v3  ;;  %v9867_v42 = vpop.xlane.xlu1 %9866  ;;  %13736 = vmatmul.mubr.msk.f32.vlgmr.msra.gmra.mxu1 %vm1364_vm3, %v9883_v33 }
0x1144   :  { %14165 = vrcp.f32 %v9867_v42  ;;  %13746 = vmatpush3.msra.mxu1 %v16699_v16  ;;  %13749 = vmatprep.mubr.msk.f32.mxu1 %vm14381_vm1, %v17296_v60 }
0x1145   :  { %13747 = vmatprep.subr.mxu1 %v17296_v60 }
0x1146   :  { %13748 = vmatpush3.msra.mxu1 %v16701_v31  ;;  %v10730_v16 = vpop.permute.xlu0 %10729 }
0x1147   :  { %13759 = vmatprep.subr.mxu1 %v17296_v60  ;;  %v10812_v52 = vpop.permute.xlu1 %10811 }
0x1148   :  { %v14160_v50 = vpop.eup %14159 }
0x1149   :  { %v9885_v54 = vmul.f32 %v14160_v50, %v16712_v10 }
0x114a   :  { %v10728_v31 = vpop.permute.xlu0 %10727 }
0x114b   :  { %13750 = vmatmul.mubr.msk.f32.vlgmr.msra.gmra.mxu1 %vm1364_vm3, %v9885_v54 }
0x114c   :  { %v14162_v5 = vpop.eup %14161  ;;  %13760 = vmatpush3.msra.mxu1 %v16703_v23  ;;  %13763 = vmatprep.mubr.msk.f32.mxu1 %vm14381_vm1, %v17296_v60 }
0x114d   :  { %v9886_v19 = vmul.f32 %v14162_v5, %v16716_v28  ;;  %13761 = vmatprep.subr.mxu1 %v17296_v60 }
0x114e   :  { %13762 = vmatpush3.msra.mxu1 %v16730_v13  ;;  %v10810_v23 = vpop.permute.xlu0 %10809 }
0x114f   :  { %13757 = vmatmul.mubr.msk.f32.vlgmr.msra.gmra.mxu0 %vm1364_vm3, %v9886_v19  ;;  %13773 = vmatprep.subr.mxu1 %v17296_v60 }
0x1150   :  { %v14164_v30 = vpop.eup %14163  ;;  %13767 = vmatpush3.msra.mxu0 %v16734_v41  ;;  %13770 = vmatprep.mubr.msk.f32.mxu0 %vm14381_vm1, %v17296_v60 }
0x1151   :  { %v14166_v6 = vpop.eup %14165  ;;  %v9888_v43 = vmul.f32 %v14164_v30, %v16720_v38  ;;  %13768 = vmatprep.subr.mxu0 %v17296_v60 }
0x1152   :  { %v9887_v24 = vmul.f32 %v14166_v6, %v16722_v0  ;;  %13769 = vmatpush3.msra.mxu0 %v16740_v8  ;;  %v10894_v10 = vpop.permute.xlu0 %10893 }
0x1153   :  { %13780 = vmatprep.subr.mxu0 %v17296_v60  ;;  %13771 = vmatmul.mubr.msk.f32.vlgmr.msra.gmra.mxu0 %vm1364_vm3, %v9888_v43 }
0x1154   :  { %13764 = vmatmul.mubr.msk.f32.vlgmr.msra.gmra.mxu1 %vm1364_vm3, %v9887_v24  ;;  %13781 = vmatpush3.xpose.msk.msra.mxu0 %vm731_vm2, %v16748_v2 }
0x1155   :  { %13774 = vmatpush3.msra.mxu1 %v16736_v36  ;;  %13782 = vmatprep.subr.mxu0 %v17296_v60 }
0x1156   :  { %13775 = vmatprep.subr.mxu1 %v17296_v60  ;;  %13784 = vmatprep.mubr.msk.f32.mxu0 %vm14381_vm1, %v17296_v60  ;;  %v10892_v0 = vpop.permute.xlu0 %10891 }
0x1157   :  { %13776 = vmatpush3.msra.mxu1 %v16744_v62  ;;  %13777 = vmatprep.mubr.msk.f32.mxu1 %vm14381_vm1, %v17296_v60 }
0x1158   :  { %13783 = vmatpush3.xpose.msk.msra.mxu0 %vm731_vm2, %v16754_v4  ;;  %13787 = vmatprep.subr.mxu1 %v17296_v60 }
0x1159   :  { %13794 = vmatprep.subr.mxu0 %v17296_v60 }
0x115a   :  { %v10974_v13 = vpop.permute.xlu0 %10973 }
0x115b   :  { %13785 = vmatmul.mubr.msk.f32.vlgmr.msra.gmra.mxu0 %vm731_vm2, %v16762_v61 }
0x115c   :  { %13795 = vmatpush3.xpose.msk.msra.mxu0 %vm731_vm2, %v16764_v1  ;;  %13798 = vmatprep.mubr.msk.f32.mxu0 %vm14381_vm1, %v17296_v60 }
0x115d   :  { %13796 = vmatprep.subr.mxu0 %v17296_v60 }
0x115e   :  { %v11058_v2 = vpop.permute.xlu0 %11057 }
0x1160   :  { %13797 = vmatpush3.xpose.msk.msra.mxu0 %vm731_vm2, %v10730_v16 }
0x1161   :  { %13808 = vmatprep.subr.mxu0 %v17296_v60 }
0x1163   :  { %13799 = vmatmul.mubr.msk.f32.vlgmr.msra.gmra.mxu0 %vm731_vm2, %v10728_v31 }
0x1164   :  { %13812 = vmatprep.mubr.msk.f32.mxu0 %vm14381_vm1, %v17296_v60 }
0x118b   :  { %v9873_v28 = vpop.xlane.xlu1 %9872 }
0x118c   :  { %14167 = vrcp.f32 %v9873_v28 }
0x118f   :  { %v10896_v38 = vpop.permute.xlu1 %10895 }
0x1190   :  { %13809 = vmatpush3.xpose.msk.msra.mxu0 %vm731_vm2, %v10896_v38 }
0x1191   :  { %13810 = vmatprep.subr.mxu0 %v17296_v60 }
0x1193   :  { %v10978_v51 = vpop.permute.xlu1 %10977 }
0x1194   :  { %13811 = vmatpush3.xpose.msk.msra.mxu0 %vm731_vm2, %v10894_v10 }
0x1195   :  { %13822 = vmatprep.subr.mxu0 %v17296_v60 }
0x1197   :  { %13813 = vmatmul.mubr.msk.f32.vlgmr.msra.gmra.mxu0 %vm731_vm2, %v10892_v0  ;;  %v10976_v41 = vpop.permute.xlu1 %10975 }
0x1198   :  { %13826 = vmatprep.mubr.msk.f32.mxu0 %vm14381_vm1, %v17296_v60 }
0x1199   :  { %v14168_v36 = vpop.eup %14167 }
0x119a   :  { %v9889_v8 = vmul.f32 %v14168_v36, %v16771_v35  ;;  %v11056_v35 = vpop.permute.xlu0 %11055 }
0x119b   :  { %v11060_v62 = vpop.permute.xlu1 %11059 }
0x119c   :  { %13778 = vmatmul.mubr.msk.f32.vlgmr.msra.gmra.mxu1 %vm1364_vm3, %v9889_v8  ;;  %13823 = vmatpush3.xpose.msk.msra.mxu0 %vm731_vm2, %v11060_v62 }
0x119d   :  { %13788 = vmatpush3.xpose.msk.msra.mxu1 %vm731_vm2, %v16750_v58  ;;  %13824 = vmatprep.subr.mxu0 %v17296_v60 }
0x119e   :  { %13789 = vmatprep.subr.mxu1 %v17296_v60  ;;  %13791 = vmatprep.mubr.msk.f32.mxu1 %vm14381_vm1, %v17296_v60 }
0x119f   :  { %v11142_v58 = vpop.permute.xlu1 %11141 }
0x11a0   :  { %13825 = vmatpush3.xpose.msk.msra.mxu0 %vm731_vm2, %v11058_v2 }
0x11a1   :  { %13790 = vmatpush3.xpose.msk.msra.mxu1 %vm731_vm2, %v16758_v59  ;;  %13836 = vmatprep.subr.mxu0 %v17296_v60 }
0x11a2   :  { %13801 = vmatprep.subr.mxu1 %v17296_v60 }
0x11a3   :  { %13827 = vmatmul.mubr.msk.f32.vlgmr.msra.gmra.mxu0 %vm731_vm2, %v11056_v35  ;;  %v11140_v4 = vpop.permute.xlu1 %11139 }
0x11a4   :  { %13792 = vmatmul.mubr.msk.f32.vlgmr.msra.gmra.mxu1 %vm731_vm2, %v16768_v25  ;;  %13840 = vmatprep.mubr.msk.f32.mxu0 %vm14381_vm1, %v17296_v60 }
0x11a5   :  { %13802 = vmatpush3.xpose.msk.msra.mxu1 %vm731_vm2, %v16804_v9  ;;  %13805 = vmatprep.mubr.msk.f32.mxu1 %vm14381_vm1, %v17296_v60 }
0x11a6   :  { %13803 = vmatprep.subr.mxu1 %v17296_v60 }
0x11a7   :  { %v11138_v59 = vpop.permute.xlu1 %11137 }
0x11a9   :  { %13804 = vmatpush3.xpose.msk.msra.mxu1 %vm731_vm2, %v10812_v52 }
0x11aa   :  { %13815 = vmatprep.subr.mxu1 %v17296_v60 }
0x11ac   :  { %13806 = vmatmul.mubr.msk.f32.vlgmr.msra.gmra.mxu1 %vm731_vm2, %v10810_v23 }
0x11ad   :  { %13816 = vmatpush3.xpose.msk.msra.mxu1 %vm731_vm2, %v10978_v51  ;;  %13819 = vmatprep.mubr.msk.f32.mxu1 %vm14381_vm1, %v17296_v60 }
0x11ae   :  { %13817 = vmatprep.subr.mxu1 %v17296_v60 }
0x11b1   :  { %13818 = vmatpush3.xpose.msk.msra.mxu1 %vm731_vm2, %v10976_v41 }
0x11b2   :  { %13829 = vmatprep.subr.mxu1 %v17296_v60 }
0x11b4   :  { %13820 = vmatmul.mubr.msk.f32.vlgmr.msra.gmra.mxu1 %vm731_vm2, %v10974_v13 }
0x11b5   :  { %13830 = vmatpush3.xpose.msk.msra.mxu1 %vm731_vm2, %v11142_v58  ;;  %13833 = vmatprep.mubr.msk.f32.mxu1 %vm14381_vm1, %v17296_v60 }
0x11b6   :  { %13831 = vmatprep.subr.mxu1 %v17296_v60 }
0x11b9   :  { %13832 = vmatpush3.xpose.msk.msra.mxu1 %vm731_vm2, %v11140_v4 }
0x11ba   :  { %13843 = vmatprep.subr.mxu1 %v17296_v60 }
0x11bc   :  { %13834 = vmatmul.mubr.msk.f32.vlgmr.msra.gmra.mxu1 %vm731_vm2, %v11138_v59 }
0x11bd   :  { %13847 = vmatprep.mubr.msk.f32.mxu1 %vm14381_vm1, %v17296_v60 }
0x11c4   :  { %v16910_v61 = vpop.f32.mrf.mxu0 }
0x11c6   :  { %v13730_v1 = vpop.f32.mrf.mxu0 }
0x11c8   :  { %v16912_v25 = vpop.f32.mrf.mxu0 }
0x11ca   :  { %v13744_v14 = vpop.f32.mrf.mxu0 }
0x1203   :  { %v16914_v37 = vpop.f32.mrf.mxu1 }
0x1205   :  { %v13737_v12 = vpop.f32.mrf.mxu1 }
0x120b   :  { %v16916_v46 = vpop.f32.mrf.mxu1 }
0x120d   :  { %v13751_v15 = vpop.f32.mrf.mxu1 }
0x120f   :  { %v16918_v7 = vpop.f32.mrf.mxu0 }
0x1211   :  { %v13758_v9 = vpop.f32.mrf.mxu0 }
0x1213   :  { %v16920_v21 = vpop.f32.mrf.mxu0 }
0x1214   :  { %v16922_v29 = vpop.f32.mrf.mxu1 }
0x1215   :  { %v13772_v44 = vpop.f32.mrf.mxu0 }
0x1216   :  { %v13765_v40 = vpop.f32.mrf.mxu1 }
0x121b   :  { %v10641_v33 = vpop.f32.mrf.mxu0 }
0x121c   :  { %v11219_v3 = vsel %vm1364_vm3, %v10641_v33, -inf }
0x121d   :  { %11220 = vmax.xlane.f32.xlu0 %v11219_v3  ;;  %v13786_v42 = vpop.f32.mrf.mxu0 }
0x1223   :  { %v10805_v50 = vpop.f32.mrf.mxu0 }
0x1224   :  { %v11225_v54 = vsel %vm1364_vm3, %v10805_v50, -inf }
0x1225   :  { %11226 = vmax.xlane.f32.xlu0 %v11225_v54  ;;  %v13800_v5 = vpop.f32.mrf.mxu0 }
0x1257   :  { %v16926_v19 = vpop.f32.mrf.mxu0 }
0x1258   :  { %v11231_v0 = vsel %vm1364_vm3, %v16926_v19, -inf }
0x1259   :  { %v13814_v30 = vpop.f32.mrf.mxu0 }
0x125c   :  { %v16928_v6 = vpop.f32.mrf.mxu1 }
0x125e   :  { %v13779_v43 = vpop.f32.mrf.mxu1 }
0x1263   :  { %v16930_v24 = vpop.f32.mrf.mxu0 }
0x1264   :  { %v10723_v16 = vpop.f32.mrf.mxu1  ;;  %v11237_v13 = vsel %vm1364_vm3, %v16930_v24, -inf }
0x1265   :  { %v13828_v31 = vpop.f32.mrf.mxu0  ;;  %v11222_v23 = vsel %vm1364_vm3, %v10723_v16, -inf }
0x1266   :  { %11223 = vmax.xlane.f32.xlu1 %v11222_v23  ;;  %v13793_v52 = vpop.f32.mrf.mxu1 }
0x126c   :  { %v10887_v10 = vpop.f32.mrf.mxu1 }
0x126d   :  { %v11228_v28 = vsel %vm1364_vm3, %v10887_v10, -inf }
0x126e   :  { %11229 = vmax.xlane.f32.xlu0 %v11228_v28  ;;  %v13807_v38 = vpop.f32.mrf.mxu1  ;;  %v17385_v28 = vld [vmem:[#allocation35_spill] sm:$0xff] }
0x126f   :  { %v17386_v38 = vld [vmem:[#allocation23_spill] sm:$0xff] }
0x1272   :  { %11232 = vmax.xlane.f32.xlu0 %v11231_v0 }
0x1274   :  { %v11051_v51 = vpop.f32.mrf.mxu1 }
0x1275   :  { %v11234_v41 = vsel %vm1364_vm3, %v11051_v51, -inf }
0x1276   :  { %11238 = vmax.xlane.f32.xlu0 %v11237_v13  ;;  %11235 = vmax.xlane.f32.xlu1 %v11234_v41  ;;  %v13821_v36 = vpop.f32.mrf.mxu1  ;;  %v17388_v41 = vld [vmem:[#allocation55_spill] sm:$0xff] }
0x127c   :  { %v16939_v8 = vpop.f32.mrf.mxu1 }
0x127e   :  { %v13835_v62 = vpop.f32.mrf.mxu1 }
0x127f   :  { %v17389_v62 = vld [vmem:[#allocation57_spill] sm:$0xff] }
0x1287   :  { %11388 = vrot.lane.b32.xlu1 %v14723_v53, %s14388_s18 }
0x128b   :  { %11307 = vrot.lane.b32.xlu1 %v14703_v49, %s14388_s18 }
0x128c   :  { %11309 = vrot.lane.b32.xlu0 %v14695_v47, %s14388_s18 }
0x128f   :  { %11386 = vrot.lane.b32.xlu1 %v14730_v56, %s14388_s18 }
0x1290   :  { %11467 = vrot.lane.b32.xlu0 %v14850_v22, %s14388_s18  ;;  %v11240_v22 = vsel %vm1364_vm3, %v16939_v8, -inf }
0x1294   :  { %11465 = vrot.lane.b32.xlu0 %v14856_v55, %s14388_s18 }
0x1298   :  { %11625 = vrot.lane.b32.xlu0 %v14864_v26, %s14388_s18 }
0x129c   :  { %11623 = vrot.lane.b32.xlu0 %v14929_v57, %s14388_s18 }
0x12a0   :  { %11783 = vrot.lane.b32.xlu0 %v14947_v34, %s14388_s18 }
0x12a6   :  { %v11221_v49 = vpop.xlane.xlu0 %11220 }
0x12a7   :  { %v11243_v47 = vsub.f32 %v10641_v33, %v11221_v49 }
0x12a9   :  { %v11251_v53 = vmul.f32 1.442695, %v11243_v47 }
0x12ab   :  { %14169 = vpow2.f32 %v11251_v53  ;;  %v17390_v53 = vld [vmem:[#allocation38_spill] sm:$0xff] }
0x12ae   :  { %v11227_v56 = vpop.xlane.xlu0 %11226 }
0x12af   :  { %v11245_v2 = vsub.f32 %v10805_v50, %v11227_v56 }
0x12b1   :  { %v11255_v35 = vmul.f32 1.442695, %v11245_v2 }
0x12b3   :  { %14171 = vpow2.f32 %v11255_v35  ;;  %11241 = vmax.xlane.f32.xlu1 %v11240_v22  ;;  %v17391_v35 = vld [vmem:[#allocation27_spill] sm:$0xff] }
0x12b8   :  { %v16961_v55 = vpop.eup %14169 }
0x12b9   :  { %v11267_v26 = vsel %vm1364_vm3, %v16961_v55, 0.0 }
0x12bf   :  { %11268 = vadd.xlane.f32.xlu0 %v11267_v26 }
0x12c0   :  { %v16965_v57 = vpop.eup %14171 }
0x12c1   :  { %v11273_v34 = vsel %vm1364_vm3, %v16965_v57, 0.0 }
0x12c3   :  { %11274 = vadd.xlane.f32.xlu0 %v11273_v34  ;;  %v17392_v34 = vld [vmem:[#allocation50_spill] sm:$0xff] }
0x12c4   :  { %11546 = vrot.lane.b32.xlu1 %v14900_v39, %s14388_s18 }
0x12c8   :  { %11544 = vrot.lane.b32.xlu1 %v14906_v17, %s14388_s18 }
0x12cc   :  { %11704 = vrot.lane.b32.xlu1 %v14912_v20, %s14388_s18 }
0x12d0   :  { %11702 = vrot.lane.b32.xlu1 %v14959_v45, %s14388_s18 }
0x12d4   :  { %11862 = vrot.lane.b32.xlu1 %v14976_v18, %s14388_s18 }
0x12ef   :  { %v11224_v58 = vpop.xlane.xlu1 %11223 }
0x12f0   :  { %v11244_v4 = vsub.f32 %v10723_v16, %v11224_v58 }
0x12f2   :  { %v11253_v59 = vmul.f32 1.442695, %v11244_v4 }
0x12f4   :  { %14173 = vpow2.f32 %v11253_v59  ;;  %v17394_v59 = vld [vmem:[#allocation41_spill] sm:$0xff] }
0x12f7   :  { %v11230_v1 = vpop.xlane.xlu0 %11229 }
0x12f8   :  { %v11246_v14 = vsub.f32 %v10887_v10, %v11230_v1 }
0x12fa   :  { %v11257_v12 = vmul.f32 1.442695, %v11246_v14  ;;  %v17398_v14 = vld [vmem:[#allocation22_spill] sm:$0xff] }
0x12fb   :  { %v11233_v39 = vpop.xlane.xlu0 %11232 }
0x12fc   :  { %14175 = vpow2.f32 %v11257_v12  ;;  %v11247_v17 = vsub.f32 %v16926_v19, %v11233_v39  ;;  %v17399_v12 = vld [vmem:[#allocation61_spill] sm:$0xff] }
0x12fd   :  { %v17400_v39 = vld [vmem:[#allocation49_spill] sm:$0xff] }
0x12fe   :  { %v11259_v15 = vmul.f32 1.442695, %v11247_v17  ;;  %v17401_v17 = vld [vmem:[#allocation42_spill] sm:$0xff] }
0x12ff   :  { %v11239_v9 = vpop.xlane.xlu0 %11238  ;;  %v11236_v20 = vpop.xlane.xlu1 %11235 }
0x1300   :  { %14177 = vpow2.f32 %v11259_v15  ;;  %v11249_v45 = vsub.f32 %v16930_v24, %v11239_v9  ;;  %v11248_v44 = vsub.f32 %v11051_v51, %v11236_v20  ;;  %v17387_v51 = vld [vmem:[#allocation47_spill] sm:$0xff]  ;;  %v17404_v20 = vld [vmem:[#allocation46_spill] sm:$0xff] }
0x1301   :  { %v16981_v40 = vpop.eup %14173  ;;  %v17403_v9 = vld [vmem:[#allocation63_spill] sm:$0xff] }
0x1302   :  { %v11263_v18 = vmul.f32 1.442695, %v11249_v45  ;;  %v11261_v33 = vmul.f32 1.442695, %v11248_v44  ;;  %v11270_v3 = vsel %vm1364_vm3, %v16981_v40, 0.0  ;;  %v17405_v45 = vld [vmem:[#allocation21_spill] sm:$0xff] }
0x1303   :  { %v11310_v42 = vpop.permute.xlu0 %11309  ;;  %v11389_v50 = vpop.permute.xlu1 %11388  ;;  %11271 = vadd.xlane.f32.xlu1 %v11270_v3  ;;  %v17408_v3 = vld [vmem:[#allocation66_spill] sm:$0xff] }
0x1304   :  { %14179 = vpow2.f32 %v11263_v18  ;;  %13837 = vmatpush3.msra.mxu0 %v11310_v42  ;;  %13844 = vmatpush3.msra.mxu1 %v11389_v50  ;;  %v17406_v18 = vld [vmem:[#allocation54_spill] sm:$0xff]  ;;  %v17409_v42 = vld [vmem:[#allocation56_spill] sm:$0xff] }
0x1305   :  { %14181 = vpow2.f32 %v11261_v33  ;;  %13838 = vmatprep.subr.mxu0 %v17296_v60  ;;  %13845 = vmatprep.subr.mxu1 %v17296_v60  ;;  %v17407_v33 = vld [vmem:[#allocation48_spill] sm:$0xff] }
0x1307   :  { %v11308_v54 = vpop.permute.xlu1 %11307  ;;  %v11468_v10 = vpop.permute.xlu0 %11467 }
0x1308   :  { %13839 = vmatpush3.msra.mxu0 %v11308_v54  ;;  %v17411_v54 = vld [vmem:[#allocation64_spill] sm:$0xff] }
0x1309   :  { %v16987_v5 = vpop.eup %14175  ;;  %13850 = vmatprep.subr.mxu0 %v17296_v60 }
0x130a   :  { %v11276_v19 = vsel %vm1364_vm3, %v16987_v5, 0.0 }
0x130b   :  { %v11387_v30 = vpop.permute.xlu1 %11386  ;;  %11277 = vadd.xlane.f32.xlu1 %v11276_v19  ;;  %v11466_v0 = vpop.permute.xlu0 %11465  ;;  %v17412_v19 = vld [vmem:[#allocation43_spill] sm:$0xff] }
0x130c   :  { %13846 = vmatpush3.msra.mxu1 %v11387_v30 }
0x130d   :  { %v16992_v43 = vpop.eup %14177  ;;  %13857 = vmatprep.subr.mxu1 %v17296_v60 }
0x130e   :  { %v11279_v24 = vsel %vm1364_vm3, %v16992_v43, 0.0 }
0x130f   :  { %11280 = vadd.xlane.f32.xlu0 %v11279_v24  ;;  %v11626_v13 = vpop.permute.xlu0 %11625 }
0x1311   :  { %v16997_v16 = vpop.eup %14179 }
0x1312   :  { %v16999_v31 = vpop.eup %14181  ;;  %v11285_v23 = vsel %vm1364_vm3, %v16997_v16, 0.0 }
0x1313   :  { %11286 = vadd.xlane.f32.xlu0 %v11285_v23  ;;  %v11282_v52 = vsel %vm1364_vm3, %v16999_v31, 0.0  ;;  %v11624_v49 = vpop.permute.xlu0 %11623 }
0x1314   :  { %11283 = vadd.xlane.f32.xlu1 %v11282_v52 }
0x1317   :  { %v17020_v56 = vpop.permute.xlu0 %11783 }
0x1329   :  { %11781 = vrot.lane.b32.xlu0 %v14953_v11, %s14388_s18 }
0x132d   :  { %3445 = vrot.lane.b32.xlu0 %v17385_v28, %s14389_s19 }
0x1331   :  { %4862 = vrot.lane.b32.xlu0 %v17386_v38, %s14374_s23  ;;  %v17414_v38 = vld [vmem:[#allocation59_spill] sm:$0xff] }
0x1335   :  { %6279 = vrot.lane.b32.xlu0 %v17387_v51, %s14390_s20 }
0x1339   :  { %7696 = vrot.lane.b32.xlu0 %v17388_v41, %s14391_s21 }
0x133c   :  { %v11242_v36 = vpop.xlane.xlu1 %11241 }
0x133d   :  { %v11250_v11 = vsub.f32 %v16939_v8, %v11242_v36  ;;  %7698 = vrot.lane.b32.xlu0 %v17389_v62, %s14391_s21  ;;  %v17416_v36 = vld [vmem:[#allocation65_spill] sm:$0xff] }
0x133f   :  { %v11265_v47 = vmul.f32 1.442695, %v11250_v11 }
0x1341   :  { %14183 = vpow2.f32 %v11265_v47  ;;  %3451 = vrot.lane.b32.xlu0 %v17390_v53, %s14389_s19 }
0x1345   :  { %9115 = vrot.lane.b32.xlu0 %v16625_v27, %s14392_s7  ;;  %v17393_v27 = vld [vmem:[#allocation58_spill] sm:$0xff] }
0x1348   :  { %v11269_v2 = vpop.xlane.xlu0 %11268 }
0x1349   :  { %14185 = vrcp.f32 %v11269_v2  ;;  %4868 = vrot.lane.b32.xlu0 %v17391_v35, %s14374_s23  ;;  %v17419_v35 = vld [vmem:[#allocation60_spill] sm:$0xff] }
0x134c   :  { %v11275_v8 = vpop.xlane.xlu0 %11274 }
0x134d   :  { %14187 = vrcp.f32 %v11275_v8  ;;  %10532 = vrot.lane.b32.xlu0 %v16914_v37, %s14393_s24  ;;  %v17420_v8 = vld [vmem:[#allocation62_spill] sm:$0xff] }
0x134e   :  { %v17028_v22 = vpop.eup %14183 }
0x134f   :  { %v11288_v26 = vsel %vm1364_vm3, %v17028_v22, 0.0 }
0x1350   :  { %11289 = vadd.xlane.f32.xlu1 %v11288_v26 }
0x1351   :  { %6285 = vrot.lane.b32.xlu0 %v17392_v34, %s14390_s20  ;;  %v17421_v34 = vld [vmem:[#allocation67_spill] sm:$0xff] }
0x1355   :  { %7702 = vrot.lane.b32.xlu0 %v17393_v27, %s14391_s21 }
0x1356   :  { %v14186_v58 = vpop.eup %14185 }
0x1357   :  { %v11299_v4 = vmul.f32 %v14186_v58, %v16961_v55  ;;  %v17395_v55 = vld [vmem:[#allocation45_spill] sm:$0xff] }
0x1359   :  { %3455 = vrot.lane.b32.xlu0 %v17394_v59, %s14389_s19  ;;  %13841 = vmatmul.mubr.msk.f32.vlgmr.msra.gmra.mxu0 %vm1364_vm3, %v11299_v4 }
0x135a   :  { %v14188_v37 = vpop.eup %14187  ;;  %13851 = vmatpush3.msra.mxu0 %v11468_v10  ;;  %13854 = vmatprep.mubr.msk.f32.mxu0 %vm14381_vm1, %v17296_v60 }
0x135b   :  { %v11301_v1 = vmul.f32 %v14188_v37, %v16965_v57  ;;  %13852 = vmatprep.subr.mxu0 %v17296_v60  ;;  %v17397_v57 = vld [vmem:[#allocation53_spill] sm:$0xff] }
0x135c   :  { %13853 = vmatpush3.msra.mxu0 %v11466_v0  ;;  %v17415_v0 = vld [vmem:[#allocation40_spill] sm:$0xff] }
0x135d   :  { %13864 = vmatprep.subr.mxu0 %v17296_v60  ;;  %9119 = vrot.lane.b32.xlu0 %v16627_v32, %s14392_s7  ;;  %v17396_v32 = vld [vmem:[#allocation37_spill] sm:$0xff] }
0x135e   :  { %13855 = vmatmul.mubr.msk.f32.vlgmr.msra.gmra.mxu0 %vm1364_vm3, %v11301_v1 }
0x135f   :  { %13865 = vmatpush3.msra.mxu0 %v11626_v13  ;;  %13868 = vmatprep.mubr.msk.f32.mxu0 %vm14381_vm1, %v17296_v60 }
0x1360   :  { %13866 = vmatprep.subr.mxu0 %v17296_v60 }
0x1361   :  { %13867 = vmatpush3.msra.mxu0 %v11624_v49  ;;  %4872 = vrot.lane.b32.xlu0 %v17395_v55, %s14374_s23  ;;  %v17417_v49 = vld [vmem:[#allocation44_spill] sm:$0xff] }
0x1362   :  { %11860 = vrot.lane.b32.xlu1 %v14984_v48, %s14388_s18  ;;  %13878 = vmatprep.subr.mxu0 %v17296_v60  ;;  %v11547_v48 = vpop.permute.xlu1 %11546 }
0x1365   :  { %10536 = vrot.lane.b32.xlu0 %v16916_v46, %s14393_s24  ;;  %v17402_v46 = vld [vmem:[#allocation36_spill] sm:$0xff] }
0x1366   :  { %3447 = vrot.lane.b32.xlu1 %v17396_v32, %s14389_s19  ;;  %v11545_v15 = vpop.permute.xlu1 %11544 }
0x1369   :  { %6289 = vrot.lane.b32.xlu0 %v17397_v57, %s14390_s20 }
0x136a   :  { %4864 = vrot.lane.b32.xlu1 %v17398_v14, %s14374_s23  ;;  %v11705_v44 = vpop.permute.xlu1 %11704 }
0x136d   :  { %7706 = vrot.lane.b32.xlu0 %v17399_v12, %s14391_s21 }
0x136e   :  { %6281 = vrot.lane.b32.xlu1 %v17400_v39, %s14390_s20 }
0x1371   :  { %3459 = vrot.lane.b32.xlu0 %v17401_v17, %s14389_s19 }
0x1372   :  { %3449 = vrot.lane.b32.xlu1 %v17402_v46, %s14389_s19 }
0x1375   :  { %9123 = vrot.lane.b32.xlu0 %v16633_v63, %s14392_s7  ;;  %v11703_v63 = vpop.permute.xlu1 %11702 }
0x1376   :  { %9113 = vrot.lane.b32.xlu1 %v17403_v9, %s14392_s7 }
0x1379   :  { %4876 = vrot.lane.b32.xlu0 %v17404_v20, %s14374_s23  ;;  %v11863_v50 = vpop.permute.xlu1 %11862 }
0x137a   :  { %4866 = vrot.lane.b32.xlu1 %v17405_v45, %s14374_s23 }
0x137d   :  { %10540 = vrot.lane.b32.xlu0 %v16922_v29, %s14393_s24  ;;  %v17410_v29 = vld [vmem:[#allocation39_spill] sm:$0xff] }
0x137e   :  { %10530 = vrot.lane.b32.xlu1 %v16910_v61, %s14393_s24 }
0x1381   :  { %6293 = vrot.lane.b32.xlu0 %v17406_v18, %s14390_s20 }
0x1382   :  { %6283 = vrot.lane.b32.xlu1 %v17407_v33, %s14390_s20 }
0x1385   :  { %9125 = vrot.lane.b32.xlu0 %v17408_v3, %s14392_s7 }
0x1386   :  { %7700 = vrot.lane.b32.xlu1 %v17409_v42, %s14391_s21 }
0x1389   :  { %10542 = vrot.lane.b32.xlu0 %v16920_v21, %s14393_s24  ;;  %v17413_v21 = vld [vmem:[#allocation51_spill] sm:$0xff] }
0x138a   :  { %3453 = vrot.lane.b32.xlu1 %v17410_v29, %s14389_s19 }
0x138c   :  { %v11272_v61 = vpop.xlane.xlu1 %11271 }
0x138d   :  { %14189 = vrcp.f32 %v11272_v61 }
0x138e   :  { %9117 = vrot.lane.b32.xlu1 %v17411_v54, %s14392_s7 }
0x1392   :  { %4870 = vrot.lane.b32.xlu1 %v17412_v19, %s14374_s23 }
0x1394   :  { %v11278_v30 = vpop.xlane.xlu1 %11277 }
0x1395   :  { %14191 = vrcp.f32 %v11278_v30 }
0x1396   :  { %10534 = vrot.lane.b32.xlu1 %v16912_v25, %s14393_s24 }
0x1398   :  { %v11281_v24 = vpop.xlane.xlu0 %11280 }
0x1399   :  { %14193 = vrcp.f32 %v11281_v24 }
0x139a   :  { %v14190_v23 = vpop.eup %14189  ;;  %6287 = vrot.lane.b32.xlu1 %v17413_v21, %s14390_s20 }
0x139b   :  { %v11300_v52 = vmul.f32 %v14190_v23, %v16981_v40 }
0x139c   :  { %v11287_v10 = vpop.xlane.xlu0 %11286 }
0x139d   :  { %14195 = vrcp.f32 %v11287_v10  ;;  %v11284_v28 = vpop.xlane.xlu1 %11283  ;;  %13848 = vmatmul.mubr.msk.f32.vlgmr.msra.gmra.mxu1 %vm1364_vm3, %v11300_v52 }
0x139e   :  { %14197 = vrcp.f32 %v11284_v28  ;;  %7704 = vrot.lane.b32.xlu1 %v17414_v38, %s14391_s21  ;;  %13858 = vmatpush3.msra.mxu1 %v11547_v48 }
0x139f   :  { %13859 = vmatprep.subr.mxu1 %v17296_v60  ;;  %13861 = vmatprep.mubr.msk.f32.mxu1 %vm14381_vm1, %v17296_v60 }
0x13a0   :  { %13860 = vmatpush3.msra.mxu1 %v11545_v15  ;;  %v11782_v25 = vpop.permute.xlu0 %11781 }
0x13a1   :  { %13871 = vmatprep.subr.mxu1 %v17296_v60 }
0x13a2   :  { %v14192_v40 = vpop.eup %14191  ;;  %3457 = vrot.lane.b32.xlu1 %v17415_v0, %s14389_s19 }
0x13a3   :  { %v11302_v51 = vmul.f32 %v14192_v40, %v16987_v5 }
0x13a4   :  { %v3446_v13 = vpop.permute.xlu0 %3445 }
0x13a5   :  { %3470 = vst.msk [vmem:[#allocation2] sm:$0xff] %vm3469_vm4, %v3446_v13  ;;  %13862 = vmatmul.mubr.msk.f32.vlgmr.msra.gmra.mxu1 %vm1364_vm3, %v11302_v51 }
0x13a6   :  { %v14194_v41 = vpop.eup %14193  ;;  %9121 = vrot.lane.b32.xlu1 %v17416_v36, %s14392_s7  ;;  %13872 = vmatpush3.msra.mxu1 %v11705_v44 }
0x13a7   :  { %v11303_v11 = vmul.f32 %v14194_v41, %v16992_v43  ;;  %13873 = vmatprep.subr.mxu1 %v17296_v60  ;;  %13875 = vmatprep.mubr.msk.f32.mxu1 %vm14381_vm1, %v17296_v60 }
0x13a8   :  { %13874 = vmatpush3.msra.mxu1 %v11703_v63  ;;  %v4863_v5 = vpop.permute.xlu0 %4862 }
0x13a9   :  { %4887 = vst.msk [vmem:[#allocation2] sm:$0xff] %vm4886_vm5, %v4863_v5  ;;  %13869 = vmatmul.mubr.msk.f32.vlgmr.msra.gmra.mxu0 %vm1364_vm3, %v11303_v11  ;;  %13885 = vmatprep.subr.mxu1 %v17296_v60  ;;  %v11991_v5 = vld [vmem:[#allocation14 + $0x18] sm:$0xff] }
0x13aa   :  { %v14196_v62 = vpop.eup %14195  ;;  %13879 = vmatpush3.msra.mxu0 %v17020_v56  ;;  %4874 = vrot.lane.b32.xlu1 %v17417_v49, %s14374_s23  ;;  %v11989_v49 = vld [vmem:[#allocation14 + $0x8] sm:$0xff] }
0x13ab   :  { %v14198_v43 = vpop.eup %14197  ;;  %v11305_v47 = vmul.f32 %v14196_v62, %v16997_v16  ;;  %13880 = vmatprep.subr.mxu0 %v17296_v60  ;;  %13882 = vmatprep.mubr.msk.f32.mxu0 %vm14381_vm1, %v17296_v60  ;;  %v11990_v62 = vld [vmem:[#allocation14 + $0x10] sm:$0xff] }
0x13ac   :  { %v11304_v53 = vmul.f32 %v14198_v43, %v16999_v31  ;;  %13881 = vmatpush3.msra.mxu0 %v11782_v25  ;;  %v6280_v2 = vpop.permute.xlu0 %6279  ;;  %v17418_v31 = vld [vmem:[#allocation52_spill] sm:$0xff]  ;;  %v11988_v43 = vld [vmem:[#allocation14] sm:$0xff] }
0x13ad   :  { %6304 = vst.msk [vmem:[#allocation2] sm:$0xff] %vm6303_vm6, %v6280_v2  ;;  %13883 = vmatmul.mubr.msk.f32.vlgmr.msra.gmra.mxu0 %vm1364_vm3, %v11305_v47  ;;  %13892 = vmatprep.subr.mxu0 %v11991_v5 }
0x13ae   :  { %10538 = vrot.lane.b32.xlu1 %v16918_v7, %s14393_s24  ;;  %13876 = vmatmul.mubr.msk.f32.vlgmr.msra.gmra.mxu1 %vm1364_vm3, %v11304_v53 }
0x13af   :  { %13886 = vmatpush3.msra.mxu1 %v11863_v50  ;;  %13889 = vmatprep.mubr.msk.f32.mxu1 %vm14381_vm1, %v17296_v60 }
0x13b0   :  { %v7697_v16 = vpop.permute.xlu0 %7696  ;;  %13887 = vmatprep.subr.mxu1 %v17296_v60  ;;  %13893 = vmatpush3.msra.mxu0 %v11991_v5 }
0x13b1   :  { %7721 = vst.msk [vmem:[#allocation2] sm:$0xff] %vm7720_vm7, %v7697_v16  ;;  %13894 = vmatprep.subr.mxu0 %v11990_v62 }
0x13b2   :  { %6291 = vrot.lane.b32.xlu1 %v17418_v31, %s14390_s20  ;;  %13895 = vmatpush3.msra.mxu0 %v11990_v62 }
0x13b3   :  { %13896 = vmatprep.subr.mxu0 %v11989_v49 }
0x13b4   :  { %v7699_v56 = vpop.permute.xlu0 %7698  ;;  %13897 = vmatpush3.msra.mxu0 %v11989_v49 }
0x13b5   :  { %13898 = vmatprep.subr.mxu0 %v11988_v43 }
0x13b6   :  { %7708 = vrot.lane.b32.xlu1 %v17419_v35, %s14391_s21  ;;  %13899 = vmatpush3.msra.mxu0 %v11988_v43 }
0x13b8   :  { %v3452_v7 = vpop.permute.xlu0 %3451 }
0x13b9   :  { %3473 = vst.msk [vmem:[#allocation2 + $0x18] sm:$0xff] %vm3469_vm4, %v3452_v7 }
0x13ba   :  { %7710 = vrot.lane.b32.xlu1 %v17420_v8, %s14391_s21 }
0x13bc   :  { %v9116_v26 = vpop.permute.xlu0 %9115 }
0x13be   :  { %9127 = vrot.lane.b32.xlu1 %v17421_v34, %s14392_s7 }
0x13c0   :  { %v4869_v60 = vpop.permute.xlu0 %4868 }
0x13c1   :  { %4890 = vst.msk [vmem:[#allocation2 + $0x18] sm:$0xff] %vm4886_vm5, %v4869_v60 }
0x13c4   :  { %v10533_v27 = vpop.permute.xlu0 %10532 }
0x13c8   :  { %v6286_v58 = vpop.permute.xlu0 %6285 }
0x13c9   :  { %6307 = vst.msk [vmem:[#allocation2 + $0x18] sm:$0xff] %vm6303_vm6, %v6286_v58 }
0x13cc   :  { %v7703_v4 = vpop.permute.xlu0 %7702 }
0x13cd   :  { %7724 = vst.msk [vmem:[#allocation2 + $0x18] sm:$0xff] %vm7720_vm7, %v7703_v4 }
0x13d0   :  { %v3456_v59 = vpop.permute.xlu0 %3455 }
0x13d1   :  { %3475 = vst.msk [vmem:[#allocation2 + $0x28] sm:$0xff] %vm3469_vm4, %v3456_v59 }
0x13d4   :  { %v9120_v37 = vpop.permute.xlu0 %9119 }
0x13d5   :  { %9141 = vst.msk [vmem:[#allocation2 + $0x18] sm:$0xff] %vm9137_vm8, %v9120_v37 }
0x13d8   :  { %v4873_v1 = vpop.permute.xlu0 %4872 }
0x13d9   :  { %4892 = vst.msk [vmem:[#allocation2 + $0x28] sm:$0xff] %vm4886_vm5, %v4873_v1  ;;  %v11290_v55 = vpop.xlane.xlu1 %11289 }
0x13da   :  { %14199 = vrcp.f32 %v11290_v55 }
0x13dc   :  { %v10537_v32 = vpop.permute.xlu0 %10536 }
0x13dd   :  { %10558 = vst.msk [vmem:[#allocation2 + $0x18] sm:$0xff] %vm10554_vm9, %v10537_v32  ;;  %v11861_v57 = vpop.permute.xlu1 %11860 }
0x13de   :  { %13888 = vmatpush3.msra.mxu1 %v11861_v57 }
0x13e0   :  { %v6290_v14 = vpop.permute.xlu0 %6289 }
0x13e1   :  { %6309 = vst.msk [vmem:[#allocation2 + $0x28] sm:$0xff] %vm6303_vm6, %v6290_v14  ;;  %v3448_v12 = vpop.permute.xlu1 %3447 }
0x13e2   :  { %3471 = vst.msk [vmem:[#allocation2 + $0x8] sm:$0xff] %vm3469_vm4, %v3448_v12 }
0x13e4   :  { %v7707_v39 = vpop.permute.xlu0 %7706 }
0x13e5   :  { %7726 = vst.msk [vmem:[#allocation2 + $0x28] sm:$0xff] %vm7720_vm7, %v7707_v39  ;;  %v4865_v48 = vpop.permute.xlu1 %4864 }
0x13e6   :  { %4888 = vst.msk [vmem:[#allocation2 + $0x8] sm:$0xff] %vm4886_vm5, %v4865_v48 }
0x13e7   :  { %v14200_v17 = vpop.eup %14199 }
0x13e8   :  { %v11306_v46 = vmul.f32 %v14200_v17, %v17028_v22  ;;  %v3460_v15 = vpop.permute.xlu0 %3459 }
0x13e9   :  { %3477 = vst.msk [vmem:[#allocation2 + $0x38] sm:$0xff] %vm3469_vm4, %v3460_v15  ;;  %v6282_v9 = vpop.permute.xlu1 %6281 }
0x13ea   :  { %6305 = vst.msk [vmem:[#allocation2 + $0x8] sm:$0xff] %vm6303_vm6, %v6282_v9  ;;  %13890 = vmatmul.mubr.msk.f32.vlgmr.msra.gmra.mxu1 %vm1364_vm3, %v11306_v46  ;;  %v12455_v9 = vld [vmem:[%s17250_s10] ss:$0 sm:$0xff]  ;;  %s14395_s10 = smov [#allocation15]  }
0x13eb   :  { %7722 = vst.msk [vmem:[#allocation2 + $0x8] sm:$0xff] %vm7720_vm7, %v7699_v56  ;;  %s12141_s27 = sshll.u32 %s14395_s10, 4  ;;  %s12142_s27 = int_to_ptr.vmem [resolvable:$true] %s12141_s27 }
0x13ec   :  { %9139 = vst.msk [vmem:[#allocation2 + $0x8] sm:$0xff] %vm9137_vm8, %v9116_v26  ;;  %v9124_v20 = vpop.permute.xlu0 %9123  ;;  %s14341_s28 = scalar_lea.vmem %s12142_s27, 1024  ;;  %p14346_p8 = scmp.lt.s32.totalorder %s12142_s27, %s12142_s27 }
0x13ed   :  { %10556 = vst.msk [vmem:[#allocation2 + $0x8] sm:$0xff] %vm10554_vm9, %v10533_v27  ;;  %v3450_v45 = vpop.permute.xlu1 %3449  ;;  %p14342_p7 = scmp.ne.s32.totalorder %s12142_s27, %s14341_s28  ;;  %p14347_p9 = scmp.lt.s32.totalorder %s14341_s28, %s14341_s28 }
0x13ee   :  { %9143 = vst.msk [vmem:[#allocation2 + $0x28] sm:$0xff] %vm9137_vm8, %v9124_v20 }
0x13ef   :  { %3472 = vst.msk [vmem:[#allocation2 + $0x10] sm:$0xff] %vm3469_vm4, %v3450_v45  ;;  %p14348_p10 = por %p14347_p9, %p14346_p8 }
0x13f0   :  { %v4877_v22 = vpop.permute.xlu0 %4876 }
0x13f1   :  { %4894 = vst.msk [vmem:[#allocation2 + $0x38] sm:$0xff] %vm4886_vm5, %v4877_v22  ;;  %v9114_v44 = vpop.permute.xlu1 %9113  ;;  %p14349_p11 = pnand %p14348_p10, %p14342_p7 }
0x13f2   :  { %9138 = vst.msk [vmem:[#allocation2] sm:$0xff] %vm9137_vm8, %v9114_v44 }
0x13f4   :  { %v10541_v18 = vpop.permute.xlu0 %10540 }
0x13f5   :  { %10560 = vst.msk [vmem:[#allocation2 + $0x28] sm:$0xff] %vm10554_vm9, %v10541_v18  ;;  %v4867_v63 = vpop.permute.xlu1 %4866 }
0x13f6   :  { %4889 = vst.msk [vmem:[#allocation2 + $0x10] sm:$0xff] %vm4886_vm5, %v4867_v63 }
0x13f8   :  { %v6294_v33 = vpop.permute.xlu0 %6293 }
0x13f9   :  { %6311 = vst.msk [vmem:[#allocation2 + $0x38] sm:$0xff] %vm6303_vm6, %v6294_v33  ;;  %v10531_v3 = vpop.permute.xlu1 %10530 }
0x13fa   :  { %10555 = vst.msk [vmem:[#allocation2] sm:$0xff] %vm10554_vm9, %v10531_v3 }
0x13fc   :  { %v9126_v0 = vpop.permute.xlu0 %9125 }
0x13fd   :  { %v6284_v42 = vpop.permute.xlu1 %6283 }
0x13fe   :  { %6306 = vst.msk [vmem:[#allocation2 + $0x10] sm:$0xff] %vm6303_vm6, %v6284_v42 }
0x1400   :  { %v10543_v41 = vpop.permute.xlu0 %10542 }
0x1401   :  { %v7701_v50 = vpop.permute.xlu1 %7700 }
0x1402   :  { %7723 = vst.msk [vmem:[#allocation2 + $0x10] sm:$0xff] %vm7720_vm7, %v7701_v50 }
0x1405   :  { %v3454_v29 = vpop.permute.xlu1 %3453 }
0x1406   :  { %3474 = vst.msk [vmem:[#allocation2 + $0x20] sm:$0xff] %vm3469_vm4, %v3454_v29 }
0x1409   :  { %v9118_v61 = vpop.permute.xlu1 %9117 }
0x140a   :  { %9140 = vst.msk [vmem:[#allocation2 + $0x10] sm:$0xff] %vm9137_vm8, %v9118_v61 }
0x140d   :  { %v4871_v54 = vpop.permute.xlu1 %4870 }
0x140e   :  { %4891 = vst.msk [vmem:[#allocation2 + $0x20] sm:$0xff] %vm4886_vm5, %v4871_v54 }
0x1411   :  { %v10535_v19 = vpop.permute.xlu1 %10534 }
0x1412   :  { %10557 = vst.msk [vmem:[#allocation2 + $0x10] sm:$0xff] %vm10554_vm9, %v10535_v19 }
0x1415   :  { %v6288_v30 = vpop.permute.xlu1 %6287 }
0x1416   :  { %6308 = vst.msk [vmem:[#allocation2 + $0x20] sm:$0xff] %vm6303_vm6, %v6288_v30 }
0x1419   :  { %v11382_v24 = vpop.f32.mrf.mxu0  ;;  %v7705_v23 = vpop.permute.xlu1 %7704 }
0x141a   :  { %7725 = vst.msk [vmem:[#allocation2 + $0x20] sm:$0xff] %vm7720_vm7, %v7705_v23  ;;  %11947 = vrot.lane.b32.xlu1 %v11382_v24, %s14394_s25 }
0x141b   :  { %v13842_v21 = vpop.f32.mrf.mxu0 }
0x141d   :  { %v3458_v52 = vpop.permute.xlu1 %3457 }
0x141e   :  { %v11540_v10 = vpop.f32.mrf.mxu0  ;;  %3476 = vst.msk [vmem:[#allocation2 + $0x30] sm:$0xff] %vm3469_vm4, %v3458_v52 }
0x141f   :  { %11951 = vrot.lane.b32.xlu1 %v11540_v10, %s14394_s25 }
0x1420   :  { %v13856_v28 = vpop.f32.mrf.mxu0 }
0x1421   :  { %v9122_v38 = vpop.permute.xlu1 %9121 }
0x1422   :  { %9142 = vst.msk [vmem:[#allocation2 + $0x20] sm:$0xff] %vm9137_vm8, %v9122_v38 }
0x1425   :  { %v4875_v25 = vpop.permute.xlu1 %4874 }
0x1426   :  { %4893 = vst.msk [vmem:[#allocation2 + $0x30] sm:$0xff] %vm4886_vm5, %v4875_v25 }
0x1429   :  { %v10539_v40 = vpop.permute.xlu1 %10538 }
0x142a   :  { %10559 = vst.msk [vmem:[#allocation2 + $0x20] sm:$0xff] %vm10554_vm9, %v10539_v40 }
0x142d   :  { %v6292_v51 = vpop.permute.xlu1 %6291 }
0x142e   :  { %6310 = vst.msk [vmem:[#allocation2 + $0x30] sm:$0xff] %vm6303_vm6, %v6292_v51 }
0x1431   :  { %v7709_v13 = vpop.permute.xlu1 %7708 }
0x1432   :  { %7727 = vst.msk [vmem:[#allocation2 + $0x30] sm:$0xff] %vm7720_vm7, %v7709_v13 }
0x1433   :  { %9144 = vst.msk [vmem:[#allocation2 + $0x30] sm:$0xff] %vm9137_vm8, %v9126_v0 }
0x1434   :  { %10561 = vst.msk [vmem:[#allocation2 + $0x30] sm:$0xff] %vm10554_vm9, %v10543_v41 }
0x1435   :  { %v7711_v36 = vpop.permute.xlu1 %7710 }
0x1436   :  { %7728 = vst.msk [vmem:[#allocation2 + $0x38] sm:$0xff] %vm7720_vm7, %v7711_v36 }
0x1439   :  { %v9128_v11 = vpop.permute.xlu1 %9127 }
0x143a   :  { %9145 = vst.msk [vmem:[#allocation2 + $0x38] sm:$0xff] %vm9137_vm8, %v9128_v11 }
0x145d   :  { %v11461_v47 = vpop.f32.mrf.mxu1 }
0x145e   :  { %11949 = vrot.lane.b32.xlu0 %v11461_v47, %s14394_s25 }
0x145f   :  { %v13849_v53 = vpop.f32.mrf.mxu1 }
0x1465   :  { %v11619_v2 = vpop.f32.mrf.mxu1 }
0x1466   :  { %11953 = vrot.lane.b32.xlu0 %v11619_v2, %s14394_s25 }
0x1467   :  { %v13863_v16 = vpop.f32.mrf.mxu1 }
0x1469   :  { %v11698_v31 = vpop.f32.mrf.mxu0 }
0x146a   :  { %11955 = vrot.lane.b32.xlu1 %v11698_v31, %s14394_s25 }
0x146b   :  { %v13870_v56 = vpop.f32.mrf.mxu0 }
0x146d   :  { %v11856_v35 = vpop.f32.mrf.mxu0 }
0x146e   :  { %v11777_v7 = vpop.f32.mrf.mxu1  ;;  %10544 = vrot.lane.b32.xlu1 %v16928_v6, %s14393_s24 }
0x146f   :  { %11957 = vrot.lane.b32.xlu0 %v11777_v7, %s14394_s25  ;;  %v13884_v8 = vpop.f32.mrf.mxu0 }
0x1470   :  { %v13877_v26 = vpop.f32.mrf.mxu1 }
0x1473   :  { %11959 = vrot.lane.b32.xlu0 %v11856_v35, %s14394_s25 }
0x148c   :  { %v11948_v34 = vpop.permute.xlu1 %11947 }
0x148d   :  { %11972 = vst.msk [vmem:[#allocation2] sm:$0xff] %vm11971_vm10, %v11948_v34 }
0x1491   :  { %v11952_v60 = vpop.permute.xlu1 %11951 }
0x1492   :  { %11974 = vst.msk [vmem:[#allocation2 + $0x10] sm:$0xff] %vm11971_vm10, %v11952_v60 }
0x1494   :  { %v11980_v27 = vld [vmem:[#allocation2] sm:$0xff] }
0x1495   :  { %13900 = vmatprep.mubr.msk.f32.mxu0 %vm185_vm0, %v11980_v27 }
0x1499   :  { %v11982_v1 = vld [vmem:[#allocation2 + $0x10] sm:$0xff] }
0x14aa   :  { %v11935_v58 = vpop.f32.mrf.mxu1 }
0x14ab   :  { %11961 = vrot.lane.b32.xlu1 %v11935_v58, %s14394_s25 }
0x14ac   :  { %v13891_v6 = vpop.f32.mrf.mxu1 }
0x14d0   :  { %v11950_v4 = vpop.permute.xlu0 %11949 }
0x14d1   :  { %11973 = vst.msk [vmem:[#allocation2 + $0x8] sm:$0xff] %vm11971_vm10, %v11950_v4 }
0x14d8   :  { %v11954_v59 = vpop.permute.xlu0 %11953  ;;  %v11981_v37 = vld [vmem:[#allocation2 + $0x8] sm:$0xff] }
0x14d9   :  { %11975 = vst.msk [vmem:[#allocation2 + $0x18] sm:$0xff] %vm11971_vm10, %v11954_v59  ;;  %13901 = vmatmul.mubr.msk.f32.vlgmr.msra.gmra.mxu0 %vm185_vm0, %v11981_v37 }
0x14da   :  { %13903 = vmatprep.mubr.msk.f32.mxu0 %vm185_vm0, %v11982_v1 }
0x14dc   :  { %v11956_v55 = vpop.permute.xlu1 %11955 }
0x14dd   :  { %11976 = vst.msk [vmem:[#allocation2 + $0x20] sm:$0xff] %vm11971_vm10, %v11956_v55 }
0x14e0   :  { %v10545_v32 = vpop.permute.xlu1 %10544  ;;  %v11983_v57 = vld [vmem:[#allocation2 + $0x18] sm:$0xff] }
0x14e1   :  { %10562 = vst.msk [vmem:[#allocation2 + $0x38] sm:$0xff] %vm10554_vm9, %v10545_v32  ;;  %v11958_v14 = vpop.permute.xlu0 %11957  ;;  %13904 = vmatmul.mubr.msk.f32.gmra.mxu0 %vm185_vm0, %v11983_v57 }
0x14e2   :  { %11977 = vst.msk [vmem:[#allocation2 + $0x28] sm:$0xff] %vm11971_vm10, %v11958_v14 }
0x14e4   :  { %v11984_v12 = vld [vmem:[#allocation2 + $0x20] sm:$0xff] }
0x14e5   :  { %v11960_v39 = vpop.permute.xlu0 %11959  ;;  %13906 = vmatprep.mubr.msk.f32.mxu0 %vm185_vm0, %v11984_v12 }
0x14e6   :  { %11978 = vst.msk [vmem:[#allocation2 + $0x30] sm:$0xff] %vm11971_vm10, %v11960_v39 }
0x14e9   :  { %v11985_v48 = vld [vmem:[#allocation2 + $0x28] sm:$0xff] }
0x14ea   :  { %13907 = vmatmul.mubr.msk.f32.gmra.mxu0 %vm185_vm0, %v11985_v48 }
0x14ed   :  { %v11986_v17 = vld [vmem:[#allocation2 + $0x30] sm:$0xff] }
0x14ee   :  { %13909 = vmatprep.mubr.msk.f32.mxu0 %vm185_vm0, %v11986_v17 }
0x151d   :  { %v11962_v46 = vpop.permute.xlu1 %11961 }
0x151e   :  { %11979 = vst.msk [vmem:[#allocation2 + $0x38] sm:$0xff] %vm11971_vm10, %v11962_v46 }
0x1525   :  { %v11987_v15 = vld [vmem:[#allocation2 + $0x38] sm:$0xff] }
0x1526   :  { %13910 = vmatmul.mubr.msk.f32.gmra.mxu0 %vm185_vm0, %v11987_v15 }
0x1599   :  { %v13902_v20 = vpop.f32.mrf.mxu0 }
0x159a   :  { %v12095_v45 = vadd.f32 %v13902_v20, %v12455_v9 }
0x159b   :  { %v12089_v22 = vpop.f32.mrf.mxu0 }
0x159c   :  { %12129 = vst.msk [vmem:[#allocation15 + $0x8] sm:$0xff] %vm185_vm0, %v12095_v45  ;;  %v12090_v44 = vadd.f32 %v12455_v9, %v12089_v22 }
0x159e   :  { %12128 = vst.msk [vmem:[#allocation15] sm:$0xff] %vm185_vm0, %v12090_v44 }
0x15a1   :  { %v13905_v18 = vpop.f32.mrf.mxu0 }
0x15a2   :  { %v12105_v63 = vadd.f32 %v13905_v18, %v12455_v9 }
0x15a3   :  { %v12099_v33 = vpop.f32.mrf.mxu0 }
0x15a4   :  { %12131 = vst.msk [vmem:[#allocation15 + $0x18] sm:$0xff] %vm185_vm0, %v12105_v63  ;;  %v12100_v3 = vadd.f32 %v12455_v9, %v12099_v33 }
0x15a6   :  { %12130 = vst.msk [vmem:[#allocation15 + $0x10] sm:$0xff] %vm185_vm0, %v12100_v3 }
0x15aa   :  { %v13908_v42 = vpop.f32.mrf.mxu0 }
0x15ab   :  { %v12115_v50 = vadd.f32 %v13908_v42, %v12455_v9 }
0x15ac   :  { %v12109_v29 = vpop.f32.mrf.mxu0 }
0x15ad   :  { %12133 = vst.msk [vmem:[#allocation15 + $0x28] sm:$0xff] %vm185_vm0, %v12115_v50  ;;  %v12110_v61 = vadd.f32 %v12455_v9, %v12109_v29 }
0x15af   :  { %12132 = vst.msk [vmem:[#allocation15 + $0x20] sm:$0xff] %vm185_vm0, %v12110_v61 }
0x15e6   :  { %v13911_v54 = vpop.f32.mrf.mxu0 }
0x15e7   :  { %v12125_v19 = vadd.f32 %v13911_v54, %v12455_v9 }
0x15e8   :  { %v12119_v30 = vpop.f32.mrf.mxu0 }
0x15e9   :  { %12135 = vst.msk [vmem:[#allocation15 + $0x38] sm:$0xff] %vm185_vm0, %v12125_v19  ;;  %v12120_v24 = vadd.f32 %v12455_v9, %v12119_v30 }
0x15eb   :  { %12134 = vst.msk [vmem:[#allocation15 + $0x30] sm:$0xff] %vm185_vm0, %v12120_v24 }
0x15ec   :  { %14352 = shalt.err (!%p14349_p11)
}
0x15ed   :  { %12147 = dma.vmem_to_hbm [thread:$0]  %s12142_s27, 1024, %s17251_s11, [#allocation5], %s14373_s22, %s14373_s22, %s14374_s23  }
0x15ee   :  { %14369 = dma.done.wait [#allocation5], 1024  }
0x15ef   :  { %14370 = vsyncadd [#allocation5], 4294966272 }
0x15f0   :  { %12151 = vsyncpa [#allocation4], 1 }
0x15f1   :  { %12152 = vsyncpa [#allocation7], 1 }
0x15f2   :  { %12153 = vsyncpa [#allocation10], 1 }
0x15f3   :  { %12154 = vsyncpa [#allocation13], 1 }
0x15f4   :  { %12155 = vsyncpa [#allocation5], 1 }

// kernel: tpu_custom_call.1
= control target key start
LH: loop header
LB: loop body
LE: loop exit
PB: predicated region body
PF: predicated region fallthrough
CT: control target
= control target key end

     0   :  { %16 = vsyncpa [#allocation4], 0  ;;  %s17240_s0 = inlined_call_operand.hbm [shape: f32[8,8,32], index: 0, kind: input, shape index: {}]   ;;  %s17241_s1 = inlined_call_operand.hbm [shape: f32[8,16,32], index: 1, kind: input, shape index: {}]   ;;  %s17242_s2 = inlined_call_operand.hbm [shape: f32[8,16,32], index: 2, kind: input, shape index: {}]   ;;  %s17243_s3 = inlined_call_operand.hbm [shape: f32[32,32], index: 3, kind: input, shape index: {}]   ;;  %s17244_s4 = inlined_call_operand.vmem [shape: f32[1,32], index: 4, kind: input, shape index: {}]   ;;  %s17245_s5 = inlined_call_operand.hbm [shape: f32[32,32], index: 5, kind: input, shape index: {}]   ;;  %s17246_s6 = inlined_call_operand.vmem [shape: f32[1,32], index: 6, kind: input, shape index: {}]   ;;  %s17247_s7 = inlined_call_operand.hbm [shape: f32[32,32], index: 7, kind: input, shape index: {}]   ;;  %s17248_s8 = inlined_call_operand.vmem [shape: f32[1,32], index: 8, kind: input, shape index: {}]   ;;  %s17249_s9 = inlined_call_operand.hbm [shape: f32[32,32], index: 9, kind: input, shape index: {}]   ;;  %s17250_s10 = inlined_call_operand.vmem [shape: f32[1,32], index: 10, kind: input, shape index: {}]   ;;  %s17251_s11 = inlined_call_operand.hbm [shape: f32[8,8,32], index: 11, kind: output, shape index: {}]  }
   0x1   :  { %17 = vsyncpa [#allocation7], 0 }
   0x2   :  { %18 = vsyncpa [#allocation10], 0 }
   0x3   :  { %19 = vsyncpa [#allocation13], 0 }
   0x4   :  { %20 = vsyncpa [#allocation5], 0  ;;  %s14371_s17 = smov [#allocation6]   ;;  %s14372_s19 = smov [#allocation9]  }
   0x5   :  { %s38_s18 = sshll.u32 %s14371_s17, 4  ;;  %s62_s20 = sshll.u32 %s14372_s19, 4  ;;  %s39_s18 = int_to_ptr.vmem [resolvable:$true] %s38_s18  ;;  %s63_s20 = int_to_ptr.vmem [resolvable:$true] %s62_s20 }
   0x6   :  { %s14209_s21 = scalar_lea.vmem %s39_s18, 2048  ;;  %p14214_p1 = scmp.lt.s32.totalorder %s39_s18, %s39_s18 }
   0x7   :  { %p14210_p0 = scmp.ne.s32.totalorder %s39_s18, %s14209_s21  ;;  %p14215_p2 = scmp.lt.s32.totalorder %s14209_s21, %s14209_s21 }
   0x9   :  { %p14216_p3 = por %p14215_p2, %p14214_p1 }
   0xb   :  { %p14217_p4 = pnand %p14216_p3, %p14210_p0 }
   0xd   :  { %14220 = shalt.err (!%p14217_p4)
}
   0xe   :  { %s14373_s22 = smov 128   ;;  %s14374_s23 = smov 8  }
   0xf   :  { %44 = dma.hbm_to_vmem [thread:$0]  %s17241_s1, 2048, %s39_s18, [#allocation7], %s14373_s22, %s14373_s22, %s14374_s23  }
  0x10   :  { %s14229_s26 = scalar_lea.vmem %s63_s20, 512  ;;  %p14234_p6 = scmp.lt.s32.totalorder %s63_s20, %s63_s20 }
  0x11   :  { %p14230_p5 = scmp.ne.s32.totalorder %s63_s20, %s14229_s26  ;;  %p14235_p7 = scmp.lt.s32.totalorder %s14229_s26, %s14229_s26 }
  0x13   :  { %p14236_p8 = por %p14235_p7, %p14234_p6 }
  0x15   :  { %p14237_p9 = pnand %p14236_p8, %p14230_p5 }
  0x17   :  { %14240 = shalt.err (!%p14237_p9)
}
  0x18   :  { %68 = dma.hbm_to_vmem [thread:$0]  %s17243_s3, 512, %s63_s20, [#allocation10], %s14373_s22, %s14373_s22, %s14374_s23  }
  0x19   :  { %s14375_s29 = smov [#allocation12]   ;;  %s14376_s12 = smov [#allocation3]  }
  0x1a   :  { %s90_s30 = sshll.u32 %s14375_s29, 4  ;;  %s26_s13 = sshll.u32 %s14376_s12, 4  ;;  %s91_s30 = int_to_ptr.vmem [resolvable:$true] %s90_s30  ;;  %s27_s13 = int_to_ptr.vmem [resolvable:$true] %s26_s13 }
  0x1b   :  { %s14249_s1 = scalar_lea.vmem %s91_s30, 512  ;;  %p14254_p11 = scmp.lt.s32.totalorder %s91_s30, %s91_s30 }
  0x1c   :  { %p14250_p10 = scmp.ne.s32.totalorder %s91_s30, %s14249_s1  ;;  %p14255_p12 = scmp.lt.s32.totalorder %s14249_s1, %s14249_s1 }
  0x1e   :  { %p14256_p13 = por %p14255_p12, %p14254_p11 }
  0x20   :  { %p14257_p0 = pnand %p14256_p13, %p14250_p10 }
  0x22   :  { %14260 = shalt.err (!%p14257_p0)
}
  0x23   :  { %96 = dma.hbm_to_vmem [thread:$0]  %s17247_s7, 512, %s91_s30, [#allocation13], %s14373_s22, %s14373_s22, %s14374_s23  }
  0x24   :  { %s14269_s3 = scalar_lea.vmem %s27_s13, 1024  ;;  %p14274_p2 = scmp.lt.s32.totalorder %s27_s13, %s27_s13 }
  0x25   :  { %p14270_p1 = scmp.ne.s32.totalorder %s27_s13, %s14269_s3  ;;  %p14275_p3 = scmp.lt.s32.totalorder %s14269_s3, %s14269_s3 }
  0x27   :  { %p14276_p4 = por %p14275_p3, %p14274_p2 }
  0x29   :  { %p14277_p5 = pnand %p14276_p4, %p14270_p1 }
  0x2b   :  { %14280 = shalt.err (!%p14277_p5)
}
  0x2c   :  { %32 = dma.hbm_to_vmem [thread:$0]  %s17240_s0, 1024, %s27_s13, [#allocation4], %s14373_s22, %s14373_s22, %s14374_s23  }
  0x2d   :  { %s14377_s18 = smov [#allocation8]   ;;  %s14378_s20 = smov [#allocation11]  }
  0x2e   :  { %s50_s19 = sshll.u32 %s14377_s18, 4  ;;  %s76_s21 = sshll.u32 %s14378_s20, 4  ;;  %s51_s19 = int_to_ptr.vmem [resolvable:$true] %s50_s19  ;;  %s77_s21 = int_to_ptr.vmem [resolvable:$true] %s76_s21 }
  0x2f   :  { %s14289_s7 = scalar_lea.vmem %s51_s19, 2048  ;;  %p14294_p7 = scmp.lt.s32.totalorder %s51_s19, %s51_s19 }
  0x30   :  { %p14290_p6 = scmp.ne.s32.totalorder %s51_s19, %s14289_s7  ;;  %p14295_p8 = scmp.lt.s32.totalorder %s14289_s7, %s14289_s7 }
  0x32   :  { %p14296_p9 = por %p14295_p8, %p14294_p7 }
  0x34   :  { %p14297_p10 = pnand %p14296_p9, %p14290_p6 }
  0x36   :  { %14300 = shalt.err (!%p14297_p10)
}
  0x37   :  { %56 = dma.hbm_to_vmem [thread:$0]  %s17242_s2, 2048, %s51_s19, [#allocation7], %s14373_s22, %s14373_s22, %s14374_s23  }
  0x38   :  { %s14309_s0 = scalar_lea.vmem %s77_s21, 512  ;;  %p14314_p12 = scmp.lt.s32.totalorder %s77_s21, %s77_s21 }
  0x39   :  { %p14310_p11 = scmp.ne.s32.totalorder %s77_s21, %s14309_s0  ;;  %p14315_p13 = scmp.lt.s32.totalorder %s14309_s0, %s14309_s0 }
  0x3b   :  { %p14316_p0 = por %p14315_p13, %p14314_p12 }
  0x3d   :  { %p14317_p1 = pnand %p14316_p0, %p14310_p11 }
  0x3f   :  { %14320 = shalt.err (!%p14317_p1)
}
  0x40   :  { %82 = dma.hbm_to_vmem [thread:$0]  %s17245_s5, 512, %s77_s21, [#allocation10], %s14373_s22, %s14373_s22, %s14374_s23  }
  0x41   :  { %s14379_s28 = smov [#allocation14]  }
  0x42   :  { %s104_s29 = sshll.u32 %s14379_s28, 4  ;;  %s105_s29 = int_to_ptr.vmem [resolvable:$true] %s104_s29 }
  0x43   :  { %s14329_s30 = scalar_lea.vmem %s105_s29, 512  ;;  %p14334_p3 = scmp.lt.s32.totalorder %s105_s29, %s105_s29 }
  0x44   :  { %p14330_p2 = scmp.ne.s32.totalorder %s105_s29, %s14329_s30  ;;  %p14335_p4 = scmp.lt.s32.totalorder %s14329_s30, %s14329_s30 }
  0x46   :  { %p14336_p5 = por %p14335_p4, %p14334_p3 }
  0x48   :  { %p14337_p6 = pnand %p14336_p5, %p14330_p2 }
  0x4a   :  { %14340 = shalt.err (!%p14337_p6)
}
  0x4b   :  { %110 = dma.hbm_to_vmem [thread:$0]  %s17249_s9, 512, %s105_s29, [#allocation13], %s14373_s22, %s14373_s22, %s14374_s23  }
  0x4c   :  { %14361 = dma.done.wait [#allocation4], 1024  }
  0x4d   :  { %14362 = vsyncadd [#allocation4], 4294966272 }
  0x4e   :  { %14363 = dma.done.wait [#allocation7], 4096  }
  0x4f   :  { %14364 = vsyncadd [#allocation7], 4294963200 }
  0x50   :  { %14365 = dma.done.wait [#allocation10], 1024  }
  0x51   :  { %14366 = vsyncadd [#allocation10], 4294966272 }
  0x52   :  { %14367 = dma.done.wait [#allocation13], 1024  }
  0x53   :  { %14368 = vsyncadd [#allocation13], 4294966272  ;;  %vm185_vm0 = vcmask 261120   ;;  %v177_v0 = vld [vmem:[#allocation9 + $0x18] sm:$0xff]  ;;  %v176_v1 = vld [vmem:[#allocation9 + $0x10] sm:$0xff]  ;;  %v17252_v46 = vmov 0.0  }
  0x54   :  { %13912 = vmatprep.subr.mxu1 %v177_v0  ;;  %v138_v2 = vld [vmem:[#allocation3 + $0x20] sm:$0xff]  ;;  %12912 = vmatprep.subr.mxu0 %v177_v0  ;;  %v175_v3 = vld [vmem:[#allocation9 + $0x8] sm:$0xff]  ;;  %v326_v6 = vld [vmem:[#allocation11 + $0x18] sm:$0xff]  ;;  %vm14381_vm1 = vmmov 0   ;;  %vm731_vm2 = vcmask 31744   ;;  %vm1364_vm3 = vcmask 130048  }
  0x55   :  { %13916 = vmatpush3.msra.mxu1 %v177_v0  ;;  %12926 = vmatprep.mubr.msk.f32.mxu1 %vm185_vm0, %v138_v2  ;;  %v174_v4 = vld [vmem:[#allocation9] sm:$0xff]  ;;  %v139_v5 = vld [vmem:[#allocation3 + $0x28] sm:$0xff]  ;;  %v140_v7 = vld [vmem:[#allocation3 + $0x30] sm:$0xff]  ;;  %s14383_s14 = smov 120   ;;  %s14384_s15 = smov 116   ;;  %vm3469_vm4 = vcmask 64544  }
  0x56   :  { %13913 = vmatprep.subr.mxu1 %v176_v1  ;;  %12913 = vmatpush3.msra.mxu0 %v177_v0  ;;  %v325_v8 = vld [vmem:[#allocation11 + $0x10] sm:$0xff]  ;;  %v134_v9 = vld [vmem:[#allocation3] sm:$0xff]  ;;  %v141_v10 = vld [vmem:[#allocation3 + $0x38] sm:$0xff]  ;;  %s14385_s3 = smov 112   ;;  %s14386_s16 = smov 108   ;;  %vm4886_vm5 = vcmask 97344  }
  0x57   :  { %13917 = vmatpush3.msra.mxu1 %v176_v1  ;;  %12914 = vmatprep.subr.mxu0 %v176_v1  ;;  %v324_v11 = vld [vmem:[#allocation11 + $0x8] sm:$0xff]  ;;  %v142_v12 = vld [vmem:[#allocation6] sm:$0xff]  ;;  %v136_v15 = vld [vmem:[#allocation3 + $0x10] sm:$0xff]  ;;  %s14387_s17 = smov 104   ;;  %s14388_s18 = smov 100   ;;  %vm6303_vm6 = vcmask 130144  }
  0x58   :  { %13914 = vmatprep.subr.mxu1 %v175_v3  ;;  %12915 = vmatpush3.msra.mxu0 %v176_v1  ;;  %v323_v13 = vld [vmem:[#allocation11] sm:$0xff]  ;;  %v135_v14 = vld [vmem:[#allocation3 + $0x8] sm:$0xff]  ;;  %v530_v17 = vld [vmem:[#allocation12 + $0x18] sm:$0xff]  ;;  %s14389_s19 = smov 4   ;;  %s14390_s20 = smov 12   ;;  %vm7720_vm7 = vcmask 162944  }
  0x59   :  { %13918 = vmatpush3.msra.mxu1 %v175_v3  ;;  %12916 = vmatprep.subr.mxu0 %v175_v3  ;;  %v143_v16 = vld [vmem:[#allocation6 + $0x8] sm:$0xff]  ;;  %v144_v18 = vld [vmem:[#allocation6 + $0x10] sm:$0xff]  ;;  %v137_v19 = vld [vmem:[#allocation3 + $0x18] sm:$0xff]  ;;  %s14391_s21 = smov 16   ;;  %s14392_s7 = smov 20   ;;  %vm9137_vm8 = vcmask 195744  }
  0x5a   :  { %13915 = vmatprep.subr.mxu1 %v174_v4  ;;  %12917 = vmatpush3.msra.mxu0 %v175_v3  ;;  %v529_v20 = vld [vmem:[#allocation12 + $0x10] sm:$0xff]  ;;  %v158_v21 = vld [vmem:[#allocation8] sm:$0xff]  ;;  %v145_v22 = vld [vmem:[#allocation6 + $0x18] sm:$0xff]  ;;  %s14393_s24 = smov 24   ;;  %vm10554_vm9 = vcmask 228544   ;;  %s14394_s25 = smov 28  }
  0x5b   :  { %13919 = vmatpush3.msra.mxu1 %v174_v4  ;;  %12918 = vmatprep.subr.mxu0 %v174_v4  ;;  %v528_v23 = vld [vmem:[#allocation12 + $0x8] sm:$0xff]  ;;  %v146_v24 = vld [vmem:[#allocation6 + $0x20] sm:$0xff]  ;;  %v148_v28 = vld [vmem:[#allocation6 + $0x30] sm:$0xff]  ;;  %vm11971_vm10 = vcmask 261344  }
  0x5c   :  { %12927 = vmatmul.mubr.msk.f32.vlgmr.msra.gmra.mxu1 %vm185_vm0, %v139_v5  ;;  %12932 = vmatprep.subr.mxu1 %v326_v6  ;;  %v527_v25 = vld [vmem:[#allocation12] sm:$0xff]  ;;  %v147_v26 = vld [vmem:[#allocation6 + $0x28] sm:$0xff]  ;;  %v160_v29 = vld [vmem:[#allocation8 + $0x10] sm:$0xff] }
  0x5d   :  { %12933 = vmatpush3.msra.mxu1 %v326_v6  ;;  %12929 = vmatprep.mubr.msk.f32.mxu1 %vm185_vm0, %v140_v7  ;;  %v159_v27 = vld [vmem:[#allocation8 + $0x8] sm:$0xff]  ;;  %v149_v30 = vld [vmem:[#allocation6 + $0x38] sm:$0xff]  ;;  %v150_v32 = vld [vmem:[#allocation6 + $0x40] sm:$0xff] }
  0x5e   :  { %12934 = vmatprep.subr.mxu1 %v325_v8  ;;  %12919 = vmatpush3.msra.mxu0 %v174_v4  ;;  %v161_v31 = vld [vmem:[#allocation8 + $0x18] sm:$0xff]  ;;  %v151_v33 = vld [vmem:[#allocation6 + $0x48] sm:$0xff]  ;;  %v152_v34 = vld [vmem:[#allocation6 + $0x50] sm:$0xff] }
  0x5f   :  { %12935 = vmatpush3.msra.mxu1 %v325_v8  ;;  %12920 = vmatprep.mubr.msk.f32.mxu0 %vm185_vm0, %v134_v9  ;;  %v153_v35 = vld [vmem:[#allocation6 + $0x58] sm:$0xff]  ;;  %v154_v36 = vld [vmem:[#allocation6 + $0x60] sm:$0xff]  ;;  %v155_v37 = vld [vmem:[#allocation6 + $0x68] sm:$0xff] }
  0x60   :  { %12930 = vmatmul.mubr.msk.f32.gmra.mxu1 %vm185_vm0, %v141_v10  ;;  %12936 = vmatprep.subr.mxu1 %v324_v11  ;;  %v156_v38 = vld [vmem:[#allocation6 + $0x70] sm:$0xff]  ;;  %v157_v39 = vld [vmem:[#allocation6 + $0x78] sm:$0xff]  ;;  %v162_v40 = vld [vmem:[#allocation8 + $0x20] sm:$0xff] }
  0x61   :  { %12937 = vmatpush3.msra.mxu1 %v324_v11  ;;  %12940 = vmatprep.mubr.msk.f32.mxu1 %vm185_vm0, %v142_v12  ;;  %v163_v41 = vld [vmem:[#allocation8 + $0x28] sm:$0xff]  ;;  %v164_v42 = vld [vmem:[#allocation8 + $0x30] sm:$0xff]  ;;  %v165_v43 = vld [vmem:[#allocation8 + $0x38] sm:$0xff] }
  0x62   :  { %12938 = vmatprep.subr.mxu1 %v323_v13  ;;  %12921 = vmatmul.mubr.msk.f32.vlgmr.msra.gmra.mxu0 %vm185_vm0, %v135_v14  ;;  %v166_v44 = vld [vmem:[#allocation8 + $0x40] sm:$0xff]  ;;  %v167_v45 = vld [vmem:[#allocation8 + $0x48] sm:$0xff]  ;;  %v168_v47 = vld [vmem:[#allocation8 + $0x50] sm:$0xff] }
  0x63   :  { %12939 = vmatpush3.msra.mxu1 %v323_v13  ;;  %12923 = vmatprep.mubr.msk.f32.mxu0 %vm185_vm0, %v136_v15  ;;  %v169_v48 = vld [vmem:[#allocation8 + $0x58] sm:$0xff]  ;;  %v170_v49 = vld [vmem:[#allocation8 + $0x60] sm:$0xff]  ;;  %v171_v50 = vld [vmem:[#allocation8 + $0x68] sm:$0xff] }
  0x64   :  { %12941 = vmatmul.mubr.msk.f32.vlgmr.msra.gmra.mxu1 %vm185_vm0, %v143_v16  ;;  %12964 = vmatprep.subr.mxu0 %v530_v17  ;;  %v172_v51 = vld [vmem:[#allocation8 + $0x70] sm:$0xff]  ;;  %v173_v52 = vld [vmem:[#allocation8 + $0x78] sm:$0xff]  ;;  %v14553_v57 = vld [vmem:[%s17246_s6] ss:$0 sm:$0xff] }
  0x65   :  { %12943 = vmatprep.mubr.msk.f32.mxu1 %vm185_vm0, %v144_v18  ;;  %12965 = vmatpush3.msra.mxu0 %v530_v17  ;;  %v14558_v61 = vld [vmem:[%s17244_s4] ss:$0 sm:$0xff] }
  0x66   :  { %12924 = vmatmul.mubr.msk.f32.gmra.mxu0 %vm185_vm0, %v137_v19  ;;  %12966 = vmatprep.subr.mxu0 %v529_v20 }
  0x67   :  { %12967 = vmatpush3.msra.mxu0 %v529_v20  ;;  %12972 = vmatprep.mubr.msk.f32.mxu0 %vm185_vm0, %v158_v21 }
  0x68   :  { %12944 = vmatmul.mubr.msk.f32.gmra.mxu1 %vm185_vm0, %v145_v22  ;;  %12968 = vmatprep.subr.mxu0 %v528_v23 }
  0x69   :  { %12946 = vmatprep.mubr.msk.f32.mxu1 %vm185_vm0, %v146_v24  ;;  %12969 = vmatpush3.msra.mxu0 %v528_v23 }
  0x6a   :  { %12970 = vmatprep.subr.mxu0 %v527_v25  ;;  %12996 = vmatprep.subr.mxu1 %v17252_v46 }
  0x6b   :  { %12971 = vmatpush3.msra.mxu0 %v527_v25 }
  0x6c   :  { %12947 = vmatmul.mubr.msk.f32.gmra.mxu1 %vm185_vm0, %v147_v26  ;;  %12973 = vmatmul.mubr.msk.f32.vlgmr.msra.gmra.mxu0 %vm185_vm0, %v159_v27 }
  0x6d   :  { %12949 = vmatprep.mubr.msk.f32.mxu1 %vm185_vm0, %v148_v28  ;;  %12975 = vmatprep.mubr.msk.f32.mxu0 %vm185_vm0, %v160_v29 }
  0x6e   :  { %13010 = vmatprep.subr.mxu0 %v17252_v46 }
  0x70   :  { %12950 = vmatmul.mubr.msk.f32.gmra.mxu1 %vm185_vm0, %v149_v30  ;;  %12976 = vmatmul.mubr.msk.f32.gmra.mxu0 %vm185_vm0, %v161_v31 }
  0x71   :  { %12952 = vmatprep.mubr.msk.f32.mxu1 %vm185_vm0, %v150_v32  ;;  %12978 = vmatprep.mubr.msk.f32.mxu0 %vm185_vm0, %v162_v40 }
  0x74   :  { %12953 = vmatmul.mubr.msk.f32.gmra.mxu1 %vm185_vm0, %v151_v33  ;;  %12979 = vmatmul.mubr.msk.f32.gmra.mxu0 %vm185_vm0, %v163_v41  ;;  %v14680_v41 = vld [vmem:[%s17248_s8] ss:$0 sm:$0xff]  ;;  %s14382_s8 = smov 124  }
  0x75   :  { %12955 = vmatprep.mubr.msk.f32.mxu1 %vm185_vm0, %v152_v34  ;;  %12981 = vmatprep.mubr.msk.f32.mxu0 %vm185_vm0, %v164_v42 }
  0x78   :  { %12956 = vmatmul.mubr.msk.f32.gmra.mxu1 %vm185_vm0, %v153_v35  ;;  %12982 = vmatmul.mubr.msk.f32.gmra.mxu0 %vm185_vm0, %v165_v43 }
  0x79   :  { %12958 = vmatprep.mubr.msk.f32.mxu1 %vm185_vm0, %v154_v36  ;;  %12984 = vmatprep.mubr.msk.f32.mxu0 %vm185_vm0, %v166_v44 }
  0x7c   :  { %12959 = vmatmul.mubr.msk.f32.gmra.mxu1 %vm185_vm0, %v155_v37  ;;  %12985 = vmatmul.mubr.msk.f32.gmra.mxu0 %vm185_vm0, %v167_v45 }
  0x7d   :  { %12961 = vmatprep.mubr.msk.f32.mxu1 %vm185_vm0, %v156_v38  ;;  %12987 = vmatprep.mubr.msk.f32.mxu0 %vm185_vm0, %v168_v47 }
  0x80   :  { %12962 = vmatmul.mubr.msk.f32.gmra.mxu1 %vm185_vm0, %v157_v39  ;;  %12988 = vmatmul.mubr.msk.f32.gmra.mxu0 %vm185_vm0, %v169_v48 }
  0x81   :  { %12990 = vmatprep.mubr.msk.f32.mxu0 %vm185_vm0, %v170_v49  ;;  %13000 = vmatprep.mubr.msk.f32.mxu1 %vm14381_vm1, %v17252_v46 }
  0x84   :  { %12991 = vmatmul.mubr.msk.f32.gmra.mxu0 %vm185_vm0, %v171_v50 }
  0x85   :  { %12993 = vmatprep.mubr.msk.f32.mxu0 %vm185_vm0, %v172_v51 }
  0x88   :  { %12994 = vmatmul.mubr.msk.f32.gmra.mxu0 %vm185_vm0, %v173_v52 }
  0x89   :  { %13014 = vmatprep.mubr.msk.f32.mxu0 %vm14381_vm1, %v17252_v46 }
 0x11c   :  { %v14544_v53 = vpop.f32.mrf.mxu1 }
 0x11d   :  { %v302_v36 = vadd.f32 %v14544_v53, %v14558_v61 }
 0x11e   :  { %v296_v54 = vpop.f32.mrf.mxu1 }
 0x11f   :  { %v297_v24 = vadd.f32 %v14558_v61, %v296_v54  ;;  %v14689_v43 = vmul.f32 0.5, %v302_v36 }
 0x120   :  { %v14546_v55 = vpop.f32.mrf.mxu1 }
 0x121   :  { %v14644_v30 = vmul.f32 0.5, %v297_v24  ;;  %17294 = vst [vmem:[#allocation33_spill] sm:$0xff] %v14689_v43  ;;  %v312_v51 = vadd.f32 %v14546_v55, %v14558_v61 }
 0x122   :  { %v14548_v56 = vpop.f32.mrf.mxu1  ;;  %v12922_v58 = vpop.f32.mrf.mxu0 }
 0x123   :  { %v282_v13 = vadd.f32 %v12922_v58, %v14558_v61  ;;  %17291 = vst [vmem:[#allocation30_spill] sm:$0xff] %v14644_v30  ;;  %v307_v37 = vadd.f32 %v14558_v61, %v14548_v56  ;;  %v14726_v54 = vmul.f32 0.5, %v312_v51 }
 0x124   :  { %v12942_v59 = vpop.f32.mrf.mxu1  ;;  %v276_v60 = vpop.f32.mrf.mxu0 }
 0x125   :  { %v14561_v62 = vadd.f32 %v12942_v59, %v14553_v57  ;;  %v277_v0 = vadd.f32 %v14558_v61, %v276_v60  ;;  %v14608_v19 = vmul.f32 0.5, %v282_v13  ;;  %v14691_v44 = vmul.f32 0.5, %v307_v37 }
 0x126   :  { %v448_v63 = vpop.f32.mrf.mxu1  ;;  %v12925_v1 = vpop.f32.mrf.mxu0 }
 0x127   :  { %12997 = vmatpush3.xpose.msk.msra.mxu1 %vm731_vm2, %v14561_v62  ;;  %v14568_v3 = vadd.f32 %v14553_v57, %v448_v63  ;;  %v14570_v4 = vmul.f32 0.5, %v277_v0  ;;  %17288 = vst [vmem:[#allocation27_spill] sm:$0xff] %v14608_v19  ;;  %v292_v25 = vadd.f32 %v12925_v1, %v14558_v61  ;;  %17295 = vst [vmem:[#allocation34_spill] sm:$0xff] %v14691_v44 }
 0x128   :  { %v12945_v2 = vpop.f32.mrf.mxu1  ;;  %12998 = vmatprep.subr.mxu1 %v17252_v46  ;;  %v286_v7 = vpop.f32.mrf.mxu0 }
 0x129   :  { %17282 = vst [vmem:[#allocation21_spill] sm:$0xff] %v14568_v3  ;;  %17283 = vst [vmem:[#allocation22_spill] sm:$0xff] %v14570_v4  ;;  %v14573_v6 = vadd.f32 %v12945_v2, %v14553_v57  ;;  %v287_v11 = vadd.f32 %v14558_v61, %v286_v7  ;;  %v14646_v31 = vmul.f32 0.5, %v292_v25 }
 0x12a   :  { %v458_v5 = vpop.f32.mrf.mxu1 }
 0x12b   :  { %12999 = vmatpush3.xpose.msk.msra.mxu1 %vm731_vm2, %v14568_v3  ;;  %v14595_v15 = vadd.f32 %v14553_v57, %v458_v5  ;;  %v14599_v16 = vmul.f32 0.5, %v287_v11  ;;  %17292 = vst [vmem:[#allocation31_spill] sm:$0xff] %v14646_v31 }
 0x12c   :  { %v12948_v8 = vpop.f32.mrf.mxu1  ;;  %13003 = vmatprep.subr.mxu1 %v17252_v46  ;;  %v12974_v39 = vpop.f32.mrf.mxu0 }
 0x12d   :  { %v14579_v9 = vadd.f32 %v12948_v8, %v14553_v57  ;;  %17286 = vst [vmem:[#allocation25_spill] sm:$0xff] %v14599_v16  ;;  %v14695_v47 = vadd.f32 %v12974_v39, %v14680_v41 }
 0x12e   :  { %v468_v10 = vpop.f32.mrf.mxu1  ;;  %13001 = vmatmul.mubr.msk.f32.vlgmr.msra.gmra.mxu1 %vm731_vm2, %v14570_v4  ;;  %v652_v48 = vpop.f32.mrf.mxu0 }
 0x12f   :  { %17284 = vst [vmem:[#allocation23_spill] sm:$0xff] %v14579_v9  ;;  %v14585_v12 = vadd.f32 %v14553_v57, %v468_v10  ;;  %13004 = vmatpush3.xpose.msk.msra.mxu1 %vm731_vm2, %v14573_v6  ;;  %13011 = vmatpush3.xpose.msk.msra.mxu0 %vm731_vm2, %v14579_v9  ;;  %v14703_v49 = vadd.f32 %v14680_v41, %v652_v48 }
 0x130   :  { %v12951_v14 = vpop.f32.mrf.mxu1  ;;  %13005 = vmatprep.subr.mxu1 %v17252_v46  ;;  %13012 = vmatprep.subr.mxu0 %v17252_v46  ;;  %v12977_v52 = vpop.f32.mrf.mxu0 }
 0x131   :  { %17285 = vst [vmem:[#allocation24_spill] sm:$0xff] %v14585_v12  ;;  %13007 = vmatprep.mubr.msk.f32.mxu1 %vm14381_vm1, %v17252_v46  ;;  %v14602_v18 = vadd.f32 %v12951_v14, %v14553_v57  ;;  %v14723_v53 = vadd.f32 %v12977_v52, %v14680_v41 }
 0x132   :  { %v478_v17 = vpop.f32.mrf.mxu1  ;;  %v662_v55 = vpop.f32.mrf.mxu0 }
 0x133   :  { %17287 = vst [vmem:[#allocation26_spill] sm:$0xff] %v14602_v18  ;;  %13006 = vmatpush3.xpose.msk.msra.mxu1 %vm731_vm2, %v14595_v15  ;;  %13013 = vmatpush3.xpose.msk.msra.mxu0 %vm731_vm2, %v14585_v12  ;;  %v14631_v27 = vadd.f32 %v14553_v57, %v478_v17  ;;  %v14730_v56 = vadd.f32 %v14680_v41, %v662_v55 }
 0x134   :  { %v12954_v20 = vpop.f32.mrf.mxu1  ;;  %13017 = vmatprep.subr.mxu1 %v17252_v46  ;;  %13024 = vmatprep.subr.mxu0 %v17252_v46 }
 0x135   :  { %v14613_v21 = vadd.f32 %v12954_v20, %v14553_v57  ;;  %17290 = vst [vmem:[#allocation29_spill] sm:$0xff] %v14631_v27 }
 0x136   :  { %v488_v22 = vpop.f32.mrf.mxu1  ;;  %13008 = vmatmul.mubr.msk.f32.vlgmr.msra.gmra.mxu1 %vm731_vm2, %v14608_v19  ;;  %13015 = vmatmul.mubr.msk.f32.vlgmr.msra.gmra.mxu0 %vm731_vm2, %v14599_v16 }
 0x137   :  { %v14620_v23 = vadd.f32 %v14553_v57, %v488_v22  ;;  %13018 = vmatpush3.xpose.msk.msra.mxu1 %vm731_vm2, %v14602_v18  ;;  %13025 = vmatpush3.xpose.msk.msra.mxu0 %vm731_vm2, %v14613_v21 }
 0x138   :  { %v12957_v26 = vpop.f32.mrf.mxu1  ;;  %13019 = vmatprep.subr.mxu1 %v17252_v46  ;;  %13026 = vmatprep.subr.mxu0 %v17252_v46 }
 0x139   :  { %17289 = vst [vmem:[#allocation28_spill] sm:$0xff] %v14620_v23  ;;  %13021 = vmatprep.mubr.msk.f32.mxu1 %vm14381_vm1, %v17252_v46  ;;  %13028 = vmatprep.mubr.msk.f32.mxu0 %vm14381_vm1, %v17252_v46  ;;  %v14638_v29 = vadd.f32 %v12957_v26, %v14553_v57 }
 0x13a   :  { %v498_v28 = vpop.f32.mrf.mxu1 }
 0x13b   :  { %13020 = vmatpush3.xpose.msk.msra.mxu1 %vm731_vm2, %v14631_v27  ;;  %13027 = vmatpush3.xpose.msk.msra.mxu0 %vm731_vm2, %v14620_v23  ;;  %v14671_v40 = vadd.f32 %v14553_v57, %v498_v28 }
 0x13c   :  { %v12960_v32 = vpop.f32.mrf.mxu1  ;;  %13031 = vmatprep.subr.mxu1 %v17252_v46  ;;  %13038 = vmatprep.subr.mxu0 %v17252_v46 }
 0x13d   :  { %v14651_v33 = vadd.f32 %v12960_v32, %v14553_v57 }
 0x13e   :  { %13022 = vmatmul.mubr.msk.f32.vlgmr.msra.gmra.mxu1 %vm731_vm2, %v14646_v31  ;;  %13029 = vmatmul.mubr.msk.f32.vlgmr.msra.gmra.mxu0 %vm731_vm2, %v14644_v30  ;;  %v508_v34 = vpop.f32.mrf.mxu1 }
 0x13f   :  { %13032 = vmatpush3.xpose.msk.msra.mxu1 %vm731_vm2, %v14638_v29  ;;  %13039 = vmatpush3.xpose.msk.msra.mxu0 %vm731_vm2, %v14651_v33  ;;  %v14662_v35 = vadd.f32 %v14553_v57, %v508_v34 }
 0x140   :  { %13033 = vmatprep.subr.mxu1 %v17252_v46  ;;  %13040 = vmatprep.subr.mxu0 %v17252_v46  ;;  %v12963_v38 = vpop.f32.mrf.mxu1 }
 0x141   :  { %17293 = vst [vmem:[#allocation32_spill] sm:$0xff] %v14662_v35  ;;  %13035 = vmatprep.mubr.msk.f32.mxu1 %vm14381_vm1, %v17252_v46  ;;  %13042 = vmatprep.mubr.msk.f32.mxu0 %vm14381_vm1, %v17252_v46  ;;  %v14687_v42 = vadd.f32 %v12963_v38, %v14553_v57 }
 0x142   :  { %v518_v45 = vpop.f32.mrf.mxu1 }
 0x143   :  { %13034 = vmatpush3.xpose.msk.msra.mxu1 %vm731_vm2, %v14671_v40  ;;  %13041 = vmatpush3.xpose.msk.msra.mxu0 %vm731_vm2, %v14662_v35  ;;  %v14708_v50 = vadd.f32 %v14553_v57, %v518_v45  ;;  %v14740_v57 = vpop.f32.mrf.mxu0 }
 0x144   :  { %13045 = vmatprep.subr.mxu1 %v17252_v46  ;;  %13052 = vmatprep.subr.mxu0 %v17252_v46 }
 0x145   :  { %v14742_v58 = vpop.f32.mrf.mxu0 }
 0x146   :  { %13036 = vmatmul.mubr.msk.f32.vlgmr.msra.gmra.mxu1 %vm731_vm2, %v14689_v43  ;;  %13043 = vmatmul.mubr.msk.f32.vlgmr.msra.gmra.mxu0 %vm731_vm2, %v14691_v44 }
 0x147   :  { %13046 = vmatpush3.xpose.msk.msra.mxu1 %vm731_vm2, %v14687_v42  ;;  %13049 = vmatprep.mubr.msk.f32.mxu1 %vm14381_vm1, %v17252_v46  ;;  %v14744_v59 = vpop.f32.mrf.mxu0 }
 0x148   :  { %13047 = vmatprep.subr.mxu1 %v17252_v46  ;;  %13053 = vmatpush3.msra.mxu0 %v14695_v47 }
 0x149   :  { %13054 = vmatprep.subr.mxu0 %v17252_v46  ;;  %13056 = vmatprep.mubr.msk.f32.mxu0 %vm14381_vm1, %v17252_v46  ;;  %v14746_v60 = vpop.f32.mrf.mxu0 }
 0x14a   :  { %13055 = vmatpush3.msra.mxu0 %v14703_v49 }
 0x14b   :  { %13048 = vmatpush3.xpose.msk.msra.mxu1 %vm731_vm2, %v14708_v50  ;;  %13066 = vmatprep.subr.mxu0 %v17252_v46  ;;  %v14748_v61 = vpop.f32.mrf.mxu0 }
 0x14c   :  { %13059 = vmatprep.subr.mxu1 %v17252_v46 }
 0x14d   :  { %v14750_v63 = vpop.f32.mrf.mxu0 }
 0x14e   :  { %13050 = vmatmul.mubr.msk.f32.vlgmr.msra.gmra.mxu1 %vm731_vm2, %v14726_v54 }
 0x14f   :  { %13060 = vmatpush3.msra.mxu1 %v14723_v53  ;;  %13063 = vmatprep.mubr.msk.f32.mxu1 %vm14381_vm1, %v17252_v46  ;;  %v14752_v0 = vpop.f32.mrf.mxu0 }
 0x150   :  { %13061 = vmatprep.subr.mxu1 %v17252_v46 }
 0x151   :  { %13062 = vmatpush3.msra.mxu1 %v14730_v56  ;;  %v14754_v1 = vpop.f32.mrf.mxu0 }
 0x152   :  { %13073 = vmatprep.subr.mxu1 %v17252_v46 }
 0x153   :  { %v14756_v2 = vpop.f32.mrf.mxu0 }
 0x155   :  { %v14758_v5 = vpop.f32.mrf.mxu0 }
 0x157   :  { %v14760_v8 = vpop.f32.mrf.mxu0 }
 0x159   :  { %v14763_v13 = vpop.f32.mrf.mxu0 }
 0x1ee   :  { %v807_v7 = vpop.f32.mrf.mxu1 }
 0x1ef   :  { %v1365_v10 = vsel %vm1364_vm3, %v807_v7, -inf }
 0x1f0   :  { %1366 = vmax.xlane.f32.xlu0 %v1365_v10  ;;  %v13002_v11 = vpop.f32.mrf.mxu1 }
 0x1f6   :  { %v886_v14 = vpop.f32.mrf.mxu1  ;;  %v965_v17 = vpop.f32.mrf.mxu0 }
 0x1f7   :  { %v1371_v20 = vsel %vm1364_vm3, %v965_v17, -inf  ;;  %v1368_v22 = vsel %vm1364_vm3, %v886_v14, -inf }
 0x1f8   :  { %1372 = vmax.xlane.f32.xlu1 %v1371_v20  ;;  %1369 = vmax.xlane.f32.xlu0 %v1368_v22  ;;  %v13009_v24 = vpop.f32.mrf.mxu1  ;;  %v13016_v25 = vpop.f32.mrf.mxu0 }
 0x1fe   :  { %v1044_v26 = vpop.f32.mrf.mxu1  ;;  %v1123_v28 = vpop.f32.mrf.mxu0 }
 0x1ff   :  { %v1377_v32 = vsel %vm1364_vm3, %v1123_v28, -inf  ;;  %v1374_v34 = vsel %vm1364_vm3, %v1044_v26, -inf }
 0x200   :  { %v13030_v36 = vpop.f32.mrf.mxu0  ;;  %1378 = vmax.xlane.f32.xlu0 %v1377_v32  ;;  %1375 = vmax.xlane.f32.xlu1 %v1374_v34  ;;  %v13023_v37 = vpop.f32.mrf.mxu1 }
 0x206   :  { %v1202_v38 = vpop.f32.mrf.mxu1  ;;  %v1281_v39 = vpop.f32.mrf.mxu0 }
 0x207   :  { %v1383_v45 = vsel %vm1364_vm3, %v1281_v39, -inf  ;;  %v1380_v48 = vsel %vm1364_vm3, %v1202_v38, -inf }
 0x208   :  { %v13044_v51 = vpop.f32.mrf.mxu0  ;;  %1384 = vmax.xlane.f32.xlu0 %v1383_v45  ;;  %1381 = vmax.xlane.f32.xlu1 %v1380_v48  ;;  %v13037_v52 = vpop.f32.mrf.mxu1 }
 0x20e   :  { %v14771_v55 = vpop.f32.mrf.mxu1 }
 0x20f   :  { %v1386_v11 = vsel %vm1364_vm3, %v14771_v55, -inf }
 0x210   :  { %v13051_v10 = vpop.f32.mrf.mxu1 }
 0x219   :  { %2131 = vrot.lane.b32.xlu1 %v14573_v6, %s14382_s8 }
 0x21d   :  { %2047 = vrot.lane.b32.xlu1 %v14568_v3, %s14382_s8 }
 0x21e   :  { %2049 = vrot.lane.b32.xlu0 %v14561_v62, %s14382_s8 }
 0x221   :  { %2129 = vrot.lane.b32.xlu1 %v14595_v15, %s14382_s8 }
 0x222   :  { %2045 = vrot.lane.b32.xlu0 %v14570_v4, %s14382_s8 }
 0x225   :  { %2213 = vrot.lane.b32.xlu1 %v14579_v9, %s14382_s8 }
 0x226   :  { %2127 = vrot.lane.b32.xlu0 %v14608_v19, %s14382_s8 }
 0x249   :  { %1387 = vmax.xlane.f32.xlu1 %v1386_v11 }
 0x25a   :  { %2295 = vrot.lane.b32.xlu1 %v14602_v18, %s14382_s8 }
 0x279   :  { %v1367_v20 = vpop.xlane.xlu0 %1366 }
 0x27a   :  { %v1389_v22 = vsub.f32 %v807_v7, %v1367_v20 }
 0x27c   :  { %v1397_v24 = vmul.f32 1.442695, %v1389_v22 }
 0x27e   :  { %13945 = vpow2.f32 %v1397_v24 }
 0x281   :  { %v1373_v25 = vpop.xlane.xlu1 %1372  ;;  %v1370_v32 = vpop.xlane.xlu0 %1369 }
 0x282   :  { %v1391_v34 = vsub.f32 %v965_v17, %v1373_v25  ;;  %v1390_v36 = vsub.f32 %v886_v14, %v1370_v32 }
 0x284   :  { %v1401_v37 = vmul.f32 1.442695, %v1391_v34  ;;  %v1399_v45 = vmul.f32 1.442695, %v1390_v36 }
 0x286   :  { %13947 = vpow2.f32 %v1401_v37 }
 0x287   :  { %13949 = vpow2.f32 %v1399_v45 }
 0x289   :  { %v1379_v48 = vpop.xlane.xlu0 %1378  ;;  %v1376_v51 = vpop.xlane.xlu1 %1375 }
 0x28a   :  { %v1393_v52 = vsub.f32 %v1123_v28, %v1379_v48  ;;  %v1392_v10 = vsub.f32 %v1044_v26, %v1376_v51 }
 0x28b   :  { %v14791_v11 = vpop.eup %13945 }
 0x28c   :  { %v1405_v46 = vmul.f32 1.442695, %v1393_v52  ;;  %v1403_v18 = vmul.f32 1.442695, %v1392_v10  ;;  %v1413_v7 = vsel %vm1364_vm3, %v14791_v11, 0.0 }
 0x28d   :  { %1414 = vadd.xlane.f32.xlu0 %v1413_v7 }
 0x28e   :  { %13951 = vpow2.f32 %v1405_v46 }
 0x28f   :  { %13953 = vpow2.f32 %v1403_v18 }
 0x291   :  { %v1385_v17 = vpop.xlane.xlu0 %1384  ;;  %v1382_v14 = vpop.xlane.xlu1 %1381 }
 0x292   :  { %v1395_v20 = vsub.f32 %v1281_v39, %v1385_v17  ;;  %v1394_v22 = vsub.f32 %v1202_v38, %v1382_v14 }
 0x293   :  { %v14795_v24 = vpop.eup %13947 }
 0x294   :  { %v14797_v25 = vpop.eup %13949  ;;  %v1409_v28 = vmul.f32 1.442695, %v1395_v20  ;;  %v1407_v26 = vmul.f32 1.442695, %v1394_v22  ;;  %v1419_v32 = vsel %vm1364_vm3, %v14795_v24, 0.0  ;;  %v14850_v22 = vadd.f32 %v14740_v57, %v14680_v41 }
 0x295   :  { %1420 = vadd.xlane.f32.xlu0 %v1419_v32  ;;  %v1416_v34 = vsel %vm1364_vm3, %v14797_v25, 0.0  ;;  %v14823_v51 = vpop.permute.xlu1 %2131 }
 0x296   :  { %13955 = vpow2.f32 %v1409_v28  ;;  %1417 = vadd.xlane.f32.xlu1 %v1416_v34 }
 0x297   :  { %13957 = vpow2.f32 %v1407_v26  ;;  %v14864_v26 = vadd.f32 %v14748_v61, %v14680_v41 }
 0x299   :  { %v14827_v52 = vpop.permute.xlu1 %2047 }
 0x29b   :  { %v14803_v46 = vpop.eup %13951 }
 0x29c   :  { %v14805_v18 = vpop.eup %13953  ;;  %v1425_v38 = vsel %vm1364_vm3, %v14803_v46, 0.0 }
 0x29d   :  { %1426 = vadd.xlane.f32.xlu0 %v1425_v38  ;;  %v1422_v39 = vsel %vm1364_vm3, %v14805_v18, 0.0  ;;  %v14833_v10 = vpop.permute.xlu1 %2129 }
 0x29e   :  { %1423 = vadd.xlane.f32.xlu1 %v1422_v39  ;;  %v14900_v39 = vadd.f32 %v14744_v59, %v14680_v41 }
 0x2a1   :  { %v14837_v7 = vpop.permute.xlu1 %2213 }
 0x2a3   :  { %v14811_v36 = vpop.eup %13955 }
 0x2a4   :  { %v14813_v37 = vpop.eup %13957  ;;  %v1431_v45 = vsel %vm1364_vm3, %v14811_v36, 0.0 }
 0x2a5   :  { %1432 = vadd.xlane.f32.xlu0 %v1431_v45  ;;  %v1428_v48 = vsel %vm1364_vm3, %v14813_v37, 0.0 }
 0x2a6   :  { %1429 = vadd.xlane.f32.xlu1 %v1428_v48 }
 0x2b7   :  { %2293 = vrot.lane.b32.xlu1 %v14631_v27, %s14382_s8 }
 0x2bb   :  { %2211 = vrot.lane.b32.xlu0 %v14585_v12, %s14382_s8 }
 0x2bf   :  { %2209 = vrot.lane.b32.xlu0 %v14599_v16, %s14382_s8 }
 0x2c3   :  { %2291 = vrot.lane.b32.xlu0 %v14646_v31, %s14382_s8 }
 0x2c7   :  { %2375 = vrot.lane.b32.xlu0 %v14620_v23, %s14382_s8 }
 0x2cb   :  { %2373 = vrot.lane.b32.xlu0 %v14644_v30, %s14382_s8 }
 0x2cf   :  { %2455 = vrot.lane.b32.xlu0 %v14689_v43, %s14382_s8 }
 0x2d2   :  { %v1388_v17 = vpop.xlane.xlu1 %1387 }
 0x2d3   :  { %v1396_v14 = vsub.f32 %v14771_v55, %v1388_v17  ;;  %2539 = vrot.lane.b32.xlu0 %v14662_v35, %s14382_s8  ;;  %v14856_v55 = vadd.f32 %v14680_v41, %v14742_v58  ;;  %v14878_v58 = vpop.permute.xlu0 %2049  ;;  %v14906_v17 = vadd.f32 %v14680_v41, %v14746_v60  ;;  %v17296_v60 = vmov 0.0  }
 0x2d5   :  { %v1411_v20 = vmul.f32 1.442695, %v1396_v14 }
 0x2d6   :  { %v14894_v38 = vpop.permute.xlu1 %2295 }
 0x2d7   :  { %13959 = vpow2.f32 %v1411_v20  ;;  %2537 = vrot.lane.b32.xlu0 %v14691_v44, %s14382_s8  ;;  %v14884_v61 = vpop.permute.xlu0 %2045  ;;  %v14912_v20 = vadd.f32 %v14752_v0, %v14680_v41 }
 0x2db   :  { %2793 = vrot.lane.b32.xlu0 %v14695_v47, %s14382_s8  ;;  %v14888_v32 = vpop.permute.xlu0 %2127 }
 0x2df   :  { %2955 = vrot.lane.b32.xlu0 %v14850_v22, %s14382_s8 }
 0x2e3   :  { %2953 = vrot.lane.b32.xlu0 %v14856_v55, %s14382_s8 }
 0x2e4   :  { %v14860_v28 = vpop.eup %13959 }
 0x2e5   :  { %v1434_v57 = vsel %vm1364_vm3, %v14860_v28, 0.0 }
 0x2e6   :  { %1435 = vadd.xlane.f32.xlu1 %v1434_v57 }
 0x2e7   :  { %3117 = vrot.lane.b32.xlu0 %v14864_v26, %s14382_s8 }
 0x2f7   :  { %2377 = vrot.lane.b32.xlu1 %v14613_v21, %s14382_s8 }
 0x2fb   :  { %2459 = vrot.lane.b32.xlu1 %v14638_v29, %s14382_s8 }
 0x2ff   :  { %2457 = vrot.lane.b32.xlu1 %v14671_v40, %s14382_s8 }
 0x303   :  { %2541 = vrot.lane.b32.xlu1 %v14651_v33, %s14382_s8 }
 0x307   :  { %2623 = vrot.lane.b32.xlu1 %v14687_v42, %s14382_s8 }
 0x30b   :  { %2621 = vrot.lane.b32.xlu1 %v14708_v50, %s14382_s8 }
 0x30f   :  { %2619 = vrot.lane.b32.xlu1 %v14726_v54, %s14382_s8 }
 0x313   :  { %2874 = vrot.lane.b32.xlu1 %v14723_v53, %s14382_s8 }
 0x316   :  { %v1415_v34 = vpop.xlane.xlu0 %1414 }
 0x317   :  { %13961 = vrcp.f32 %v1415_v34  ;;  %2791 = vrot.lane.b32.xlu1 %v14703_v49, %s14382_s8 }
 0x31b   :  { %2872 = vrot.lane.b32.xlu1 %v14730_v56, %s14382_s8 }
 0x31e   :  { %v1421_v45 = vpop.xlane.xlu0 %1420 }
 0x31f   :  { %13963 = vrcp.f32 %v1421_v45  ;;  %v1418_v48 = vpop.xlane.xlu1 %1417  ;;  %3036 = vrot.lane.b32.xlu1 %v14900_v39, %s14382_s8 }
 0x320   :  { %13965 = vrcp.f32 %v1418_v48 }
 0x323   :  { %3034 = vrot.lane.b32.xlu1 %v14906_v17, %s14382_s8 }
 0x324   :  { %v13962_v14 = vpop.eup %13961 }
 0x325   :  { %v1445_v59 = vmul.f32 %v13962_v14, %v14791_v11 }
 0x326   :  { %v1427_v57 = vpop.xlane.xlu0 %1426 }
 0x327   :  { %13967 = vrcp.f32 %v1427_v57  ;;  %v1424_v34 = vpop.xlane.xlu1 %1423  ;;  %13057 = vmatmul.mubr.msk.f32.vlgmr.msra.gmra.mxu0 %vm1364_vm3, %v1445_v59  ;;  %3198 = vrot.lane.b32.xlu1 %v14912_v20, %s14382_s8  ;;  %v14929_v57 = vadd.f32 %v14680_v41, %v14750_v63 }
 0x328   :  { %13969 = vrcp.f32 %v1424_v34  ;;  %13067 = vmatpush3.msra.mxu0 %v14850_v22  ;;  %13070 = vmatprep.mubr.msk.f32.mxu0 %vm14381_vm1, %v17296_v60  ;;  %v14947_v34 = vadd.f32 %v14756_v2, %v14680_v41 }
 0x329   :  { %13068 = vmatprep.subr.mxu0 %v17296_v60 }
 0x32a   :  { %13069 = vmatpush3.msra.mxu0 %v14856_v55 }
 0x32b   :  { %13080 = vmatprep.subr.mxu0 %v17296_v60 }
 0x32c   :  { %v13964_v0 = vpop.eup %13963 }
 0x32d   :  { %v13966_v11 = vpop.eup %13965  ;;  %v1447_v45 = vmul.f32 %v13964_v0, %v14795_v24 }
 0x32e   :  { %v1433_v48 = vpop.xlane.xlu0 %1432  ;;  %v1446_v14 = vmul.f32 %v13966_v11, %v14797_v25  ;;  %v14953_v11 = vadd.f32 %v14680_v41, %v14758_v5 }
 0x32f   :  { %13971 = vrcp.f32 %v1433_v48  ;;  %v1430_v59 = vpop.xlane.xlu1 %1429  ;;  %13071 = vmatmul.mubr.msk.f32.vlgmr.msra.gmra.mxu0 %vm1364_vm3, %v1447_v45  ;;  %v14959_v45 = vadd.f32 %v14680_v41, %v14754_v1  ;;  %v14984_v48 = vadd.f32 %v14680_v41, %v14763_v13 }
 0x330   :  { %13973 = vrcp.f32 %v1430_v59  ;;  %13064 = vmatmul.mubr.msk.f32.vlgmr.msra.gmra.mxu1 %vm1364_vm3, %v1446_v14  ;;  %13081 = vmatpush3.msra.mxu0 %v14864_v26 }
 0x331   :  { %13074 = vmatpush3.msra.mxu1 %v14900_v39  ;;  %13082 = vmatprep.subr.mxu0 %v17296_v60 }
 0x332   :  { %13075 = vmatprep.subr.mxu1 %v17296_v60  ;;  %13083 = vmatpush3.msra.mxu0 %v14929_v57 }
 0x333   :  { %13076 = vmatpush3.msra.mxu1 %v14906_v17  ;;  %13084 = vmatprep.mubr.msk.f32.mxu0 %vm14381_vm1, %v17296_v60 }
 0x334   :  { %v13968_v63 = vpop.eup %13967  ;;  %13094 = vmatprep.subr.mxu0 %v17296_v60  ;;  %13077 = vmatprep.mubr.msk.f32.mxu1 %vm14381_vm1, %v17296_v60 }
 0x335   :  { %v13970_v24 = vpop.eup %13969  ;;  %13087 = vmatprep.subr.mxu1 %v17296_v60  ;;  %v1449_v25 = vmul.f32 %v13968_v63, %v14803_v46 }
 0x336   :  { %v1448_v0 = vmul.f32 %v13970_v24, %v14805_v18  ;;  %v14976_v18 = vadd.f32 %v14760_v8, %v14680_v41  ;;  %v2212_v41 = vpop.permute.xlu0 %2211 }
 0x337   :  { %13085 = vmatmul.mubr.msk.f32.vlgmr.msra.gmra.mxu0 %vm1364_vm3, %v1449_v25 }
 0x338   :  { %13078 = vmatmul.mubr.msk.f32.vlgmr.msra.gmra.mxu1 %vm1364_vm3, %v1448_v0  ;;  %13095 = vmatpush3.msra.mxu0 %v14947_v34 }
 0x339   :  { %13088 = vmatpush3.msra.mxu1 %v14912_v20  ;;  %13096 = vmatprep.subr.mxu0 %v17296_v60 }
 0x33a   :  { %13089 = vmatprep.subr.mxu1 %v17296_v60  ;;  %13097 = vmatpush3.msra.mxu0 %v14953_v11  ;;  %v2210_v8 = vpop.permute.xlu0 %2209 }
 0x33b   :  { %13090 = vmatpush3.msra.mxu1 %v14959_v45  ;;  %13098 = vmatprep.mubr.msk.f32.mxu0 %vm14381_vm1, %v17296_v60 }
 0x33c   :  { %v13972_v2 = vpop.eup %13971  ;;  %13108 = vmatprep.subr.mxu0 %v17296_v60  ;;  %13091 = vmatprep.mubr.msk.f32.mxu1 %vm14381_vm1, %v17296_v60 }
 0x33d   :  { %v13974_v1 = vpop.eup %13973  ;;  %13101 = vmatprep.subr.mxu1 %v17296_v60  ;;  %v1451_v5 = vmul.f32 %v13972_v2, %v14811_v36 }
 0x33e   :  { %v1450_v46 = vmul.f32 %v13974_v1, %v14813_v37  ;;  %v2292_v13 = vpop.permute.xlu0 %2291  ;;  %v2294_v37 = vpop.permute.xlu1 %2293 }
 0x33f   :  { %13099 = vmatmul.mubr.msk.f32.vlgmr.msra.gmra.mxu0 %vm1364_vm3, %v1451_v5 }
 0x340   :  { %13092 = vmatmul.mubr.msk.f32.vlgmr.msra.gmra.mxu1 %vm1364_vm3, %v1450_v46  ;;  %13109 = vmatpush3.xpose.msk.msra.mxu0 %vm731_vm2, %v14878_v58 }
 0x341   :  { %13102 = vmatpush3.msra.mxu1 %v14976_v18  ;;  %13110 = vmatprep.subr.mxu0 %v17296_v60 }
 0x342   :  { %13103 = vmatprep.subr.mxu1 %v17296_v60  ;;  %13112 = vmatprep.mubr.msk.f32.mxu0 %vm14381_vm1, %v17296_v60  ;;  %v2376_v36 = vpop.permute.xlu0 %2375 }
 0x343   :  { %13104 = vmatpush3.msra.mxu1 %v14984_v48  ;;  %13105 = vmatprep.mubr.msk.f32.mxu1 %vm14381_vm1, %v17296_v60 }
 0x344   :  { %13111 = vmatpush3.xpose.msk.msra.mxu0 %vm731_vm2, %v14827_v52  ;;  %13115 = vmatprep.subr.mxu1 %v17296_v60 }
 0x345   :  { %13122 = vmatprep.subr.mxu0 %v17296_v60 }
 0x346   :  { %v2374_v52 = vpop.permute.xlu0 %2373 }
 0x347   :  { %13113 = vmatmul.mubr.msk.f32.vlgmr.msra.gmra.mxu0 %vm731_vm2, %v14884_v61 }
 0x348   :  { %13123 = vmatpush3.xpose.msk.msra.mxu0 %vm731_vm2, %v14837_v7  ;;  %13126 = vmatprep.mubr.msk.f32.mxu0 %vm14381_vm1, %v17296_v60 }
 0x349   :  { %13124 = vmatprep.subr.mxu0 %v17296_v60 }
 0x34a   :  { %v2456_v61 = vpop.permute.xlu0 %2455 }
 0x34c   :  { %13125 = vmatpush3.xpose.msk.msra.mxu0 %vm731_vm2, %v2212_v41 }
 0x34d   :  { %13136 = vmatprep.subr.mxu0 %v17296_v60 }
 0x34e   :  { %v2540_v59 = vpop.permute.xlu0 %2539 }
 0x34f   :  { %13127 = vmatmul.mubr.msk.f32.vlgmr.msra.gmra.mxu0 %vm731_vm2, %v2210_v8 }
 0x350   :  { %13140 = vmatprep.mubr.msk.f32.mxu0 %vm14381_vm1, %v17296_v60 }
 0x352   :  { %v2538_v2 = vpop.permute.xlu0 %2537 }
 0x36f   :  { %v1436_v7 = vpop.xlane.xlu1 %1435 }
 0x370   :  { %13975 = vrcp.f32 %v1436_v7 }
 0x373   :  { %v2378_v58 = vpop.permute.xlu1 %2377 }
 0x374   :  { %13137 = vmatpush3.xpose.msk.msra.mxu0 %vm731_vm2, %v2378_v58 }
 0x375   :  { %13138 = vmatprep.subr.mxu0 %v17296_v60 }
 0x377   :  { %v2460_v14 = vpop.permute.xlu1 %2459 }
 0x378   :  { %13139 = vmatpush3.xpose.msk.msra.mxu0 %vm731_vm2, %v2376_v36 }
 0x379   :  { %13150 = vmatprep.subr.mxu0 %v17296_v60 }
 0x37b   :  { %13141 = vmatmul.mubr.msk.f32.vlgmr.msra.gmra.mxu0 %vm731_vm2, %v2374_v52  ;;  %v2458_v63 = vpop.permute.xlu1 %2457 }
 0x37c   :  { %13154 = vmatprep.mubr.msk.f32.mxu0 %vm14381_vm1, %v17296_v60 }
 0x37d   :  { %v13976_v24 = vpop.eup %13975 }
 0x37e   :  { %v1452_v25 = vmul.f32 %v13976_v24, %v14860_v28  ;;  %v2794_v28 = vpop.permute.xlu0 %2793 }
 0x37f   :  { %v2542_v0 = vpop.permute.xlu1 %2541 }
 0x380   :  { %13106 = vmatmul.mubr.msk.f32.vlgmr.msra.gmra.mxu1 %vm1364_vm3, %v1452_v25  ;;  %13151 = vmatpush3.xpose.msk.msra.mxu0 %vm731_vm2, %v2542_v0 }
 0x381   :  { %13116 = vmatpush3.xpose.msk.msra.mxu1 %vm731_vm2, %v14823_v51  ;;  %13152 = vmatprep.subr.mxu0 %v17296_v60 }
 0x382   :  { %13117 = vmatprep.subr.mxu1 %v17296_v60  ;;  %13119 = vmatprep.mubr.msk.f32.mxu1 %vm14381_vm1, %v17296_v60 }
 0x383   :  { %v2624_v1 = vpop.permute.xlu1 %2623 }
 0x384   :  { %13153 = vmatpush3.xpose.msk.msra.mxu0 %vm731_vm2, %v2540_v59 }
 0x385   :  { %13118 = vmatpush3.xpose.msk.msra.mxu1 %vm731_vm2, %v14833_v10  ;;  %13164 = vmatprep.subr.mxu0 %v17296_v60 }
 0x386   :  { %13129 = vmatprep.subr.mxu1 %v17296_v60 }
 0x387   :  { %13155 = vmatmul.mubr.msk.f32.vlgmr.msra.gmra.mxu0 %vm731_vm2, %v2538_v2  ;;  %v2622_v51 = vpop.permute.xlu1 %2621 }
 0x388   :  { %13120 = vmatmul.mubr.msk.f32.vlgmr.msra.gmra.mxu1 %vm731_vm2, %v14888_v32  ;;  %13165 = vmatpush3.msra.mxu0 %v2794_v28 }
 0x389   :  { %13130 = vmatpush3.xpose.msk.msra.mxu1 %vm731_vm2, %v14894_v38  ;;  %13133 = vmatprep.mubr.msk.f32.mxu1 %vm14381_vm1, %v17296_v60 }
 0x38a   :  { %13131 = vmatprep.subr.mxu1 %v17296_v60  ;;  %13166 = vmatprep.subr.mxu0 %v17296_v60 }
 0x38b   :  { %v2620_v10 = vpop.permute.xlu1 %2619  ;;  %13168 = vmatprep.mubr.msk.f32.mxu0 %vm14381_vm1, %v17296_v60 }
 0x38d   :  { %13132 = vmatpush3.xpose.msk.msra.mxu1 %vm731_vm2, %v2294_v37 }
 0x38e   :  { %13143 = vmatprep.subr.mxu1 %v17296_v60 }
 0x38f   :  { %v2875_v32 = vpop.permute.xlu1 %2874 }
 0x390   :  { %13134 = vmatmul.mubr.msk.f32.vlgmr.msra.gmra.mxu1 %vm731_vm2, %v2292_v13 }
 0x391   :  { %13144 = vmatpush3.xpose.msk.msra.mxu1 %vm731_vm2, %v2460_v14  ;;  %13147 = vmatprep.mubr.msk.f32.mxu1 %vm14381_vm1, %v17296_v60 }
 0x392   :  { %13145 = vmatprep.subr.mxu1 %v17296_v60 }
 0x393   :  { %v2792_v38 = vpop.permute.xlu1 %2791 }
 0x394   :  { %13167 = vmatpush3.msra.mxu0 %v2792_v38 }
 0x395   :  { %13146 = vmatpush3.xpose.msk.msra.mxu1 %vm731_vm2, %v2458_v63  ;;  %13178 = vmatprep.subr.mxu0 %v17296_v60 }
 0x396   :  { %13157 = vmatprep.subr.mxu1 %v17296_v60 }
 0x397   :  { %v2873_v5 = vpop.permute.xlu1 %2872 }
 0x398   :  { %13148 = vmatmul.mubr.msk.f32.vlgmr.msra.gmra.mxu1 %vm731_vm2, %v2456_v61 }
 0x399   :  { %13158 = vmatpush3.xpose.msk.msra.mxu1 %vm731_vm2, %v2624_v1  ;;  %13161 = vmatprep.mubr.msk.f32.mxu1 %vm14381_vm1, %v17296_v60 }
 0x39a   :  { %13159 = vmatprep.subr.mxu1 %v17296_v60 }
 0x39d   :  { %13160 = vmatpush3.xpose.msk.msra.mxu1 %vm731_vm2, %v2622_v51 }
 0x39e   :  { %13171 = vmatprep.subr.mxu1 %v17296_v60 }
 0x3a0   :  { %13162 = vmatmul.mubr.msk.f32.vlgmr.msra.gmra.mxu1 %vm731_vm2, %v2620_v10 }
 0x3a1   :  { %13172 = vmatpush3.msra.mxu1 %v2875_v32  ;;  %13175 = vmatprep.mubr.msk.f32.mxu1 %vm14381_vm1, %v17296_v60 }
 0x3a2   :  { %13173 = vmatprep.subr.mxu1 %v17296_v60 }
 0x3a3   :  { %13174 = vmatpush3.msra.mxu1 %v2873_v5 }
 0x3a4   :  { %13185 = vmatprep.subr.mxu1 %v17296_v60 }
 0x3e7   :  { %v1522_v46 = vpop.f32.mrf.mxu0 }
 0x3e8   :  { %2037 = vst.msk [vmem:[#allocation2] sm:$0xff] %vm731_vm2, %v1522_v46 }
 0x3e9   :  { %v13058_v41 = vpop.f32.mrf.mxu0 }
 0x3ef   :  { %v1668_v8 = vpop.f32.mrf.mxu0 }
 0x3f0   :  { %v1595_v13 = vpop.f32.mrf.mxu1  ;;  %2039 = vst.msk [vmem:[#allocation2 + $0x10] sm:$0xff] %vm731_vm2, %v1668_v8 }
 0x3f1   :  { %2038 = vst.msk [vmem:[#allocation2 + $0x8] sm:$0xff] %vm731_vm2, %v1595_v13  ;;  %v13072_v36 = vpop.f32.mrf.mxu0 }
 0x3f2   :  { %v13065_v37 = vpop.f32.mrf.mxu1 }
 0x3f7   :  { %v1814_v52 = vpop.f32.mrf.mxu0 }
 0x3f8   :  { %v1741_v7 = vpop.f32.mrf.mxu1  ;;  %2041 = vst.msk [vmem:[#allocation2 + $0x20] sm:$0xff] %vm731_vm2, %v1814_v52 }
 0x3f9   :  { %2040 = vst.msk [vmem:[#allocation2 + $0x18] sm:$0xff] %vm731_vm2, %v1741_v7  ;;  %v13086_v58 = vpop.f32.mrf.mxu0 }
 0x3fa   :  { %v13079_v61 = vpop.f32.mrf.mxu1 }
 0x3ff   :  { %v1960_v14 = vpop.f32.mrf.mxu0 }
 0x400   :  { %v1887_v59 = vpop.f32.mrf.mxu1  ;;  %2043 = vst.msk [vmem:[#allocation2 + $0x30] sm:$0xff] %vm731_vm2, %v1960_v14 }
 0x401   :  { %2042 = vst.msk [vmem:[#allocation2 + $0x28] sm:$0xff] %vm731_vm2, %v1887_v59  ;;  %v13100_v63 = vpop.f32.mrf.mxu0 }
 0x402   :  { %v13093_v24 = vpop.f32.mrf.mxu1 }
 0x407   :  { %v2123_v25 = vpop.f32.mrf.mxu0 }
 0x408   :  { %v2701_v0 = vsel %vm1364_vm3, %v2123_v25, -inf }
 0x409   :  { %2702 = vmax.xlane.f32.xlu0 %v2701_v0  ;;  %v13114_v2 = vpop.f32.mrf.mxu0 }
 0x40a   :  { %v15112_v2 = vpop.permute.xlu0 %2955 }
 0x40f   :  { %v2287_v1 = vpop.f32.mrf.mxu0 }
 0x410   :  { %v2707_v28 = vsel %vm1364_vm3, %v2287_v1, -inf }
 0x411   :  { %2708 = vmax.xlane.f32.xlu0 %v2707_v28  ;;  %v13128_v51 = vpop.f32.mrf.mxu0  ;;  %v15116_v28 = vpop.permute.xlu0 %2953 }
 0x415   :  { %v15120_v51 = vpop.permute.xlu0 %3117 }
 0x43b   :  { %v15073_v10 = vpop.f32.mrf.mxu0 }
 0x43c   :  { %v2713_v58 = vsel %vm1364_vm3, %v15073_v10, -inf }
 0x43d   :  { %v13142_v32 = vpop.f32.mrf.mxu0 }
 0x440   :  { %v2033_v38 = vpop.f32.mrf.mxu1 }
 0x441   :  { %2044 = vst.msk [vmem:[#allocation2 + $0x38] sm:$0xff] %vm731_vm2, %v2033_v38 }
 0x442   :  { %v13107_v5 = vpop.f32.mrf.mxu1 }
 0x447   :  { %v15076_v46 = vpop.f32.mrf.mxu0 }
 0x448   :  { %v2205_v41 = vpop.f32.mrf.mxu1  ;;  %v2719_v14 = vsel %vm1364_vm3, %v15076_v46, -inf }
 0x449   :  { %v13156_v8 = vpop.f32.mrf.mxu0  ;;  %v2704_v13 = vsel %vm1364_vm3, %v2205_v41, -inf }
 0x44a   :  { %2705 = vmax.xlane.f32.xlu1 %v2704_v13  ;;  %v13121_v36 = vpop.f32.mrf.mxu1 }
 0x450   :  { %v2369_v37 = vpop.f32.mrf.mxu1 }
 0x451   :  { %v2710_v52 = vsel %vm1364_vm3, %v2369_v37, -inf }
 0x452   :  { %2711 = vmax.xlane.f32.xlu0 %v2710_v52  ;;  %v13135_v7 = vpop.f32.mrf.mxu1 }
 0x456   :  { %2714 = vmax.xlane.f32.xlu0 %v2713_v58 }
 0x458   :  { %v15082_v61 = vpop.f32.mrf.mxu1 }
 0x459   :  { %v2716_v59 = vsel %vm1364_vm3, %v15082_v61, -inf }
 0x45a   :  { %2720 = vmax.xlane.f32.xlu0 %v2719_v14  ;;  %2717 = vmax.xlane.f32.xlu1 %v2716_v59  ;;  %v13149_v63 = vpop.f32.mrf.mxu1  ;;  %v15134_v59 = vpop.permute.xlu1 %3036 }
 0x45e   :  { %v15136_v63 = vpop.permute.xlu1 %3034 }
 0x460   :  { %v15088_v24 = vpop.f32.mrf.mxu1 }
 0x461   :  { %v2722_v52 = vsel %vm1364_vm3, %v15088_v24, -inf }
 0x462   :  { %v13163_v0 = vpop.f32.mrf.mxu1 }
 0x463   :  { %v15138_v0 = vpop.permute.xlu1 %3198 }
 0x46b   :  { %3196 = vrot.lane.b32.xlu1 %v14959_v45, %s14382_s8 }
 0x46f   :  { %3360 = vrot.lane.b32.xlu1 %v14976_v18, %s14382_s8 }
 0x470   :  { %3115 = vrot.lane.b32.xlu0 %v14929_v57, %s14382_s8 }
 0x473   :  { %3358 = vrot.lane.b32.xlu1 %v14984_v48, %s14382_s8 }
 0x474   :  { %3279 = vrot.lane.b32.xlu0 %v14947_v34, %s14382_s8 }
 0x477   :  { %3564 = vrot.lane.b32.xlu1 %v14573_v6, %s14383_s14 }
 0x478   :  { %3277 = vrot.lane.b32.xlu0 %v14953_v11, %s14382_s8 }
 0x47b   :  { %3562 = vrot.lane.b32.xlu1 %v14595_v15, %s14383_s14 }
 0x47c   :  { %3482 = vrot.lane.b32.xlu0 %v14561_v62, %s14383_s14 }
 0x47f   :  { %3646 = vrot.lane.b32.xlu1 %v14579_v9, %s14383_s14 }
 0x480   :  { %3480 = vrot.lane.b32.xlu0 %v14568_v3, %s14383_s14 }
 0x484   :  { %3478 = vrot.lane.b32.xlu0 %v14570_v4, %s14383_s14 }
 0x488   :  { %3560 = vrot.lane.b32.xlu0 %v14608_v19, %s14383_s14 }
 0x492   :  { %v2703_v32 = vpop.xlane.xlu0 %2702 }
 0x493   :  { %v2725_v38 = vsub.f32 %v2123_v25, %v2703_v32 }
 0x495   :  { %v2733_v5 = vmul.f32 1.442695, %v2725_v38 }
 0x497   :  { %13977 = vpow2.f32 %v2733_v5 }
 0x49a   :  { %v2709_v8 = vpop.xlane.xlu0 %2708 }
 0x49b   :  { %v2727_v13 = vsub.f32 %v2287_v1, %v2709_v8  ;;  %v17297_v1 = vld [vmem:[#allocation26_spill] sm:$0xff] }
 0x49d   :  { %v2737_v36 = vmul.f32 1.442695, %v2727_v13 }
 0x49f   :  { %13979 = vpow2.f32 %v2737_v36 }
 0x4a3   :  { %2723 = vmax.xlane.f32.xlu1 %v2722_v52 }
 0x4a4   :  { %v15124_v7 = vpop.eup %13977 }
 0x4a5   :  { %v2749_v58 = vsel %vm1364_vm3, %v15124_v7, 0.0 }
 0x4a7   :  { %2750 = vadd.xlane.f32.xlu0 %v2749_v58 }
 0x4ac   :  { %v15128_v14 = vpop.eup %13979 }
 0x4ad   :  { %v2755_v25 = vsel %vm1364_vm3, %v15128_v14, 0.0 }
 0x4ae   :  { %2756 = vadd.xlane.f32.xlu0 %v2755_v25 }
 0x4b4   :  { %3728 = vrot.lane.b32.xlu1 %v17297_v1, %s14383_s14 }
 0x4d3   :  { %v2706_v32 = vpop.xlane.xlu1 %2705 }
 0x4d4   :  { %v2726_v38 = vsub.f32 %v2205_v41, %v2706_v32 }
 0x4d6   :  { %v2735_v5 = vmul.f32 1.442695, %v2726_v38 }
 0x4d8   :  { %13981 = vpow2.f32 %v2735_v5 }
 0x4db   :  { %v2712_v8 = vpop.xlane.xlu0 %2711 }
 0x4dc   :  { %v2728_v13 = vsub.f32 %v2369_v37, %v2712_v8 }
 0x4de   :  { %v2739_v36 = vmul.f32 1.442695, %v2728_v13 }
 0x4df   :  { %v2715_v52 = vpop.xlane.xlu0 %2714 }
 0x4e0   :  { %13983 = vpow2.f32 %v2739_v36  ;;  %v2729_v58 = vsub.f32 %v15073_v10, %v2715_v52 }
 0x4e2   :  { %v2741_v25 = vmul.f32 1.442695, %v2729_v58 }
 0x4e3   :  { %v2721_v19 = vpop.xlane.xlu0 %2720  ;;  %v2718_v1 = vpop.xlane.xlu1 %2717 }
 0x4e4   :  { %13985 = vpow2.f32 %v2741_v25  ;;  %v2731_v4 = vsub.f32 %v15076_v46, %v2721_v19  ;;  %v2730_v3 = vsub.f32 %v15082_v61, %v2718_v1 }
 0x4e5   :  { %v15143_v9 = vpop.eup %13981 }
 0x4e6   :  { %v2745_v41 = vmul.f32 1.442695, %v2731_v4  ;;  %v2743_v32 = vmul.f32 1.442695, %v2730_v3  ;;  %v2752_v37 = vsel %vm1364_vm3, %v15143_v9, 0.0 }
 0x4e7   :  { %2753 = vadd.xlane.f32.xlu1 %v2752_v37  ;;  %v3116_v1 = vpop.permute.xlu0 %3115  ;;  %v15165_v8 = vpop.permute.xlu1 %3196 }
 0x4e8   :  { %13987 = vpow2.f32 %v2745_v41 }
 0x4e9   :  { %13989 = vpow2.f32 %v2743_v32 }
 0x4eb   :  { %v15169_v13 = vpop.permute.xlu0 %3279  ;;  %v15171_v36 = vpop.permute.xlu1 %3360 }
 0x4ed   :  { %v15147_v38 = vpop.eup %13983 }
 0x4ee   :  { %v2758_v10 = vsel %vm1364_vm3, %v15147_v38, 0.0 }
 0x4ef   :  { %2759 = vadd.xlane.f32.xlu1 %v2758_v10  ;;  %v15175_v52 = vpop.permute.xlu0 %3277  ;;  %v15179_v58 = vpop.permute.xlu1 %3358 }
 0x4f1   :  { %v15151_v5 = vpop.eup %13985 }
 0x4f2   :  { %v2761_v19 = vsel %vm1364_vm3, %v15151_v5, 0.0 }
 0x4f3   :  { %2762 = vadd.xlane.f32.xlu0 %v2761_v19  ;;  %v15183_v25 = vpop.permute.xlu0 %3482  ;;  %v15185_v41 = vpop.permute.xlu1 %3564 }
 0x4f5   :  { %v15155_v4 = vpop.eup %13987 }
 0x4f6   :  { %v15157_v3 = vpop.eup %13989  ;;  %v2767_v46 = vsel %vm1364_vm3, %v15155_v4, 0.0 }
 0x4f7   :  { %2768 = vadd.xlane.f32.xlu0 %v2767_v46  ;;  %v2764_v61 = vsel %vm1364_vm3, %v15157_v3, 0.0  ;;  %v15189_v32 = vpop.permute.xlu0 %3480  ;;  %v15193_v37 = vpop.permute.xlu1 %3562 }
 0x4f8   :  { %2765 = vadd.xlane.f32.xlu1 %v2764_v61 }
 0x4fb   :  { %v15197_v10 = vpop.permute.xlu0 %3478  ;;  %v15199_v19 = vpop.permute.xlu1 %3646 }
 0x4ff   :  { %v15203_v46 = vpop.permute.xlu0 %3560 }
 0x509   :  { %3726 = vrot.lane.b32.xlu1 %v14631_v27, %s14383_s14 }
 0x50d   :  { %3644 = vrot.lane.b32.xlu0 %v14585_v12, %s14383_s14 }
 0x511   :  { %3642 = vrot.lane.b32.xlu0 %v14599_v16, %s14383_s14 }
 0x515   :  { %3724 = vrot.lane.b32.xlu0 %v14646_v31, %s14383_s14 }
 0x519   :  { %3808 = vrot.lane.b32.xlu0 %v14620_v23, %s14383_s14 }
 0x51d   :  { %3806 = vrot.lane.b32.xlu0 %v14644_v30, %s14383_s14 }
 0x521   :  { %3888 = vrot.lane.b32.xlu0 %v14689_v43, %s14383_s14 }
 0x525   :  { %3972 = vrot.lane.b32.xlu0 %v14662_v35, %s14383_s14 }
 0x529   :  { %3970 = vrot.lane.b32.xlu0 %v14691_v44, %s14383_s14 }
 0x52c   :  { %v2724_v61 = vpop.xlane.xlu1 %2723 }
 0x52d   :  { %v2732_v30 = vsub.f32 %v15088_v24, %v2724_v61  ;;  %4224 = vrot.lane.b32.xlu0 %v14695_v47, %s14383_s14 }
 0x52f   :  { %v2747_v43 = vmul.f32 1.442695, %v2732_v30 }
 0x530   :  { %v2751_v23 = vpop.xlane.xlu0 %2750 }
 0x531   :  { %13991 = vpow2.f32 %v2747_v43  ;;  %4382 = vrot.lane.b32.xlu0 %v14850_v22, %s14383_s14 }
 0x532   :  { %13993 = vrcp.f32 %v2751_v23 }
 0x535   :  { %4380 = vrot.lane.b32.xlu0 %v14856_v55, %s14383_s14 }
 0x537   :  { %v2757_v35 = vpop.xlane.xlu0 %2756 }
 0x538   :  { %13995 = vrcp.f32 %v2757_v35 }
 0x539   :  { %4540 = vrot.lane.b32.xlu0 %v14864_v26, %s14383_s14 }
 0x53e   :  { %v15214_v44 = vpop.eup %13991 }
 0x53f   :  { %v13994_v24 = vpop.eup %13993  ;;  %v2770_v30 = vsel %vm1364_vm3, %v15214_v44, 0.0 }
 0x540   :  { %2771 = vadd.xlane.f32.xlu1 %v2770_v30  ;;  %v2781_v43 = vmul.f32 %v13994_v24, %v15124_v7 }
 0x542   :  { %13169 = vmatmul.mubr.msk.f32.vlgmr.msra.gmra.mxu0 %vm1364_vm3, %v2781_v43 }
 0x543   :  { %13179 = vmatpush3.msra.mxu0 %v15112_v2  ;;  %13182 = vmatprep.mubr.msk.f32.mxu0 %vm14381_vm1, %v17296_v60  ;;  %v15247_v2 = vpop.permute.xlu1 %3728 }
 0x544   :  { %13180 = vmatprep.subr.mxu0 %v17296_v60 }
 0x545   :  { %v13996_v23 = vpop.eup %13995  ;;  %13181 = vmatpush3.msra.mxu0 %v15116_v28 }
 0x546   :  { %13192 = vmatprep.subr.mxu0 %v17296_v60  ;;  %v2783_v35 = vmul.f32 %v13996_v23, %v15128_v14 }
 0x548   :  { %13183 = vmatmul.mubr.msk.f32.vlgmr.msra.gmra.mxu0 %vm1364_vm3, %v2783_v35 }
 0x549   :  { %13193 = vmatpush3.msra.mxu0 %v15120_v51  ;;  %13196 = vmatprep.mubr.msk.f32.mxu0 %vm14381_vm1, %v17296_v60 }
 0x54a   :  { %13194 = vmatprep.subr.mxu0 %v17296_v60 }
 0x54b   :  { %13195 = vmatpush3.msra.mxu0 %v3116_v1 }
 0x54c   :  { %13206 = vmatprep.subr.mxu0 %v17296_v60 }
 0x551   :  { %3810 = vrot.lane.b32.xlu1 %v14613_v21, %s14383_s14 }
 0x555   :  { %3892 = vrot.lane.b32.xlu1 %v14638_v29, %s14383_s14 }
 0x559   :  { %3890 = vrot.lane.b32.xlu1 %v14671_v40, %s14383_s14 }
 0x55d   :  { %3974 = vrot.lane.b32.xlu1 %v14651_v33, %s14383_s14 }
 0x561   :  { %4056 = vrot.lane.b32.xlu1 %v14687_v42, %s14383_s14 }
 0x565   :  { %4054 = vrot.lane.b32.xlu1 %v14708_v50, %s14383_s14 }
 0x569   :  { %4052 = vrot.lane.b32.xlu1 %v14726_v54, %s14383_s14 }
 0x56d   :  { %4303 = vrot.lane.b32.xlu1 %v14723_v53, %s14383_s14 }
 0x570   :  { %v2754_v28 = vpop.xlane.xlu1 %2753 }
 0x571   :  { %13997 = vrcp.f32 %v2754_v28  ;;  %4222 = vrot.lane.b32.xlu1 %v14703_v49, %s14383_s14 }
 0x575   :  { %4301 = vrot.lane.b32.xlu1 %v14730_v56, %s14383_s14 }
 0x578   :  { %v2760_v51 = vpop.xlane.xlu1 %2759 }
 0x579   :  { %13999 = vrcp.f32 %v2760_v51  ;;  %4461 = vrot.lane.b32.xlu1 %v14900_v39, %s14383_s14 }
 0x57c   :  { %v2763_v7 = vpop.xlane.xlu0 %2762 }
 0x57d   :  { %14001 = vrcp.f32 %v2763_v7  ;;  %4459 = vrot.lane.b32.xlu1 %v14906_v17, %s14383_s14 }
 0x57e   :  { %v13998_v14 = vpop.eup %13997 }
 0x57f   :  { %v2782_v1 = vmul.f32 %v13998_v14, %v15143_v9 }
 0x580   :  { %v2769_v61 = vpop.xlane.xlu0 %2768 }
 0x581   :  { %14003 = vrcp.f32 %v2769_v61  ;;  %v2766_v24 = vpop.xlane.xlu1 %2765  ;;  %4619 = vrot.lane.b32.xlu1 %v14912_v20, %s14383_s14  ;;  %13176 = vmatmul.mubr.msk.f32.vlgmr.msra.gmra.mxu1 %vm1364_vm3, %v2782_v1 }
 0x582   :  { %14005 = vrcp.f32 %v2766_v24  ;;  %13186 = vmatpush3.msra.mxu1 %v15134_v59  ;;  %13189 = vmatprep.mubr.msk.f32.mxu1 %vm14381_vm1, %v17296_v60 }
 0x583   :  { %13187 = vmatprep.subr.mxu1 %v17296_v60 }
 0x584   :  { %13188 = vmatpush3.msra.mxu1 %v15136_v63 }
 0x585   :  { %13199 = vmatprep.subr.mxu1 %v17296_v60 }
 0x586   :  { %v14000_v9 = vpop.eup %13999 }
 0x587   :  { %v2784_v30 = vmul.f32 %v14000_v9, %v15147_v38 }
 0x589   :  { %13190 = vmatmul.mubr.msk.f32.vlgmr.msra.gmra.mxu1 %vm1364_vm3, %v2784_v30 }
 0x58a   :  { %v14002_v43 = vpop.eup %14001  ;;  %13200 = vmatpush3.msra.mxu1 %v15138_v0  ;;  %13203 = vmatprep.mubr.msk.f32.mxu1 %vm14381_vm1, %v17296_v60 }
 0x58b   :  { %13201 = vmatprep.subr.mxu1 %v17296_v60  ;;  %v2785_v59 = vmul.f32 %v14002_v43, %v15151_v5 }
 0x58c   :  { %13202 = vmatpush3.msra.mxu1 %v15165_v8 }
 0x58d   :  { %13197 = vmatmul.mubr.msk.f32.vlgmr.msra.gmra.mxu0 %vm1364_vm3, %v2785_v59  ;;  %13213 = vmatprep.subr.mxu1 %v17296_v60 }
 0x58e   :  { %v14004_v63 = vpop.eup %14003  ;;  %13207 = vmatpush3.msra.mxu0 %v15169_v13  ;;  %13210 = vmatprep.mubr.msk.f32.mxu0 %vm14381_vm1, %v17296_v60 }
 0x58f   :  { %v14006_v0 = vpop.eup %14005  ;;  %13208 = vmatprep.subr.mxu0 %v17296_v60  ;;  %v2787_v38 = vmul.f32 %v14004_v63, %v15155_v4  ;;  %v3645_v4 = vpop.permute.xlu0 %3644 }
 0x590   :  { %13209 = vmatpush3.msra.mxu0 %v15175_v52  ;;  %v2786_v5 = vmul.f32 %v14006_v0, %v15157_v3 }
 0x591   :  { %13220 = vmatprep.subr.mxu0 %v17296_v60  ;;  %13211 = vmatmul.mubr.msk.f32.vlgmr.msra.gmra.mxu0 %vm1364_vm3, %v2787_v38 }
 0x592   :  { %13204 = vmatmul.mubr.msk.f32.vlgmr.msra.gmra.mxu1 %vm1364_vm3, %v2786_v5  ;;  %13221 = vmatpush3.xpose.msk.msra.mxu0 %vm731_vm2, %v15183_v25 }
 0x593   :  { %13214 = vmatpush3.msra.mxu1 %v15171_v36  ;;  %13222 = vmatprep.subr.mxu0 %v17296_v60  ;;  %v3643_v3 = vpop.permute.xlu0 %3642  ;;  %v3727_v36 = vpop.permute.xlu1 %3726 }
 0x594   :  { %13215 = vmatprep.subr.mxu1 %v17296_v60  ;;  %13224 = vmatprep.mubr.msk.f32.mxu0 %vm14381_vm1, %v17296_v60 }
 0x595   :  { %13216 = vmatpush3.msra.mxu1 %v15179_v58  ;;  %13217 = vmatprep.mubr.msk.f32.mxu1 %vm14381_vm1, %v17296_v60 }
 0x596   :  { %13223 = vmatpush3.xpose.msk.msra.mxu0 %vm731_vm2, %v15189_v32  ;;  %13227 = vmatprep.subr.mxu1 %v17296_v60 }
 0x597   :  { %13234 = vmatprep.subr.mxu0 %v17296_v60  ;;  %v3725_v8 = vpop.permute.xlu0 %3724 }
 0x599   :  { %13225 = vmatmul.mubr.msk.f32.vlgmr.msra.gmra.mxu0 %vm731_vm2, %v15197_v10 }
 0x59a   :  { %13235 = vmatpush3.xpose.msk.msra.mxu0 %vm731_vm2, %v15199_v19  ;;  %13238 = vmatprep.mubr.msk.f32.mxu0 %vm14381_vm1, %v17296_v60 }
 0x59b   :  { %13236 = vmatprep.subr.mxu0 %v17296_v60  ;;  %v3809_v13 = vpop.permute.xlu0 %3808 }
 0x59e   :  { %13237 = vmatpush3.xpose.msk.msra.mxu0 %vm731_vm2, %v3645_v4 }
 0x59f   :  { %13248 = vmatprep.subr.mxu0 %v17296_v60  ;;  %v3807_v52 = vpop.permute.xlu0 %3806 }
 0x5a1   :  { %13239 = vmatmul.mubr.msk.f32.vlgmr.msra.gmra.mxu0 %vm731_vm2, %v3643_v3 }
 0x5a2   :  { %13252 = vmatprep.mubr.msk.f32.mxu0 %vm14381_vm1, %v17296_v60 }
 0x5a3   :  { %v3889_v32 = vpop.permute.xlu0 %3888 }
 0x5a7   :  { %v3973_v19 = vpop.permute.xlu0 %3972 }
 0x5ab   :  { %v3971_v7 = vpop.permute.xlu0 %3970 }
 0x5c9   :  { %v2772_v58 = vpop.xlane.xlu1 %2771 }
 0x5ca   :  { %14007 = vrcp.f32 %v2772_v58 }
 0x5cd   :  { %v3811_v25 = vpop.permute.xlu1 %3810 }
 0x5ce   :  { %13249 = vmatpush3.xpose.msk.msra.mxu0 %vm731_vm2, %v3811_v25 }
 0x5cf   :  { %13250 = vmatprep.subr.mxu0 %v17296_v60 }
 0x5d1   :  { %v3893_v10 = vpop.permute.xlu1 %3892 }
 0x5d2   :  { %13251 = vmatpush3.xpose.msk.msra.mxu0 %vm731_vm2, %v3809_v13 }
 0x5d3   :  { %13262 = vmatprep.subr.mxu0 %v17296_v60 }
 0x5d5   :  { %13253 = vmatmul.mubr.msk.f32.vlgmr.msra.gmra.mxu0 %vm731_vm2, %v3807_v52  ;;  %v3891_v23 = vpop.permute.xlu1 %3890 }
 0x5d6   :  { %13266 = vmatprep.mubr.msk.f32.mxu0 %vm14381_vm1, %v17296_v60 }
 0x5d7   :  { %v14008_v35 = vpop.eup %14007 }
 0x5d8   :  { %v2788_v28 = vmul.f32 %v14008_v35, %v15214_v44  ;;  %v4225_v44 = vpop.permute.xlu0 %4224 }
 0x5d9   :  { %v3975_v51 = vpop.permute.xlu1 %3974 }
 0x5da   :  { %13218 = vmatmul.mubr.msk.f32.vlgmr.msra.gmra.mxu1 %vm1364_vm3, %v2788_v28  ;;  %13263 = vmatpush3.xpose.msk.msra.mxu0 %vm731_vm2, %v3975_v51 }
 0x5db   :  { %13228 = vmatpush3.xpose.msk.msra.mxu1 %vm731_vm2, %v15185_v41  ;;  %13264 = vmatprep.subr.mxu0 %v17296_v60 }
 0x5dc   :  { %13229 = vmatprep.subr.mxu1 %v17296_v60  ;;  %13231 = vmatprep.mubr.msk.f32.mxu1 %vm14381_vm1, %v17296_v60 }
 0x5dd   :  { %v4057_v14 = vpop.permute.xlu1 %4056 }
 0x5de   :  { %13265 = vmatpush3.xpose.msk.msra.mxu0 %vm731_vm2, %v3973_v19 }
 0x5df   :  { %13230 = vmatpush3.xpose.msk.msra.mxu1 %vm731_vm2, %v15193_v37  ;;  %13276 = vmatprep.subr.mxu0 %v17296_v60 }
 0x5e0   :  { %13241 = vmatprep.subr.mxu1 %v17296_v60 }
 0x5e1   :  { %13267 = vmatmul.mubr.msk.f32.vlgmr.msra.gmra.mxu0 %vm731_vm2, %v3971_v7  ;;  %v4055_v41 = vpop.permute.xlu1 %4054 }
 0x5e2   :  { %13232 = vmatmul.mubr.msk.f32.vlgmr.msra.gmra.mxu1 %vm731_vm2, %v15203_v46  ;;  %13277 = vmatpush3.msra.mxu0 %v4225_v44 }
 0x5e3   :  { %13242 = vmatpush3.xpose.msk.msra.mxu1 %vm731_vm2, %v15247_v2  ;;  %13245 = vmatprep.mubr.msk.f32.mxu1 %vm14381_vm1, %v17296_v60 }
 0x5e4   :  { %13243 = vmatprep.subr.mxu1 %v17296_v60  ;;  %13278 = vmatprep.subr.mxu0 %v17296_v60 }
 0x5e5   :  { %v4053_v37 = vpop.permute.xlu1 %4052  ;;  %13280 = vmatprep.mubr.msk.f32.mxu0 %vm14381_vm1, %v17296_v60 }
 0x5e7   :  { %13244 = vmatpush3.xpose.msk.msra.mxu1 %vm731_vm2, %v3727_v36 }
 0x5e8   :  { %13255 = vmatprep.subr.mxu1 %v17296_v60 }
 0x5e9   :  { %v4304_v46 = vpop.permute.xlu1 %4303 }
 0x5ea   :  { %13246 = vmatmul.mubr.msk.f32.vlgmr.msra.gmra.mxu1 %vm731_vm2, %v3725_v8 }
 0x5eb   :  { %13256 = vmatpush3.xpose.msk.msra.mxu1 %vm731_vm2, %v3893_v10  ;;  %13259 = vmatprep.mubr.msk.f32.mxu1 %vm14381_vm1, %v17296_v60 }
 0x5ec   :  { %13257 = vmatprep.subr.mxu1 %v17296_v60 }
 0x5ed   :  { %v4223_v2 = vpop.permute.xlu1 %4222 }
 0x5ee   :  { %13279 = vmatpush3.msra.mxu0 %v4223_v2 }
 0x5ef   :  { %13258 = vmatpush3.xpose.msk.msra.mxu1 %vm731_vm2, %v3891_v23  ;;  %13290 = vmatprep.subr.mxu0 %v17296_v60 }
 0x5f0   :  { %13269 = vmatprep.subr.mxu1 %v17296_v60 }
 0x5f1   :  { %v4302_v1 = vpop.permute.xlu1 %4301 }
 0x5f2   :  { %13260 = vmatmul.mubr.msk.f32.vlgmr.msra.gmra.mxu1 %vm731_vm2, %v3889_v32 }
 0x5f3   :  { %13270 = vmatpush3.xpose.msk.msra.mxu1 %vm731_vm2, %v4057_v14  ;;  %13273 = vmatprep.mubr.msk.f32.mxu1 %vm14381_vm1, %v17296_v60 }
 0x5f4   :  { %13271 = vmatprep.subr.mxu1 %v17296_v60 }
 0x5f7   :  { %13272 = vmatpush3.xpose.msk.msra.mxu1 %vm731_vm2, %v4055_v41 }
 0x5f8   :  { %13283 = vmatprep.subr.mxu1 %v17296_v60 }
 0x5fa   :  { %13274 = vmatmul.mubr.msk.f32.vlgmr.msra.gmra.mxu1 %vm731_vm2, %v4053_v37 }
 0x5fb   :  { %13284 = vmatpush3.msra.mxu1 %v4304_v46  ;;  %13287 = vmatprep.mubr.msk.f32.mxu1 %vm14381_vm1, %v17296_v60 }
 0x5fc   :  { %13285 = vmatprep.subr.mxu1 %v17296_v60 }
 0x5fd   :  { %13286 = vmatpush3.msra.mxu1 %v4302_v1 }
 0x5fe   :  { %13297 = vmatprep.subr.mxu1 %v17296_v60 }
 0x602   :  { %v15369_v61 = vpop.f32.mrf.mxu0 }
 0x603   :  { %17298 = vst [vmem:[#allocation35_spill] sm:$0xff] %v15369_v61 }
 0x604   :  { %v13170_v24 = vpop.f32.mrf.mxu0 }
 0x608   :  { %v15371_v9 = vpop.f32.mrf.mxu0 }
 0x609   :  { %17299 = vst [vmem:[#allocation36_spill] sm:$0xff] %v15371_v9 }
 0x60a   :  { %v13184_v30 = vpop.f32.mrf.mxu0 }
 0x641   :  { %v15373_v43 = vpop.f32.mrf.mxu1 }
 0x642   :  { %17300 = vst [vmem:[#allocation37_spill] sm:$0xff] %v15373_v43 }
 0x643   :  { %v13177_v59 = vpop.f32.mrf.mxu1 }
 0x649   :  { %v15375_v63 = vpop.f32.mrf.mxu1 }
 0x64a   :  { %17301 = vst [vmem:[#allocation38_spill] sm:$0xff] %v15375_v63 }
 0x64b   :  { %v13191_v0 = vpop.f32.mrf.mxu1 }
 0x64d   :  { %v15377_v38 = vpop.f32.mrf.mxu0 }
 0x64e   :  { %17302 = vst [vmem:[#allocation39_spill] sm:$0xff] %v15377_v38 }
 0x64f   :  { %v13198_v5 = vpop.f32.mrf.mxu0 }
 0x651   :  { %v15379_v4 = vpop.f32.mrf.mxu0 }
 0x652   :  { %17303 = vst [vmem:[#allocation40_spill] sm:$0xff] %v15379_v4  ;;  %v15381_v3 = vpop.f32.mrf.mxu1 }
 0x653   :  { %17304 = vst [vmem:[#allocation41_spill] sm:$0xff] %v15381_v3  ;;  %v13212_v8 = vpop.f32.mrf.mxu0 }
 0x654   :  { %v13205_v13 = vpop.f32.mrf.mxu1 }
 0x655   :  { %v15417_v13 = vpop.permute.xlu0 %4382 }
 0x659   :  { %v3556_v36 = vpop.f32.mrf.mxu0 }
 0x65a   :  { %v4134_v52 = vsel %vm1364_vm3, %v3556_v36, -inf }
 0x65b   :  { %4135 = vmax.xlane.f32.xlu0 %v4134_v52  ;;  %v13226_v58 = vpop.f32.mrf.mxu0  ;;  %v17306_v52 = vld [vmem:[#allocation23_spill] sm:$0xff] }
 0x65c   :  { %v17307_v58 = vld [vmem:[#allocation21_spill] sm:$0xff] }
 0x661   :  { %v3720_v25 = vpop.f32.mrf.mxu0 }
 0x662   :  { %v4140_v32 = vsel %vm1364_vm3, %v3720_v25, -inf }
 0x663   :  { %4141 = vmax.xlane.f32.xlu0 %v4140_v32  ;;  %v13240_v10 = vpop.f32.mrf.mxu0  ;;  %v15427_v32 = vpop.permute.xlu0 %4380 }
 0x664   :  { %v17308_v10 = vld [vmem:[#allocation22_spill] sm:$0xff] }
 0x695   :  { %v15385_v19 = vpop.f32.mrf.mxu0 }
 0x696   :  { %v4146_v1 = vsel %vm1364_vm3, %v15385_v19, -inf }
 0x697   :  { %v13254_v23 = vpop.f32.mrf.mxu0 }
 0x698   :  { %v15431_v23 = vpop.permute.xlu0 %4540 }
 0x69a   :  { %v15387_v35 = vpop.f32.mrf.mxu1 }
 0x69b   :  { %17305 = vst [vmem:[#allocation42_spill] sm:$0xff] %v15387_v35 }
 0x69c   :  { %v13219_v28 = vpop.f32.mrf.mxu1 }
 0x69d   :  { %v17309_v28 = vld [vmem:[#allocation27_spill] sm:$0xff] }
 0x6a1   :  { %v15389_v51 = vpop.f32.mrf.mxu0 }
 0x6a2   :  { %v3638_v7 = vpop.f32.mrf.mxu1  ;;  %v4152_v30 = vsel %vm1364_vm3, %v15389_v51, -inf }
 0x6a3   :  { %v13268_v14 = vpop.f32.mrf.mxu0  ;;  %v4137_v44 = vsel %vm1364_vm3, %v3638_v7, -inf }
 0x6a4   :  { %4138 = vmax.xlane.f32.xlu1 %v4137_v44  ;;  %v13233_v41 = vpop.f32.mrf.mxu1 }
 0x6aa   :  { %v3802_v37 = vpop.f32.mrf.mxu1 }
 0x6ab   :  { %v4143_v46 = vsel %vm1364_vm3, %v3802_v37, -inf }
 0x6ac   :  { %4144 = vmax.xlane.f32.xlu0 %v4143_v46  ;;  %v13247_v2 = vpop.f32.mrf.mxu1 }
 0x6b0   :  { %4147 = vmax.xlane.f32.xlu0 %v4146_v1 }
 0x6b2   :  { %v15395_v24 = vpop.f32.mrf.mxu1 }
 0x6b3   :  { %v4149_v59 = vsel %vm1364_vm3, %v15395_v24, -inf }
 0x6b4   :  { %4153 = vmax.xlane.f32.xlu0 %v4152_v30  ;;  %4150 = vmax.xlane.f32.xlu1 %v4149_v59  ;;  %v13261_v0 = vpop.f32.mrf.mxu1 }
 0x6ba   :  { %v15401_v5 = vpop.f32.mrf.mxu1 }
 0x6bb   :  { %v4155_v30 = vsel %vm1364_vm3, %v15401_v5, -inf }
 0x6bc   :  { %v13275_v8 = vpop.f32.mrf.mxu1 }
 0x6c5   :  { %4617 = vrot.lane.b32.xlu1 %v14959_v45, %s14383_s14 }
 0x6c9   :  { %4777 = vrot.lane.b32.xlu1 %v14976_v18, %s14383_s14 }
 0x6ca   :  { %4538 = vrot.lane.b32.xlu0 %v14929_v57, %s14383_s14 }
 0x6cd   :  { %4775 = vrot.lane.b32.xlu1 %v14984_v48, %s14383_s14 }
 0x6ce   :  { %4698 = vrot.lane.b32.xlu0 %v14947_v34, %s14383_s14 }
 0x6d1   :  { %4981 = vrot.lane.b32.xlu1 %v14573_v6, %s14384_s15 }
 0x6d2   :  { %4696 = vrot.lane.b32.xlu0 %v14953_v11, %s14383_s14 }
 0x6d5   :  { %4979 = vrot.lane.b32.xlu1 %v14595_v15, %s14384_s15 }
 0x6d6   :  { %4899 = vrot.lane.b32.xlu0 %v14561_v62, %s14384_s15 }
 0x6d9   :  { %5063 = vrot.lane.b32.xlu1 %v17306_v52, %s14384_s15 }
 0x6da   :  { %4897 = vrot.lane.b32.xlu0 %v17307_v58, %s14384_s15 }
 0x6de   :  { %4895 = vrot.lane.b32.xlu0 %v17308_v10, %s14384_s15 }
 0x6e2   :  { %4977 = vrot.lane.b32.xlu0 %v17309_v28, %s14384_s15 }
 0x6e4   :  { %v4136_v14 = vpop.xlane.xlu0 %4135 }
 0x6e5   :  { %v4158_v44 = vsub.f32 %v3556_v36, %v4136_v14  ;;  %v15447_v14 = vpop.permute.xlu1 %4461 }
 0x6e7   :  { %v4166_v41 = vmul.f32 1.442695, %v4158_v44 }
 0x6e9   :  { %14009 = vpow2.f32 %v4166_v41  ;;  %v15449_v44 = vpop.permute.xlu1 %4459 }
 0x6ec   :  { %v4142_v46 = vpop.xlane.xlu0 %4141 }
 0x6ed   :  { %v4160_v2 = vsub.f32 %v3720_v25, %v4142_v46  ;;  %v17310_v25 = vld [vmem:[#allocation26_spill] sm:$0xff]  ;;  %v15451_v41 = vpop.permute.xlu1 %4619 }
 0x6ef   :  { %v4170_v1 = vmul.f32 1.442695, %v4160_v2 }
 0x6f1   :  { %14011 = vpow2.f32 %v4170_v1 }
 0x6f6   :  { %v15437_v59 = vpop.eup %14009 }
 0x6f7   :  { %v4182_v0 = vsel %vm1364_vm3, %v15437_v59, 0.0 }
 0x6fd   :  { %4156 = vmax.xlane.f32.xlu1 %v4155_v30 }
 0x6fe   :  { %v15441_v8 = vpop.eup %14011 }
 0x6ff   :  { %v4188_v36 = vsel %vm1364_vm3, %v15441_v8, 0.0 }
 0x701   :  { %4183 = vadd.xlane.f32.xlu0 %v4182_v0 }
 0x705   :  { %4189 = vadd.xlane.f32.xlu0 %v4188_v36 }
 0x70e   :  { %5145 = vrot.lane.b32.xlu1 %v17310_v25, %s14384_s15 }
 0x72d   :  { %v4139_v46 = vpop.xlane.xlu1 %4138 }
 0x72e   :  { %v4159_v2 = vsub.f32 %v3638_v7, %v4139_v46 }
 0x730   :  { %v4168_v1 = vmul.f32 1.442695, %v4159_v2 }
 0x732   :  { %14013 = vpow2.f32 %v4168_v1 }
 0x735   :  { %v4145_v30 = vpop.xlane.xlu0 %4144 }
 0x736   :  { %v4161_v4 = vsub.f32 %v3802_v37, %v4145_v30 }
 0x738   :  { %v4172_v0 = vmul.f32 1.442695, %v4161_v4 }
 0x739   :  { %v4148_v38 = vpop.xlane.xlu0 %4147 }
 0x73a   :  { %14015 = vpow2.f32 %v4172_v0  ;;  %v4162_v36 = vsub.f32 %v15385_v19, %v4148_v38 }
 0x73c   :  { %v4174_v9 = vmul.f32 1.442695, %v4162_v36  ;;  %v17311_v36 = vld [vmem:[#allocation28_spill] sm:$0xff] }
 0x73d   :  { %v4154_v35 = vpop.xlane.xlu0 %4153  ;;  %v4151_v43 = vpop.xlane.xlu1 %4150 }
 0x73e   :  { %14017 = vpow2.f32 %v4174_v9  ;;  %v4164_v3 = vsub.f32 %v15389_v51, %v4154_v35  ;;  %v4163_v63 = vsub.f32 %v15395_v24, %v4151_v43 }
 0x73f   :  { %v15456_v61 = vpop.eup %14013 }
 0x740   :  { %v4178_v7 = vmul.f32 1.442695, %v4164_v3  ;;  %v4176_v46 = vmul.f32 1.442695, %v4163_v63  ;;  %v4185_v37 = vsel %vm1364_vm3, %v15456_v61, 0.0 }
 0x741   :  { %4186 = vadd.xlane.f32.xlu1 %v4185_v37  ;;  %v4539_v51 = vpop.permute.xlu0 %4538  ;;  %v15478_v24 = vpop.permute.xlu1 %4617  ;;  %v17312_v37 = vld [vmem:[#allocation30_spill] sm:$0xff] }
 0x742   :  { %14019 = vpow2.f32 %v4178_v7 }
 0x743   :  { %14021 = vpow2.f32 %v4176_v46 }
 0x745   :  { %v15482_v2 = vpop.permute.xlu0 %4698  ;;  %v15484_v1 = vpop.permute.xlu1 %4777 }
 0x747   :  { %v15460_v4 = vpop.eup %14015 }
 0x748   :  { %v4191_v38 = vsel %vm1364_vm3, %v15460_v4, 0.0 }
 0x749   :  { %4192 = vadd.xlane.f32.xlu1 %v4191_v38  ;;  %v15488_v30 = vpop.permute.xlu0 %4696  ;;  %v15492_v0 = vpop.permute.xlu1 %4775 }
 0x74b   :  { %v15464_v9 = vpop.eup %14017 }
 0x74c   :  { %v4194_v43 = vsel %vm1364_vm3, %v15464_v9, 0.0 }
 0x74d   :  { %4195 = vadd.xlane.f32.xlu0 %v4194_v43  ;;  %v15496_v7 = vpop.permute.xlu0 %4899  ;;  %v15498_v46 = vpop.permute.xlu1 %4981  ;;  %v17313_v43 = vld [vmem:[#allocation33_spill] sm:$0xff] }
 0x74f   :  { %v15468_v3 = vpop.eup %14019 }
 0x750   :  { %v15470_v63 = vpop.eup %14021  ;;  %v4200_v19 = vsel %vm1364_vm3, %v15468_v3, 0.0 }
 0x751   :  { %4201 = vadd.xlane.f32.xlu0 %v4200_v19  ;;  %v4197_v35 = vsel %vm1364_vm3, %v15470_v63, 0.0  ;;  %v15502_v38 = vpop.permute.xlu0 %4897  ;;  %v15506_v19 = vpop.permute.xlu1 %4979 }
 0x752   :  { %4198 = vadd.xlane.f32.xlu1 %v4197_v35  ;;  %v17314_v35 = vld [vmem:[#allocation32_spill] sm:$0xff] }
 0x763   :  { %5143 = vrot.lane.b32.xlu1 %v14631_v27, %s14384_s15 }
 0x767   :  { %5061 = vrot.lane.b32.xlu0 %v14585_v12, %s14384_s15 }
 0x76b   :  { %5059 = vrot.lane.b32.xlu0 %v14599_v16, %s14384_s15  ;;  %v17315_v16 = vld [vmem:[#allocation34_spill] sm:$0xff] }
 0x76f   :  { %5141 = vrot.lane.b32.xlu0 %v14646_v31, %s14384_s15  ;;  %v15510_v31 = vpop.permute.xlu0 %4895 }
 0x773   :  { %5225 = vrot.lane.b32.xlu0 %v17311_v36, %s14384_s15  ;;  %v15512_v36 = vpop.permute.xlu1 %5063  ;;  %v15516_v12 = vpop.permute.xlu0 %4977 }
 0x777   :  { %5223 = vrot.lane.b32.xlu0 %v17312_v37, %s14384_s15 }
 0x77b   :  { %5305 = vrot.lane.b32.xlu0 %v17313_v43, %s14384_s15 }
 0x77f   :  { %5389 = vrot.lane.b32.xlu0 %v17314_v35, %s14384_s15 }
 0x783   :  { %5387 = vrot.lane.b32.xlu0 %v17315_v16, %s14384_s15 }
 0x786   :  { %v4157_v37 = vpop.xlane.xlu1 %4156 }
 0x787   :  { %v4165_v27 = vsub.f32 %v15401_v5, %v4157_v37  ;;  %5641 = vrot.lane.b32.xlu0 %v14695_v47, %s14384_s15 }
 0x789   :  { %v4180_v43 = vmul.f32 1.442695, %v4165_v27 }
 0x78a   :  { %v4184_v25 = vpop.xlane.xlu0 %4183 }
 0x78b   :  { %14023 = vpow2.f32 %v4180_v43  ;;  %5799 = vrot.lane.b32.xlu0 %v14850_v22, %s14384_s15 }
 0x78c   :  { %14025 = vrcp.f32 %v4184_v25 }
 0x78e   :  { %v4190_v35 = vpop.xlane.xlu0 %4189 }
 0x78f   :  { %14027 = vrcp.f32 %v4190_v35  ;;  %5797 = vrot.lane.b32.xlu0 %v14856_v55, %s14384_s15 }
 0x793   :  { %5957 = vrot.lane.b32.xlu0 %v14864_v26, %s14384_s15 }
 0x798   :  { %v15527_v16 = vpop.eup %14023 }
 0x799   :  { %v14026_v5 = vpop.eup %14025  ;;  %v4203_v27 = vsel %vm1364_vm3, %v15527_v16, 0.0 }
 0x79a   :  { %4204 = vadd.xlane.f32.xlu1 %v4203_v27  ;;  %v4214_v37 = vmul.f32 %v14026_v5, %v15437_v59 }
 0x79c   :  { %v14028_v43 = vpop.eup %14027  ;;  %13281 = vmatmul.mubr.msk.f32.vlgmr.msra.gmra.mxu0 %vm1364_vm3, %v4214_v37 }
 0x79d   :  { %13291 = vmatpush3.msra.mxu0 %v15417_v13  ;;  %13294 = vmatprep.mubr.msk.f32.mxu0 %vm14381_vm1, %v17296_v60  ;;  %v4216_v25 = vmul.f32 %v14028_v43, %v15441_v8  ;;  %v15560_v13 = vpop.permute.xlu1 %5145 }
 0x79e   :  { %13292 = vmatprep.subr.mxu0 %v17296_v60 }
 0x79f   :  { %13293 = vmatpush3.msra.mxu0 %v15427_v32 }
 0x7a0   :  { %13304 = vmatprep.subr.mxu0 %v17296_v60  ;;  %13295 = vmatmul.mubr.msk.f32.vlgmr.msra.gmra.mxu0 %vm1364_vm3, %v4216_v25 }
 0x7a1   :  { %13305 = vmatpush3.msra.mxu0 %v15431_v23  ;;  %13308 = vmatprep.mubr.msk.f32.mxu0 %vm14381_vm1, %v17296_v60 }
 0x7a2   :  { %13306 = vmatprep.subr.mxu0 %v17296_v60 }
 0x7a3   :  { %13307 = vmatpush3.msra.mxu0 %v4539_v51 }
 0x7a4   :  { %13318 = vmatprep.subr.mxu0 %v17296_v60 }
 0x7ab   :  { %5227 = vrot.lane.b32.xlu1 %v14613_v21, %s14384_s15 }
 0x7af   :  { %5309 = vrot.lane.b32.xlu1 %v14638_v29, %s14384_s15 }
 0x7b3   :  { %5307 = vrot.lane.b32.xlu1 %v14671_v40, %s14384_s15 }
 0x7b7   :  { %5391 = vrot.lane.b32.xlu1 %v14651_v33, %s14384_s15 }
 0x7bb   :  { %5473 = vrot.lane.b32.xlu1 %v14687_v42, %s14384_s15 }
 0x7bf   :  { %5471 = vrot.lane.b32.xlu1 %v14708_v50, %s14384_s15 }
 0x7c3   :  { %5469 = vrot.lane.b32.xlu1 %v14726_v54, %s14384_s15 }
 0x7c7   :  { %5720 = vrot.lane.b32.xlu1 %v14723_v53, %s14384_s15 }
 0x7ca   :  { %v4187_v32 = vpop.xlane.xlu1 %4186 }
 0x7cb   :  { %14029 = vrcp.f32 %v4187_v32  ;;  %5639 = vrot.lane.b32.xlu1 %v14703_v49, %s14384_s15 }
 0x7cf   :  { %5718 = vrot.lane.b32.xlu1 %v14730_v56, %s14384_s15 }
 0x7d2   :  { %v4193_v23 = vpop.xlane.xlu1 %4192 }
 0x7d3   :  { %14031 = vrcp.f32 %v4193_v23  ;;  %5878 = vrot.lane.b32.xlu1 %v14900_v39, %s14384_s15 }
 0x7d6   :  { %v4196_v59 = vpop.xlane.xlu0 %4195 }
 0x7d7   :  { %14033 = vrcp.f32 %v4196_v59  ;;  %5876 = vrot.lane.b32.xlu1 %v14906_v17, %s14384_s15 }
 0x7d8   :  { %v14030_v8 = vpop.eup %14029 }
 0x7d9   :  { %v4215_v51 = vmul.f32 %v14030_v8, %v15456_v61 }
 0x7da   :  { %v4202_v35 = vpop.xlane.xlu0 %4201 }
 0x7db   :  { %14035 = vrcp.f32 %v4202_v35  ;;  %v4199_v5 = vpop.xlane.xlu1 %4198  ;;  %6036 = vrot.lane.b32.xlu1 %v14912_v20, %s14384_s15  ;;  %13288 = vmatmul.mubr.msk.f32.vlgmr.msra.gmra.mxu1 %vm1364_vm3, %v4215_v51 }
 0x7dc   :  { %14037 = vrcp.f32 %v4199_v5  ;;  %13298 = vmatpush3.msra.mxu1 %v15447_v14  ;;  %13301 = vmatprep.mubr.msk.f32.mxu1 %vm14381_vm1, %v17296_v60 }
 0x7dd   :  { %13299 = vmatprep.subr.mxu1 %v17296_v60 }
 0x7de   :  { %13300 = vmatpush3.msra.mxu1 %v15449_v44 }
 0x7df   :  { %13311 = vmatprep.subr.mxu1 %v17296_v60 }
 0x7e0   :  { %v14032_v61 = vpop.eup %14031 }
 0x7e1   :  { %v4217_v27 = vmul.f32 %v14032_v61, %v15460_v4 }
 0x7e3   :  { %13302 = vmatmul.mubr.msk.f32.vlgmr.msra.gmra.mxu1 %vm1364_vm3, %v4217_v27 }
 0x7e4   :  { %v14034_v37 = vpop.eup %14033  ;;  %13312 = vmatpush3.msra.mxu1 %v15451_v41  ;;  %13315 = vmatprep.mubr.msk.f32.mxu1 %vm14381_vm1, %v17296_v60 }
 0x7e5   :  { %13313 = vmatprep.subr.mxu1 %v17296_v60  ;;  %v4218_v14 = vmul.f32 %v14034_v37, %v15464_v9 }
 0x7e6   :  { %13314 = vmatpush3.msra.mxu1 %v15478_v24 }
 0x7e7   :  { %13309 = vmatmul.mubr.msk.f32.vlgmr.msra.gmra.mxu0 %vm1364_vm3, %v4218_v14  ;;  %13325 = vmatprep.subr.mxu1 %v17296_v60 }
 0x7e8   :  { %v14036_v44 = vpop.eup %14035  ;;  %13319 = vmatpush3.msra.mxu0 %v15482_v2  ;;  %13322 = vmatprep.mubr.msk.f32.mxu0 %vm14381_vm1, %v17296_v60  ;;  %v5144_v2 = vpop.permute.xlu1 %5143 }
 0x7e9   :  { %v14038_v41 = vpop.eup %14037  ;;  %13320 = vmatprep.subr.mxu0 %v17296_v60  ;;  %v4220_v4 = vmul.f32 %v14036_v44, %v15468_v3  ;;  %v5062_v3 = vpop.permute.xlu0 %5061 }
 0x7ea   :  { %13321 = vmatpush3.msra.mxu0 %v15488_v30  ;;  %v4219_v9 = vmul.f32 %v14038_v41, %v15470_v63 }
 0x7eb   :  { %13332 = vmatprep.subr.mxu0 %v17296_v60  ;;  %13323 = vmatmul.mubr.msk.f32.vlgmr.msra.gmra.mxu0 %vm1364_vm3, %v4220_v4 }
 0x7ec   :  { %13316 = vmatmul.mubr.msk.f32.vlgmr.msra.gmra.mxu1 %vm1364_vm3, %v4219_v9  ;;  %13333 = vmatpush3.xpose.msk.msra.mxu0 %vm731_vm2, %v15496_v7 }
 0x7ed   :  { %13326 = vmatpush3.msra.mxu1 %v15484_v1  ;;  %13334 = vmatprep.subr.mxu0 %v17296_v60  ;;  %v5060_v63 = vpop.permute.xlu0 %5059 }
 0x7ee   :  { %13327 = vmatprep.subr.mxu1 %v17296_v60  ;;  %13336 = vmatprep.mubr.msk.f32.mxu0 %vm14381_vm1, %v17296_v60 }
 0x7ef   :  { %13328 = vmatpush3.msra.mxu1 %v15492_v0  ;;  %13329 = vmatprep.mubr.msk.f32.mxu1 %vm14381_vm1, %v17296_v60 }
 0x7f0   :  { %13335 = vmatpush3.xpose.msk.msra.mxu0 %vm731_vm2, %v15502_v38  ;;  %13339 = vmatprep.subr.mxu1 %v17296_v60 }
 0x7f1   :  { %13346 = vmatprep.subr.mxu0 %v17296_v60 }
 0x7f3   :  { %13337 = vmatmul.mubr.msk.f32.vlgmr.msra.gmra.mxu0 %vm731_vm2, %v15510_v31  ;;  %v5142_v31 = vpop.permute.xlu0 %5141 }
 0x7f4   :  { %13347 = vmatpush3.xpose.msk.msra.mxu0 %vm731_vm2, %v15512_v36  ;;  %13350 = vmatprep.mubr.msk.f32.mxu0 %vm14381_vm1, %v17296_v60 }
 0x7f5   :  { %13348 = vmatprep.subr.mxu0 %v17296_v60 }
 0x7f7   :  { %v5226_v24 = vpop.permute.xlu0 %5225 }
 0x7f8   :  { %13349 = vmatpush3.xpose.msk.msra.mxu0 %vm731_vm2, %v5062_v3 }
 0x7f9   :  { %13360 = vmatprep.subr.mxu0 %v17296_v60 }
 0x7fb   :  { %13351 = vmatmul.mubr.msk.f32.vlgmr.msra.gmra.mxu0 %vm731_vm2, %v5060_v63  ;;  %v5224_v1 = vpop.permute.xlu0 %5223 }
 0x7fc   :  { %13364 = vmatprep.mubr.msk.f32.mxu0 %vm14381_vm1, %v17296_v60 }
 0x7ff   :  { %v5306_v36 = vpop.permute.xlu0 %5305 }
 0x803   :  { %v5390_v38 = vpop.permute.xlu0 %5389 }
 0x807   :  { %v5388_v59 = vpop.permute.xlu0 %5387 }
 0x823   :  { %v4205_v30 = vpop.xlane.xlu1 %4204 }
 0x824   :  { %14039 = vrcp.f32 %v4205_v30 }
 0x827   :  { %v5228_v0 = vpop.permute.xlu1 %5227 }
 0x828   :  { %13361 = vmatpush3.xpose.msk.msra.mxu0 %vm731_vm2, %v5228_v0 }
 0x829   :  { %13362 = vmatprep.subr.mxu0 %v17296_v60 }
 0x82b   :  { %v5310_v7 = vpop.permute.xlu1 %5309 }
 0x82c   :  { %13363 = vmatpush3.xpose.msk.msra.mxu0 %vm731_vm2, %v5226_v24 }
 0x82d   :  { %13374 = vmatprep.subr.mxu0 %v17296_v60 }
 0x82f   :  { %13365 = vmatmul.mubr.msk.f32.vlgmr.msra.gmra.mxu0 %vm731_vm2, %v5224_v1  ;;  %v5308_v43 = vpop.permute.xlu1 %5307 }
 0x830   :  { %13378 = vmatprep.mubr.msk.f32.mxu0 %vm14381_vm1, %v17296_v60 }
 0x831   :  { %v14040_v25 = vpop.eup %14039 }
 0x832   :  { %v4221_v32 = vmul.f32 %v14040_v25, %v15527_v16  ;;  %v5642_v16 = vpop.permute.xlu0 %5641 }
 0x833   :  { %v5392_v23 = vpop.permute.xlu1 %5391 }
 0x834   :  { %13330 = vmatmul.mubr.msk.f32.vlgmr.msra.gmra.mxu1 %vm1364_vm3, %v4221_v32  ;;  %13375 = vmatpush3.xpose.msk.msra.mxu0 %vm731_vm2, %v5392_v23 }
 0x835   :  { %13340 = vmatpush3.xpose.msk.msra.mxu1 %vm731_vm2, %v15498_v46  ;;  %13376 = vmatprep.subr.mxu0 %v17296_v60 }
 0x836   :  { %13341 = vmatprep.subr.mxu1 %v17296_v60  ;;  %13343 = vmatprep.mubr.msk.f32.mxu1 %vm14381_vm1, %v17296_v60 }
 0x837   :  { %v5474_v8 = vpop.permute.xlu1 %5473 }
 0x838   :  { %13377 = vmatpush3.xpose.msk.msra.mxu0 %vm731_vm2, %v5390_v38 }
 0x839   :  { %13342 = vmatpush3.xpose.msk.msra.mxu1 %vm731_vm2, %v15506_v19  ;;  %13388 = vmatprep.subr.mxu0 %v17296_v60 }
 0x83a   :  { %13353 = vmatprep.subr.mxu1 %v17296_v60 }
 0x83b   :  { %13379 = vmatmul.mubr.msk.f32.vlgmr.msra.gmra.mxu0 %vm731_vm2, %v5388_v59  ;;  %v5472_v46 = vpop.permute.xlu1 %5471 }
 0x83c   :  { %13344 = vmatmul.mubr.msk.f32.vlgmr.msra.gmra.mxu1 %vm731_vm2, %v15516_v12  ;;  %13389 = vmatpush3.msra.mxu0 %v5642_v16 }
 0x83d   :  { %13354 = vmatpush3.xpose.msk.msra.mxu1 %vm731_vm2, %v15560_v13  ;;  %13357 = vmatprep.mubr.msk.f32.mxu1 %vm14381_vm1, %v17296_v60 }
 0x83e   :  { %13355 = vmatprep.subr.mxu1 %v17296_v60  ;;  %13390 = vmatprep.subr.mxu0 %v17296_v60 }
 0x83f   :  { %v5470_v19 = vpop.permute.xlu1 %5469  ;;  %13392 = vmatprep.mubr.msk.f32.mxu0 %vm14381_vm1, %v17296_v60 }
 0x841   :  { %13356 = vmatpush3.xpose.msk.msra.mxu1 %vm731_vm2, %v5144_v2 }
 0x842   :  { %13367 = vmatprep.subr.mxu1 %v17296_v60 }
 0x843   :  { %v5721_v12 = vpop.permute.xlu1 %5720 }
 0x844   :  { %13358 = vmatmul.mubr.msk.f32.vlgmr.msra.gmra.mxu1 %vm731_vm2, %v5142_v31 }
 0x845   :  { %13368 = vmatpush3.xpose.msk.msra.mxu1 %vm731_vm2, %v5310_v7  ;;  %13371 = vmatprep.mubr.msk.f32.mxu1 %vm14381_vm1, %v17296_v60 }
 0x846   :  { %13369 = vmatprep.subr.mxu1 %v17296_v60 }
 0x847   :  { %v5640_v13 = vpop.permute.xlu1 %5639 }
 0x848   :  { %13391 = vmatpush3.msra.mxu0 %v5640_v13 }
 0x849   :  { %13370 = vmatpush3.xpose.msk.msra.mxu1 %vm731_vm2, %v5308_v43  ;;  %13402 = vmatprep.subr.mxu0 %v17296_v60 }
 0x84a   :  { %13381 = vmatprep.subr.mxu1 %v17296_v60 }
 0x84b   :  { %v5719_v51 = vpop.permute.xlu1 %5718 }
 0x84c   :  { %13372 = vmatmul.mubr.msk.f32.vlgmr.msra.gmra.mxu1 %vm731_vm2, %v5306_v36 }
 0x84d   :  { %13382 = vmatpush3.xpose.msk.msra.mxu1 %vm731_vm2, %v5474_v8  ;;  %13385 = vmatprep.mubr.msk.f32.mxu1 %vm14381_vm1, %v17296_v60 }
 0x84e   :  { %13383 = vmatprep.subr.mxu1 %v17296_v60 }
 0x851   :  { %13384 = vmatpush3.xpose.msk.msra.mxu1 %vm731_vm2, %v5472_v46 }
 0x852   :  { %13395 = vmatprep.subr.mxu1 %v17296_v60 }
 0x854   :  { %13386 = vmatmul.mubr.msk.f32.vlgmr.msra.gmra.mxu1 %vm731_vm2, %v5470_v19 }
 0x855   :  { %13396 = vmatpush3.msra.mxu1 %v5721_v12  ;;  %13399 = vmatprep.mubr.msk.f32.mxu1 %vm14381_vm1, %v17296_v60 }
 0x856   :  { %13397 = vmatprep.subr.mxu1 %v17296_v60 }
 0x857   :  { %13398 = vmatpush3.msra.mxu1 %v5719_v51 }
 0x858   :  { %13409 = vmatprep.subr.mxu1 %v17296_v60 }
 0x85c   :  { %v15682_v35 = vpop.f32.mrf.mxu0 }
 0x85d   :  { %17316 = vst [vmem:[#allocation23_spill] sm:$0xff] %v15682_v35  ;;  %v17332_v35 = vld [vmem:[#allocation32_spill] sm:$0xff] }
 0x85e   :  { %v13282_v5 = vpop.f32.mrf.mxu0 }
 0x860   :  { %v15684_v61 = vpop.f32.mrf.mxu0 }
 0x861   :  { %17317 = vst [vmem:[#allocation21_spill] sm:$0xff] %v15684_v61 }
 0x862   :  { %v13296_v27 = vpop.f32.mrf.mxu0 }
 0x89b   :  { %v15686_v37 = vpop.f32.mrf.mxu1 }
 0x89c   :  { %17318 = vst [vmem:[#allocation22_spill] sm:$0xff] %v15686_v37 }
 0x89d   :  { %v13289_v14 = vpop.f32.mrf.mxu1 }
 0x8a3   :  { %v15688_v44 = vpop.f32.mrf.mxu1 }
 0x8a4   :  { %17319 = vst [vmem:[#allocation27_spill] sm:$0xff] %v15688_v44 }
 0x8a5   :  { %v13303_v41 = vpop.f32.mrf.mxu1 }
 0x8a7   :  { %v15690_v4 = vpop.f32.mrf.mxu0 }
 0x8a8   :  { %17320 = vst [vmem:[#allocation43_spill] sm:$0xff] %v15690_v4 }
 0x8a9   :  { %v13310_v9 = vpop.f32.mrf.mxu0 }
 0x8ab   :  { %v15692_v3 = vpop.f32.mrf.mxu0 }
 0x8ac   :  { %17321 = vst [vmem:[#allocation44_spill] sm:$0xff] %v15692_v3  ;;  %v15694_v63 = vpop.f32.mrf.mxu1 }
 0x8ad   :  { %17322 = vst [vmem:[#allocation45_spill] sm:$0xff] %v15694_v63  ;;  %v13324_v31 = vpop.f32.mrf.mxu0  ;;  %v17331_v63 = vld [vmem:[#allocation33_spill] sm:$0xff] }
 0x8ae   :  { %v13317_v24 = vpop.f32.mrf.mxu1 }
 0x8af   :  { %v15730_v24 = vpop.permute.xlu0 %5799 }
 0x8b3   :  { %v4973_v2 = vpop.f32.mrf.mxu0 }
 0x8b4   :  { %v5551_v1 = vsel %vm1364_vm3, %v4973_v2, -inf }
 0x8b5   :  { %5552 = vmax.xlane.f32.xlu0 %v5551_v1  ;;  %v13338_v30 = vpop.f32.mrf.mxu0  ;;  %v15740_v1 = vpop.permute.xlu0 %5797 }
 0x8b9   :  { %v15744_v30 = vpop.permute.xlu0 %5957 }
 0x8bb   :  { %v5137_v0 = vpop.f32.mrf.mxu0 }
 0x8bc   :  { %v5557_v36 = vsel %vm1364_vm3, %v5137_v0, -inf }
 0x8bd   :  { %5558 = vmax.xlane.f32.xlu0 %v5557_v36  ;;  %v13352_v7 = vpop.f32.mrf.mxu0 }
 0x8ef   :  { %v15698_v38 = vpop.f32.mrf.mxu0 }
 0x8f0   :  { %v5563_v51 = vsel %vm1364_vm3, %v15698_v38, -inf }
 0x8f1   :  { %v13366_v43 = vpop.f32.mrf.mxu0 }
 0x8f4   :  { %v15700_v25 = vpop.f32.mrf.mxu1 }
 0x8f5   :  { %17323 = vst [vmem:[#allocation46_spill] sm:$0xff] %v15700_v25 }
 0x8f6   :  { %v13331_v32 = vpop.f32.mrf.mxu1 }
 0x8fb   :  { %v15702_v23 = vpop.f32.mrf.mxu0 }
 0x8fc   :  { %v5055_v59 = vpop.f32.mrf.mxu1  ;;  %v5569_v27 = vsel %vm1364_vm3, %v15702_v23, -inf }
 0x8fd   :  { %v13380_v8 = vpop.f32.mrf.mxu0  ;;  %v5554_v16 = vsel %vm1364_vm3, %v5055_v59, -inf }
 0x8fe   :  { %5555 = vmax.xlane.f32.xlu1 %v5554_v16  ;;  %v13345_v46 = vpop.f32.mrf.mxu1 }
 0x904   :  { %v5219_v19 = vpop.f32.mrf.mxu1 }
 0x905   :  { %v5560_v12 = vsel %vm1364_vm3, %v5219_v19, -inf }
 0x906   :  { %5561 = vmax.xlane.f32.xlu0 %v5560_v12  ;;  %v13359_v13 = vpop.f32.mrf.mxu1 }
 0x90a   :  { %5564 = vmax.xlane.f32.xlu0 %v5563_v51 }
 0x90c   :  { %v15708_v5 = vpop.f32.mrf.mxu1 }
 0x90d   :  { %v5566_v14 = vsel %vm1364_vm3, %v15708_v5, -inf }
 0x90e   :  { %5570 = vmax.xlane.f32.xlu0 %v5569_v27  ;;  %5567 = vmax.xlane.f32.xlu1 %v5566_v14  ;;  %v13373_v41 = vpop.f32.mrf.mxu1  ;;  %v15760_v27 = vpop.permute.xlu1 %5878 }
 0x912   :  { %v15762_v14 = vpop.permute.xlu1 %5876 }
 0x914   :  { %v15714_v9 = vpop.f32.mrf.mxu1 }
 0x915   :  { %v5572_v46 = vsel %vm1364_vm3, %v15714_v9, -inf }
 0x916   :  { %v13387_v31 = vpop.f32.mrf.mxu1  ;;  %v15764_v41 = vpop.permute.xlu1 %6036 }
 0x91f   :  { %6034 = vrot.lane.b32.xlu1 %v14959_v45, %s14384_s15 }
 0x923   :  { %6194 = vrot.lane.b32.xlu1 %v14976_v18, %s14384_s15 }
 0x924   :  { %5955 = vrot.lane.b32.xlu0 %v14929_v57, %s14384_s15 }
 0x927   :  { %6192 = vrot.lane.b32.xlu1 %v14984_v48, %s14384_s15 }
 0x928   :  { %6115 = vrot.lane.b32.xlu0 %v14947_v34, %s14384_s15 }
 0x92b   :  { %6398 = vrot.lane.b32.xlu1 %v14573_v6, %s14385_s3 }
 0x92c   :  { %6113 = vrot.lane.b32.xlu0 %v14953_v11, %s14384_s15 }
 0x92f   :  { %6396 = vrot.lane.b32.xlu1 %v14595_v15, %s14385_s3 }
 0x930   :  { %6316 = vrot.lane.b32.xlu0 %v14561_v62, %s14385_s3 }
 0x933   :  { %6480 = vrot.lane.b32.xlu1 %v17306_v52, %s14385_s3 }
 0x934   :  { %6314 = vrot.lane.b32.xlu0 %v17307_v58, %s14385_s3 }
 0x938   :  { %6312 = vrot.lane.b32.xlu0 %v17308_v10, %s14385_s3 }
 0x93c   :  { %6394 = vrot.lane.b32.xlu0 %v17309_v28, %s14385_s3 }
 0x93e   :  { %v5553_v36 = vpop.xlane.xlu0 %5552 }
 0x93f   :  { %v5575_v7 = vsub.f32 %v4973_v2, %v5553_v36 }
 0x941   :  { %v5583_v43 = vmul.f32 1.442695, %v5575_v7 }
 0x943   :  { %14041 = vpow2.f32 %v5583_v43 }
 0x946   :  { %v5559_v32 = vpop.xlane.xlu0 %5558 }
 0x947   :  { %v5577_v8 = vsub.f32 %v5137_v0, %v5559_v32  ;;  %v17324_v0 = vld [vmem:[#allocation26_spill] sm:$0xff] }
 0x949   :  { %v5587_v16 = vmul.f32 1.442695, %v5577_v8 }
 0x94b   :  { %14043 = vpow2.f32 %v5587_v16 }
 0x950   :  { %v15750_v12 = vpop.eup %14041 }
 0x951   :  { %v5599_v13 = vsel %vm1364_vm3, %v15750_v12, 0.0 }
 0x957   :  { %5573 = vmax.xlane.f32.xlu1 %v5572_v46 }
 0x958   :  { %v15754_v51 = vpop.eup %14043 }
 0x959   :  { %v5605_v2 = vsel %vm1364_vm3, %v15754_v51, 0.0 }
 0x95b   :  { %5600 = vadd.xlane.f32.xlu0 %v5599_v13 }
 0x95f   :  { %5606 = vadd.xlane.f32.xlu0 %v5605_v2 }
 0x968   :  { %6562 = vrot.lane.b32.xlu1 %v17324_v0, %s14385_s3 }
 0x987   :  { %v5556_v31 = vpop.xlane.xlu1 %5555 }
 0x988   :  { %v5576_v36 = vsub.f32 %v5055_v59, %v5556_v31 }
 0x98a   :  { %v5585_v7 = vmul.f32 1.442695, %v5576_v36 }
 0x98c   :  { %14045 = vpow2.f32 %v5585_v7 }
 0x98f   :  { %v5562_v43 = vpop.xlane.xlu0 %5561 }
 0x990   :  { %v5578_v32 = vsub.f32 %v5219_v19, %v5562_v43 }
 0x992   :  { %v5589_v8 = vmul.f32 1.442695, %v5578_v32  ;;  %v17325_v32 = vld [vmem:[#allocation29_spill] sm:$0xff] }
 0x993   :  { %v5565_v16 = vpop.xlane.xlu0 %5564 }
 0x994   :  { %14047 = vpow2.f32 %v5589_v8  ;;  %v5579_v46 = vsub.f32 %v15698_v38, %v5565_v16  ;;  %v17326_v16 = vld [vmem:[#allocation24_spill] sm:$0xff] }
 0x996   :  { %v5591_v13 = vmul.f32 1.442695, %v5579_v46 }
 0x997   :  { %v5571_v2 = vpop.xlane.xlu0 %5570  ;;  %v5568_v3 = vpop.xlane.xlu1 %5567 }
 0x998   :  { %14049 = vpow2.f32 %v5591_v13  ;;  %v5581_v4 = vsub.f32 %v15702_v23, %v5571_v2  ;;  %v5580_v61 = vsub.f32 %v15708_v5, %v5568_v3  ;;  %v17327_v2 = vld [vmem:[#allocation25_spill] sm:$0xff] }
 0x999   :  { %v15769_v25 = vpop.eup %14045 }
 0x99a   :  { %v5595_v59 = vmul.f32 1.442695, %v5581_v4  ;;  %v5593_v31 = vmul.f32 1.442695, %v5580_v61  ;;  %v5602_v19 = vsel %vm1364_vm3, %v15769_v25, 0.0 }
 0x99b   :  { %5603 = vadd.xlane.f32.xlu1 %v5602_v19  ;;  %v5956_v43 = vpop.permute.xlu0 %5955  ;;  %v15791_v8 = vpop.permute.xlu1 %6034 }
 0x99c   :  { %14051 = vpow2.f32 %v5595_v59 }
 0x99d   :  { %14053 = vpow2.f32 %v5593_v31  ;;  %v17328_v31 = vld [vmem:[#allocation31_spill] sm:$0xff] }
 0x99f   :  { %v15795_v46 = vpop.permute.xlu0 %6115  ;;  %v15797_v13 = vpop.permute.xlu1 %6194 }
 0x9a1   :  { %v15773_v36 = vpop.eup %14047 }
 0x9a2   :  { %v5608_v38 = vsel %vm1364_vm3, %v15773_v36, 0.0 }
 0x9a3   :  { %5609 = vadd.xlane.f32.xlu1 %v5608_v38  ;;  %v15801_v59 = vpop.permute.xlu0 %6113  ;;  %v15805_v19 = vpop.permute.xlu1 %6192  ;;  %v17329_v38 = vld [vmem:[#allocation28_spill] sm:$0xff] }
 0x9a5   :  { %v15777_v7 = vpop.eup %14049 }
 0x9a6   :  { %v5611_v3 = vsel %vm1364_vm3, %v15777_v7, 0.0 }
 0x9a7   :  { %5612 = vadd.xlane.f32.xlu0 %v5611_v3  ;;  %v15809_v3 = vpop.permute.xlu0 %6316 }
 0x9a9   :  { %v15781_v4 = vpop.eup %14051 }
 0x9aa   :  { %v15783_v61 = vpop.eup %14053  ;;  %v5617_v23 = vsel %vm1364_vm3, %v15781_v4, 0.0 }
 0x9ab   :  { %5618 = vadd.xlane.f32.xlu0 %v5617_v23  ;;  %v5614_v5 = vsel %vm1364_vm3, %v15783_v61, 0.0  ;;  %v15811_v23 = vpop.permute.xlu1 %6398  ;;  %v15815_v37 = vpop.permute.xlu0 %6314 }
 0x9ac   :  { %5615 = vadd.xlane.f32.xlu1 %v5614_v5  ;;  %v17330_v5 = vld [vmem:[#allocation30_spill] sm:$0xff] }
 0x9af   :  { %v15819_v44 = vpop.permute.xlu1 %6396 }
 0x9bd   :  { %6560 = vrot.lane.b32.xlu1 %v17325_v32, %s14385_s3 }
 0x9c1   :  { %6478 = vrot.lane.b32.xlu0 %v17326_v16, %s14385_s3 }
 0x9c5   :  { %6476 = vrot.lane.b32.xlu0 %v17327_v2, %s14385_s3  ;;  %v17333_v2 = vld [vmem:[#allocation34_spill] sm:$0xff] }
 0x9c9   :  { %6558 = vrot.lane.b32.xlu0 %v17328_v31, %s14385_s3  ;;  %v15823_v31 = vpop.permute.xlu0 %6312 }
 0x9cd   :  { %6642 = vrot.lane.b32.xlu0 %v17329_v38, %s14385_s3  ;;  %v15825_v38 = vpop.permute.xlu1 %6480  ;;  %v15829_v16 = vpop.permute.xlu0 %6394 }
 0x9d1   :  { %6640 = vrot.lane.b32.xlu0 %v17330_v5, %s14385_s3 }
 0x9d5   :  { %6722 = vrot.lane.b32.xlu0 %v17331_v63, %s14385_s3 }
 0x9d9   :  { %6806 = vrot.lane.b32.xlu0 %v17332_v35, %s14385_s3 }
 0x9dd   :  { %6804 = vrot.lane.b32.xlu0 %v17333_v2, %s14385_s3 }
 0x9e0   :  { %v5574_v5 = vpop.xlane.xlu1 %5573 }
 0x9e1   :  { %v5582_v32 = vsub.f32 %v15714_v9, %v5574_v5  ;;  %7058 = vrot.lane.b32.xlu0 %v14695_v47, %s14385_s3 }
 0x9e3   :  { %v5597_v63 = vmul.f32 1.442695, %v5582_v32 }
 0x9e4   :  { %v5601_v0 = vpop.xlane.xlu0 %5600 }
 0x9e5   :  { %14055 = vpow2.f32 %v5597_v63  ;;  %7216 = vrot.lane.b32.xlu0 %v14850_v22, %s14385_s3 }
 0x9e6   :  { %14057 = vrcp.f32 %v5601_v0 }
 0x9e8   :  { %v5607_v35 = vpop.xlane.xlu0 %5606 }
 0x9e9   :  { %14059 = vrcp.f32 %v5607_v35  ;;  %7214 = vrot.lane.b32.xlu0 %v14856_v55, %s14385_s3 }
 0x9ed   :  { %7374 = vrot.lane.b32.xlu0 %v14864_v26, %s14385_s3 }
 0x9f2   :  { %v15840_v2 = vpop.eup %14055 }
 0x9f3   :  { %v14058_v9 = vpop.eup %14057  ;;  %v5620_v32 = vsel %vm1364_vm3, %v15840_v2, 0.0 }
 0x9f4   :  { %5621 = vadd.xlane.f32.xlu1 %v5620_v32  ;;  %v5631_v63 = vmul.f32 %v14058_v9, %v15750_v12 }
 0x9f6   :  { %v14060_v5 = vpop.eup %14059  ;;  %13393 = vmatmul.mubr.msk.f32.vlgmr.msra.gmra.mxu0 %vm1364_vm3, %v5631_v63 }
 0x9f7   :  { %13403 = vmatpush3.msra.mxu0 %v15730_v24  ;;  %13406 = vmatprep.mubr.msk.f32.mxu0 %vm14381_vm1, %v17296_v60  ;;  %v5633_v35 = vmul.f32 %v14060_v5, %v15754_v51  ;;  %v15873_v24 = vpop.permute.xlu1 %6562 }
 0x9f8   :  { %13404 = vmatprep.subr.mxu0 %v17296_v60 }
 0x9f9   :  { %13405 = vmatpush3.msra.mxu0 %v15740_v1 }
 0x9fa   :  { %13416 = vmatprep.subr.mxu0 %v17296_v60  ;;  %13407 = vmatmul.mubr.msk.f32.vlgmr.msra.gmra.mxu0 %vm1364_vm3, %v5633_v35 }
 0x9fb   :  { %13417 = vmatpush3.msra.mxu0 %v15744_v30  ;;  %13420 = vmatprep.mubr.msk.f32.mxu0 %vm14381_vm1, %v17296_v60 }
 0x9fc   :  { %13418 = vmatprep.subr.mxu0 %v17296_v60 }
 0x9fd   :  { %13419 = vmatpush3.msra.mxu0 %v5956_v43 }
 0x9fe   :  { %13430 = vmatprep.subr.mxu0 %v17296_v60 }
 0xa05   :  { %6644 = vrot.lane.b32.xlu1 %v14613_v21, %s14385_s3 }
 0xa09   :  { %6726 = vrot.lane.b32.xlu1 %v14638_v29, %s14385_s3 }
 0xa0d   :  { %6724 = vrot.lane.b32.xlu1 %v14671_v40, %s14385_s3 }
 0xa11   :  { %6808 = vrot.lane.b32.xlu1 %v14651_v33, %s14385_s3 }
 0xa15   :  { %6890 = vrot.lane.b32.xlu1 %v14687_v42, %s14385_s3 }
 0xa19   :  { %6888 = vrot.lane.b32.xlu1 %v14708_v50, %s14385_s3 }
 0xa1d   :  { %6886 = vrot.lane.b32.xlu1 %v14726_v54, %s14385_s3 }
 0xa21   :  { %7137 = vrot.lane.b32.xlu1 %v14723_v53, %s14385_s3 }
 0xa24   :  { %v5604_v1 = vpop.xlane.xlu1 %5603 }
 0xa25   :  { %14061 = vrcp.f32 %v5604_v1  ;;  %7056 = vrot.lane.b32.xlu1 %v14703_v49, %s14385_s3 }
 0xa29   :  { %7135 = vrot.lane.b32.xlu1 %v14730_v56, %s14385_s3 }
 0xa2c   :  { %v5610_v30 = vpop.xlane.xlu1 %5609 }
 0xa2d   :  { %14063 = vrcp.f32 %v5610_v30  ;;  %7295 = vrot.lane.b32.xlu1 %v14900_v39, %s14385_s3 }
 0xa30   :  { %v5613_v12 = vpop.xlane.xlu0 %5612 }
 0xa31   :  { %14065 = vrcp.f32 %v5613_v12  ;;  %7293 = vrot.lane.b32.xlu1 %v14906_v17, %s14385_s3 }
 0xa32   :  { %v14062_v51 = vpop.eup %14061 }
 0xa33   :  { %v5632_v0 = vmul.f32 %v14062_v51, %v15769_v25 }
 0xa34   :  { %v5619_v43 = vpop.xlane.xlu0 %5618 }
 0xa35   :  { %14067 = vrcp.f32 %v5619_v43  ;;  %v5616_v9 = vpop.xlane.xlu1 %5615  ;;  %7453 = vrot.lane.b32.xlu1 %v14912_v20, %s14385_s3  ;;  %13400 = vmatmul.mubr.msk.f32.vlgmr.msra.gmra.mxu1 %vm1364_vm3, %v5632_v0 }
 0xa36   :  { %14069 = vrcp.f32 %v5616_v9  ;;  %13410 = vmatpush3.msra.mxu1 %v15760_v27  ;;  %13413 = vmatprep.mubr.msk.f32.mxu1 %vm14381_vm1, %v17296_v60 }
 0xa37   :  { %13411 = vmatprep.subr.mxu1 %v17296_v60 }
 0xa38   :  { %13412 = vmatpush3.msra.mxu1 %v15762_v14 }
 0xa39   :  { %13423 = vmatprep.subr.mxu1 %v17296_v60 }
 0xa3a   :  { %v14064_v25 = vpop.eup %14063 }
 0xa3b   :  { %v5634_v32 = vmul.f32 %v14064_v25, %v15773_v36 }
 0xa3d   :  { %13414 = vmatmul.mubr.msk.f32.vlgmr.msra.gmra.mxu1 %vm1364_vm3, %v5634_v32 }
 0xa3e   :  { %v14066_v63 = vpop.eup %14065  ;;  %13424 = vmatpush3.msra.mxu1 %v15764_v41  ;;  %13427 = vmatprep.mubr.msk.f32.mxu1 %vm14381_vm1, %v17296_v60 }
 0xa3f   :  { %13425 = vmatprep.subr.mxu1 %v17296_v60  ;;  %v5635_v27 = vmul.f32 %v14066_v63, %v15777_v7 }
 0xa40   :  { %13426 = vmatpush3.msra.mxu1 %v15791_v8 }
 0xa41   :  { %13421 = vmatmul.mubr.msk.f32.vlgmr.msra.gmra.mxu0 %vm1364_vm3, %v5635_v27  ;;  %13437 = vmatprep.subr.mxu1 %v17296_v60 }
 0xa42   :  { %v14068_v14 = vpop.eup %14067  ;;  %13431 = vmatpush3.msra.mxu0 %v15795_v46  ;;  %13434 = vmatprep.mubr.msk.f32.mxu0 %vm14381_vm1, %v17296_v60  ;;  %v6561_v46 = vpop.permute.xlu1 %6560 }
 0xa43   :  { %v14070_v41 = vpop.eup %14069  ;;  %13432 = vmatprep.subr.mxu0 %v17296_v60  ;;  %v5637_v36 = vmul.f32 %v14068_v14, %v15781_v4  ;;  %v6479_v4 = vpop.permute.xlu0 %6478 }
 0xa44   :  { %13433 = vmatpush3.msra.mxu0 %v15801_v59  ;;  %v5636_v7 = vmul.f32 %v14070_v41, %v15783_v61 }
 0xa45   :  { %13444 = vmatprep.subr.mxu0 %v17296_v60  ;;  %13435 = vmatmul.mubr.msk.f32.vlgmr.msra.gmra.mxu0 %vm1364_vm3, %v5637_v36 }
 0xa46   :  { %13428 = vmatmul.mubr.msk.f32.vlgmr.msra.gmra.mxu1 %vm1364_vm3, %v5636_v7  ;;  %13445 = vmatpush3.xpose.msk.msra.mxu0 %vm731_vm2, %v15809_v3 }
 0xa47   :  { %13438 = vmatpush3.msra.mxu1 %v15797_v13  ;;  %13446 = vmatprep.subr.mxu0 %v17296_v60 }
 0xa48   :  { %13439 = vmatprep.subr.mxu1 %v17296_v60  ;;  %13448 = vmatprep.mubr.msk.f32.mxu0 %vm14381_vm1, %v17296_v60 }
 0xa49   :  { %13440 = vmatpush3.msra.mxu1 %v15805_v19  ;;  %13441 = vmatprep.mubr.msk.f32.mxu1 %vm14381_vm1, %v17296_v60 }
 0xa4a   :  { %13447 = vmatpush3.xpose.msk.msra.mxu0 %vm731_vm2, %v15815_v37  ;;  %13451 = vmatprep.subr.mxu1 %v17296_v60  ;;  %v6477_v37 = vpop.permute.xlu0 %6476 }
 0xa4b   :  { %13458 = vmatprep.subr.mxu0 %v17296_v60 }
 0xa4d   :  { %13449 = vmatmul.mubr.msk.f32.vlgmr.msra.gmra.mxu0 %vm731_vm2, %v15823_v31 }
 0xa4e   :  { %13459 = vmatpush3.xpose.msk.msra.mxu0 %vm731_vm2, %v15825_v38  ;;  %13462 = vmatprep.mubr.msk.f32.mxu0 %vm14381_vm1, %v17296_v60  ;;  %v6559_v61 = vpop.permute.xlu0 %6558 }
 0xa4f   :  { %13460 = vmatprep.subr.mxu0 %v17296_v60 }
 0xa52   :  { %13461 = vmatpush3.xpose.msk.msra.mxu0 %vm731_vm2, %v6479_v4  ;;  %v6643_v8 = vpop.permute.xlu0 %6642 }
 0xa53   :  { %13472 = vmatprep.subr.mxu0 %v17296_v60 }
 0xa55   :  { %13463 = vmatmul.mubr.msk.f32.vlgmr.msra.gmra.mxu0 %vm731_vm2, %v6477_v37 }
 0xa56   :  { %13476 = vmatprep.mubr.msk.f32.mxu0 %vm14381_vm1, %v17296_v60  ;;  %v6641_v13 = vpop.permute.xlu0 %6640 }
 0xa5a   :  { %v6723_v19 = vpop.permute.xlu0 %6722 }
 0xa5e   :  { %v6807_v3 = vpop.permute.xlu0 %6806 }
 0xa62   :  { %v6805_v12 = vpop.permute.xlu0 %6804 }
 0xa7d   :  { %v5622_v59 = vpop.xlane.xlu1 %5621 }
 0xa7e   :  { %14071 = vrcp.f32 %v5622_v59 }
 0xa81   :  { %v6645_v31 = vpop.permute.xlu1 %6644 }
 0xa82   :  { %13473 = vmatpush3.xpose.msk.msra.mxu0 %vm731_vm2, %v6645_v31 }
 0xa83   :  { %13474 = vmatprep.subr.mxu0 %v17296_v60 }
 0xa85   :  { %v6727_v38 = vpop.permute.xlu1 %6726 }
 0xa86   :  { %13475 = vmatpush3.xpose.msk.msra.mxu0 %vm731_vm2, %v6643_v8 }
 0xa87   :  { %13486 = vmatprep.subr.mxu0 %v17296_v60 }
 0xa89   :  { %13477 = vmatmul.mubr.msk.f32.vlgmr.msra.gmra.mxu0 %vm731_vm2, %v6641_v13  ;;  %v6725_v5 = vpop.permute.xlu1 %6724 }
 0xa8a   :  { %13490 = vmatprep.mubr.msk.f32.mxu0 %vm14381_vm1, %v17296_v60 }
 0xa8b   :  { %v14072_v35 = vpop.eup %14071 }
 0xa8c   :  { %v5638_v1 = vmul.f32 %v14072_v35, %v15840_v2  ;;  %v7059_v2 = vpop.permute.xlu0 %7058 }
 0xa8d   :  { %v6809_v30 = vpop.permute.xlu1 %6808 }
 0xa8e   :  { %13442 = vmatmul.mubr.msk.f32.vlgmr.msra.gmra.mxu1 %vm1364_vm3, %v5638_v1  ;;  %13487 = vmatpush3.xpose.msk.msra.mxu0 %vm731_vm2, %v6809_v30 }
 0xa8f   :  { %13452 = vmatpush3.xpose.msk.msra.mxu1 %vm731_vm2, %v15811_v23  ;;  %13488 = vmatprep.subr.mxu0 %v17296_v60 }
 0xa90   :  { %13453 = vmatprep.subr.mxu1 %v17296_v60  ;;  %13455 = vmatprep.mubr.msk.f32.mxu1 %vm14381_vm1, %v17296_v60 }
 0xa91   :  { %v6891_v51 = vpop.permute.xlu1 %6890 }
 0xa92   :  { %13489 = vmatpush3.xpose.msk.msra.mxu0 %vm731_vm2, %v6807_v3 }
 0xa93   :  { %13454 = vmatpush3.xpose.msk.msra.mxu1 %vm731_vm2, %v15819_v44  ;;  %13500 = vmatprep.subr.mxu0 %v17296_v60 }
 0xa94   :  { %13465 = vmatprep.subr.mxu1 %v17296_v60 }
 0xa95   :  { %13491 = vmatmul.mubr.msk.f32.vlgmr.msra.gmra.mxu0 %vm731_vm2, %v6805_v12  ;;  %v6889_v23 = vpop.permute.xlu1 %6888 }
 0xa96   :  { %13456 = vmatmul.mubr.msk.f32.vlgmr.msra.gmra.mxu1 %vm731_vm2, %v15829_v16  ;;  %13501 = vmatpush3.msra.mxu0 %v7059_v2 }
 0xa97   :  { %13466 = vmatpush3.xpose.msk.msra.mxu1 %vm731_vm2, %v15873_v24  ;;  %13469 = vmatprep.mubr.msk.f32.mxu1 %vm14381_vm1, %v17296_v60 }
 0xa98   :  { %13467 = vmatprep.subr.mxu1 %v17296_v60  ;;  %13502 = vmatprep.subr.mxu0 %v17296_v60 }
 0xa99   :  { %v6887_v44 = vpop.permute.xlu1 %6886  ;;  %13504 = vmatprep.mubr.msk.f32.mxu0 %vm14381_vm1, %v17296_v60 }
 0xa9b   :  { %13468 = vmatpush3.xpose.msk.msra.mxu1 %vm731_vm2, %v6561_v46 }
 0xa9c   :  { %13479 = vmatprep.subr.mxu1 %v17296_v60 }
 0xa9d   :  { %v7138_v16 = vpop.permute.xlu1 %7137 }
 0xa9e   :  { %13470 = vmatmul.mubr.msk.f32.vlgmr.msra.gmra.mxu1 %vm731_vm2, %v6559_v61 }
 0xa9f   :  { %13480 = vmatpush3.xpose.msk.msra.mxu1 %vm731_vm2, %v6727_v38  ;;  %13483 = vmatprep.mubr.msk.f32.mxu1 %vm14381_vm1, %v17296_v60 }
 0xaa0   :  { %13481 = vmatprep.subr.mxu1 %v17296_v60 }
 0xaa1   :  { %v7057_v24 = vpop.permute.xlu1 %7056 }
 0xaa2   :  { %13503 = vmatpush3.msra.mxu0 %v7057_v24 }
 0xaa3   :  { %13482 = vmatpush3.xpose.msk.msra.mxu1 %vm731_vm2, %v6725_v5  ;;  %13514 = vmatprep.subr.mxu0 %v17296_v60 }
 0xaa4   :  { %13493 = vmatprep.subr.mxu1 %v17296_v60 }
 0xaa5   :  { %v7136_v0 = vpop.permute.xlu1 %7135 }
 0xaa6   :  { %13484 = vmatmul.mubr.msk.f32.vlgmr.msra.gmra.mxu1 %vm731_vm2, %v6723_v19 }
 0xaa7   :  { %13494 = vmatpush3.xpose.msk.msra.mxu1 %vm731_vm2, %v6891_v51  ;;  %13497 = vmatprep.mubr.msk.f32.mxu1 %vm14381_vm1, %v17296_v60 }
 0xaa8   :  { %13495 = vmatprep.subr.mxu1 %v17296_v60 }
 0xaab   :  { %13496 = vmatpush3.xpose.msk.msra.mxu1 %vm731_vm2, %v6889_v23 }
 0xaac   :  { %13507 = vmatprep.subr.mxu1 %v17296_v60 }
 0xaae   :  { %13498 = vmatmul.mubr.msk.f32.vlgmr.msra.gmra.mxu1 %vm731_vm2, %v6887_v44 }
 0xaaf   :  { %13508 = vmatpush3.msra.mxu1 %v7138_v16  ;;  %13511 = vmatprep.mubr.msk.f32.mxu1 %vm14381_vm1, %v17296_v60 }
 0xab0   :  { %13509 = vmatprep.subr.mxu1 %v17296_v60 }
 0xab1   :  { %13510 = vmatpush3.msra.mxu1 %v7136_v0 }
 0xab2   :  { %13521 = vmatprep.subr.mxu1 %v17296_v60 }
 0xab6   :  { %v15995_v43 = vpop.f32.mrf.mxu0 }
 0xab7   :  { %17334 = vst [vmem:[#allocation47_spill] sm:$0xff] %v15995_v43  ;;  %v17350_v43 = vld [vmem:[#allocation32_spill] sm:$0xff] }
 0xab8   :  { %v13394_v9 = vpop.f32.mrf.mxu0 }
 0xaba   :  { %v15997_v25 = vpop.f32.mrf.mxu0 }
 0xabb   :  { %17335 = vst [vmem:[#allocation48_spill] sm:$0xff] %v15997_v25 }
 0xabc   :  { %v13408_v32 = vpop.f32.mrf.mxu0 }
 0xaf5   :  { %v15999_v63 = vpop.f32.mrf.mxu1 }
 0xaf6   :  { %17336 = vst [vmem:[#allocation49_spill] sm:$0xff] %v15999_v63 }
 0xaf7   :  { %v13401_v27 = vpop.f32.mrf.mxu1 }
 0xafd   :  { %v16001_v14 = vpop.f32.mrf.mxu1 }
 0xafe   :  { %17337 = vst [vmem:[#allocation50_spill] sm:$0xff] %v16001_v14 }
 0xaff   :  { %v13415_v41 = vpop.f32.mrf.mxu1 }
 0xb01   :  { %v16003_v36 = vpop.f32.mrf.mxu0 }
 0xb02   :  { %17338 = vst [vmem:[#allocation51_spill] sm:$0xff] %v16003_v36 }
 0xb03   :  { %v13422_v7 = vpop.f32.mrf.mxu0 }
 0xb05   :  { %v16005_v4 = vpop.f32.mrf.mxu0 }
 0xb06   :  { %17339 = vst [vmem:[#allocation52_spill] sm:$0xff] %v16005_v4  ;;  %v16007_v37 = vpop.f32.mrf.mxu1 }
 0xb07   :  { %17340 = vst [vmem:[#allocation53_spill] sm:$0xff] %v16007_v37  ;;  %v13436_v61 = vpop.f32.mrf.mxu0  ;;  %v17349_v37 = vld [vmem:[#allocation33_spill] sm:$0xff] }
 0xb08   :  { %v13429_v8 = vpop.f32.mrf.mxu1 }
 0xb09   :  { %v16043_v8 = vpop.permute.xlu0 %7216 }
 0xb0d   :  { %v6390_v46 = vpop.f32.mrf.mxu0 }
 0xb0e   :  { %v6968_v13 = vsel %vm1364_vm3, %v6390_v46, -inf }
 0xb0f   :  { %6969 = vmax.xlane.f32.xlu0 %v6968_v13  ;;  %v13450_v59 = vpop.f32.mrf.mxu0  ;;  %v16053_v13 = vpop.permute.xlu0 %7214 }
 0xb13   :  { %v16057_v59 = vpop.permute.xlu0 %7374 }
 0xb15   :  { %v6554_v31 = vpop.f32.mrf.mxu0 }
 0xb16   :  { %v6974_v19 = vsel %vm1364_vm3, %v6554_v31, -inf }
 0xb17   :  { %6975 = vmax.xlane.f32.xlu0 %v6974_v19  ;;  %v13464_v38 = vpop.f32.mrf.mxu0 }
 0xb49   :  { %v16011_v3 = vpop.f32.mrf.mxu0 }
 0xb4a   :  { %v6980_v0 = vsel %vm1364_vm3, %v16011_v3, -inf }
 0xb4b   :  { %v13478_v5 = vpop.f32.mrf.mxu0 }
 0xb4e   :  { %v16013_v35 = vpop.f32.mrf.mxu1 }
 0xb4f   :  { %17341 = vst [vmem:[#allocation54_spill] sm:$0xff] %v16013_v35 }
 0xb50   :  { %v13443_v1 = vpop.f32.mrf.mxu1 }
 0xb55   :  { %v16015_v30 = vpop.f32.mrf.mxu0 }
 0xb56   :  { %v6472_v12 = vpop.f32.mrf.mxu1  ;;  %v6986_v32 = vsel %vm1364_vm3, %v16015_v30, -inf }
 0xb57   :  { %v13492_v51 = vpop.f32.mrf.mxu0  ;;  %v6971_v2 = vsel %vm1364_vm3, %v6472_v12, -inf }
 0xb58   :  { %6972 = vmax.xlane.f32.xlu1 %v6971_v2  ;;  %v13457_v23 = vpop.f32.mrf.mxu1 }
 0xb5e   :  { %v6636_v44 = vpop.f32.mrf.mxu1 }
 0xb5f   :  { %v6977_v16 = vsel %vm1364_vm3, %v6636_v44, -inf }
 0xb60   :  { %6978 = vmax.xlane.f32.xlu0 %v6977_v16  ;;  %v13471_v24 = vpop.f32.mrf.mxu1 }
 0xb64   :  { %6981 = vmax.xlane.f32.xlu0 %v6980_v0 }
 0xb66   :  { %v16021_v9 = vpop.f32.mrf.mxu1 }
 0xb67   :  { %v6983_v27 = vsel %vm1364_vm3, %v16021_v9, -inf }
 0xb68   :  { %6987 = vmax.xlane.f32.xlu0 %v6986_v32  ;;  %6984 = vmax.xlane.f32.xlu1 %v6983_v27  ;;  %v13485_v41 = vpop.f32.mrf.mxu1  ;;  %v16073_v32 = vpop.permute.xlu1 %7295 }
 0xb6c   :  { %v16075_v27 = vpop.permute.xlu1 %7293 }
 0xb6e   :  { %v16027_v7 = vpop.f32.mrf.mxu1 }
 0xb6f   :  { %v6989_v23 = vsel %vm1364_vm3, %v16027_v7, -inf }
 0xb70   :  { %v13499_v61 = vpop.f32.mrf.mxu1  ;;  %v16077_v41 = vpop.permute.xlu1 %7453 }
 0xb79   :  { %7451 = vrot.lane.b32.xlu1 %v14959_v45, %s14385_s3 }
 0xb7d   :  { %7611 = vrot.lane.b32.xlu1 %v14976_v18, %s14385_s3 }
 0xb7e   :  { %7372 = vrot.lane.b32.xlu0 %v14929_v57, %s14385_s3 }
 0xb81   :  { %7609 = vrot.lane.b32.xlu1 %v14984_v48, %s14385_s3 }
 0xb82   :  { %7532 = vrot.lane.b32.xlu0 %v14947_v34, %s14385_s3 }
 0xb85   :  { %7815 = vrot.lane.b32.xlu1 %v14573_v6, %s14386_s16 }
 0xb86   :  { %7530 = vrot.lane.b32.xlu0 %v14953_v11, %s14385_s3 }
 0xb89   :  { %7813 = vrot.lane.b32.xlu1 %v14595_v15, %s14386_s16 }
 0xb8a   :  { %7733 = vrot.lane.b32.xlu0 %v14561_v62, %s14386_s16 }
 0xb8d   :  { %7897 = vrot.lane.b32.xlu1 %v17306_v52, %s14386_s16 }
 0xb8e   :  { %7731 = vrot.lane.b32.xlu0 %v17307_v58, %s14386_s16 }
 0xb92   :  { %7729 = vrot.lane.b32.xlu0 %v17308_v10, %s14386_s16 }
 0xb96   :  { %7811 = vrot.lane.b32.xlu0 %v17309_v28, %s14386_s16 }
 0xb98   :  { %v6970_v19 = vpop.xlane.xlu0 %6969 }
 0xb99   :  { %v6992_v38 = vsub.f32 %v6390_v46, %v6970_v19 }
 0xb9b   :  { %v7000_v5 = vmul.f32 1.442695, %v6992_v38 }
 0xb9d   :  { %14073 = vpow2.f32 %v7000_v5 }
 0xba0   :  { %v6976_v1 = vpop.xlane.xlu0 %6975 }
 0xba1   :  { %v6994_v51 = vsub.f32 %v6554_v31, %v6976_v1  ;;  %v17342_v31 = vld [vmem:[#allocation26_spill] sm:$0xff] }
 0xba3   :  { %v7004_v2 = vmul.f32 1.442695, %v6994_v51 }
 0xba5   :  { %14075 = vpow2.f32 %v7004_v2 }
 0xbaa   :  { %v16063_v16 = vpop.eup %14073 }
 0xbab   :  { %v7016_v24 = vsel %vm1364_vm3, %v16063_v16, 0.0 }
 0xbb1   :  { %6990 = vmax.xlane.f32.xlu1 %v6989_v23 }
 0xbb2   :  { %v16067_v0 = vpop.eup %14075 }
 0xbb3   :  { %v7022_v46 = vsel %vm1364_vm3, %v16067_v0, 0.0 }
 0xbb5   :  { %7017 = vadd.xlane.f32.xlu0 %v7016_v24 }
 0xbb9   :  { %7023 = vadd.xlane.f32.xlu0 %v7022_v46 }
 0xbc2   :  { %7979 = vrot.lane.b32.xlu1 %v17342_v31, %s14386_s16 }
 0xbe1   :  { %v6973_v61 = vpop.xlane.xlu1 %6972 }
 0xbe2   :  { %v6993_v19 = vsub.f32 %v6472_v12, %v6973_v61 }
 0xbe4   :  { %v7002_v38 = vmul.f32 1.442695, %v6993_v19 }
 0xbe6   :  { %14077 = vpow2.f32 %v7002_v38 }
 0xbe9   :  { %v6979_v5 = vpop.xlane.xlu0 %6978 }
 0xbea   :  { %v6995_v1 = vsub.f32 %v6636_v44, %v6979_v5 }
 0xbec   :  { %v7006_v51 = vmul.f32 1.442695, %v6995_v1  ;;  %v17343_v1 = vld [vmem:[#allocation29_spill] sm:$0xff] }
 0xbed   :  { %v6982_v2 = vpop.xlane.xlu0 %6981 }
 0xbee   :  { %14079 = vpow2.f32 %v7006_v51  ;;  %v6996_v23 = vsub.f32 %v16011_v3, %v6982_v2  ;;  %v17344_v2 = vld [vmem:[#allocation24_spill] sm:$0xff] }
 0xbf0   :  { %v7008_v24 = vmul.f32 1.442695, %v6996_v23 }
 0xbf1   :  { %v6988_v46 = vpop.xlane.xlu0 %6987  ;;  %v6985_v4 = vpop.xlane.xlu1 %6984 }
 0xbf2   :  { %14081 = vpow2.f32 %v7008_v24  ;;  %v6998_v36 = vsub.f32 %v16015_v30, %v6988_v46  ;;  %v6997_v25 = vsub.f32 %v16021_v9, %v6985_v4  ;;  %v17345_v46 = vld [vmem:[#allocation25_spill] sm:$0xff] }
 0xbf3   :  { %v16082_v35 = vpop.eup %14077 }
 0xbf4   :  { %v7012_v12 = vmul.f32 1.442695, %v6998_v36  ;;  %v7010_v61 = vmul.f32 1.442695, %v6997_v25  ;;  %v7019_v44 = vsel %vm1364_vm3, %v16082_v35, 0.0 }
 0xbf5   :  { %7020 = vadd.xlane.f32.xlu1 %v7019_v44  ;;  %v7373_v5 = vpop.permute.xlu0 %7372  ;;  %v16104_v51 = vpop.permute.xlu1 %7451 }
 0xbf6   :  { %14083 = vpow2.f32 %v7012_v12 }
 0xbf7   :  { %14085 = vpow2.f32 %v7010_v61  ;;  %v17346_v61 = vld [vmem:[#allocation31_spill] sm:$0xff] }
 0xbf9   :  { %v16108_v23 = vpop.permute.xlu0 %7532  ;;  %v16110_v24 = vpop.permute.xlu1 %7611 }
 0xbfb   :  { %v16086_v19 = vpop.eup %14079 }
 0xbfc   :  { %v7025_v3 = vsel %vm1364_vm3, %v16086_v19, 0.0 }
 0xbfd   :  { %7026 = vadd.xlane.f32.xlu1 %v7025_v3  ;;  %v16114_v12 = vpop.permute.xlu0 %7530  ;;  %v16118_v44 = vpop.permute.xlu1 %7609  ;;  %v17347_v3 = vld [vmem:[#allocation28_spill] sm:$0xff] }
 0xbff   :  { %v16090_v38 = vpop.eup %14081 }
 0xc00   :  { %v7028_v4 = vsel %vm1364_vm3, %v16090_v38, 0.0 }
 0xc01   :  { %7029 = vadd.xlane.f32.xlu0 %v7028_v4  ;;  %v16122_v4 = vpop.permute.xlu0 %7733 }
 0xc03   :  { %v16094_v36 = vpop.eup %14083 }
 0xc04   :  { %v16096_v25 = vpop.eup %14085  ;;  %v7034_v30 = vsel %vm1364_vm3, %v16094_v36, 0.0 }
 0xc05   :  { %7035 = vadd.xlane.f32.xlu0 %v7034_v30  ;;  %v7031_v9 = vsel %vm1364_vm3, %v16096_v25, 0.0  ;;  %v16124_v30 = vpop.permute.xlu1 %7815  ;;  %v16128_v63 = vpop.permute.xlu0 %7731 }
 0xc06   :  { %7032 = vadd.xlane.f32.xlu1 %v7031_v9  ;;  %v17348_v9 = vld [vmem:[#allocation30_spill] sm:$0xff] }
 0xc09   :  { %v16132_v14 = vpop.permute.xlu1 %7813 }
 0xc17   :  { %7977 = vrot.lane.b32.xlu1 %v17343_v1, %s14386_s16 }
 0xc1b   :  { %7895 = vrot.lane.b32.xlu0 %v17344_v2, %s14386_s16 }
 0xc1f   :  { %7893 = vrot.lane.b32.xlu0 %v17345_v46, %s14386_s16  ;;  %v17351_v46 = vld [vmem:[#allocation34_spill] sm:$0xff] }
 0xc23   :  { %7975 = vrot.lane.b32.xlu0 %v17346_v61, %s14386_s16  ;;  %v16136_v61 = vpop.permute.xlu0 %7729 }
 0xc27   :  { %8059 = vrot.lane.b32.xlu0 %v17347_v3, %s14386_s16  ;;  %v16138_v3 = vpop.permute.xlu1 %7897  ;;  %v16142_v2 = vpop.permute.xlu0 %7811 }
 0xc2b   :  { %8057 = vrot.lane.b32.xlu0 %v17348_v9, %s14386_s16 }
 0xc2f   :  { %8139 = vrot.lane.b32.xlu0 %v17349_v37, %s14386_s16 }
 0xc33   :  { %8223 = vrot.lane.b32.xlu0 %v17350_v43, %s14386_s16 }
 0xc37   :  { %8221 = vrot.lane.b32.xlu0 %v17351_v46, %s14386_s16 }
 0xc3a   :  { %v6991_v9 = vpop.xlane.xlu1 %6990 }
 0xc3b   :  { %v6999_v1 = vsub.f32 %v16027_v7, %v6991_v9  ;;  %8475 = vrot.lane.b32.xlu0 %v14695_v47, %s14386_s16 }
 0xc3d   :  { %v7014_v37 = vmul.f32 1.442695, %v6999_v1 }
 0xc3e   :  { %v7018_v31 = vpop.xlane.xlu0 %7017 }
 0xc3f   :  { %14087 = vpow2.f32 %v7014_v37  ;;  %8633 = vrot.lane.b32.xlu0 %v14850_v22, %s14386_s16 }
 0xc40   :  { %14089 = vrcp.f32 %v7018_v31 }
 0xc42   :  { %v7024_v43 = vpop.xlane.xlu0 %7023 }
 0xc43   :  { %14091 = vrcp.f32 %v7024_v43  ;;  %8631 = vrot.lane.b32.xlu0 %v14856_v55, %s14386_s16 }
 0xc47   :  { %8791 = vrot.lane.b32.xlu0 %v14864_v26, %s14386_s16 }
 0xc4c   :  { %v16153_v46 = vpop.eup %14087 }
 0xc4d   :  { %v14090_v7 = vpop.eup %14089  ;;  %v7037_v1 = vsel %vm1364_vm3, %v16153_v46, 0.0 }
 0xc4e   :  { %7038 = vadd.xlane.f32.xlu1 %v7037_v1  ;;  %v7048_v37 = vmul.f32 %v14090_v7, %v16063_v16 }
 0xc50   :  { %v14092_v9 = vpop.eup %14091  ;;  %13505 = vmatmul.mubr.msk.f32.vlgmr.msra.gmra.mxu0 %vm1364_vm3, %v7048_v37 }
 0xc51   :  { %13515 = vmatpush3.msra.mxu0 %v16043_v8  ;;  %13518 = vmatprep.mubr.msk.f32.mxu0 %vm14381_vm1, %v17296_v60  ;;  %v7050_v43 = vmul.f32 %v14092_v9, %v16067_v0  ;;  %v16186_v8 = vpop.permute.xlu1 %7979 }
 0xc52   :  { %13516 = vmatprep.subr.mxu0 %v17296_v60 }
 0xc53   :  { %13517 = vmatpush3.msra.mxu0 %v16053_v13 }
 0xc54   :  { %13528 = vmatprep.subr.mxu0 %v17296_v60  ;;  %13519 = vmatmul.mubr.msk.f32.vlgmr.msra.gmra.mxu0 %vm1364_vm3, %v7050_v43 }
 0xc55   :  { %13529 = vmatpush3.msra.mxu0 %v16057_v59  ;;  %13532 = vmatprep.mubr.msk.f32.mxu0 %vm14381_vm1, %v17296_v60 }
 0xc56   :  { %13530 = vmatprep.subr.mxu0 %v17296_v60 }
 0xc57   :  { %13531 = vmatpush3.msra.mxu0 %v7373_v5 }
 0xc58   :  { %13542 = vmatprep.subr.mxu0 %v17296_v60 }
 0xc5f   :  { %8061 = vrot.lane.b32.xlu1 %v14613_v21, %s14386_s16 }
 0xc63   :  { %8143 = vrot.lane.b32.xlu1 %v14638_v29, %s14386_s16 }
 0xc67   :  { %8141 = vrot.lane.b32.xlu1 %v14671_v40, %s14386_s16 }
 0xc6b   :  { %8225 = vrot.lane.b32.xlu1 %v14651_v33, %s14386_s16 }
 0xc6f   :  { %8307 = vrot.lane.b32.xlu1 %v14687_v42, %s14386_s16 }
 0xc73   :  { %8305 = vrot.lane.b32.xlu1 %v14708_v50, %s14386_s16 }
 0xc77   :  { %8303 = vrot.lane.b32.xlu1 %v14726_v54, %s14386_s16 }
 0xc7b   :  { %8554 = vrot.lane.b32.xlu1 %v14723_v53, %s14386_s16 }
 0xc7e   :  { %v7021_v13 = vpop.xlane.xlu1 %7020 }
 0xc7f   :  { %14093 = vrcp.f32 %v7021_v13  ;;  %8473 = vrot.lane.b32.xlu1 %v14703_v49, %s14386_s16 }
 0xc83   :  { %8552 = vrot.lane.b32.xlu1 %v14730_v56, %s14386_s16 }
 0xc86   :  { %v7027_v59 = vpop.xlane.xlu1 %7026 }
 0xc87   :  { %14095 = vrcp.f32 %v7027_v59  ;;  %8712 = vrot.lane.b32.xlu1 %v14900_v39, %s14386_s16 }
 0xc8a   :  { %v7030_v16 = vpop.xlane.xlu0 %7029 }
 0xc8b   :  { %14097 = vrcp.f32 %v7030_v16  ;;  %8710 = vrot.lane.b32.xlu1 %v14906_v17, %s14386_s16 }
 0xc8c   :  { %v14094_v0 = vpop.eup %14093 }
 0xc8d   :  { %v7049_v31 = vmul.f32 %v14094_v0, %v16082_v35 }
 0xc8e   :  { %v7036_v5 = vpop.xlane.xlu0 %7035 }
 0xc8f   :  { %14099 = vrcp.f32 %v7036_v5  ;;  %v7033_v7 = vpop.xlane.xlu1 %7032  ;;  %8870 = vrot.lane.b32.xlu1 %v14912_v20, %s14386_s16  ;;  %13512 = vmatmul.mubr.msk.f32.vlgmr.msra.gmra.mxu1 %vm1364_vm3, %v7049_v31 }
 0xc90   :  { %14101 = vrcp.f32 %v7033_v7  ;;  %13522 = vmatpush3.msra.mxu1 %v16073_v32  ;;  %13525 = vmatprep.mubr.msk.f32.mxu1 %vm14381_vm1, %v17296_v60 }
 0xc91   :  { %13523 = vmatprep.subr.mxu1 %v17296_v60 }
 0xc92   :  { %13524 = vmatpush3.msra.mxu1 %v16075_v27 }
 0xc93   :  { %13535 = vmatprep.subr.mxu1 %v17296_v60 }
 0xc94   :  { %v14096_v35 = vpop.eup %14095 }
 0xc95   :  { %v7051_v1 = vmul.f32 %v14096_v35, %v16086_v19 }
 0xc97   :  { %13526 = vmatmul.mubr.msk.f32.vlgmr.msra.gmra.mxu1 %vm1364_vm3, %v7051_v1 }
 0xc98   :  { %v14098_v37 = vpop.eup %14097  ;;  %13536 = vmatpush3.msra.mxu1 %v16077_v41  ;;  %13539 = vmatprep.mubr.msk.f32.mxu1 %vm14381_vm1, %v17296_v60 }
 0xc99   :  { %13537 = vmatprep.subr.mxu1 %v17296_v60  ;;  %v7052_v32 = vmul.f32 %v14098_v37, %v16090_v38 }
 0xc9a   :  { %13538 = vmatpush3.msra.mxu1 %v16104_v51 }
 0xc9b   :  { %13533 = vmatmul.mubr.msk.f32.vlgmr.msra.gmra.mxu0 %vm1364_vm3, %v7052_v32  ;;  %13549 = vmatprep.subr.mxu1 %v17296_v60 }
 0xc9c   :  { %v14100_v27 = vpop.eup %14099  ;;  %13543 = vmatpush3.msra.mxu0 %v16108_v23  ;;  %13546 = vmatprep.mubr.msk.f32.mxu0 %vm14381_vm1, %v17296_v60  ;;  %v7978_v23 = vpop.permute.xlu1 %7977 }
 0xc9d   :  { %v14102_v41 = vpop.eup %14101  ;;  %13544 = vmatprep.subr.mxu0 %v17296_v60  ;;  %v7054_v19 = vmul.f32 %v14100_v27, %v16094_v36  ;;  %v7896_v36 = vpop.permute.xlu0 %7895 }
 0xc9e   :  { %13545 = vmatpush3.msra.mxu0 %v16114_v12  ;;  %v7053_v38 = vmul.f32 %v14102_v41, %v16096_v25 }
 0xc9f   :  { %13556 = vmatprep.subr.mxu0 %v17296_v60  ;;  %13547 = vmatmul.mubr.msk.f32.vlgmr.msra.gmra.mxu0 %vm1364_vm3, %v7054_v19 }
 0xca0   :  { %13540 = vmatmul.mubr.msk.f32.vlgmr.msra.gmra.mxu1 %vm1364_vm3, %v7053_v38  ;;  %13557 = vmatpush3.xpose.msk.msra.mxu0 %vm731_vm2, %v16122_v4 }
 0xca1   :  { %13550 = vmatpush3.msra.mxu1 %v16110_v24  ;;  %13558 = vmatprep.subr.mxu0 %v17296_v60 }
 0xca2   :  { %13551 = vmatprep.subr.mxu1 %v17296_v60  ;;  %13560 = vmatprep.mubr.msk.f32.mxu0 %vm14381_vm1, %v17296_v60 }
 0xca3   :  { %13552 = vmatpush3.msra.mxu1 %v16118_v44  ;;  %13553 = vmatprep.mubr.msk.f32.mxu1 %vm14381_vm1, %v17296_v60 }
 0xca4   :  { %13559 = vmatpush3.xpose.msk.msra.mxu0 %vm731_vm2, %v16128_v63  ;;  %13563 = vmatprep.subr.mxu1 %v17296_v60  ;;  %v7894_v63 = vpop.permute.xlu0 %7893 }
 0xca5   :  { %13570 = vmatprep.subr.mxu0 %v17296_v60 }
 0xca7   :  { %13561 = vmatmul.mubr.msk.f32.vlgmr.msra.gmra.mxu0 %vm731_vm2, %v16136_v61 }
 0xca8   :  { %13571 = vmatpush3.xpose.msk.msra.mxu0 %vm731_vm2, %v16138_v3  ;;  %13574 = vmatprep.mubr.msk.f32.mxu0 %vm14381_vm1, %v17296_v60  ;;  %v7976_v25 = vpop.permute.xlu0 %7975 }
 0xca9   :  { %13572 = vmatprep.subr.mxu0 %v17296_v60 }
 0xcac   :  { %13573 = vmatpush3.xpose.msk.msra.mxu0 %vm731_vm2, %v7896_v36  ;;  %v8060_v51 = vpop.permute.xlu0 %8059 }
 0xcad   :  { %13584 = vmatprep.subr.mxu0 %v17296_v60 }
 0xcaf   :  { %13575 = vmatmul.mubr.msk.f32.vlgmr.msra.gmra.mxu0 %vm731_vm2, %v7894_v63 }
 0xcb0   :  { %13588 = vmatprep.mubr.msk.f32.mxu0 %vm14381_vm1, %v17296_v60  ;;  %v8058_v24 = vpop.permute.xlu0 %8057 }
 0xcb4   :  { %v8140_v44 = vpop.permute.xlu0 %8139 }
 0xcb8   :  { %v8224_v4 = vpop.permute.xlu0 %8223 }
 0xcbc   :  { %v8222_v16 = vpop.permute.xlu0 %8221 }
 0xcd7   :  { %v7039_v12 = vpop.xlane.xlu1 %7038 }
 0xcd8   :  { %14103 = vrcp.f32 %v7039_v12 }
 0xcdb   :  { %v8062_v61 = vpop.permute.xlu1 %8061 }
 0xcdc   :  { %13585 = vmatpush3.xpose.msk.msra.mxu0 %vm731_vm2, %v8062_v61 }
 0xcdd   :  { %13586 = vmatprep.subr.mxu0 %v17296_v60 }
 0xcdf   :  { %v8144_v3 = vpop.permute.xlu1 %8143 }
 0xce0   :  { %13587 = vmatpush3.xpose.msk.msra.mxu0 %vm731_vm2, %v8060_v51 }
 0xce1   :  { %13598 = vmatprep.subr.mxu0 %v17296_v60 }
 0xce3   :  { %13589 = vmatmul.mubr.msk.f32.vlgmr.msra.gmra.mxu0 %vm731_vm2, %v8058_v24  ;;  %v8142_v9 = vpop.permute.xlu1 %8141 }
 0xce4   :  { %13602 = vmatprep.mubr.msk.f32.mxu0 %vm14381_vm1, %v17296_v60 }
 0xce5   :  { %v14104_v43 = vpop.eup %14103 }
 0xce6   :  { %v7055_v13 = vmul.f32 %v14104_v43, %v16153_v46  ;;  %v8476_v46 = vpop.permute.xlu0 %8475 }
 0xce7   :  { %v8226_v59 = vpop.permute.xlu1 %8225 }
 0xce8   :  { %13554 = vmatmul.mubr.msk.f32.vlgmr.msra.gmra.mxu1 %vm1364_vm3, %v7055_v13  ;;  %13599 = vmatpush3.xpose.msk.msra.mxu0 %vm731_vm2, %v8226_v59 }
 0xce9   :  { %13564 = vmatpush3.xpose.msk.msra.mxu1 %vm731_vm2, %v16124_v30  ;;  %13600 = vmatprep.subr.mxu0 %v17296_v60 }
 0xcea   :  { %13565 = vmatprep.subr.mxu1 %v17296_v60  ;;  %13567 = vmatprep.mubr.msk.f32.mxu1 %vm14381_vm1, %v17296_v60 }
 0xceb   :  { %v8308_v0 = vpop.permute.xlu1 %8307 }
 0xcec   :  { %13601 = vmatpush3.xpose.msk.msra.mxu0 %vm731_vm2, %v8224_v4 }
 0xced   :  { %13566 = vmatpush3.xpose.msk.msra.mxu1 %vm731_vm2, %v16132_v14  ;;  %13612 = vmatprep.subr.mxu0 %v17296_v60 }
 0xcee   :  { %13577 = vmatprep.subr.mxu1 %v17296_v60 }
 0xcef   :  { %13603 = vmatmul.mubr.msk.f32.vlgmr.msra.gmra.mxu0 %vm731_vm2, %v8222_v16  ;;  %v8306_v30 = vpop.permute.xlu1 %8305 }
 0xcf0   :  { %13568 = vmatmul.mubr.msk.f32.vlgmr.msra.gmra.mxu1 %vm731_vm2, %v16142_v2  ;;  %13613 = vmatpush3.msra.mxu0 %v8476_v46 }
 0xcf1   :  { %13578 = vmatpush3.xpose.msk.msra.mxu1 %vm731_vm2, %v16186_v8  ;;  %13581 = vmatprep.mubr.msk.f32.mxu1 %vm14381_vm1, %v17296_v60 }
 0xcf2   :  { %13579 = vmatprep.subr.mxu1 %v17296_v60  ;;  %13614 = vmatprep.subr.mxu0 %v17296_v60 }
 0xcf3   :  { %v8304_v14 = vpop.permute.xlu1 %8303  ;;  %13616 = vmatprep.mubr.msk.f32.mxu0 %vm14381_vm1, %v17296_v60 }
 0xcf5   :  { %13580 = vmatpush3.xpose.msk.msra.mxu1 %vm731_vm2, %v7978_v23 }
 0xcf6   :  { %13591 = vmatprep.subr.mxu1 %v17296_v60 }
 0xcf7   :  { %v8555_v2 = vpop.permute.xlu1 %8554 }
 0xcf8   :  { %13582 = vmatmul.mubr.msk.f32.vlgmr.msra.gmra.mxu1 %vm731_vm2, %v7976_v25 }
 0xcf9   :  { %13592 = vmatpush3.xpose.msk.msra.mxu1 %vm731_vm2, %v8144_v3  ;;  %13595 = vmatprep.mubr.msk.f32.mxu1 %vm14381_vm1, %v17296_v60 }
 0xcfa   :  { %13593 = vmatprep.subr.mxu1 %v17296_v60 }
 0xcfb   :  { %v8474_v8 = vpop.permute.xlu1 %8473 }
 0xcfc   :  { %13615 = vmatpush3.msra.mxu0 %v8474_v8 }
 0xcfd   :  { %13594 = vmatpush3.xpose.msk.msra.mxu1 %vm731_vm2, %v8142_v9  ;;  %13626 = vmatprep.subr.mxu0 %v17296_v60 }
 0xcfe   :  { %13605 = vmatprep.subr.mxu1 %v17296_v60 }
 0xcff   :  { %v8553_v31 = vpop.permute.xlu1 %8552 }
 0xd00   :  { %13596 = vmatmul.mubr.msk.f32.vlgmr.msra.gmra.mxu1 %vm731_vm2, %v8140_v44 }
 0xd01   :  { %13606 = vmatpush3.xpose.msk.msra.mxu1 %vm731_vm2, %v8308_v0  ;;  %13609 = vmatprep.mubr.msk.f32.mxu1 %vm14381_vm1, %v17296_v60 }
 0xd02   :  { %13607 = vmatprep.subr.mxu1 %v17296_v60 }
 0xd05   :  { %13608 = vmatpush3.xpose.msk.msra.mxu1 %vm731_vm2, %v8306_v30 }
 0xd06   :  { %13619 = vmatprep.subr.mxu1 %v17296_v60 }
 0xd08   :  { %13610 = vmatmul.mubr.msk.f32.vlgmr.msra.gmra.mxu1 %vm731_vm2, %v8304_v14 }
 0xd09   :  { %13620 = vmatpush3.msra.mxu1 %v8555_v2  ;;  %13623 = vmatprep.mubr.msk.f32.mxu1 %vm14381_vm1, %v17296_v60 }
 0xd0a   :  { %13621 = vmatprep.subr.mxu1 %v17296_v60 }
 0xd0b   :  { %13622 = vmatpush3.msra.mxu1 %v8553_v31 }
 0xd0c   :  { %13633 = vmatprep.subr.mxu1 %v17296_v60 }
 0xd10   :  { %v16308_v5 = vpop.f32.mrf.mxu0 }
 0xd11   :  { %17352 = vst [vmem:[#allocation55_spill] sm:$0xff] %v16308_v5  ;;  %v17368_v5 = vld [vmem:[#allocation32_spill] sm:$0xff] }
 0xd12   :  { %v13506_v7 = vpop.f32.mrf.mxu0 }
 0xd14   :  { %v16310_v35 = vpop.f32.mrf.mxu0 }
 0xd15   :  { %17353 = vst [vmem:[#allocation56_spill] sm:$0xff] %v16310_v35 }
 0xd16   :  { %v13520_v1 = vpop.f32.mrf.mxu0 }
 0xd4f   :  { %v16312_v37 = vpop.f32.mrf.mxu1 }
 0xd50   :  { %17354 = vst [vmem:[#allocation57_spill] sm:$0xff] %v16312_v37 }
 0xd51   :  { %v13513_v32 = vpop.f32.mrf.mxu1 }
 0xd57   :  { %v16314_v27 = vpop.f32.mrf.mxu1 }
 0xd58   :  { %17355 = vst [vmem:[#allocation58_spill] sm:$0xff] %v16314_v27  ;;  %v17367_v27 = vld [vmem:[#allocation33_spill] sm:$0xff] }
 0xd59   :  { %v13527_v41 = vpop.f32.mrf.mxu1 }
 0xd5b   :  { %v16316_v19 = vpop.f32.mrf.mxu0 }
 0xd5c   :  { %17356 = vst [vmem:[#allocation59_spill] sm:$0xff] %v16316_v19 }
 0xd5d   :  { %v13534_v38 = vpop.f32.mrf.mxu0 }
 0xd5f   :  { %v16318_v36 = vpop.f32.mrf.mxu0 }
 0xd60   :  { %17357 = vst [vmem:[#allocation60_spill] sm:$0xff] %v16318_v36  ;;  %v16320_v63 = vpop.f32.mrf.mxu1 }
 0xd61   :  { %17358 = vst [vmem:[#allocation61_spill] sm:$0xff] %v16320_v63  ;;  %v13548_v25 = vpop.f32.mrf.mxu0 }
 0xd62   :  { %v13541_v51 = vpop.f32.mrf.mxu1 }
 0xd63   :  { %v16356_v51 = vpop.permute.xlu0 %8633 }
 0xd67   :  { %v7807_v23 = vpop.f32.mrf.mxu0 }
 0xd68   :  { %v8385_v24 = vsel %vm1364_vm3, %v7807_v23, -inf }
 0xd69   :  { %8386 = vmax.xlane.f32.xlu0 %v8385_v24  ;;  %v13562_v12 = vpop.f32.mrf.mxu0  ;;  %v16366_v24 = vpop.permute.xlu0 %8631 }
 0xd6d   :  { %v16370_v12 = vpop.permute.xlu0 %8791 }
 0xd6f   :  { %v7971_v61 = vpop.f32.mrf.mxu0 }
 0xd70   :  { %v8391_v44 = vsel %vm1364_vm3, %v7971_v61, -inf }
 0xd71   :  { %8392 = vmax.xlane.f32.xlu0 %v8391_v44  ;;  %v13576_v3 = vpop.f32.mrf.mxu0 }
 0xda3   :  { %v16324_v4 = vpop.f32.mrf.mxu0 }
 0xda4   :  { %v8397_v31 = vsel %vm1364_vm3, %v16324_v4, -inf }
 0xda5   :  { %v13590_v9 = vpop.f32.mrf.mxu0 }
 0xda8   :  { %v16326_v43 = vpop.f32.mrf.mxu1 }
 0xda9   :  { %17359 = vst [vmem:[#allocation62_spill] sm:$0xff] %v16326_v43 }
 0xdaa   :  { %v13555_v13 = vpop.f32.mrf.mxu1 }
 0xdaf   :  { %v16328_v59 = vpop.f32.mrf.mxu0 }
 0xdb0   :  { %v7889_v16 = vpop.f32.mrf.mxu1  ;;  %v8403_v1 = vsel %vm1364_vm3, %v16328_v59, -inf }
 0xdb1   :  { %v13604_v0 = vpop.f32.mrf.mxu0  ;;  %v8388_v46 = vsel %vm1364_vm3, %v7889_v16, -inf }
 0xdb2   :  { %8389 = vmax.xlane.f32.xlu1 %v8388_v46  ;;  %v13569_v30 = vpop.f32.mrf.mxu1 }
 0xdb8   :  { %v8053_v14 = vpop.f32.mrf.mxu1 }
 0xdb9   :  { %v8394_v2 = vsel %vm1364_vm3, %v8053_v14, -inf }
 0xdba   :  { %8395 = vmax.xlane.f32.xlu0 %v8394_v2  ;;  %v13583_v8 = vpop.f32.mrf.mxu1 }
 0xdbe   :  { %8398 = vmax.xlane.f32.xlu0 %v8397_v31 }
 0xdc0   :  { %v16334_v7 = vpop.f32.mrf.mxu1 }
 0xdc1   :  { %v8400_v32 = vsel %vm1364_vm3, %v16334_v7, -inf }
 0xdc2   :  { %8404 = vmax.xlane.f32.xlu0 %v8403_v1  ;;  %8401 = vmax.xlane.f32.xlu1 %v8400_v32  ;;  %v13597_v41 = vpop.f32.mrf.mxu1  ;;  %v16386_v1 = vpop.permute.xlu1 %8712 }
 0xdc6   :  { %v16388_v32 = vpop.permute.xlu1 %8710 }
 0xdc8   :  { %v16340_v38 = vpop.f32.mrf.mxu1 }
 0xdc9   :  { %v8406_v30 = vsel %vm1364_vm3, %v16340_v38, -inf }
 0xdca   :  { %v13611_v25 = vpop.f32.mrf.mxu1  ;;  %v16390_v41 = vpop.permute.xlu1 %8870 }
 0xdd3   :  { %8868 = vrot.lane.b32.xlu1 %v14959_v45, %s14386_s16 }
 0xdd7   :  { %9028 = vrot.lane.b32.xlu1 %v14976_v18, %s14386_s16 }
 0xdd8   :  { %8789 = vrot.lane.b32.xlu0 %v14929_v57, %s14386_s16 }
 0xddb   :  { %9026 = vrot.lane.b32.xlu1 %v14984_v48, %s14386_s16 }
 0xddc   :  { %8949 = vrot.lane.b32.xlu0 %v14947_v34, %s14386_s16 }
 0xddf   :  { %9232 = vrot.lane.b32.xlu1 %v14573_v6, %s14387_s17 }
 0xde0   :  { %8947 = vrot.lane.b32.xlu0 %v14953_v11, %s14386_s16 }
 0xde3   :  { %9230 = vrot.lane.b32.xlu1 %v14595_v15, %s14387_s17 }
 0xde4   :  { %9150 = vrot.lane.b32.xlu0 %v14561_v62, %s14387_s17 }
 0xde7   :  { %9314 = vrot.lane.b32.xlu1 %v17306_v52, %s14387_s17 }
 0xde8   :  { %9148 = vrot.lane.b32.xlu0 %v17307_v58, %s14387_s17 }
 0xdec   :  { %9146 = vrot.lane.b32.xlu0 %v17308_v10, %s14387_s17 }
 0xdf0   :  { %9228 = vrot.lane.b32.xlu0 %v17309_v28, %s14387_s17 }
 0xdf2   :  { %v8387_v44 = vpop.xlane.xlu0 %8386 }
 0xdf3   :  { %v8409_v3 = vsub.f32 %v7807_v23, %v8387_v44 }
 0xdf5   :  { %v8417_v9 = vmul.f32 1.442695, %v8409_v3 }
 0xdf7   :  { %14105 = vpow2.f32 %v8417_v9 }
 0xdfa   :  { %v8393_v13 = vpop.xlane.xlu0 %8392 }
 0xdfb   :  { %v8411_v0 = vsub.f32 %v7971_v61, %v8393_v13  ;;  %v17360_v61 = vld [vmem:[#allocation26_spill] sm:$0xff] }
 0xdfd   :  { %v8421_v46 = vmul.f32 1.442695, %v8411_v0 }
 0xdff   :  { %14107 = vpow2.f32 %v8421_v46 }
 0xe04   :  { %v16376_v2 = vpop.eup %14105 }
 0xe05   :  { %v8433_v8 = vsel %vm1364_vm3, %v16376_v2, 0.0 }
 0xe0b   :  { %8407 = vmax.xlane.f32.xlu1 %v8406_v30 }
 0xe0c   :  { %v16380_v31 = vpop.eup %14107 }
 0xe0d   :  { %v8439_v23 = vsel %vm1364_vm3, %v16380_v31, 0.0 }
 0xe0f   :  { %8434 = vadd.xlane.f32.xlu0 %v8433_v8 }
 0xe13   :  { %8440 = vadd.xlane.f32.xlu0 %v8439_v23 }
 0xe1c   :  { %9396 = vrot.lane.b32.xlu1 %v17360_v61, %s14387_s17 }
 0xe3b   :  { %v8390_v25 = vpop.xlane.xlu1 %8389 }
 0xe3c   :  { %v8410_v44 = vsub.f32 %v7889_v16, %v8390_v25 }
 0xe3e   :  { %v8419_v3 = vmul.f32 1.442695, %v8410_v44 }
 0xe40   :  { %14109 = vpow2.f32 %v8419_v3 }
 0xe43   :  { %v8396_v9 = vpop.xlane.xlu0 %8395 }
 0xe44   :  { %v8412_v13 = vsub.f32 %v8053_v14, %v8396_v9 }
 0xe46   :  { %v8423_v0 = vmul.f32 1.442695, %v8412_v13  ;;  %v17361_v13 = vld [vmem:[#allocation29_spill] sm:$0xff] }
 0xe47   :  { %v8399_v46 = vpop.xlane.xlu0 %8398 }
 0xe48   :  { %14111 = vpow2.f32 %v8423_v0  ;;  %v8413_v30 = vsub.f32 %v16324_v4, %v8399_v46  ;;  %v17362_v46 = vld [vmem:[#allocation24_spill] sm:$0xff] }
 0xe4a   :  { %v8425_v8 = vmul.f32 1.442695, %v8413_v30 }
 0xe4b   :  { %v8405_v23 = vpop.xlane.xlu0 %8404  ;;  %v8402_v43 = vpop.xlane.xlu1 %8401 }
 0xe4c   :  { %14113 = vpow2.f32 %v8425_v8  ;;  %v8415_v36 = vsub.f32 %v16328_v59, %v8405_v23  ;;  %v8414_v19 = vsub.f32 %v16334_v7, %v8402_v43  ;;  %v17363_v23 = vld [vmem:[#allocation25_spill] sm:$0xff] }
 0xe4d   :  { %v16395_v35 = vpop.eup %14109 }
 0xe4e   :  { %v8429_v16 = vmul.f32 1.442695, %v8415_v36  ;;  %v8427_v25 = vmul.f32 1.442695, %v8414_v19  ;;  %v8436_v14 = vsel %vm1364_vm3, %v16395_v35, 0.0 }
 0xe4f   :  { %8437 = vadd.xlane.f32.xlu1 %v8436_v14  ;;  %v8790_v9 = vpop.permute.xlu0 %8789  ;;  %v16417_v0 = vpop.permute.xlu1 %8868 }
 0xe50   :  { %14115 = vpow2.f32 %v8429_v16 }
 0xe51   :  { %14117 = vpow2.f32 %v8427_v25  ;;  %v17364_v25 = vld [vmem:[#allocation31_spill] sm:$0xff] }
 0xe53   :  { %v16421_v30 = vpop.permute.xlu0 %8949  ;;  %v16423_v8 = vpop.permute.xlu1 %9028 }
 0xe55   :  { %v16399_v44 = vpop.eup %14111 }
 0xe56   :  { %v8442_v4 = vsel %vm1364_vm3, %v16399_v44, 0.0 }
 0xe57   :  { %8443 = vadd.xlane.f32.xlu1 %v8442_v4  ;;  %v16427_v16 = vpop.permute.xlu0 %8947  ;;  %v16431_v14 = vpop.permute.xlu1 %9026  ;;  %v17365_v4 = vld [vmem:[#allocation28_spill] sm:$0xff] }
 0xe59   :  { %v16403_v3 = vpop.eup %14113 }
 0xe5a   :  { %v8445_v43 = vsel %vm1364_vm3, %v16403_v3, 0.0 }
 0xe5b   :  { %8446 = vadd.xlane.f32.xlu0 %v8445_v43  ;;  %v16435_v43 = vpop.permute.xlu0 %9150 }
 0xe5d   :  { %v16407_v36 = vpop.eup %14115 }
 0xe5e   :  { %v16409_v19 = vpop.eup %14117  ;;  %v8451_v59 = vsel %vm1364_vm3, %v16407_v36, 0.0 }
 0xe5f   :  { %8452 = vadd.xlane.f32.xlu0 %v8451_v59  ;;  %v8448_v7 = vsel %vm1364_vm3, %v16409_v19, 0.0  ;;  %v16437_v59 = vpop.permute.xlu1 %9232  ;;  %v16441_v63 = vpop.permute.xlu0 %9148 }
 0xe60   :  { %8449 = vadd.xlane.f32.xlu1 %v8448_v7  ;;  %v17366_v7 = vld [vmem:[#allocation30_spill] sm:$0xff] }
 0xe63   :  { %v16445_v37 = vpop.permute.xlu1 %9230 }
 0xe71   :  { %9394 = vrot.lane.b32.xlu1 %v17361_v13, %s14387_s17 }
 0xe75   :  { %9312 = vrot.lane.b32.xlu0 %v17362_v46, %s14387_s17 }
 0xe79   :  { %9310 = vrot.lane.b32.xlu0 %v17363_v23, %s14387_s17  ;;  %v17369_v23 = vld [vmem:[#allocation34_spill] sm:$0xff] }
 0xe7d   :  { %9392 = vrot.lane.b32.xlu0 %v17364_v25, %s14387_s17  ;;  %v16449_v25 = vpop.permute.xlu0 %9146 }
 0xe81   :  { %9476 = vrot.lane.b32.xlu0 %v17365_v4, %s14387_s17  ;;  %v16451_v4 = vpop.permute.xlu1 %9314  ;;  %v16455_v46 = vpop.permute.xlu0 %9228 }
 0xe85   :  { %9474 = vrot.lane.b32.xlu0 %v17366_v7, %s14387_s17 }
 0xe89   :  { %9556 = vrot.lane.b32.xlu0 %v17367_v27, %s14387_s17 }
 0xe8d   :  { %9640 = vrot.lane.b32.xlu0 %v17368_v5, %s14387_s17 }
 0xe91   :  { %9638 = vrot.lane.b32.xlu0 %v17369_v23, %s14387_s17 }
 0xe94   :  { %v8408_v7 = vpop.xlane.xlu1 %8407 }
 0xe95   :  { %v8416_v13 = vsub.f32 %v16340_v38, %v8408_v7  ;;  %9892 = vrot.lane.b32.xlu0 %v14695_v47, %s14387_s17 }
 0xe97   :  { %v8431_v27 = vmul.f32 1.442695, %v8416_v13 }
 0xe98   :  { %v8435_v61 = vpop.xlane.xlu0 %8434 }
 0xe99   :  { %14119 = vpow2.f32 %v8431_v27  ;;  %10050 = vrot.lane.b32.xlu0 %v14850_v22, %s14387_s17 }
 0xe9a   :  { %14121 = vrcp.f32 %v8435_v61 }
 0xe9c   :  { %v8441_v5 = vpop.xlane.xlu0 %8440 }
 0xe9d   :  { %14123 = vrcp.f32 %v8441_v5  ;;  %10048 = vrot.lane.b32.xlu0 %v14856_v55, %s14387_s17 }
 0xea1   :  { %10208 = vrot.lane.b32.xlu0 %v14864_v26, %s14387_s17 }
 0xea6   :  { %v16466_v23 = vpop.eup %14119 }
 0xea7   :  { %v14122_v38 = vpop.eup %14121  ;;  %v8454_v13 = vsel %vm1364_vm3, %v16466_v23, 0.0 }
 0xea8   :  { %8455 = vadd.xlane.f32.xlu1 %v8454_v13  ;;  %v8465_v27 = vmul.f32 %v14122_v38, %v16376_v2 }
 0xeaa   :  { %v14124_v7 = vpop.eup %14123  ;;  %13617 = vmatmul.mubr.msk.f32.vlgmr.msra.gmra.mxu0 %vm1364_vm3, %v8465_v27 }
 0xeab   :  { %13627 = vmatpush3.msra.mxu0 %v16356_v51  ;;  %13630 = vmatprep.mubr.msk.f32.mxu0 %vm14381_vm1, %v17296_v60  ;;  %v8467_v5 = vmul.f32 %v14124_v7, %v16380_v31  ;;  %v16499_v51 = vpop.permute.xlu1 %9396 }
 0xeac   :  { %13628 = vmatprep.subr.mxu0 %v17296_v60 }
 0xead   :  { %13629 = vmatpush3.msra.mxu0 %v16366_v24 }
 0xeae   :  { %13640 = vmatprep.subr.mxu0 %v17296_v60  ;;  %13631 = vmatmul.mubr.msk.f32.vlgmr.msra.gmra.mxu0 %vm1364_vm3, %v8467_v5 }
 0xeaf   :  { %13641 = vmatpush3.msra.mxu0 %v16370_v12  ;;  %13644 = vmatprep.mubr.msk.f32.mxu0 %vm14381_vm1, %v17296_v60 }
 0xeb0   :  { %13642 = vmatprep.subr.mxu0 %v17296_v60 }
 0xeb1   :  { %13643 = vmatpush3.msra.mxu0 %v8790_v9 }
 0xeb2   :  { %13654 = vmatprep.subr.mxu0 %v17296_v60 }
 0xeb9   :  { %9478 = vrot.lane.b32.xlu1 %v14613_v21, %s14387_s17 }
 0xebd   :  { %9560 = vrot.lane.b32.xlu1 %v14638_v29, %s14387_s17 }
 0xec1   :  { %9558 = vrot.lane.b32.xlu1 %v14671_v40, %s14387_s17 }
 0xec5   :  { %9642 = vrot.lane.b32.xlu1 %v14651_v33, %s14387_s17 }
 0xec9   :  { %9724 = vrot.lane.b32.xlu1 %v14687_v42, %s14387_s17 }
 0xecd   :  { %9722 = vrot.lane.b32.xlu1 %v14708_v50, %s14387_s17 }
 0xed1   :  { %9720 = vrot.lane.b32.xlu1 %v14726_v54, %s14387_s17 }
 0xed5   :  { %9971 = vrot.lane.b32.xlu1 %v14723_v53, %s14387_s17 }
 0xed8   :  { %v8438_v24 = vpop.xlane.xlu1 %8437 }
 0xed9   :  { %14125 = vrcp.f32 %v8438_v24  ;;  %9890 = vrot.lane.b32.xlu1 %v14703_v49, %s14387_s17 }
 0xedd   :  { %9969 = vrot.lane.b32.xlu1 %v14730_v56, %s14387_s17 }
 0xee0   :  { %v8444_v12 = vpop.xlane.xlu1 %8443 }
 0xee1   :  { %14127 = vrcp.f32 %v8444_v12  ;;  %10129 = vrot.lane.b32.xlu1 %v14900_v39, %s14387_s17 }
 0xee4   :  { %v8447_v2 = vpop.xlane.xlu0 %8446 }
 0xee5   :  { %14129 = vrcp.f32 %v8447_v2  ;;  %10127 = vrot.lane.b32.xlu1 %v14906_v17, %s14387_s17 }
 0xee6   :  { %v14126_v31 = vpop.eup %14125 }
 0xee7   :  { %v8466_v61 = vmul.f32 %v14126_v31, %v16395_v35 }
 0xee8   :  { %v8453_v9 = vpop.xlane.xlu0 %8452 }
 0xee9   :  { %14131 = vrcp.f32 %v8453_v9  ;;  %v8450_v38 = vpop.xlane.xlu1 %8449  ;;  %10287 = vrot.lane.b32.xlu1 %v14912_v20, %s14387_s17  ;;  %13624 = vmatmul.mubr.msk.f32.vlgmr.msra.gmra.mxu1 %vm1364_vm3, %v8466_v61 }
 0xeea   :  { %14133 = vrcp.f32 %v8450_v38  ;;  %13634 = vmatpush3.msra.mxu1 %v16386_v1  ;;  %13637 = vmatprep.mubr.msk.f32.mxu1 %vm14381_vm1, %v17296_v60 }
 0xeeb   :  { %13635 = vmatprep.subr.mxu1 %v17296_v60 }
 0xeec   :  { %13636 = vmatpush3.msra.mxu1 %v16388_v32 }
 0xeed   :  { %13647 = vmatprep.subr.mxu1 %v17296_v60 }
 0xeee   :  { %v14128_v35 = vpop.eup %14127 }
 0xeef   :  { %v8468_v13 = vmul.f32 %v14128_v35, %v16399_v44 }
 0xef1   :  { %13638 = vmatmul.mubr.msk.f32.vlgmr.msra.gmra.mxu1 %vm1364_vm3, %v8468_v13 }
 0xef2   :  { %v14130_v27 = vpop.eup %14129  ;;  %13648 = vmatpush3.msra.mxu1 %v16390_v41  ;;  %13651 = vmatprep.mubr.msk.f32.mxu1 %vm14381_vm1, %v17296_v60 }
 0xef3   :  { %13649 = vmatprep.subr.mxu1 %v17296_v60  ;;  %v8469_v1 = vmul.f32 %v14130_v27, %v16403_v3  ;;  %v9313_v3 = vpop.permute.xlu0 %9312 }
 0xef4   :  { %13650 = vmatpush3.msra.mxu1 %v16417_v0  ;;  %v9395_v0 = vpop.permute.xlu1 %9394 }
 0xef5   :  { %13645 = vmatmul.mubr.msk.f32.vlgmr.msra.gmra.mxu0 %vm1364_vm3, %v8469_v1  ;;  %13661 = vmatprep.subr.mxu1 %v17296_v60 }
 0xef6   :  { %v14132_v32 = vpop.eup %14131  ;;  %13655 = vmatpush3.msra.mxu0 %v16421_v30  ;;  %13658 = vmatprep.mubr.msk.f32.mxu0 %vm14381_vm1, %v17296_v60 }
 0xef7   :  { %v14134_v41 = vpop.eup %14133  ;;  %v8471_v44 = vmul.f32 %v14132_v32, %v16407_v36  ;;  %13656 = vmatprep.subr.mxu0 %v17296_v60 }
 0xef8   :  { %v8470_v7 = vmul.f32 %v14134_v41, %v16409_v19  ;;  %13657 = vmatpush3.msra.mxu0 %v16427_v16 }
 0xef9   :  { %13668 = vmatprep.subr.mxu0 %v17296_v60  ;;  %13659 = vmatmul.mubr.msk.f32.vlgmr.msra.gmra.mxu0 %vm1364_vm3, %v8471_v44 }
 0xefa   :  { %13652 = vmatmul.mubr.msk.f32.vlgmr.msra.gmra.mxu1 %vm1364_vm3, %v8470_v7  ;;  %13669 = vmatpush3.xpose.msk.msra.mxu0 %vm731_vm2, %v16435_v43 }
 0xefb   :  { %13662 = vmatpush3.msra.mxu1 %v16423_v8  ;;  %13670 = vmatprep.subr.mxu0 %v17296_v60 }
 0xefc   :  { %13663 = vmatprep.subr.mxu1 %v17296_v60  ;;  %13672 = vmatprep.mubr.msk.f32.mxu0 %vm14381_vm1, %v17296_v60 }
 0xefd   :  { %13664 = vmatpush3.msra.mxu1 %v16431_v14  ;;  %13665 = vmatprep.mubr.msk.f32.mxu1 %vm14381_vm1, %v17296_v60 }
 0xefe   :  { %13671 = vmatpush3.xpose.msk.msra.mxu0 %vm731_vm2, %v16441_v63  ;;  %13675 = vmatprep.subr.mxu1 %v17296_v60  ;;  %v9311_v63 = vpop.permute.xlu0 %9310 }
 0xeff   :  { %13682 = vmatprep.subr.mxu0 %v17296_v60 }
 0xf01   :  { %13673 = vmatmul.mubr.msk.f32.vlgmr.msra.gmra.mxu0 %vm731_vm2, %v16449_v25 }
 0xf02   :  { %13683 = vmatpush3.xpose.msk.msra.mxu0 %vm731_vm2, %v16451_v4  ;;  %13686 = vmatprep.mubr.msk.f32.mxu0 %vm14381_vm1, %v17296_v60  ;;  %v9393_v36 = vpop.permute.xlu0 %9392 }
 0xf03   :  { %13684 = vmatprep.subr.mxu0 %v17296_v60 }
 0xf06   :  { %13685 = vmatpush3.xpose.msk.msra.mxu0 %vm731_vm2, %v9313_v3  ;;  %v9477_v19 = vpop.permute.xlu0 %9476 }
 0xf07   :  { %13696 = vmatprep.subr.mxu0 %v17296_v60 }
 0xf09   :  { %13687 = vmatmul.mubr.msk.f32.vlgmr.msra.gmra.mxu0 %vm731_vm2, %v9311_v63 }
 0xf0a   :  { %13700 = vmatprep.mubr.msk.f32.mxu0 %vm14381_vm1, %v17296_v60  ;;  %v9475_v30 = vpop.permute.xlu0 %9474 }
 0xf0e   :  { %v9557_v25 = vpop.permute.xlu0 %9556 }
 0xf12   :  { %v9641_v4 = vpop.permute.xlu0 %9640 }
 0xf16   :  { %v9639_v2 = vpop.permute.xlu0 %9638 }
 0xf31   :  { %v8456_v8 = vpop.xlane.xlu1 %8455 }
 0xf32   :  { %14135 = vrcp.f32 %v8456_v8 }
 0xf35   :  { %v9479_v16 = vpop.permute.xlu1 %9478 }
 0xf36   :  { %13697 = vmatpush3.xpose.msk.msra.mxu0 %vm731_vm2, %v9479_v16 }
 0xf37   :  { %13698 = vmatprep.subr.mxu0 %v17296_v60 }
 0xf39   :  { %v9561_v14 = vpop.permute.xlu1 %9560 }
 0xf3a   :  { %13699 = vmatpush3.xpose.msk.msra.mxu0 %vm731_vm2, %v9477_v19 }
 0xf3b   :  { %13710 = vmatprep.subr.mxu0 %v17296_v60 }
 0xf3d   :  { %13701 = vmatmul.mubr.msk.f32.vlgmr.msra.gmra.mxu0 %vm731_vm2, %v9475_v30  ;;  %v9559_v43 = vpop.permute.xlu1 %9558 }
 0xf3e   :  { %13714 = vmatprep.mubr.msk.f32.mxu0 %vm14381_vm1, %v17296_v60 }
 0xf3f   :  { %v14136_v5 = vpop.eup %14135 }
 0xf40   :  { %v8472_v24 = vmul.f32 %v14136_v5, %v16466_v23  ;;  %v9893_v23 = vpop.permute.xlu0 %9892 }
 0xf41   :  { %v9643_v12 = vpop.permute.xlu1 %9642 }
 0xf42   :  { %13666 = vmatmul.mubr.msk.f32.vlgmr.msra.gmra.mxu1 %vm1364_vm3, %v8472_v24  ;;  %13711 = vmatpush3.xpose.msk.msra.mxu0 %vm731_vm2, %v9643_v12 }
 0xf43   :  { %13676 = vmatpush3.xpose.msk.msra.mxu1 %vm731_vm2, %v16437_v59  ;;  %13712 = vmatprep.subr.mxu0 %v17296_v60 }
 0xf44   :  { %13677 = vmatprep.subr.mxu1 %v17296_v60  ;;  %13679 = vmatprep.mubr.msk.f32.mxu1 %vm14381_vm1, %v17296_v60 }
 0xf45   :  { %v9725_v31 = vpop.permute.xlu1 %9724 }
 0xf46   :  { %13713 = vmatpush3.xpose.msk.msra.mxu0 %vm731_vm2, %v9641_v4 }
 0xf47   :  { %13678 = vmatpush3.xpose.msk.msra.mxu1 %vm731_vm2, %v16445_v37  ;;  %13724 = vmatprep.subr.mxu0 %v17296_v60 }
 0xf48   :  { %13689 = vmatprep.subr.mxu1 %v17296_v60 }
 0xf49   :  { %13715 = vmatmul.mubr.msk.f32.vlgmr.msra.gmra.mxu0 %vm731_vm2, %v9639_v2  ;;  %v9723_v59 = vpop.permute.xlu1 %9722 }
 0xf4a   :  { %13680 = vmatmul.mubr.msk.f32.vlgmr.msra.gmra.mxu1 %vm731_vm2, %v16455_v46  ;;  %13725 = vmatpush3.msra.mxu0 %v9893_v23 }
 0xf4b   :  { %13690 = vmatpush3.xpose.msk.msra.mxu1 %vm731_vm2, %v16499_v51  ;;  %13693 = vmatprep.mubr.msk.f32.mxu1 %vm14381_vm1, %v17296_v60 }
 0xf4c   :  { %13691 = vmatprep.subr.mxu1 %v17296_v60  ;;  %13726 = vmatprep.subr.mxu0 %v17296_v60 }
 0xf4d   :  { %v9721_v37 = vpop.permute.xlu1 %9720  ;;  %13728 = vmatprep.mubr.msk.f32.mxu0 %vm14381_vm1, %v17296_v60 }
 0xf4f   :  { %13692 = vmatpush3.xpose.msk.msra.mxu1 %vm731_vm2, %v9395_v0 }
 0xf50   :  { %13703 = vmatprep.subr.mxu1 %v17296_v60 }
 0xf51   :  { %v9972_v46 = vpop.permute.xlu1 %9971 }
 0xf52   :  { %13694 = vmatmul.mubr.msk.f32.vlgmr.msra.gmra.mxu1 %vm731_vm2, %v9393_v36 }
 0xf53   :  { %13704 = vmatpush3.xpose.msk.msra.mxu1 %vm731_vm2, %v9561_v14  ;;  %13707 = vmatprep.mubr.msk.f32.mxu1 %vm14381_vm1, %v17296_v60 }
 0xf54   :  { %13705 = vmatprep.subr.mxu1 %v17296_v60 }
 0xf55   :  { %v9891_v51 = vpop.permute.xlu1 %9890 }
 0xf56   :  { %13727 = vmatpush3.msra.mxu0 %v9891_v51 }
 0xf57   :  { %13706 = vmatpush3.xpose.msk.msra.mxu1 %vm731_vm2, %v9559_v43  ;;  %13738 = vmatprep.subr.mxu0 %v17296_v60 }
 0xf58   :  { %13717 = vmatprep.subr.mxu1 %v17296_v60 }
 0xf59   :  { %v9970_v61 = vpop.permute.xlu1 %9969 }
 0xf5a   :  { %13708 = vmatmul.mubr.msk.f32.vlgmr.msra.gmra.mxu1 %vm731_vm2, %v9557_v25 }
 0xf5b   :  { %13718 = vmatpush3.xpose.msk.msra.mxu1 %vm731_vm2, %v9725_v31  ;;  %13721 = vmatprep.mubr.msk.f32.mxu1 %vm14381_vm1, %v17296_v60 }
 0xf5c   :  { %13719 = vmatprep.subr.mxu1 %v17296_v60 }
 0xf5f   :  { %13720 = vmatpush3.xpose.msk.msra.mxu1 %vm731_vm2, %v9723_v59 }
 0xf60   :  { %13731 = vmatprep.subr.mxu1 %v17296_v60 }
 0xf62   :  { %13722 = vmatmul.mubr.msk.f32.vlgmr.msra.gmra.mxu1 %vm731_vm2, %v9721_v37 }
 0xf63   :  { %13732 = vmatpush3.msra.mxu1 %v9972_v46  ;;  %13735 = vmatprep.mubr.msk.f32.mxu1 %vm14381_vm1, %v17296_v60 }
 0xf64   :  { %13733 = vmatprep.subr.mxu1 %v17296_v60 }
 0xf65   :  { %13734 = vmatpush3.msra.mxu1 %v9970_v61 }
 0xf66   :  { %13745 = vmatprep.subr.mxu1 %v17296_v60 }
 0xf6a   :  { %v16621_v9 = vpop.f32.mrf.mxu0 }
 0xf6b   :  { %17370 = vst [vmem:[#allocation63_spill] sm:$0xff] %v16621_v9 }
 0xf6c   :  { %v13618_v38 = vpop.f32.mrf.mxu0 }
 0xf6e   :  { %v16623_v35 = vpop.f32.mrf.mxu0 }
 0xf6f   :  { %17371 = vst [vmem:[#allocation64_spill] sm:$0xff] %v16623_v35 }
 0xf70   :  { %v13632_v13 = vpop.f32.mrf.mxu0 }
 0xfa9   :  { %v16625_v27 = vpop.f32.mrf.mxu1 }
 0xfab   :  { %v13625_v1 = vpop.f32.mrf.mxu1 }
 0xfb1   :  { %v16627_v32 = vpop.f32.mrf.mxu1 }
 0xfb3   :  { %v13639_v41 = vpop.f32.mrf.mxu1 }
 0xfb5   :  { %v16629_v44 = vpop.f32.mrf.mxu0 }
 0xfb6   :  { %17372 = vst [vmem:[#allocation65_spill] sm:$0xff] %v16629_v44 }
 0xfb7   :  { %v13646_v7 = vpop.f32.mrf.mxu0 }
 0xfb9   :  { %v16631_v3 = vpop.f32.mrf.mxu0 }
 0xfba   :  { %17373 = vst [vmem:[#allocation66_spill] sm:$0xff] %v16631_v3  ;;  %v16633_v63 = vpop.f32.mrf.mxu1 }
 0xfbb   :  { %v13660_v36 = vpop.f32.mrf.mxu0 }
 0xfbc   :  { %v13653_v19 = vpop.f32.mrf.mxu1 }
 0xfbd   :  { %v16669_v19 = vpop.permute.xlu0 %10050 }
 0xfc1   :  { %v9224_v0 = vpop.f32.mrf.mxu0 }
 0xfc2   :  { %v9802_v30 = vsel %vm1364_vm3, %v9224_v0, -inf }
 0xfc3   :  { %9803 = vmax.xlane.f32.xlu0 %v9802_v30  ;;  %v13674_v8 = vpop.f32.mrf.mxu0  ;;  %v16679_v30 = vpop.permute.xlu0 %10048 }
 0xfc9   :  { %v9388_v16 = vpop.f32.mrf.mxu0 }
 0xfca   :  { %v9808_v25 = vsel %vm1364_vm3, %v9388_v16, -inf }
 0xfcb   :  { %9809 = vmax.xlane.f32.xlu0 %v9808_v25  ;;  %v13688_v14 = vpop.f32.mrf.mxu0 }
 0xffd   :  { %v16637_v4 = vpop.f32.mrf.mxu0 }
 0xffe   :  { %v9814_v61 = vsel %vm1364_vm3, %v16637_v4, -inf }
 0xfff   :  { %v13702_v43 = vpop.f32.mrf.mxu0 }
0x1002   :  { %v16639_v5 = vpop.f32.mrf.mxu1 }
0x1003   :  { %17374 = vst [vmem:[#allocation67_spill] sm:$0xff] %v16639_v5 }
0x1004   :  { %v13667_v24 = vpop.f32.mrf.mxu1 }
0x1009   :  { %v16641_v12 = vpop.f32.mrf.mxu0 }
0x100a   :  { %v9306_v2 = vpop.f32.mrf.mxu1  ;;  %v9820_v13 = vsel %vm1364_vm3, %v16641_v12, -inf }
0x100b   :  { %v13716_v31 = vpop.f32.mrf.mxu0  ;;  %v9805_v23 = vsel %vm1364_vm3, %v9306_v2, -inf }
0x100c   :  { %9806 = vmax.xlane.f32.xlu1 %v9805_v23  ;;  %v13681_v59 = vpop.f32.mrf.mxu1 }
0x1012   :  { %v9470_v37 = vpop.f32.mrf.mxu1 }
0x1013   :  { %v9811_v46 = vsel %vm1364_vm3, %v9470_v37, -inf }
0x1014   :  { %9812 = vmax.xlane.f32.xlu0 %v9811_v46  ;;  %v13695_v51 = vpop.f32.mrf.mxu1 }
0x1018   :  { %9815 = vmax.xlane.f32.xlu0 %v9814_v61 }
0x101a   :  { %v16647_v38 = vpop.f32.mrf.mxu1 }
0x101b   :  { %v9817_v1 = vsel %vm1364_vm3, %v16647_v38, -inf }
0x101c   :  { %9821 = vmax.xlane.f32.xlu0 %v9820_v13  ;;  %9818 = vmax.xlane.f32.xlu1 %v9817_v1  ;;  %v13709_v41 = vpop.f32.mrf.mxu1 }
0x1022   :  { %v16653_v7 = vpop.f32.mrf.mxu1 }
0x1024   :  { %v13723_v36 = vpop.f32.mrf.mxu1 }
0x102d   :  { %10285 = vrot.lane.b32.xlu1 %v14959_v45, %s14387_s17 }
0x1031   :  { %10445 = vrot.lane.b32.xlu1 %v14976_v18, %s14387_s17 }
0x1032   :  { %10206 = vrot.lane.b32.xlu0 %v14929_v57, %s14387_s17 }
0x1035   :  { %10443 = vrot.lane.b32.xlu1 %v14984_v48, %s14387_s17 }
0x1036   :  { %10366 = vrot.lane.b32.xlu0 %v14947_v34, %s14387_s17 }
0x1039   :  { %10649 = vrot.lane.b32.xlu1 %v14573_v6, %s14388_s18  ;;  %v16683_v6 = vpop.permute.xlu0 %10208 }
0x103a   :  { %10364 = vrot.lane.b32.xlu0 %v14953_v11, %s14387_s17 }
0x103d   :  { %10647 = vrot.lane.b32.xlu1 %v14595_v15, %s14388_s18 }
0x103e   :  { %10567 = vrot.lane.b32.xlu0 %v14561_v62, %s14388_s18 }
0x1041   :  { %10731 = vrot.lane.b32.xlu1 %v17306_v52, %s14388_s18 }
0x1042   :  { %10565 = vrot.lane.b32.xlu0 %v17307_v58, %s14388_s18  ;;  %v9823_v58 = vsel %vm1364_vm3, %v16653_v7, -inf }
0x1046   :  { %10563 = vrot.lane.b32.xlu0 %v17308_v10, %s14388_s18 }
0x104a   :  { %10645 = vrot.lane.b32.xlu0 %v17309_v28, %s14388_s18 }
0x104c   :  { %v9804_v15 = vpop.xlane.xlu0 %9803 }
0x104d   :  { %v9826_v8 = vsub.f32 %v9224_v0, %v9804_v15  ;;  %v17375_v0 = vld [vmem:[#allocation26_spill] sm:$0xff] }
0x104f   :  { %v9834_v25 = vmul.f32 1.442695, %v9826_v8 }
0x1051   :  { %14137 = vpow2.f32 %v9834_v25 }
0x1054   :  { %v9810_v62 = vpop.xlane.xlu0 %9809 }
0x1055   :  { %v9828_v14 = vsub.f32 %v9388_v16, %v9810_v62  ;;  %v16699_v16 = vpop.permute.xlu1 %10129 }
0x1057   :  { %v9838_v52 = vmul.f32 1.442695, %v9828_v14 }
0x1059   :  { %14139 = vpow2.f32 %v9838_v52  ;;  %v16701_v31 = vpop.permute.xlu1 %10127 }
0x105d   :  { %v16703_v23 = vpop.permute.xlu1 %10287 }
0x105e   :  { %v16689_v43 = vpop.eup %14137 }
0x105f   :  { %v9850_v10 = vsel %vm1364_vm3, %v16689_v43, 0.0 }
0x1065   :  { %9824 = vmax.xlane.f32.xlu1 %v9823_v58 }
0x1066   :  { %v16693_v24 = vpop.eup %14139 }
0x1067   :  { %v9856_v28 = vsel %vm1364_vm3, %v16693_v24, 0.0 }
0x1069   :  { %9851 = vadd.xlane.f32.xlu0 %v9850_v10 }
0x106d   :  { %9857 = vadd.xlane.f32.xlu0 %v9856_v28 }
0x1076   :  { %10813 = vrot.lane.b32.xlu1 %v17375_v0, %s14388_s18 }
0x1095   :  { %v9807_v59 = vpop.xlane.xlu1 %9806 }
0x1096   :  { %v9827_v46 = vsub.f32 %v9306_v2, %v9807_v59 }
0x1098   :  { %v9836_v51 = vmul.f32 1.442695, %v9827_v46 }
0x109a   :  { %14141 = vpow2.f32 %v9836_v51 }
0x109d   :  { %v9813_v61 = vpop.xlane.xlu0 %9812 }
0x109e   :  { %v9829_v13 = vsub.f32 %v9470_v37, %v9813_v61  ;;  %v17376_v61 = vld [vmem:[#allocation29_spill] sm:$0xff] }
0x10a0   :  { %v9840_v1 = vmul.f32 1.442695, %v9829_v13 }
0x10a1   :  { %v9816_v41 = vpop.xlane.xlu0 %9815 }
0x10a2   :  { %14143 = vpow2.f32 %v9840_v1  ;;  %v9830_v36 = vsub.f32 %v16637_v4, %v9816_v41  ;;  %v17377_v1 = vld [vmem:[#allocation24_spill] sm:$0xff] }
0x10a4   :  { %v9842_v15 = vmul.f32 1.442695, %v9830_v36 }
0x10a5   :  { %v9822_v8 = vpop.xlane.xlu0 %9821  ;;  %v9819_v25 = vpop.xlane.xlu1 %9818 }
0x10a6   :  { %14145 = vpow2.f32 %v9842_v15  ;;  %v9832_v62 = vsub.f32 %v16641_v12, %v9822_v8  ;;  %v9831_v14 = vsub.f32 %v16647_v38, %v9819_v25  ;;  %v17378_v15 = vld [vmem:[#allocation25_spill] sm:$0xff]  ;;  %v17379_v25 = vld [vmem:[#allocation31_spill] sm:$0xff] }
0x10a7   :  { %v16708_v52 = vpop.eup %14141 }
0x10a8   :  { %v9846_v2 = vmul.f32 1.442695, %v9832_v62  ;;  %v9844_v58 = vmul.f32 1.442695, %v9831_v14  ;;  %v9853_v37 = vsel %vm1364_vm3, %v16708_v52, 0.0  ;;  %v17380_v14 = vld [vmem:[#allocation28_spill] sm:$0xff] }
0x10a9   :  { %9854 = vadd.xlane.f32.xlu1 %v9853_v37  ;;  %v10207_v51 = vpop.permute.xlu0 %10206  ;;  %v16730_v13 = vpop.permute.xlu1 %10285  ;;  %v17381_v37 = vld [vmem:[#allocation30_spill] sm:$0xff] }
0x10aa   :  { %14147 = vpow2.f32 %v9846_v2 }
0x10ab   :  { %14149 = vpow2.f32 %v9844_v58 }
0x10ad   :  { %v16734_v41 = vpop.permute.xlu0 %10366  ;;  %v16736_v36 = vpop.permute.xlu1 %10445 }
0x10af   :  { %v16712_v10 = vpop.eup %14143 }
0x10b0   :  { %v9859_v4 = vsel %vm1364_vm3, %v16712_v10, 0.0 }
0x10b1   :  { %9860 = vadd.xlane.f32.xlu1 %v9859_v4  ;;  %v16740_v8 = vpop.permute.xlu0 %10364  ;;  %v16744_v62 = vpop.permute.xlu1 %10443 }
0x10b3   :  { %v16716_v28 = vpop.eup %14145 }
0x10b4   :  { %v9862_v12 = vsel %vm1364_vm3, %v16716_v28, 0.0 }
0x10b5   :  { %9863 = vadd.xlane.f32.xlu0 %v9862_v12  ;;  %v16748_v2 = vpop.permute.xlu0 %10567  ;;  %v16750_v58 = vpop.permute.xlu1 %10649  ;;  %v17382_v12 = vld [vmem:[#allocation33_spill] sm:$0xff] }
0x10b7   :  { %v16720_v38 = vpop.eup %14147 }
0x10b8   :  { %v16722_v0 = vpop.eup %14149  ;;  %v9868_v59 = vsel %vm1364_vm3, %v16720_v38, 0.0 }
0x10b9   :  { %9869 = vadd.xlane.f32.xlu0 %v9868_v59  ;;  %v9865_v46 = vsel %vm1364_vm3, %v16722_v0, 0.0  ;;  %v16754_v4 = vpop.permute.xlu0 %10565  ;;  %v16758_v59 = vpop.permute.xlu1 %10647 }
0x10ba   :  { %9866 = vadd.xlane.f32.xlu1 %v9865_v46  ;;  %v17383_v46 = vld [vmem:[#allocation32_spill] sm:$0xff] }
0x10cb   :  { %10811 = vrot.lane.b32.xlu1 %v17376_v61, %s14388_s18  ;;  %v16762_v61 = vpop.permute.xlu0 %10563 }
0x10cf   :  { %10729 = vrot.lane.b32.xlu0 %v17377_v1, %s14388_s18  ;;  %v16764_v1 = vpop.permute.xlu1 %10731 }
0x10d3   :  { %10727 = vrot.lane.b32.xlu0 %v17378_v15, %s14388_s18  ;;  %v17384_v15 = vld [vmem:[#allocation34_spill] sm:$0xff] }
0x10d7   :  { %10809 = vrot.lane.b32.xlu0 %v17379_v25, %s14388_s18  ;;  %v16768_v25 = vpop.permute.xlu0 %10645 }
0x10db   :  { %10893 = vrot.lane.b32.xlu0 %v17380_v14, %s14388_s18 }
0x10df   :  { %10891 = vrot.lane.b32.xlu0 %v17381_v37, %s14388_s18 }
0x10e3   :  { %10973 = vrot.lane.b32.xlu0 %v17382_v12, %s14388_s18 }
0x10e7   :  { %11057 = vrot.lane.b32.xlu0 %v17383_v46, %s14388_s18 }
0x10eb   :  { %11055 = vrot.lane.b32.xlu0 %v17384_v15, %s14388_s18 }
0x10ee   :  { %v9825_v14 = vpop.xlane.xlu1 %9824 }
0x10ef   :  { %v9833_v37 = vsub.f32 %v16653_v7, %v9825_v14 }
0x10f1   :  { %v9848_v5 = vmul.f32 1.442695, %v9833_v37 }
0x10f2   :  { %v9852_v44 = vpop.xlane.xlu0 %9851 }
0x10f3   :  { %14151 = vpow2.f32 %v9848_v5 }
0x10f4   :  { %14153 = vrcp.f32 %v9852_v44 }
0x10f6   :  { %v9858_v12 = vpop.xlane.xlu0 %9857 }
0x10f7   :  { %14155 = vrcp.f32 %v9858_v12 }
0x1100   :  { %v16771_v35 = vpop.eup %14151 }
0x1101   :  { %v14154_v46 = vpop.eup %14153  ;;  %v9871_v3 = vsel %vm1364_vm3, %v16771_v35, 0.0 }
0x1102   :  { %v9882_v9 = vmul.f32 %v14154_v46, %v16689_v43  ;;  %9872 = vadd.xlane.f32.xlu1 %v9871_v3 }
0x1104   :  { %v14156_v15 = vpop.eup %14155  ;;  %13729 = vmatmul.mubr.msk.f32.vlgmr.msra.gmra.mxu0 %vm1364_vm3, %v9882_v9  ;;  %v16804_v9 = vpop.permute.xlu1 %10813 }
0x1105   :  { %v9884_v7 = vmul.f32 %v14156_v15, %v16693_v24  ;;  %13739 = vmatpush3.msra.mxu0 %v16669_v19  ;;  %13742 = vmatprep.mubr.msk.f32.mxu0 %vm14381_vm1, %v17296_v60 }
0x1106   :  { %13740 = vmatprep.subr.mxu0 %v17296_v60 }
0x1107   :  { %13741 = vmatpush3.msra.mxu0 %v16679_v30 }
0x1108   :  { %13752 = vmatprep.subr.mxu0 %v17296_v60  ;;  %13743 = vmatmul.mubr.msk.f32.vlgmr.msra.gmra.mxu0 %vm1364_vm3, %v9884_v7 }
0x1109   :  { %13753 = vmatpush3.msra.mxu0 %v16683_v6  ;;  %13756 = vmatprep.mubr.msk.f32.mxu0 %vm14381_vm1, %v17296_v60 }
0x110a   :  { %13754 = vmatprep.subr.mxu0 %v17296_v60 }
0x110b   :  { %13755 = vmatpush3.msra.mxu0 %v10207_v51 }
0x110c   :  { %13766 = vmatprep.subr.mxu0 %v17296_v60 }
0x1113   :  { %10895 = vrot.lane.b32.xlu1 %v14613_v21, %s14388_s18 }
0x1117   :  { %10977 = vrot.lane.b32.xlu1 %v14638_v29, %s14388_s18 }
0x111b   :  { %10975 = vrot.lane.b32.xlu1 %v14671_v40, %s14388_s18 }
0x111f   :  { %11059 = vrot.lane.b32.xlu1 %v14651_v33, %s14388_s18 }
0x1123   :  { %11141 = vrot.lane.b32.xlu1 %v14687_v42, %s14388_s18 }
0x1127   :  { %11139 = vrot.lane.b32.xlu1 %v14708_v50, %s14388_s18 }
0x112b   :  { %11137 = vrot.lane.b32.xlu1 %v14726_v54, %s14388_s18 }
0x1132   :  { %v9855_v21 = vpop.xlane.xlu1 %9854 }
0x1133   :  { %14157 = vrcp.f32 %v9855_v21 }
0x113a   :  { %v9861_v29 = vpop.xlane.xlu1 %9860 }
0x113b   :  { %14159 = vrcp.f32 %v9861_v29 }
0x113e   :  { %v9864_v44 = vpop.xlane.xlu0 %9863 }
0x113f   :  { %14161 = vrcp.f32 %v9864_v44 }
0x1140   :  { %v14158_v40 = vpop.eup %14157 }
0x1141   :  { %v9883_v33 = vmul.f32 %v14158_v40, %v16708_v52 }
0x1142   :  { %v9870_v3 = vpop.xlane.xlu0 %9869 }
0x1143   :  { %14163 = vrcp.f32 %v9870_v3  ;;  %v9867_v42 = vpop.xlane.xlu1 %9866  ;;  %13736 = vmatmul.mubr.msk.f32.vlgmr.msra.gmra.mxu1 %vm1364_vm3, %v9883_v33 }
0x1144   :  { %14165 = vrcp.f32 %v9867_v42  ;;  %13746 = vmatpush3.msra.mxu1 %v16699_v16  ;;  %13749 = vmatprep.mubr.msk.f32.mxu1 %vm14381_vm1, %v17296_v60 }
0x1145   :  { %13747 = vmatprep.subr.mxu1 %v17296_v60 }
0x1146   :  { %13748 = vmatpush3.msra.mxu1 %v16701_v31  ;;  %v10730_v16 = vpop.permute.xlu0 %10729 }
0x1147   :  { %13759 = vmatprep.subr.mxu1 %v17296_v60  ;;  %v10812_v52 = vpop.permute.xlu1 %10811 }
0x1148   :  { %v14160_v50 = vpop.eup %14159 }
0x1149   :  { %v9885_v54 = vmul.f32 %v14160_v50, %v16712_v10 }
0x114a   :  { %v10728_v31 = vpop.permute.xlu0 %10727 }
0x114b   :  { %13750 = vmatmul.mubr.msk.f32.vlgmr.msra.gmra.mxu1 %vm1364_vm3, %v9885_v54 }
0x114c   :  { %v14162_v5 = vpop.eup %14161  ;;  %13760 = vmatpush3.msra.mxu1 %v16703_v23  ;;  %13763 = vmatprep.mubr.msk.f32.mxu1 %vm14381_vm1, %v17296_v60 }
0x114d   :  { %v9886_v19 = vmul.f32 %v14162_v5, %v16716_v28  ;;  %13761 = vmatprep.subr.mxu1 %v17296_v60 }
0x114e   :  { %13762 = vmatpush3.msra.mxu1 %v16730_v13  ;;  %v10810_v23 = vpop.permute.xlu0 %10809 }
0x114f   :  { %13757 = vmatmul.mubr.msk.f32.vlgmr.msra.gmra.mxu0 %vm1364_vm3, %v9886_v19  ;;  %13773 = vmatprep.subr.mxu1 %v17296_v60 }
0x1150   :  { %v14164_v30 = vpop.eup %14163  ;;  %13767 = vmatpush3.msra.mxu0 %v16734_v41  ;;  %13770 = vmatprep.mubr.msk.f32.mxu0 %vm14381_vm1, %v17296_v60 }
0x1151   :  { %v14166_v6 = vpop.eup %14165  ;;  %v9888_v43 = vmul.f32 %v14164_v30, %v16720_v38  ;;  %13768 = vmatprep.subr.mxu0 %v17296_v60 }
0x1152   :  { %v9887_v24 = vmul.f32 %v14166_v6, %v16722_v0  ;;  %13769 = vmatpush3.msra.mxu0 %v16740_v8  ;;  %v10894_v10 = vpop.permute.xlu0 %10893 }
0x1153   :  { %13780 = vmatprep.subr.mxu0 %v17296_v60  ;;  %13771 = vmatmul.mubr.msk.f32.vlgmr.msra.gmra.mxu0 %vm1364_vm3, %v9888_v43 }
0x1154   :  { %13764 = vmatmul.mubr.msk.f32.vlgmr.msra.gmra.mxu1 %vm1364_vm3, %v9887_v24  ;;  %13781 = vmatpush3.xpose.msk.msra.mxu0 %vm731_vm2, %v16748_v2 }
0x1155   :  { %13774 = vmatpush3.msra.mxu1 %v16736_v36  ;;  %13782 = vmatprep.subr.mxu0 %v17296_v60 }
0x1156   :  { %13775 = vmatprep.subr.mxu1 %v17296_v60  ;;  %13784 = vmatprep.mubr.msk.f32.mxu0 %vm14381_vm1, %v17296_v60  ;;  %v10892_v0 = vpop.permute.xlu0 %10891 }
0x1157   :  { %13776 = vmatpush3.msra.mxu1 %v16744_v62  ;;  %13777 = vmatprep.mubr.msk.f32.mxu1 %vm14381_vm1, %v17296_v60 }
0x1158   :  { %13783 = vmatpush3.xpose.msk.msra.mxu0 %vm731_vm2, %v16754_v4  ;;  %13787 = vmatprep.subr.mxu1 %v17296_v60 }
0x1159   :  { %13794 = vmatprep.subr.mxu0 %v17296_v60 }
0x115a   :  { %v10974_v13 = vpop.permute.xlu0 %10973 }
0x115b   :  { %13785 = vmatmul.mubr.msk.f32.vlgmr.msra.gmra.mxu0 %vm731_vm2, %v16762_v61 }
0x115c   :  { %13795 = vmatpush3.xpose.msk.msra.mxu0 %vm731_vm2, %v16764_v1  ;;  %13798 = vmatprep.mubr.msk.f32.mxu0 %vm14381_vm1, %v17296_v60 }
0x115d   :  { %13796 = vmatprep.subr.mxu0 %v17296_v60 }
0x115e   :  { %v11058_v2 = vpop.permute.xlu0 %11057 }
0x1160   :  { %13797 = vmatpush3.xpose.msk.msra.mxu0 %vm731_vm2, %v10730_v16 }
0x1161   :  { %13808 = vmatprep.subr.mxu0 %v17296_v60 }
0x1163   :  { %13799 = vmatmul.mubr.msk.f32.vlgmr.msra.gmra.mxu0 %vm731_vm2, %v10728_v31 }
0x1164   :  { %13812 = vmatprep.mubr.msk.f32.mxu0 %vm14381_vm1, %v17296_v60 }
0x118b   :  { %v9873_v28 = vpop.xlane.xlu1 %9872 }
0x118c   :  { %14167 = vrcp.f32 %v9873_v28 }
0x118f   :  { %v10896_v38 = vpop.permute.xlu1 %10895 }
0x1190   :  { %13809 = vmatpush3.xpose.msk.msra.mxu0 %vm731_vm2, %v10896_v38 }
0x1191   :  { %13810 = vmatprep.subr.mxu0 %v17296_v60 }
0x1193   :  { %v10978_v51 = vpop.permute.xlu1 %10977 }
0x1194   :  { %13811 = vmatpush3.xpose.msk.msra.mxu0 %vm731_vm2, %v10894_v10 }
0x1195   :  { %13822 = vmatprep.subr.mxu0 %v17296_v60 }
0x1197   :  { %13813 = vmatmul.mubr.msk.f32.vlgmr.msra.gmra.mxu0 %vm731_vm2, %v10892_v0  ;;  %v10976_v41 = vpop.permute.xlu1 %10975 }
0x1198   :  { %13826 = vmatprep.mubr.msk.f32.mxu0 %vm14381_vm1, %v17296_v60 }
0x1199   :  { %v14168_v36 = vpop.eup %14167 }
0x119a   :  { %v9889_v8 = vmul.f32 %v14168_v36, %v16771_v35  ;;  %v11056_v35 = vpop.permute.xlu0 %11055 }
0x119b   :  { %v11060_v62 = vpop.permute.xlu1 %11059 }
0x119c   :  { %13778 = vmatmul.mubr.msk.f32.vlgmr.msra.gmra.mxu1 %vm1364_vm3, %v9889_v8  ;;  %13823 = vmatpush3.xpose.msk.msra.mxu0 %vm731_vm2, %v11060_v62 }
0x119d   :  { %13788 = vmatpush3.xpose.msk.msra.mxu1 %vm731_vm2, %v16750_v58  ;;  %13824 = vmatprep.subr.mxu0 %v17296_v60 }
0x119e   :  { %13789 = vmatprep.subr.mxu1 %v17296_v60  ;;  %13791 = vmatprep.mubr.msk.f32.mxu1 %vm14381_vm1, %v17296_v60 }
0x119f   :  { %v11142_v58 = vpop.permute.xlu1 %11141 }
0x11a0   :  { %13825 = vmatpush3.xpose.msk.msra.mxu0 %vm731_vm2, %v11058_v2 }
0x11a1   :  { %13790 = vmatpush3.xpose.msk.msra.mxu1 %vm731_vm2, %v16758_v59  ;;  %13836 = vmatprep.subr.mxu0 %v17296_v60 }
0x11a2   :  { %13801 = vmatprep.subr.mxu1 %v17296_v60 }
0x11a3   :  { %13827 = vmatmul.mubr.msk.f32.vlgmr.msra.gmra.mxu0 %vm731_vm2, %v11056_v35  ;;  %v11140_v4 = vpop.permute.xlu1 %11139 }
0x11a4   :  { %13792 = vmatmul.mubr.msk.f32.vlgmr.msra.gmra.mxu1 %vm731_vm2, %v16768_v25  ;;  %13840 = vmatprep.mubr.msk.f32.mxu0 %vm14381_vm1, %v17296_v60 }
0x11a5   :  { %13802 = vmatpush3.xpose.msk.msra.mxu1 %vm731_vm2, %v16804_v9  ;;  %13805 = vmatprep.mubr.msk.f32.mxu1 %vm14381_vm1, %v17296_v60 }
0x11a6   :  { %13803 = vmatprep.subr.mxu1 %v17296_v60 }
0x11a7   :  { %v11138_v59 = vpop.permute.xlu1 %11137 }
0x11a9   :  { %13804 = vmatpush3.xpose.msk.msra.mxu1 %vm731_vm2, %v10812_v52 }
0x11aa   :  { %13815 = vmatprep.subr.mxu1 %v17296_v60 }
0x11ac   :  { %13806 = vmatmul.mubr.msk.f32.vlgmr.msra.gmra.mxu1 %vm731_vm2, %v10810_v23 }
0x11ad   :  { %13816 = vmatpush3.xpose.msk.msra.mxu1 %vm731_vm2, %v10978_v51  ;;  %13819 = vmatprep.mubr.msk.f32.mxu1 %vm14381_vm1, %v17296_v60 }
0x11ae   :  { %13817 = vmatprep.subr.mxu1 %v17296_v60 }
0x11b1   :  { %13818 = vmatpush3.xpose.msk.msra.mxu1 %vm731_vm2, %v10976_v41 }
0x11b2   :  { %13829 = vmatprep.subr.mxu1 %v17296_v60 }
0x11b4   :  { %13820 = vmatmul.mubr.msk.f32.vlgmr.msra.gmra.mxu1 %vm731_vm2, %v10974_v13 }
0x11b5   :  { %13830 = vmatpush3.xpose.msk.msra.mxu1 %vm731_vm2, %v11142_v58  ;;  %13833 = vmatprep.mubr.msk.f32.mxu1 %vm14381_vm1, %v17296_v60 }
0x11b6   :  { %13831 = vmatprep.subr.mxu1 %v17296_v60 }
0x11b9   :  { %13832 = vmatpush3.xpose.msk.msra.mxu1 %vm731_vm2, %v11140_v4 }
0x11ba   :  { %13843 = vmatprep.subr.mxu1 %v17296_v60 }
0x11bc   :  { %13834 = vmatmul.mubr.msk.f32.vlgmr.msra.gmra.mxu1 %vm731_vm2, %v11138_v59 }
0x11bd   :  { %13847 = vmatprep.mubr.msk.f32.mxu1 %vm14381_vm1, %v17296_v60 }
0x11c4   :  { %v16910_v61 = vpop.f32.mrf.mxu0 }
0x11c6   :  { %v13730_v1 = vpop.f32.mrf.mxu0 }
0x11c8   :  { %v16912_v25 = vpop.f32.mrf.mxu0 }
0x11ca   :  { %v13744_v14 = vpop.f32.mrf.mxu0 }
0x1203   :  { %v16914_v37 = vpop.f32.mrf.mxu1 }
0x1205   :  { %v13737_v12 = vpop.f32.mrf.mxu1 }
0x120b   :  { %v16916_v46 = vpop.f32.mrf.mxu1 }
0x120d   :  { %v13751_v15 = vpop.f32.mrf.mxu1 }
0x120f   :  { %v16918_v7 = vpop.f32.mrf.mxu0 }
0x1211   :  { %v13758_v9 = vpop.f32.mrf.mxu0 }
0x1213   :  { %v16920_v21 = vpop.f32.mrf.mxu0 }
0x1214   :  { %v16922_v29 = vpop.f32.mrf.mxu1 }
0x1215   :  { %v13772_v44 = vpop.f32.mrf.mxu0 }
0x1216   :  { %v13765_v40 = vpop.f32.mrf.mxu1 }
0x121b   :  { %v10641_v33 = vpop.f32.mrf.mxu0 }
0x121c   :  { %v11219_v3 = vsel %vm1364_vm3, %v10641_v33, -inf }
0x121d   :  { %11220 = vmax.xlane.f32.xlu0 %v11219_v3  ;;  %v13786_v42 = vpop.f32.mrf.mxu0 }
0x1223   :  { %v10805_v50 = vpop.f32.mrf.mxu0 }
0x1224   :  { %v11225_v54 = vsel %vm1364_vm3, %v10805_v50, -inf }
0x1225   :  { %11226 = vmax.xlane.f32.xlu0 %v11225_v54  ;;  %v13800_v5 = vpop.f32.mrf.mxu0 }
0x1257   :  { %v16926_v19 = vpop.f32.mrf.mxu0 }
0x1258   :  { %v11231_v0 = vsel %vm1364_vm3, %v16926_v19, -inf }
0x1259   :  { %v13814_v30 = vpop.f32.mrf.mxu0 }
0x125c   :  { %v16928_v6 = vpop.f32.mrf.mxu1 }
0x125e   :  { %v13779_v43 = vpop.f32.mrf.mxu1 }
0x1263   :  { %v16930_v24 = vpop.f32.mrf.mxu0 }
0x1264   :  { %v10723_v16 = vpop.f32.mrf.mxu1  ;;  %v11237_v13 = vsel %vm1364_vm3, %v16930_v24, -inf }
0x1265   :  { %v13828_v31 = vpop.f32.mrf.mxu0  ;;  %v11222_v23 = vsel %vm1364_vm3, %v10723_v16, -inf }
0x1266   :  { %11223 = vmax.xlane.f32.xlu1 %v11222_v23  ;;  %v13793_v52 = vpop.f32.mrf.mxu1 }
0x126c   :  { %v10887_v10 = vpop.f32.mrf.mxu1 }
0x126d   :  { %v11228_v28 = vsel %vm1364_vm3, %v10887_v10, -inf }
0x126e   :  { %11229 = vmax.xlane.f32.xlu0 %v11228_v28  ;;  %v13807_v38 = vpop.f32.mrf.mxu1  ;;  %v17385_v28 = vld [vmem:[#allocation35_spill] sm:$0xff] }
0x126f   :  { %v17386_v38 = vld [vmem:[#allocation23_spill] sm:$0xff] }
0x1272   :  { %11232 = vmax.xlane.f32.xlu0 %v11231_v0 }
0x1274   :  { %v11051_v51 = vpop.f32.mrf.mxu1 }
0x1275   :  { %v11234_v41 = vsel %vm1364_vm3, %v11051_v51, -inf }
0x1276   :  { %11238 = vmax.xlane.f32.xlu0 %v11237_v13  ;;  %11235 = vmax.xlane.f32.xlu1 %v11234_v41  ;;  %v13821_v36 = vpop.f32.mrf.mxu1  ;;  %v17388_v41 = vld [vmem:[#allocation55_spill] sm:$0xff] }
0x127c   :  { %v16939_v8 = vpop.f32.mrf.mxu1 }
0x127e   :  { %v13835_v62 = vpop.f32.mrf.mxu1 }
0x127f   :  { %v17389_v62 = vld [vmem:[#allocation57_spill] sm:$0xff] }
0x1287   :  { %11388 = vrot.lane.b32.xlu1 %v14723_v53, %s14388_s18 }
0x128b   :  { %11307 = vrot.lane.b32.xlu1 %v14703_v49, %s14388_s18 }
0x128c   :  { %11309 = vrot.lane.b32.xlu0 %v14695_v47, %s14388_s18 }
0x128f   :  { %11386 = vrot.lane.b32.xlu1 %v14730_v56, %s14388_s18 }
0x1290   :  { %11467 = vrot.lane.b32.xlu0 %v14850_v22, %s14388_s18  ;;  %v11240_v22 = vsel %vm1364_vm3, %v16939_v8, -inf }
0x1294   :  { %11465 = vrot.lane.b32.xlu0 %v14856_v55, %s14388_s18 }
0x1298   :  { %11625 = vrot.lane.b32.xlu0 %v14864_v26, %s14388_s18 }
0x129c   :  { %11623 = vrot.lane.b32.xlu0 %v14929_v57, %s14388_s18 }
0x12a0   :  { %11783 = vrot.lane.b32.xlu0 %v14947_v34, %s14388_s18 }
0x12a6   :  { %v11221_v49 = vpop.xlane.xlu0 %11220 }
0x12a7   :  { %v11243_v47 = vsub.f32 %v10641_v33, %v11221_v49 }
0x12a9   :  { %v11251_v53 = vmul.f32 1.442695, %v11243_v47 }
0x12ab   :  { %14169 = vpow2.f32 %v11251_v53  ;;  %v17390_v53 = vld [vmem:[#allocation38_spill] sm:$0xff] }
0x12ae   :  { %v11227_v56 = vpop.xlane.xlu0 %11226 }
0x12af   :  { %v11245_v2 = vsub.f32 %v10805_v50, %v11227_v56 }
0x12b1   :  { %v11255_v35 = vmul.f32 1.442695, %v11245_v2 }
0x12b3   :  { %14171 = vpow2.f32 %v11255_v35  ;;  %11241 = vmax.xlane.f32.xlu1 %v11240_v22  ;;  %v17391_v35 = vld [vmem:[#allocation27_spill] sm:$0xff] }
0x12b8   :  { %v16961_v55 = vpop.eup %14169 }
0x12b9   :  { %v11267_v26 = vsel %vm1364_vm3, %v16961_v55, 0.0 }
0x12bf   :  { %11268 = vadd.xlane.f32.xlu0 %v11267_v26 }
0x12c0   :  { %v16965_v57 = vpop.eup %14171 }
0x12c1   :  { %v11273_v34 = vsel %vm1364_vm3, %v16965_v57, 0.0 }
0x12c3   :  { %11274 = vadd.xlane.f32.xlu0 %v11273_v34  ;;  %v17392_v34 = vld [vmem:[#allocation50_spill] sm:$0xff] }
0x12c4   :  { %11546 = vrot.lane.b32.xlu1 %v14900_v39, %s14388_s18 }
0x12c8   :  { %11544 = vrot.lane.b32.xlu1 %v14906_v17, %s14388_s18 }
0x12cc   :  { %11704 = vrot.lane.b32.xlu1 %v14912_v20, %s14388_s18 }
0x12d0   :  { %11702 = vrot.lane.b32.xlu1 %v14959_v45, %s14388_s18 }
0x12d4   :  { %11862 = vrot.lane.b32.xlu1 %v14976_v18, %s14388_s18 }
0x12ef   :  { %v11224_v58 = vpop.xlane.xlu1 %11223 }
0x12f0   :  { %v11244_v4 = vsub.f32 %v10723_v16, %v11224_v58 }
0x12f2   :  { %v11253_v59 = vmul.f32 1.442695, %v11244_v4 }
0x12f4   :  { %14173 = vpow2.f32 %v11253_v59  ;;  %v17394_v59 = vld [vmem:[#allocation41_spill] sm:$0xff] }
0x12f7   :  { %v11230_v1 = vpop.xlane.xlu0 %11229 }
0x12f8   :  { %v11246_v14 = vsub.f32 %v10887_v10, %v11230_v1 }
0x12fa   :  { %v11257_v12 = vmul.f32 1.442695, %v11246_v14  ;;  %v17398_v14 = vld [vmem:[#allocation22_spill] sm:$0xff] }
0x12fb   :  { %v11233_v39 = vpop.xlane.xlu0 %11232 }
0x12fc   :  { %14175 = vpow2.f32 %v11257_v12  ;;  %v11247_v17 = vsub.f32 %v16926_v19, %v11233_v39  ;;  %v17399_v12 = vld [vmem:[#allocation61_spill] sm:$0xff] }
0x12fd   :  { %v17400_v39 = vld [vmem:[#allocation49_spill] sm:$0xff] }
0x12fe   :  { %v11259_v15 = vmul.f32 1.442695, %v11247_v17  ;;  %v17401_v17 = vld [vmem:[#allocation42_spill] sm:$0xff] }
0x12ff   :  { %v11239_v9 = vpop.xlane.xlu0 %11238  ;;  %v11236_v20 = vpop.xlane.xlu1 %11235 }
0x1300   :  { %14177 = vpow2.f32 %v11259_v15  ;;  %v11249_v45 = vsub.f32 %v16930_v24, %v11239_v9  ;;  %v11248_v44 = vsub.f32 %v11051_v51, %v11236_v20  ;;  %v17387_v51 = vld [vmem:[#allocation47_spill] sm:$0xff]  ;;  %v17404_v20 = vld [vmem:[#allocation46_spill] sm:$0xff] }
0x1301   :  { %v16981_v40 = vpop.eup %14173  ;;  %v17403_v9 = vld [vmem:[#allocation63_spill] sm:$0xff] }
0x1302   :  { %v11263_v18 = vmul.f32 1.442695, %v11249_v45  ;;  %v11261_v33 = vmul.f32 1.442695, %v11248_v44  ;;  %v11270_v3 = vsel %vm1364_vm3, %v16981_v40, 0.0  ;;  %v17405_v45 = vld [vmem:[#allocation21_spill] sm:$0xff] }
0x1303   :  { %v11310_v42 = vpop.permute.xlu0 %11309  ;;  %v11389_v50 = vpop.permute.xlu1 %11388  ;;  %11271 = vadd.xlane.f32.xlu1 %v11270_v3  ;;  %v17408_v3 = vld [vmem:[#allocation66_spill] sm:$0xff] }
0x1304   :  { %14179 = vpow2.f32 %v11263_v18  ;;  %13837 = vmatpush3.msra.mxu0 %v11310_v42  ;;  %13844 = vmatpush3.msra.mxu1 %v11389_v50  ;;  %v17406_v18 = vld [vmem:[#allocation54_spill] sm:$0xff]  ;;  %v17409_v42 = vld [vmem:[#allocation56_spill] sm:$0xff] }
0x1305   :  { %14181 = vpow2.f32 %v11261_v33  ;;  %13838 = vmatprep.subr.mxu0 %v17296_v60  ;;  %13845 = vmatprep.subr.mxu1 %v17296_v60  ;;  %v17407_v33 = vld [vmem:[#allocation48_spill] sm:$0xff] }
0x1307   :  { %v11308_v54 = vpop.permute.xlu1 %11307  ;;  %v11468_v10 = vpop.permute.xlu0 %11467 }
0x1308   :  { %13839 = vmatpush3.msra.mxu0 %v11308_v54  ;;  %v17411_v54 = vld [vmem:[#allocation64_spill] sm:$0xff] }
0x1309   :  { %v16987_v5 = vpop.eup %14175  ;;  %13850 = vmatprep.subr.mxu0 %v17296_v60 }
0x130a   :  { %v11276_v19 = vsel %vm1364_vm3, %v16987_v5, 0.0 }
0x130b   :  { %v11387_v30 = vpop.permute.xlu1 %11386  ;;  %11277 = vadd.xlane.f32.xlu1 %v11276_v19  ;;  %v11466_v0 = vpop.permute.xlu0 %11465  ;;  %v17412_v19 = vld [vmem:[#allocation43_spill] sm:$0xff] }
0x130c   :  { %13846 = vmatpush3.msra.mxu1 %v11387_v30 }
0x130d   :  { %v16992_v43 = vpop.eup %14177  ;;  %13857 = vmatprep.subr.mxu1 %v17296_v60 }
0x130e   :  { %v11279_v24 = vsel %vm1364_vm3, %v16992_v43, 0.0 }
0x130f   :  { %11280 = vadd.xlane.f32.xlu0 %v11279_v24  ;;  %v11626_v13 = vpop.permute.xlu0 %11625 }
0x1311   :  { %v16997_v16 = vpop.eup %14179 }
0x1312   :  { %v16999_v31 = vpop.eup %14181  ;;  %v11285_v23 = vsel %vm1364_vm3, %v16997_v16, 0.0 }
0x1313   :  { %11286 = vadd.xlane.f32.xlu0 %v11285_v23  ;;  %v11282_v52 = vsel %vm1364_vm3, %v16999_v31, 0.0  ;;  %v11624_v49 = vpop.permute.xlu0 %11623 }
0x1314   :  { %11283 = vadd.xlane.f32.xlu1 %v11282_v52 }
0x1317   :  { %v17020_v56 = vpop.permute.xlu0 %11783 }
0x1329   :  { %11781 = vrot.lane.b32.xlu0 %v14953_v11, %s14388_s18 }
0x132d   :  { %3445 = vrot.lane.b32.xlu0 %v17385_v28, %s14389_s19 }
0x1331   :  { %4862 = vrot.lane.b32.xlu0 %v17386_v38, %s14374_s23  ;;  %v17414_v38 = vld [vmem:[#allocation59_spill] sm:$0xff] }
0x1335   :  { %6279 = vrot.lane.b32.xlu0 %v17387_v51, %s14390_s20 }
0x1339   :  { %7696 = vrot.lane.b32.xlu0 %v17388_v41, %s14391_s21 }
0x133c   :  { %v11242_v36 = vpop.xlane.xlu1 %11241 }
0x133d   :  { %v11250_v11 = vsub.f32 %v16939_v8, %v11242_v36  ;;  %7698 = vrot.lane.b32.xlu0 %v17389_v62, %s14391_s21  ;;  %v17416_v36 = vld [vmem:[#allocation65_spill] sm:$0xff] }
0x133f   :  { %v11265_v47 = vmul.f32 1.442695, %v11250_v11 }
0x1341   :  { %14183 = vpow2.f32 %v11265_v47  ;;  %3451 = vrot.lane.b32.xlu0 %v17390_v53, %s14389_s19 }
0x1345   :  { %9115 = vrot.lane.b32.xlu0 %v16625_v27, %s14392_s7  ;;  %v17393_v27 = vld [vmem:[#allocation58_spill] sm:$0xff] }
0x1348   :  { %v11269_v2 = vpop.xlane.xlu0 %11268 }
0x1349   :  { %14185 = vrcp.f32 %v11269_v2  ;;  %4868 = vrot.lane.b32.xlu0 %v17391_v35, %s14374_s23  ;;  %v17419_v35 = vld [vmem:[#allocation60_spill] sm:$0xff] }
0x134c   :  { %v11275_v8 = vpop.xlane.xlu0 %11274 }
0x134d   :  { %14187 = vrcp.f32 %v11275_v8  ;;  %10532 = vrot.lane.b32.xlu0 %v16914_v37, %s14393_s24  ;;  %v17420_v8 = vld [vmem:[#allocation62_spill] sm:$0xff] }
0x134e   :  { %v17028_v22 = vpop.eup %14183 }
0x134f   :  { %v11288_v26 = vsel %vm1364_vm3, %v17028_v22, 0.0 }
0x1350   :  { %11289 = vadd.xlane.f32.xlu1 %v11288_v26 }
0x1351   :  { %6285 = vrot.lane.b32.xlu0 %v17392_v34, %s14390_s20  ;;  %v17421_v34 = vld [vmem:[#allocation67_spill] sm:$0xff] }
0x1355   :  { %7702 = vrot.lane.b32.xlu0 %v17393_v27, %s14391_s21 }
0x1356   :  { %v14186_v58 = vpop.eup %14185 }
0x1357   :  { %v11299_v4 = vmul.f32 %v14186_v58, %v16961_v55  ;;  %v17395_v55 = vld [vmem:[#allocation45_spill] sm:$0xff] }
0x1359   :  { %3455 = vrot.lane.b32.xlu0 %v17394_v59, %s14389_s19  ;;  %13841 = vmatmul.mubr.msk.f32.vlgmr.msra.gmra.mxu0 %vm1364_vm3, %v11299_v4 }
0x135a   :  { %v14188_v37 = vpop.eup %14187  ;;  %13851 = vmatpush3.msra.mxu0 %v11468_v10  ;;  %13854 = vmatprep.mubr.msk.f32.mxu0 %vm14381_vm1, %v17296_v60 }
0x135b   :  { %v11301_v1 = vmul.f32 %v14188_v37, %v16965_v57  ;;  %13852 = vmatprep.subr.mxu0 %v17296_v60  ;;  %v17397_v57 = vld [vmem:[#allocation53_spill] sm:$0xff] }
0x135c   :  { %13853 = vmatpush3.msra.mxu0 %v11466_v0  ;;  %v17415_v0 = vld [vmem:[#allocation40_spill] sm:$0xff] }
0x135d   :  { %13864 = vmatprep.subr.mxu0 %v17296_v60  ;;  %9119 = vrot.lane.b32.xlu0 %v16627_v32, %s14392_s7  ;;  %v17396_v32 = vld [vmem:[#allocation37_spill] sm:$0xff] }
0x135e   :  { %13855 = vmatmul.mubr.msk.f32.vlgmr.msra.gmra.mxu0 %vm1364_vm3, %v11301_v1 }
0x135f   :  { %13865 = vmatpush3.msra.mxu0 %v11626_v13  ;;  %13868 = vmatprep.mubr.msk.f32.mxu0 %vm14381_vm1, %v17296_v60 }
0x1360   :  { %13866 = vmatprep.subr.mxu0 %v17296_v60 }
0x1361   :  { %13867 = vmatpush3.msra.mxu0 %v11624_v49  ;;  %4872 = vrot.lane.b32.xlu0 %v17395_v55, %s14374_s23  ;;  %v17417_v49 = vld [vmem:[#allocation44_spill] sm:$0xff] }
0x1362   :  { %11860 = vrot.lane.b32.xlu1 %v14984_v48, %s14388_s18  ;;  %13878 = vmatprep.subr.mxu0 %v17296_v60  ;;  %v11547_v48 = vpop.permute.xlu1 %11546 }
0x1365   :  { %10536 = vrot.lane.b32.xlu0 %v16916_v46, %s14393_s24  ;;  %v17402_v46 = vld [vmem:[#allocation36_spill] sm:$0xff] }
0x1366   :  { %3447 = vrot.lane.b32.xlu1 %v17396_v32, %s14389_s19  ;;  %v11545_v15 = vpop.permute.xlu1 %11544 }
0x1369   :  { %6289 = vrot.lane.b32.xlu0 %v17397_v57, %s14390_s20 }
0x136a   :  { %4864 = vrot.lane.b32.xlu1 %v17398_v14, %s14374_s23  ;;  %v11705_v44 = vpop.permute.xlu1 %11704 }
0x136d   :  { %7706 = vrot.lane.b32.xlu0 %v17399_v12, %s14391_s21 }
0x136e   :  { %6281 = vrot.lane.b32.xlu1 %v17400_v39, %s14390_s20 }
0x1371   :  { %3459 = vrot.lane.b32.xlu0 %v17401_v17, %s14389_s19 }
0x1372   :  { %3449 = vrot.lane.b32.xlu1 %v17402_v46, %s14389_s19 }
0x1375   :  { %9123 = vrot.lane.b32.xlu0 %v16633_v63, %s14392_s7  ;;  %v11703_v63 = vpop.permute.xlu1 %11702 }
0x1376   :  { %9113 = vrot.lane.b32.xlu1 %v17403_v9, %s14392_s7 }
0x1379   :  { %4876 = vrot.lane.b32.xlu0 %v17404_v20, %s14374_s23  ;;  %v11863_v50 = vpop.permute.xlu1 %11862 }
0x137a   :  { %4866 = vrot.lane.b32.xlu1 %v17405_v45, %s14374_s23 }
0x137d   :  { %10540 = vrot.lane.b32.xlu0 %v16922_v29, %s14393_s24  ;;  %v17410_v29 = vld [vmem:[#allocation39_spill] sm:$0xff] }
0x137e   :  { %10530 = vrot.lane.b32.xlu1 %v16910_v61, %s14393_s24 }
0x1381   :  { %6293 = vrot.lane.b32.xlu0 %v17406_v18, %s14390_s20 }
0x1382   :  { %6283 = vrot.lane.b32.xlu1 %v17407_v33, %s14390_s20 }
0x1385   :  { %9125 = vrot.lane.b32.xlu0 %v17408_v3, %s14392_s7 }
0x1386   :  { %7700 = vrot.lane.b32.xlu1 %v17409_v42, %s14391_s21 }
0x1389   :  { %10542 = vrot.lane.b32.xlu0 %v16920_v21, %s14393_s24  ;;  %v17413_v21 = vld [vmem:[#allocation51_spill] sm:$0xff] }
0x138a   :  { %3453 = vrot.lane.b32.xlu1 %v17410_v29, %s14389_s19 }
0x138c   :  { %v11272_v61 = vpop.xlane.xlu1 %11271 }
0x138d   :  { %14189 = vrcp.f32 %v11272_v61 }
0x138e   :  { %9117 = vrot.lane.b32.xlu1 %v17411_v54, %s14392_s7 }
0x1392   :  { %4870 = vrot.lane.b32.xlu1 %v17412_v19, %s14374_s23 }
0x1394   :  { %v11278_v30 = vpop.xlane.xlu1 %11277 }
0x1395   :  { %14191 = vrcp.f32 %v11278_v30 }
0x1396   :  { %10534 = vrot.lane.b32.xlu1 %v16912_v25, %s14393_s24 }
0x1398   :  { %v11281_v24 = vpop.xlane.xlu0 %11280 }
0x1399   :  { %14193 = vrcp.f32 %v11281_v24 }
0x139a   :  { %v14190_v23 = vpop.eup %14189  ;;  %6287 = vrot.lane.b32.xlu1 %v17413_v21, %s14390_s20 }
0x139b   :  { %v11300_v52 = vmul.f32 %v14190_v23, %v16981_v40 }
0x139c   :  { %v11287_v10 = vpop.xlane.xlu0 %11286 }
0x139d   :  { %14195 = vrcp.f32 %v11287_v10  ;;  %v11284_v28 = vpop.xlane.xlu1 %11283  ;;  %13848 = vmatmul.mubr.msk.f32.vlgmr.msra.gmra.mxu1 %vm1364_vm3, %v11300_v52 }
0x139e   :  { %14197 = vrcp.f32 %v11284_v28  ;;  %7704 = vrot.lane.b32.xlu1 %v17414_v38, %s14391_s21  ;;  %13858 = vmatpush3.msra.mxu1 %v11547_v48 }
0x139f   :  { %13859 = vmatprep.subr.mxu1 %v17296_v60  ;;  %13861 = vmatprep.mubr.msk.f32.mxu1 %vm14381_vm1, %v17296_v60 }
0x13a0   :  { %13860 = vmatpush3.msra.mxu1 %v11545_v15  ;;  %v11782_v25 = vpop.permute.xlu0 %11781 }
0x13a1   :  { %13871 = vmatprep.subr.mxu1 %v17296_v60 }
0x13a2   :  { %v14192_v40 = vpop.eup %14191  ;;  %3457 = vrot.lane.b32.xlu1 %v17415_v0, %s14389_s19 }
0x13a3   :  { %v11302_v51 = vmul.f32 %v14192_v40, %v16987_v5 }
0x13a4   :  { %v3446_v13 = vpop.permute.xlu0 %3445 }
0x13a5   :  { %3470 = vst.msk [vmem:[#allocation2] sm:$0xff] %vm3469_vm4, %v3446_v13  ;;  %13862 = vmatmul.mubr.msk.f32.vlgmr.msra.gmra.mxu1 %vm1364_vm3, %v11302_v51 }
0x13a6   :  { %v14194_v41 = vpop.eup %14193  ;;  %9121 = vrot.lane.b32.xlu1 %v17416_v36, %s14392_s7  ;;  %13872 = vmatpush3.msra.mxu1 %v11705_v44 }
0x13a7   :  { %v11303_v11 = vmul.f32 %v14194_v41, %v16992_v43  ;;  %13873 = vmatprep.subr.mxu1 %v17296_v60  ;;  %13875 = vmatprep.mubr.msk.f32.mxu1 %vm14381_vm1, %v17296_v60 }
0x13a8   :  { %13874 = vmatpush3.msra.mxu1 %v11703_v63  ;;  %v4863_v5 = vpop.permute.xlu0 %4862 }
0x13a9   :  { %4887 = vst.msk [vmem:[#allocation2] sm:$0xff] %vm4886_vm5, %v4863_v5  ;;  %13869 = vmatmul.mubr.msk.f32.vlgmr.msra.gmra.mxu0 %vm1364_vm3, %v11303_v11  ;;  %13885 = vmatprep.subr.mxu1 %v17296_v60  ;;  %v11991_v5 = vld [vmem:[#allocation14 + $0x18] sm:$0xff] }
0x13aa   :  { %v14196_v62 = vpop.eup %14195  ;;  %13879 = vmatpush3.msra.mxu0 %v17020_v56  ;;  %4874 = vrot.lane.b32.xlu1 %v17417_v49, %s14374_s23  ;;  %v11989_v49 = vld [vmem:[#allocation14 + $0x8] sm:$0xff] }
0x13ab   :  { %v14198_v43 = vpop.eup %14197  ;;  %v11305_v47 = vmul.f32 %v14196_v62, %v16997_v16  ;;  %13880 = vmatprep.subr.mxu0 %v17296_v60  ;;  %13882 = vmatprep.mubr.msk.f32.mxu0 %vm14381_vm1, %v17296_v60  ;;  %v11990_v62 = vld [vmem:[#allocation14 + $0x10] sm:$0xff] }
0x13ac   :  { %v11304_v53 = vmul.f32 %v14198_v43, %v16999_v31  ;;  %13881 = vmatpush3.msra.mxu0 %v11782_v25  ;;  %v6280_v2 = vpop.permute.xlu0 %6279  ;;  %v17418_v31 = vld [vmem:[#allocation52_spill] sm:$0xff]  ;;  %v11988_v43 = vld [vmem:[#allocation14] sm:$0xff] }
0x13ad   :  { %6304 = vst.msk [vmem:[#allocation2] sm:$0xff] %vm6303_vm6, %v6280_v2  ;;  %13883 = vmatmul.mubr.msk.f32.vlgmr.msra.gmra.mxu0 %vm1364_vm3, %v11305_v47  ;;  %13892 = vmatprep.subr.mxu0 %v11991_v5 }
0x13ae   :  { %10538 = vrot.lane.b32.xlu1 %v16918_v7, %s14393_s24  ;;  %13876 = vmatmul.mubr.msk.f32.vlgmr.msra.gmra.mxu1 %vm1364_vm3, %v11304_v53 }
0x13af   :  { %13886 = vmatpush3.msra.mxu1 %v11863_v50  ;;  %13889 = vmatprep.mubr.msk.f32.mxu1 %vm14381_vm1, %v17296_v60 }
0x13b0   :  { %v7697_v16 = vpop.permute.xlu0 %7696  ;;  %13887 = vmatprep.subr.mxu1 %v17296_v60  ;;  %13893 = vmatpush3.msra.mxu0 %v11991_v5 }
0x13b1   :  { %7721 = vst.msk [vmem:[#allocation2] sm:$0xff] %vm7720_vm7, %v7697_v16  ;;  %13894 = vmatprep.subr.mxu0 %v11990_v62 }
0x13b2   :  { %6291 = vrot.lane.b32.xlu1 %v17418_v31, %s14390_s20  ;;  %13895 = vmatpush3.msra.mxu0 %v11990_v62 }
0x13b3   :  { %13896 = vmatprep.subr.mxu0 %v11989_v49 }
0x13b4   :  { %v7699_v56 = vpop.permute.xlu0 %7698  ;;  %13897 = vmatpush3.msra.mxu0 %v11989_v49 }
0x13b5   :  { %13898 = vmatprep.subr.mxu0 %v11988_v43 }
0x13b6   :  { %7708 = vrot.lane.b32.xlu1 %v17419_v35, %s14391_s21  ;;  %13899 = vmatpush3.msra.mxu0 %v11988_v43 }
0x13b8   :  { %v3452_v7 = vpop.permute.xlu0 %3451 }
0x13b9   :  { %3473 = vst.msk [vmem:[#allocation2 + $0x18] sm:$0xff] %vm3469_vm4, %v3452_v7 }
0x13ba   :  { %7710 = vrot.lane.b32.xlu1 %v17420_v8, %s14391_s21 }
0x13bc   :  { %v9116_v26 = vpop.permute.xlu0 %9115 }
0x13be   :  { %9127 = vrot.lane.b32.xlu1 %v17421_v34, %s14392_s7 }
0x13c0   :  { %v4869_v60 = vpop.permute.xlu0 %4868 }
0x13c1   :  { %4890 = vst.msk [vmem:[#allocation2 + $0x18] sm:$0xff] %vm4886_vm5, %v4869_v60 }
0x13c4   :  { %v10533_v27 = vpop.permute.xlu0 %10532 }
0x13c8   :  { %v6286_v58 = vpop.permute.xlu0 %6285 }
0x13c9   :  { %6307 = vst.msk [vmem:[#allocation2 + $0x18] sm:$0xff] %vm6303_vm6, %v6286_v58 }
0x13cc   :  { %v7703_v4 = vpop.permute.xlu0 %7702 }
0x13cd   :  { %7724 = vst.msk [vmem:[#allocation2 + $0x18] sm:$0xff] %vm7720_vm7, %v7703_v4 }
0x13d0   :  { %v3456_v59 = vpop.permute.xlu0 %3455 }
0x13d1   :  { %3475 = vst.msk [vmem:[#allocation2 + $0x28] sm:$0xff] %vm3469_vm4, %v3456_v59 }
0x13d4   :  { %v9120_v37 = vpop.permute.xlu0 %9119 }
0x13d5   :  { %9141 = vst.msk [vmem:[#allocation2 + $0x18] sm:$0xff] %vm9137_vm8, %v9120_v37 }
0x13d8   :  { %v4873_v1 = vpop.permute.xlu0 %4872 }
0x13d9   :  { %4892 = vst.msk [vmem:[#allocation2 + $0x28] sm:$0xff] %vm4886_vm5, %v4873_v1  ;;  %v11290_v55 = vpop.xlane.xlu1 %11289 }
0x13da   :  { %14199 = vrcp.f32 %v11290_v55 }
0x13dc   :  { %v10537_v32 = vpop.permute.xlu0 %10536 }
0x13dd   :  { %10558 = vst.msk [vmem:[#allocation2 + $0x18] sm:$0xff] %vm10554_vm9, %v10537_v32  ;;  %v11861_v57 = vpop.permute.xlu1 %11860 }
0x13de   :  { %13888 = vmatpush3.msra.mxu1 %v11861_v57 }
0x13e0   :  { %v6290_v14 = vpop.permute.xlu0 %6289 }
0x13e1   :  { %6309 = vst.msk [vmem:[#allocation2 + $0x28] sm:$0xff] %vm6303_vm6, %v6290_v14  ;;  %v3448_v12 = vpop.permute.xlu1 %3447 }
0x13e2   :  { %3471 = vst.msk [vmem:[#allocation2 + $0x8] sm:$0xff] %vm3469_vm4, %v3448_v12 }
0x13e4   :  { %v7707_v39 = vpop.permute.xlu0 %7706 }
0x13e5   :  { %7726 = vst.msk [vmem:[#allocation2 + $0x28] sm:$0xff] %vm7720_vm7, %v7707_v39  ;;  %v4865_v48 = vpop.permute.xlu1 %4864 }
0x13e6   :  { %4888 = vst.msk [vmem:[#allocation2 + $0x8] sm:$0xff] %vm4886_vm5, %v4865_v48 }
0x13e7   :  { %v14200_v17 = vpop.eup %14199 }
0x13e8   :  { %v11306_v46 = vmul.f32 %v14200_v17, %v17028_v22  ;;  %v3460_v15 = vpop.permute.xlu0 %3459 }
0x13e9   :  { %3477 = vst.msk [vmem:[#allocation2 + $0x38] sm:$0xff] %vm3469_vm4, %v3460_v15  ;;  %v6282_v9 = vpop.permute.xlu1 %6281 }
0x13ea   :  { %6305 = vst.msk [vmem:[#allocation2 + $0x8] sm:$0xff] %vm6303_vm6, %v6282_v9  ;;  %13890 = vmatmul.mubr.msk.f32.vlgmr.msra.gmra.mxu1 %vm1364_vm3, %v11306_v46  ;;  %v12455_v9 = vld [vmem:[%s17250_s10] ss:$0 sm:$0xff]  ;;  %s14395_s10 = smov [#allocation15]  }
0x13eb   :  { %7722 = vst.msk [vmem:[#allocation2 + $0x8] sm:$0xff] %vm7720_vm7, %v7699_v56  ;;  %s12141_s27 = sshll.u32 %s14395_s10, 4  ;;  %s12142_s27 = int_to_ptr.vmem [resolvable:$true] %s12141_s27 }
0x13ec   :  { %9139 = vst.msk [vmem:[#allocation2 + $0x8] sm:$0xff] %vm9137_vm8, %v9116_v26  ;;  %v9124_v20 = vpop.permute.xlu0 %9123  ;;  %s14341_s28 = scalar_lea.vmem %s12142_s27, 1024  ;;  %p14346_p8 = scmp.lt.s32.totalorder %s12142_s27, %s12142_s27 }
0x13ed   :  { %10556 = vst.msk [vmem:[#allocation2 + $0x8] sm:$0xff] %vm10554_vm9, %v10533_v27  ;;  %v3450_v45 = vpop.permute.xlu1 %3449  ;;  %p14342_p7 = scmp.ne.s32.totalorder %s12142_s27, %s14341_s28  ;;  %p14347_p9 = scmp.lt.s32.totalorder %s14341_s28, %s14341_s28 }
0x13ee   :  { %9143 = vst.msk [vmem:[#allocation2 + $0x28] sm:$0xff] %vm9137_vm8, %v9124_v20 }
0x13ef   :  { %3472 = vst.msk [vmem:[#allocation2 + $0x10] sm:$0xff] %vm3469_vm4, %v3450_v45  ;;  %p14348_p10 = por %p14347_p9, %p14346_p8 }
0x13f0   :  { %v4877_v22 = vpop.permute.xlu0 %4876 }
0x13f1   :  { %4894 = vst.msk [vmem:[#allocation2 + $0x38] sm:$0xff] %vm4886_vm5, %v4877_v22  ;;  %v9114_v44 = vpop.permute.xlu1 %9113  ;;  %p14349_p11 = pnand %p14348_p10, %p14342_p7 }
0x13f2   :  { %9138 = vst.msk [vmem:[#allocation2] sm:$0xff] %vm9137_vm8, %v9114_v44 }
0x13f4   :  { %v10541_v18 = vpop.permute.xlu0 %10540 }
0x13f5   :  { %10560 = vst.msk [vmem:[#allocation2 + $0x28] sm:$0xff] %vm10554_vm9, %v10541_v18  ;;  %v4867_v63 = vpop.permute.xlu1 %4866 }
0x13f6   :  { %4889 = vst.msk [vmem:[#allocation2 + $0x10] sm:$0xff] %vm4886_vm5, %v4867_v63 }
0x13f8   :  { %v6294_v33 = vpop.permute.xlu0 %6293 }
0x13f9   :  { %6311 = vst.msk [vmem:[#allocation2 + $0x38] sm:$0xff] %vm6303_vm6, %v6294_v33  ;;  %v10531_v3 = vpop.permute.xlu1 %10530 }
0x13fa   :  { %10555 = vst.msk [vmem:[#allocation2] sm:$0xff] %vm10554_vm9, %v10531_v3 }
0x13fc   :  { %v9126_v0 = vpop.permute.xlu0 %9125 }
0x13fd   :  { %v6284_v42 = vpop.permute.xlu1 %6283 }
0x13fe   :  { %6306 = vst.msk [vmem:[#allocation2 + $0x10] sm:$0xff] %vm6303_vm6, %v6284_v42 }
0x1400   :  { %v10543_v41 = vpop.permute.xlu0 %10542 }
0x1401   :  { %v7701_v50 = vpop.permute.xlu1 %7700 }
0x1402   :  { %7723 = vst.msk [vmem:[#allocation2 + $0x10] sm:$0xff] %vm7720_vm7, %v7701_v50 }
0x1405   :  { %v3454_v29 = vpop.permute.xlu1 %3453 }
0x1406   :  { %3474 = vst.msk [vmem:[#allocation2 + $0x20] sm:$0xff] %vm3469_vm4, %v3454_v29 }
0x1409   :  { %v9118_v61 = vpop.permute.xlu1 %9117 }
0x140a   :  { %9140 = vst.msk [vmem:[#allocation2 + $0x10] sm:$0xff] %vm9137_vm8, %v9118_v61 }
0x140d   :  { %v4871_v54 = vpop.permute.xlu1 %4870 }
0x140e   :  { %4891 = vst.msk [vmem:[#allocation2 + $0x20] sm:$0xff] %vm4886_vm5, %v4871_v54 }
0x1411   :  { %v10535_v19 = vpop.permute.xlu1 %10534 }
0x1412   :  { %10557 = vst.msk [vmem:[#allocation2 + $0x10] sm:$0xff] %vm10554_vm9, %v10535_v19 }
0x1415   :  { %v6288_v30 = vpop.permute.xlu1 %6287 }
0x1416   :  { %6308 = vst.msk [vmem:[#allocation2 + $0x20] sm:$0xff] %vm6303_vm6, %v6288_v30 }
0x1419   :  { %v11382_v24 = vpop.f32.mrf.mxu0  ;;  %v7705_v23 = vpop.permute.xlu1 %7704 }
0x141a   :  { %7725 = vst.msk [vmem:[#allocation2 + $0x20] sm:$0xff] %vm7720_vm7, %v7705_v23  ;;  %11947 = vrot.lane.b32.xlu1 %v11382_v24, %s14394_s25 }
0x141b   :  { %v13842_v21 = vpop.f32.mrf.mxu0 }
0x141d   :  { %v3458_v52 = vpop.permute.xlu1 %3457 }
0x141e   :  { %v11540_v10 = vpop.f32.mrf.mxu0  ;;  %3476 = vst.msk [vmem:[#allocation2 + $0x30] sm:$0xff] %vm3469_vm4, %v3458_v52 }
0x141f   :  { %11951 = vrot.lane.b32.xlu1 %v11540_v10, %s14394_s25 }
0x1420   :  { %v13856_v28 = vpop.f32.mrf.mxu0 }
0x1421   :  { %v9122_v38 = vpop.permute.xlu1 %9121 }
0x1422   :  { %9142 = vst.msk [vmem:[#allocation2 + $0x20] sm:$0xff] %vm9137_vm8, %v9122_v38 }
0x1425   :  { %v4875_v25 = vpop.permute.xlu1 %4874 }
0x1426   :  { %4893 = vst.msk [vmem:[#allocation2 + $0x30] sm:$0xff] %vm4886_vm5, %v4875_v25 }
0x1429   :  { %v10539_v40 = vpop.permute.xlu1 %10538 }
0x142a   :  { %10559 = vst.msk [vmem:[#allocation2 + $0x20] sm:$0xff] %vm10554_vm9, %v10539_v40 }
0x142d   :  { %v6292_v51 = vpop.permute.xlu1 %6291 }
0x142e   :  { %6310 = vst.msk [vmem:[#allocation2 + $0x30] sm:$0xff] %vm6303_vm6, %v6292_v51 }
0x1431   :  { %v7709_v13 = vpop.permute.xlu1 %7708 }
0x1432   :  { %7727 = vst.msk [vmem:[#allocation2 + $0x30] sm:$0xff] %vm7720_vm7, %v7709_v13 }
0x1433   :  { %9144 = vst.msk [vmem:[#allocation2 + $0x30] sm:$0xff] %vm9137_vm8, %v9126_v0 }
0x1434   :  { %10561 = vst.msk [vmem:[#allocation2 + $0x30] sm:$0xff] %vm10554_vm9, %v10543_v41 }
0x1435   :  { %v7711_v36 = vpop.permute.xlu1 %7710 }
0x1436   :  { %7728 = vst.msk [vmem:[#allocation2 + $0x38] sm:$0xff] %vm7720_vm7, %v7711_v36 }
0x1439   :  { %v9128_v11 = vpop.permute.xlu1 %9127 }
0x143a   :  { %9145 = vst.msk [vmem:[#allocation2 + $0x38] sm:$0xff] %vm9137_vm8, %v9128_v11 }
0x145d   :  { %v11461_v47 = vpop.f32.mrf.mxu1 }
0x145e   :  { %11949 = vrot.lane.b32.xlu0 %v11461_v47, %s14394_s25 }
0x145f   :  { %v13849_v53 = vpop.f32.mrf.mxu1 }
0x1465   :  { %v11619_v2 = vpop.f32.mrf.mxu1 }
0x1466   :  { %11953 = vrot.lane.b32.xlu0 %v11619_v2, %s14394_s25 }
0x1467   :  { %v13863_v16 = vpop.f32.mrf.mxu1 }
0x1469   :  { %v11698_v31 = vpop.f32.mrf.mxu0 }
0x146a   :  { %11955 = vrot.lane.b32.xlu1 %v11698_v31, %s14394_s25 }
0x146b   :  { %v13870_v56 = vpop.f32.mrf.mxu0 }
0x146d   :  { %v11856_v35 = vpop.f32.mrf.mxu0 }
0x146e   :  { %v11777_v7 = vpop.f32.mrf.mxu1  ;;  %10544 = vrot.lane.b32.xlu1 %v16928_v6, %s14393_s24 }
0x146f   :  { %11957 = vrot.lane.b32.xlu0 %v11777_v7, %s14394_s25  ;;  %v13884_v8 = vpop.f32.mrf.mxu0 }
0x1470   :  { %v13877_v26 = vpop.f32.mrf.mxu1 }
0x1473   :  { %11959 = vrot.lane.b32.xlu0 %v11856_v35, %s14394_s25 }
0x148c   :  { %v11948_v34 = vpop.permute.xlu1 %11947 }
0x148d   :  { %11972 = vst.msk [vmem:[#allocation2] sm:$0xff] %vm11971_vm10, %v11948_v34 }
0x1491   :  { %v11952_v60 = vpop.permute.xlu1 %11951 }
0x1492   :  { %11974 = vst.msk [vmem:[#allocation2 + $0x10] sm:$0xff] %vm11971_vm10, %v11952_v60 }
0x1494   :  { %v11980_v27 = vld [vmem:[#allocation2] sm:$0xff] }
0x1495   :  { %13900 = vmatprep.mubr.msk.f32.mxu0 %vm185_vm0, %v11980_v27 }
0x1499   :  { %v11982_v1 = vld [vmem:[#allocation2 + $0x10] sm:$0xff] }
0x14aa   :  { %v11935_v58 = vpop.f32.mrf.mxu1 }
0x14ab   :  { %11961 = vrot.lane.b32.xlu1 %v11935_v58, %s14394_s25 }
0x14ac   :  { %v13891_v6 = vpop.f32.mrf.mxu1 }
0x14d0   :  { %v11950_v4 = vpop.permute.xlu0 %11949 }
0x14d1   :  { %11973 = vst.msk [vmem:[#allocation2 + $0x8] sm:$0xff] %vm11971_vm10, %v11950_v4 }
0x14d8   :  { %v11954_v59 = vpop.permute.xlu0 %11953  ;;  %v11981_v37 = vld [vmem:[#allocation2 + $0x8] sm:$0xff] }
0x14d9   :  { %11975 = vst.msk [vmem:[#allocation2 + $0x18] sm:$0xff] %vm11971_vm10, %v11954_v59  ;;  %13901 = vmatmul.mubr.msk.f32.vlgmr.msra.gmra.mxu0 %vm185_vm0, %v11981_v37 }
0x14da   :  { %13903 = vmatprep.mubr.msk.f32.mxu0 %vm185_vm0, %v11982_v1 }
0x14dc   :  { %v11956_v55 = vpop.permute.xlu1 %11955 }
0x14dd   :  { %11976 = vst.msk [vmem:[#allocation2 + $0x20] sm:$0xff] %vm11971_vm10, %v11956_v55 }
0x14e0   :  { %v10545_v32 = vpop.permute.xlu1 %10544  ;;  %v11983_v57 = vld [vmem:[#allocation2 + $0x18] sm:$0xff] }
0x14e1   :  { %10562 = vst.msk [vmem:[#allocation2 + $0x38] sm:$0xff] %vm10554_vm9, %v10545_v32  ;;  %v11958_v14 = vpop.permute.xlu0 %11957  ;;  %13904 = vmatmul.mubr.msk.f32.gmra.mxu0 %vm185_vm0, %v11983_v57 }
0x14e2   :  { %11977 = vst.msk [vmem:[#allocation2 + $0x28] sm:$0xff] %vm11971_vm10, %v11958_v14 }
0x14e4   :  { %v11984_v12 = vld [vmem:[#allocation2 + $0x20] sm:$0xff] }
0x14e5   :  { %v11960_v39 = vpop.permute.xlu0 %11959  ;;  %13906 = vmatprep.mubr.msk.f32.mxu0 %vm185_vm0, %v11984_v12 }
0x14e6   :  { %11978 = vst.msk [vmem:[#allocation2 + $0x30] sm:$0xff] %vm11971_vm10, %v11960_v39 }
0x14e9   :  { %v11985_v48 = vld [vmem:[#allocation2 + $0x28] sm:$0xff] }
0x14ea   :  { %13907 = vmatmul.mubr.msk.f32.gmra.mxu0 %vm185_vm0, %v11985_v48 }
0x14ed   :  { %v11986_v17 = vld [vmem:[#allocation2 + $0x30] sm:$0xff] }
0x14ee   :  { %13909 = vmatprep.mubr.msk.f32.mxu0 %vm185_vm0, %v11986_v17 }
0x151d   :  { %v11962_v46 = vpop.permute.xlu1 %11961 }
0x151e   :  { %11979 = vst.msk [vmem:[#allocation2 + $0x38] sm:$0xff] %vm11971_vm10, %v11962_v46 }
0x1525   :  { %v11987_v15 = vld [vmem:[#allocation2 + $0x38] sm:$0xff] }
0x1526   :  { %13910 = vmatmul.mubr.msk.f32.gmra.mxu0 %vm185_vm0, %v11987_v15 }
0x1599   :  { %v13902_v20 = vpop.f32.mrf.mxu0 }
0x159a   :  { %v12095_v45 = vadd.f32 %v13902_v20, %v12455_v9 }
0x159b   :  { %v12089_v22 = vpop.f32.mrf.mxu0 }
0x159c   :  { %12129 = vst.msk [vmem:[#allocation15 + $0x8] sm:$0xff] %vm185_vm0, %v12095_v45  ;;  %v12090_v44 = vadd.f32 %v12455_v9, %v12089_v22 }
0x159e   :  { %12128 = vst.msk [vmem:[#allocation15] sm:$0xff] %vm185_vm0, %v12090_v44 }
0x15a1   :  { %v13905_v18 = vpop.f32.mrf.mxu0 }
0x15a2   :  { %v12105_v63 = vadd.f32 %v13905_v18, %v12455_v9 }
0x15a3   :  { %v12099_v33 = vpop.f32.mrf.mxu0 }
0x15a4   :  { %12131 = vst.msk [vmem:[#allocation15 + $0x18] sm:$0xff] %vm185_vm0, %v12105_v63  ;;  %v12100_v3 = vadd.f32 %v12455_v9, %v12099_v33 }
0x15a6   :  { %12130 = vst.msk [vmem:[#allocation15 + $0x10] sm:$0xff] %vm185_vm0, %v12100_v3 }
0x15aa   :  { %v13908_v42 = vpop.f32.mrf.mxu0 }
0x15ab   :  { %v12115_v50 = vadd.f32 %v13908_v42, %v12455_v9 }
0x15ac   :  { %v12109_v29 = vpop.f32.mrf.mxu0 }
0x15ad   :  { %12133 = vst.msk [vmem:[#allocation15 + $0x28] sm:$0xff] %vm185_vm0, %v12115_v50  ;;  %v12110_v61 = vadd.f32 %v12455_v9, %v12109_v29 }
0x15af   :  { %12132 = vst.msk [vmem:[#allocation15 + $0x20] sm:$0xff] %vm185_vm0, %v12110_v61 }
0x15e6   :  { %v13911_v54 = vpop.f32.mrf.mxu0 }
0x15e7   :  { %v12125_v19 = vadd.f32 %v13911_v54, %v12455_v9 }
0x15e8   :  { %v12119_v30 = vpop.f32.mrf.mxu0 }
0x15e9   :  { %12135 = vst.msk [vmem:[#allocation15 + $0x38] sm:$0xff] %vm185_vm0, %v12125_v19  ;;  %v12120_v24 = vadd.f32 %v12455_v9, %v12119_v30 }
0x15eb   :  { %12134 = vst.msk [vmem:[#allocation15 + $0x30] sm:$0xff] %vm185_vm0, %v12120_v24 }
0x15ec   :  { %14352 = shalt.err (!%p14349_p11)
}
0x15ed   :  { %12147 = dma.vmem_to_hbm [thread:$0]  %s12142_s27, 1024, %s17251_s11, [#allocation5], %s14373_s22, %s14373_s22, %s14374_s23  }
0x15ee   :  { %14369 = dma.done.wait [#allocation5], 1024  }
0x15ef   :  { %14370 = vsyncadd [#allocation5], 4294966272 }
0x15f0   :  { %12151 = vsyncpa [#allocation4], 1 }
0x15f1   :  { %12152 = vsyncpa [#allocation7], 1 }
0x15f2   :  { %12153 = vsyncpa [#allocation10], 1 }
0x15f3   :  { %12154 = vsyncpa [#allocation13], 1 }
0x15f4   :  { %12155 = vsyncpa [#allocation5], 1 }

</bundles_post_ra>
